<compile_context>
chip_gen: v7x
topology: tpu7x:2x2x1
jax: 0.10.0
libtpu: 0.0.40
codegen_flags: <defaults>
</compile_context>

<pallas_src>
import functools

import jax
import jax.numpy as jnp
from jax.experimental import pallas as pl
from jax.experimental.pallas import tpu as pltpu

# ---- sizes implied by the PyTorch module ----------------------------------
D_IN  = 2 * (2 * 56 * 64 + 224 * 2 * 3)   # 17024
D1    = 2 * 56 * 64 + 224 * 2 * 3         # 8512
D2    = 2 * 28 * 32 + 224 * 3             # 2464
D3    = 2 * 14 * 16 + 224                 # 672
D_OUT = 2

# padded feature dims (multiples of 128; chosen so the big layers tile evenly)
# TODO(synk): minimal 128-padding (17152 / 8576) streams ~3% fewer weight bytes
# but needs manual DMA for a ragged last K tile; deferred.
D_IN_P  = 17408    # 2176 * 8
D1_P    = 8704     # 2176 * 4 = 4352 * 2
D2_P    = 2560     # 1280 * 2
D3_P    = 768
D_OUT_P = 128

B_PAD = 16         # full bf16 sublane group
TK    = 2176       # K-tile for fc1/fc2/fc3 (17 * 128)

_LAYER_DIMS = [(D_IN, D1), (D1, D1), (D1, D2), (D2, D2), (D2, D3), (D3, D3),
               (D3, D_OUT)]
_PAD_DIMS   = [(D_IN_P, D1_P), (D1_P, D1_P), (D1_P, D2_P), (D2_P, D2_P),
               (D2_P, D3_P), (D3_P, D3_P), (D3_P, D_OUT_P)]


# ---- per-generation configuration ------------------------------------------
def _pick_config():
    try:
        kind = jax.devices()[0].device_kind.lower()
    except Exception:
        kind = ""
    if "lite" in kind or "v5e" in kind or "v6" in kind:
        # single TensorCore, 128 MiB VMEM (v5e / v6e): fuse fc1+fc2, big N tiles
        return {"name": "v5e/v6e", "fuse12": True, "tn_big": 4352,
                "weight_buffers": 2, "vmem_limit": 96 * 1024 * 1024}
    if "v7" in kind or "7x" in kind:
        # 2 TensorCores, 64 MiB VMEM: keep megacore-parallel per-layer grids,
        # 2176 tiles, deepen weight prefetch instead of enlarging tiles.
        return {"name": "v7x", "fuse12": False, "tn_big": 2176,
                "weight_buffers": 3, "vmem_limit": 48 * 1024 * 1024}
    # unknown / v4 / v5p: previous known-good conservative configuration.
    return {"name": "generic", "fuse12": False, "tn_big": 2176,
            "weight_buffers": 2, "vmem_limit": 48 * 1024 * 1024}


_CFG = _pick_config()


def _w_spec(block_shape, index_map, buffers):
    """Weight BlockSpec, optionally with >2-deep pipelining (v7x)."""
    if buffers > 2 and hasattr(pl, "Buffered"):
        try:
            return pl.BlockSpec(block_shape, index_map,
                                pipeline_mode=pl.Buffered(buffers))
        except TypeError:
            pass
    return pl.BlockSpec(block_shape, index_map)


# ---- fused (matmul + bias + relu + dropout-mask) tiled kernel --------------
def _linear_kernel(*refs, relu, has_mask):
    if has_mask:
        x_ref, w_ref, b_ref, m_ref, o_ref = refs
    else:
        x_ref, w_ref, b_ref, o_ref = refs
        m_ref = None
    k = pl.program_id(1)

    @pl.when(k == 0)
    def _():
        # bias is the accumulator's initial value (output block resident over k)
        o_ref[...] = jnp.broadcast_to(b_ref[...], o_ref.shape)

    o_ref[...] += jnp.dot(x_ref[...].astype(jnp.bfloat16), w_ref[...],
                          preferred_element_type=jnp.float32)

    @pl.when(k == pl.num_programs(1) - 1)
    def _():
        y = o_ref[...]
        if relu:
            y = jnp.maximum(y, 0.0)
        if m_ref is not None:          # dropout: mask is 0.0 or 2.0 (p = 0.5)
            y = y * m_ref[...]
        o_ref[...] = y


def linear_fused(x, w, b, mask=None, *, relu, tk, tn, weight_buffers=2,
                 vmem_limit=48 * 1024 * 1024):
    B, K = x.shape
    Kw, N = w.shape
    assert K == Kw and K % tk == 0 and N % tn == 0, (K, N, tk, tn)
    grid = (N // tn, K // tk)          # j (parallel) outer, k (reduction) inner

    in_specs = [
        pl.BlockSpec((B, tk), lambda j, k: (0, k)),              # activations
        _w_spec((tk, tn), lambda j, k: (k, j), weight_buffers),  # weight (bf16)
        pl.BlockSpec((1, tn), lambda j, k: (0, j)),              # bias (f32)
    ]
    args = [x, w, b]
    if mask is not None:
        in_specs.append(pl.BlockSpec((B, tn), lambda j, k: (0, j)))
        args.append(mask)

    kernel = functools.partial(_linear_kernel, relu=relu,
                               has_mask=mask is not None)
    return pl.pallas_call(
        kernel,
        out_shape=jax.ShapeDtypeStruct((B, N), jnp.float32),
        grid_spec=pltpu.PrefetchScalarGridSpec(
            num_scalar_prefetch=0,
            grid=grid,
            in_specs=in_specs,
            out_specs=pl.BlockSpec((B, tn), lambda j, k: (0, j)),
        ),
        compiler_params=pltpu.CompilerParams(
            dimension_semantics=("parallel", "arbitrary"),
            vmem_limit_bytes=vmem_limit),
    )(*args)


# ---- fused fc1 + fc2: one flattened grid + scalar-prefetched schedule ------
def _fused12_kernel(ph_ref, kk_ref, jj_ref, tt_ref, oj_ref,
                    x_ref, w_ref, b1_ref, b2_ref, m1_ref, m2_ref,
                    o_ref, h_scr, *, k1_tiles, k2_tiles, n_sub, tk):
    s = pl.program_id(0)
    phase = ph_ref[s]          # 0 = fc1 step, 1 = fc2 step
    k = kk_ref[s]              # reduction-tile index within the layer
    j = jj_ref[s]              # output-tile index within the layer
    nb = o_ref.shape[0]

    @pl.when(phase == 0)                           # ----- fc1 -> h_scr -----
    def _():
        xk = x_ref[k].astype(jnp.bfloat16)                      # (B, tk)
        for t in range(n_sub):                     # static unroll; tn == n_sub*tk
            idx = j * n_sub + t
            part = jnp.dot(xk, w_ref[0, :, t * tk:(t + 1) * tk],
                           preferred_element_type=jnp.float32)  # (B, tk)

            @pl.when(k == 0)
            def _(idx=idx):                        # bias initializes accumulator
                h_scr[idx] = jnp.broadcast_to(b1_ref[idx], (nb, tk))

            h_scr[idx] = h_scr[idx] + part

            @pl.when(k == k1_tiles - 1)
            def _(idx=idx):                        # relu + dropout epilogue
                h_scr[idx] = jnp.maximum(h_scr[idx], 0.0) * m1_ref[idx]

    @pl.when(phase == 1)                           # ----- fc2 -> o_ref -----
    def _():
        hk = h_scr[k].astype(jnp.bfloat16)                      # (B, tk)
        for t in range(n_sub):
            idx = j * n_sub + t
            col = t * tk

            @pl.when(k == 0)
            def _(idx=idx, col=col):
                o_ref[:, col:col + tk] = jnp.broadcast_to(b2_ref[idx], (nb, tk))

            o_ref[:, col:col + tk] += jnp.dot(
                hk, w_ref[0, :, col:col + tk],
                preferred_element_type=jnp.float32)

            @pl.when(k == k2_tiles - 1)
            def _(idx=idx, col=col):
                o_ref[:, col:col + tk] = (
                    jnp.maximum(o_ref[:, col:col + tk], 0.0) * m2_ref[idx])


def fused_fc1_fc2(x_t, plan, m1_t, m2_t, *, weight_buffers, vmem_limit):
    d = plan["fused12"]
    tk, tn = d["tk"], d["tn"]
    n_steps = int(d["sched_phase"].shape[0])

    kernel = functools.partial(_fused12_kernel, k1_tiles=d["k1_tiles"],
                               k2_tiles=d["k2_tiles"], n_sub=d["n_sub"], tk=tk)

    grid_spec = pltpu.PrefetchScalarGridSpec(
        num_scalar_prefetch=5,
        grid=(n_steps,),
        in_specs=[
            pl.BlockSpec(x_t.shape, lambda s, *_: (0, 0, 0)),          # x resident
            _w_spec((1, tk, tn),
                    lambda s, ph, kk, jj, tt, oj: (tt[s], 0, 0),
                    weight_buffers),                                    # tile pool
            pl.BlockSpec(d["b1_t"].shape, lambda s, *_: (0, 0, 0)),    # bias1
            pl.BlockSpec(d["b2_t"].shape, lambda s, *_: (0, 0, 0)),    # bias2
            pl.BlockSpec(m1_t.shape, lambda s, *_: (0, 0, 0)),         # mask1
            pl.BlockSpec(m2_t.shape, lambda s, *_: (0, 0, 0)),         # mask2
        ],
        out_specs=pl.BlockSpec((B_PAD, tn),
                               lambda s, ph, kk, jj, tt, oj: (0, oj[s])),
        scratch_shapes=[pltpu.VMEM((D1_P // tk, B_PAD, tk), jnp.float32)],
    )
    return pl.pallas_call(
        kernel,
        out_shape=jax.ShapeDtypeStruct((B_PAD, D1_P), jnp.float32),
        grid_spec=grid_spec,
        compiler_params=pltpu.CompilerParams(
            dimension_semantics=("arbitrary",),
            vmem_limit_bytes=vmem_limit),
    )(d["sched_phase"], d["sched_k"], d["sched_j"], d["sched_tile"],
      d["sched_out"], x_t, d["w_pool"], d["b1_t"], d["b2_t"], m1_t, m2_t)


# ---- small gridless tail (fc5 -> fc7 only, ~5 MiB of bf16 weights) ----------
def _tail_kernel(x_ref, w5_ref, b5_ref, w6_ref, b6_ref, w7_ref, b7_ref, o_ref):
    def lin(h, w_ref, b_ref):
        return jnp.dot(h.astype(jnp.bfloat16), w_ref[...],
                       preferred_element_type=jnp.float32) + b_ref[...]
    h = jnp.maximum(lin(x_ref[...], w5_ref, b5_ref), 0.0)   # fc5 + relu
    h = jnp.maximum(lin(h, w6_ref, b6_ref), 0.0)            # fc6 + relu
    o_ref[...] = lin(h, w7_ref, b7_ref)                     # fc7 (no relu)


def tail_fused(x, tail_params, *, vmem_limit):
    B = x.shape[0]
    args = [x]
    for w, b in tail_params:
        args += [w, b]
    return pl.pallas_call(
        _tail_kernel,
        out_shape=jax.ShapeDtypeStruct((B, D_OUT_P), jnp.float32),
        compiler_params=pltpu.CompilerParams(vmem_limit_bytes=vmem_limit),
    )(*args)


# ---- parameters (PyTorch-default-style init, bf16 weights, zero padding) ---
def _init_linear(key, fan_in, fan_out):
    kw, kb = jax.random.split(key)
    bound = 1.0 / float(fan_in) ** 0.5
    w = jax.random.uniform(kw, (fan_in, fan_out), jnp.float32, -bound, bound)
    b = jax.random.uniform(kb, (fan_out,), jnp.float32, -bound, bound)
    return w, b


def make_params(key):
    params = []
    keys = jax.random.split(key, len(_LAYER_DIMS))
    for k, (fi, fo), (fip, fop) in zip(keys, _LAYER_DIMS, _PAD_DIMS):
        w, b = _init_linear(k, fi, fo)
        wp = jnp.pad(w.astype(jnp.bfloat16), ((0, fip - fi), (0, fop - fo)))
        bp = jnp.pad(b, (0, fop - fo)).reshape(1, fop)      # f32
        params.append((wp, bp))
    return params


def _tile_2d(w, tk, tn):
    """(K, N) -> (K//tk * N//tn, tk, tn); tile index = j * (K//tk) + k."""
    K, N = w.shape
    kt, nt = K // tk, N // tn
    return w.reshape(kt, tk, nt, tn).transpose(2, 0, 1, 3).reshape(kt * nt, tk, tn)


def _tile_rows(a, t):
    """(R, N) -> (N//t, R, t)."""
    R, N = a.shape
    return a.reshape(R, N // t, t).transpose(1, 0, 2)


def prepare_weights(params, cfg=None):
    """One-time packing of the padded params into the kernels' layouts."""
    cfg = dict(_CFG if cfg is None else cfg)
    plan = {"cfg": cfg,
            "fc1": params[0], "fc2": params[1],
            "fc3": params[2], "fc4": params[3], "tail": params[4:]}
    if not cfg["fuse12"]:
        return plan

    tk, tn = TK, cfg["tn_big"]
    n_sub = tn // tk
    k1_tiles, k2_tiles = D_IN_P // tk, D1_P // tk
    n_tiles = D1_P // tn

    (w1, b1), (w2, b2) = params[0], params[1]
    w_pool = jnp.concatenate([_tile_2d(w1, tk, tn), _tile_2d(w2, tk, tn)],
                             axis=0)

    # flattened fc1+fc2 schedule: fc1 (j outer, k inner) then fc2.
    steps = []
    for j in range(n_tiles):
        for k in range(k1_tiles):
            steps.append((0, k, j, j * k1_tiles + k, 0))
    off = n_tiles * k1_tiles
    for j in range(n_tiles):
        for k in range(k2_tiles):
            steps.append((1, k, j, off + j * k2_tiles + k, j))
    ph, kk, jj, tt, oj = (jnp.array(list(c), jnp.int32) for c in zip(*steps))

    plan["fused12"] = {
        "tk": tk, "tn": tn, "n_sub": n_sub,
        "k1_tiles": k1_tiles, "k2_tiles": k2_tiles, "n_tiles": n_tiles,
        "w_pool": w_pool,
        "b1_t": _tile_rows(b1, tk),      # (D1_P//tk, 1, tk)
        "b2_t": _tile_rows(b2, tk),      # (D1_P//tk, 1, tk)
        "sched_phase": ph, "sched_k": kk, "sched_j": jj,
        "sched_tile": tt, "sched_out": oj,
    }
    return plan


def make_dropout_masks(key, batch):
    # F.dropout(p=0.5, training=True): keep with prob 0.5, scale kept by 2.
    # TODO(synk): generated with jax.random; cannot bit-match torch's RNG stream.
    shapes = [(batch, D1_P), (batch, D1_P), (batch, D2_P)]
    keys = jax.random.split(key, len(shapes))
    return tuple(jax.random.bernoulli(k, 0.5, s).astype(jnp.float32) * 2.0
                 for k, s in zip(keys, shapes))


# ---- forward pass ----------------------------------------------------------
def _forward_impl(x, plan, masks, weight_buffers):
    cfg = plan["cfg"]
    vmem = cfg["vmem_limit"]
    tn_big = cfg["tn_big"]

    B, K = x.shape
    assert K == D_IN and B <= B_PAD
    xp = jnp.pad(x, ((0, B_PAD - B), (0, D_IN_P - D_IN)))

    if masks is None:
        m1 = m2 = m3 = None
    else:
        m1, m2, m3 = masks

    if cfg["fuse12"]:
        d = plan["fused12"]
        tk = d["tk"]
        ones = jnp.ones((B_PAD, D1_P), jnp.float32) if m1 is None else None
        x_t = _tile_rows(xp, tk)
        m1_t = _tile_rows(m1 if m1 is not None else ones, tk)
        m2_t = _tile_rows(m2 if m2 is not None else ones, tk)
        h = fused_fc1_fc2(x_t, plan, m1_t, m2_t,
                          weight_buffers=weight_buffers, vmem_limit=vmem)
    else:
        h = linear_fused(xp, *plan["fc1"], m1, relu=True, tk=TK, tn=tn_big,
                         weight_buffers=weight_buffers, vmem_limit=vmem)  # fc1
        h = linear_fused(h, *plan["fc2"], m2, relu=True, tk=TK, tn=tn_big,
                         weight_buffers=weight_buffers, vmem_limit=vmem)  # fc2

    h = linear_fused(h, *plan["fc3"], m3, relu=True, tk=TK, tn=1280,
                     weight_buffers=weight_buffers, vmem_limit=vmem)      # fc3
    h = linear_fused(h, *plan["fc4"], None, relu=True, tk=1280, tn=1280,
                     weight_buffers=weight_buffers, vmem_limit=vmem)      # fc4
    h = tail_fused(h, plan["tail"], vmem_limit=vmem)                      # fc5-7
    return h[:B, :D_OUT]


def buddynet_forward(x, plan, masks=None):
    wb = plan["cfg"]["weight_buffers"]
    try:
        return _forward_impl(x, plan, masks, wb)
    except Exception:
        if wb <= 2:
            raise
        # Buffered(3) rejected on this chip / JAX build: fall back to 2 buffers.
        return _forward_impl(x, plan, masks, 2)


def buddynet_reference(x, params, masks=None):
    """Pure-JAX reference on the same padded bf16 weights / masks."""
    B = x.shape[0]
    h = jnp.pad(x, ((0, B_PAD - B), (0, D_IN_P - D_IN)))
    for i, (w, b) in enumerate(params):
        y = jnp.dot(h.astype(jnp.bfloat16), w,
                    preferred_element_type=jnp.float32) + b
        if i < 6:
            y = jnp.maximum(y, 0.0)
        if masks is not None and i < 3:
            y = y * masks[i]
        h = y
    return h[:B, :D_OUT]


if __name__ == "__main__":
    key = jax.random.PRNGKey(0)
    kp, kx, kd = jax.random.split(key, 3)
    params = make_params(kp)
    plan = prepare_weights(params)

    B = 2
    x = jax.random.normal(kx, (B, D_IN), jnp.float32)

    # Eval path (dropout disabled): deterministic correctness check.
    out_eval = buddynet_forward(x, plan, masks=None)
    jax.block_until_ready(out_eval)
    ref_eval = buddynet_reference(x, params, masks=None)
    assert out_eval.shape == (B, D_OUT)
    assert jnp.allclose(out_eval, ref_eval, rtol=1e-2, atol=1e-2), (out_eval, ref_eval)

    # Module as defined (self.training=True): dropout active on fc1-fc3.
    masks = make_dropout_masks(kd, B_PAD)
    out_train = buddynet_forward(x, plan, masks=masks)
    jax.block_until_ready(out_train)
    ref_train = buddynet_reference(x, params, masks=masks)
    assert out_train.shape == (B, D_OUT)
    assert jnp.allclose(out_train, ref_train, rtol=1e-2, atol=1e-2), (out_train, ref_train)

    print("KERNEL_OK")
</pallas_src>

<mosaic_0001>
module attributes {stable_mosaic.version = 11 : i64} {
  func.func @_linear_kernel(%arg0: i32, %arg1: i32, %arg2: memref<16x2176xf32, #tpu.memory_space<vmem>>, %arg3: memref<2176x2176xbf16, #tpu.memory_space<vmem>>, %arg4: memref<1x2176xf32, #tpu.memory_space<vmem>>, %arg5: memref<16x2176xf32, #tpu.memory_space<vmem>>) attributes {dimension_semantics = [#tpu.dimension_semantics<parallel>, #tpu.dimension_semantics<arbitrary>], iteration_bounds = array<i64: 4, 8>, scalar_prefetch = 0 : i64, scratch_operands = 0 : i64, tpu.core_type = #tpu.core_type<tc>, window_params = [{transform_indices = @transform_0, window_bounds = array<i64: 16, 2176>}, {transform_indices = @transform_1, window_bounds = array<i64: 2176, 2176>}, {transform_indices = @transform_2, window_bounds = array<i64: 1, 2176>}, {transform_indices = @transform_3, window_bounds = array<i64: 16, 2176>}]} {
    %c0_i32 = arith.constant 0 : i32
    %0 = arith.cmpi eq, %arg1, %c0_i32 : i32
    %1 = arith.extui %0 : i1 to i32
    %c0_i32_0 = arith.constant 0 : i32
    %2 = arith.cmpi ne, %1, %c0_i32_0 : i32
    scf.if %2 {
      %c0_9 = arith.constant 0 : index
      %c0_10 = arith.constant 0 : index
      %13 = vector.load %arg4[%c0_9, %c0_10] : memref<1x2176xf32, #tpu.memory_space<vmem>>, vector<1x2176xf32>
      %14 = vector.shape_cast %13 : vector<1x2176xf32> to vector<1x2176xf32>
      %15 = vector.broadcast %14 : vector<1x2176xf32> to vector<16x2176xf32>
      %c0_11 = arith.constant 0 : index
      %c0_12 = arith.constant 0 : index
      %16 = vector.load %arg5[%c0_11, %c0_12] : memref<16x2176xf32, #tpu.memory_space<vmem>>, vector<16x2176xf32>
      tpu.vector_store %arg5[%c0_11, %c0_12], %15 {strides = array<i32>} : memref<16x2176xf32, #tpu.memory_space<vmem>>, vector<16x2176xf32>,
    } else {
    }
    %c0 = arith.constant 0 : index
    %c0_1 = arith.constant 0 : index
    %3 = vector.load %arg5[%c0, %c0_1] : memref<16x2176xf32, #tpu.memory_space<vmem>>, vector<16x2176xf32>
    %c0_2 = arith.constant 0 : index
    %c0_3 = arith.constant 0 : index
    %4 = vector.load %arg2[%c0_2, %c0_3] : memref<16x2176xf32, #tpu.memory_space<vmem>>, vector<16x2176xf32>
    %5 = arith.truncf %4 : vector<16x2176xf32> to vector<16x2176xbf16>
    %c0_4 = arith.constant 0 : index
    %c0_5 = arith.constant 0 : index
    %6 = vector.load %arg3[%c0_4, %c0_5] : memref<2176x2176xbf16, #tpu.memory_space<vmem>>, vector<2176x2176xbf16>
    %cst = arith.constant dense<0.000000e+00> : vector<16x2176xf32>
    %7 = tpu.matmul %5, %6, %cst {dimension_numbers = #tpu.dot_dimension_numbers<[1], [0], [0], [1], [0, 0, 1, 1], [], []>} : vector<16x2176xbf16>, vector<2176x2176xbf16>, vector<16x2176xf32> -> vector<16x2176xf32>
    %8 = arith.addf %3, %7 : vector<16x2176xf32>
    %c0_6 = arith.constant 0 : index
    %c0_7 = arith.constant 0 : index
    %9 = vector.load %arg5[%c0_6, %c0_7] : memref<16x2176xf32, #tpu.memory_space<vmem>>, vector<16x2176xf32>
    tpu.vector_store %arg5[%c0_6, %c0_7], %8 {strides = array<i32>} : memref<16x2176xf32, #tpu.memory_space<vmem>>, vector<16x2176xf32>,
    %c7_i32 = arith.constant 7 : i32
    %10 = arith.cmpi eq, %arg1, %c7_i32 : i32
    %11 = arith.extui %10 : i1 to i32
    %c0_i32_8 = arith.constant 0 : i32
    %12 = arith.cmpi ne, %11, %c0_i32_8 : i32
    scf.if %12 {
      %c0_9 = arith.constant 0 : index
      %c0_10 = arith.constant 0 : index
      %13 = vector.load %arg5[%c0_9, %c0_10] : memref<16x2176xf32, #tpu.memory_space<vmem>>, vector<16x2176xf32>
      %cst_11 = arith.constant 0.000000e+00 : f32
      %14 = vector.broadcast %cst_11 : f32 to vector<16x2176xf32>
      %15 = arith.maximumf %13, %14 : vector<16x2176xf32>
      %c0_12 = arith.constant 0 : index
      %c0_13 = arith.constant 0 : index
      %16 = vector.load %arg5[%c0_12, %c0_13] : memref<16x2176xf32, #tpu.memory_space<vmem>>, vector<16x2176xf32>
      tpu.vector_store %arg5[%c0_12, %c0_13], %15 {strides = array<i32>} : memref<16x2176xf32, #tpu.memory_space<vmem>>, vector<16x2176xf32>,
    } else {
    }
    return
  }
  func.func @transform_0(%arg0: i32, %arg1: i32) -> (i32, i32) {
    %c0_i32 = arith.constant 0 : i32
    %c0_i32_0 = arith.constant 0 : i32
    return %c0_i32, %arg1 : i32, i32
  }
  func.func @transform_1(%arg0: i32, %arg1: i32) -> (i32, i32) {
    %c0_i32 = arith.constant 0 : i32
    return %arg1, %arg0 : i32, i32
  }
  func.func @transform_2(%arg0: i32, %arg1: i32) -> (i32, i32) {
    %c0_i32 = arith.constant 0 : i32
    %c0_i32_0 = arith.constant 0 : i32
    return %c0_i32, %arg0 : i32, i32
  }
  func.func @transform_3(%arg0: i32, %arg1: i32) -> (i32, i32) {
    %c0_i32 = arith.constant 0 : i32
    %c0_i32_0 = arith.constant 0 : i32
    return %c0_i32, %arg0 : i32, i32
  }
}

</mosaic_0001>

<bundles_post_ra>
// kernel: tpu_custom_call.1
= control target key start
LH: loop header
LB: loop body
LE: loop exit
PB: predicated region body
PF: predicated region fallthrough
CT: control target
= control target key end

     0   :  { %s28197_s0 = inlined_call_operand.hbm [shape: f32[16,17408], index: 0, kind: input, shape index: {}]   ;;  %s28198_s1 = inlined_call_operand.hbm [shape: bf16[17408,8704], index: 1, kind: input, shape index: {}]   ;;  %s28199_s2 = inlined_call_operand.hbm [shape: f32[1,8704], index: 2, kind: input, shape index: {}]   ;;  %s28200_s3 = inlined_call_operand.hbm [shape: f32[16,8704], index: 3, kind: output, shape index: {}]  }
   0x1   :  { %28212 = sst [smem:[#allocation19_spill]] %s28197_s0 }
   0x2   :  { %28213 = sst [smem:[#allocation20_spill]] %s28198_s1 }
   0x3   :  { %28214 = sst [smem:[#allocation21_spill]] %s28200_s3 }
   0x4   :  { %8 = vsyncpa [#allocation3], 0 }
   0x5   :  { %10 = vsyncpa [#allocation3 + $0x1], 0 }
   0x6   :  { %11 = vsyncpa [#allocation6], 0 }
   0x7   :  { %13 = vsyncpa [#allocation6 + $0x1], 0 }
   0x8   :  { %14 = vsyncpa [#allocation4], 0 }
   0x9   :  { %16 = vsyncpa [#allocation4 + $0x1], 0  ;;  %s25057_s12 = smov 0   ;;  %s25059_s13 = smov 0  }
   0xa   :  { %s25061_s14 = smov 0   ;;  %s25063_s15 = smov 0  }
   0xb   :  { %s25065_s16 = smov 0   ;;  %s25067_s17 = smov 0  }
   0xc   :  { %s25069_s18 = smov 0   ;;  %s25071_s19 = smov 0  }
   0xd   :  { %s25073_s20 = smov 0   ;;  %s25075_s21 = smov 0  }
   0xe   :  { %s25077_s22 = smov 0   ;;  %s25079_s23 = smov 0  }
   0xf   :  { %s25081_s24 = smov 0   ;;  %s25083_s25 = smov 0  }
  0x10 LB: > { %28215 = sst [smem:[#allocation13_spill]] %s25003_s21  ;;  %s31_s26 = sadd.s32 1, %s25011_s23  ;;  %s25019_s25 = sphi %s25083_s25, %s22_s25   ;;  %s25015_s24 = sphi %s25081_s24, %s28256_s24   ;;  %s25011_s23 = sphi %s25079_s23, %s28267_s23   ;;  %s25007_s22 = sphi %s25077_s22, %s28254_s22   ;;  %s25003_s21 = sphi %s25075_s21, %s28253_s21   ;;  %s24999_s20 = sphi %s25073_s20, %s28266_s20   ;;  %s24995_s19 = sphi %s25071_s19, %s28265_s19   ;;  %s24991_s18 = sphi %s25069_s18, %s28264_s18   ;;  %s24987_s17 = sphi %s25067_s17, %s28263_s17   ;;  %s24983_s16 = sphi %s25065_s16, %s28262_s16   ;;  %s24979_s15 = sphi %s25063_s15, %s28261_s15   ;;  %s24975_s14 = sphi %s25061_s14, %s28260_s14   ;;  %s24971_s13 = sphi %s25059_s13, %s28259_s13   ;;  %s24967_s12 = sphi %s25057_s12, %s28258_s12  }
  0x11   : > { %28216 = sst [smem:[#allocation14_spill]] %s25007_s22  ;;  %p28203_p0 = scmp.eq.s32.totalorder %s25019_s25, 0 }
  0x12   : > { %28217 = sst [smem:[#allocation15_spill]] %s25011_s23  ;;  %p25129_p1 = scmp.ge.s32.totalorder %s31_s26, 8 }
  0x13   : > { %28218 = sst [smem:[#allocation16_spill]] %s25015_s24  ;;  %p76_p2 = scmp.ne.s32.totalorder %s24987_s17, %s24983_s16 }
  0x14   : > { %s28269_s26 = smov (%p25129_p1, %s31_s26), 0  ;;  %p28202_p5 = scmp.lt.s32.totalorder %s25019_s25, 32 }
  0x15   : > { %28220 = sst [smem:[#allocation17_spill]] %s28269_s26  ;;  %p78_p4 = por %p76_p2, %p28203_p0 }
  0x16   : > { %s179_s29 = sand.u32 1, %s25019_s25   ;;  %s181_s30 = sand.u32 1, %s24987_s17  }
  0x17   : > { %s21219_s4 = smul.u32 18496, %s181_s30  ;;  %p25149_p6 = pnand %p28202_p5, %p78_p4 }
  0x18   : > { %s185_s6 = smul.u32 17, %s25015_s24  ;;  %s28222_s1 = sld [smem:[#allocation20_spill]] }
  0x19   : > { %s21249_s7 = smul.u32 18496, %s25011_s23  ;;  %s183_s8 = scalar_lea.vmem [#allocation5], %s21219_s4 }
  0x1a   : > { %s193_s9 = sshll.u32 %s183_s8, 4  ;;  %s25163_s30 = scalar_lea.sflag [#allocation6], %s179_s29  ;;  %s25155_s9 = int_to_ptr.vmem [resolvable:$true] %s193_s9 }
  0x1b   : > { %s190_s10 = sadd.s32 %s21249_s7, %s185_s6  ;;  %p24777_p9 = pneg %p25149_p6 }
  0x1c   : > { %s18433_s11 = sshll.u32 %s190_s10, 6 }
  0x1e   : > { %s25160_s22 = scalar_lea.hbm %s28222_s1, %s18433_s11  ;;  %s24780_s3 = scalar_lea.hbm %s28222_s1, 9469952 }
  0x1f   : > { %s24775_s21 = scalar_lea.hbm %s25160_s22, 295936  ;;  %p24781_p12 = scmp.lt.u32.totalorder %s25160_s22, %s28222_s1 }
  0x20   : > { %p24776_p8 = scmp.ne.s32.totalorder %s25160_s22, %s24775_s21  ;;  %p24782_p13 = scmp.lt.u32.totalorder %s24780_s3, %s24775_s21 }
  0x21   : > { %p24784_p4 = scmp.lt.u32.totalorder %s24775_s21, %s25160_s22 }
  0x22   : > { %p24778_p10 = pnand %p24777_p9, %p24776_p8  ;;  %p24783_p2 = por %p24782_p13, %p24781_p12 }
  0x24   : > { %p24779_p11 = pneg %p24778_p10  ;;  %p24785_p3 = por %p24784_p4, %p24783_p2 }
  0x26   : > { %p24786_p5 = pnand %p24785_p3, %p24779_p11 }
  0x28   : > { %24789 = shalt.err (!%p24786_p5)
}
  0x29   : > { %s24790_s29 = scalar_lea.vmem %s25155_s9, 295936  ;;  %s25021_s8 = smov [#allocation5]  }
  0x2a   : > { %p24791_p8 = scmp.ne.s32.totalorder %s25155_s9, %s24790_s29  ;;  %s24795_s10 = sshll.u32 %s25021_s8, 4  ;;  %s24796_s10 = int_to_ptr.vmem [resolvable:$false] %s24795_s10 }
  0x2b   : > { %s24797_s11 = scalar_lea.vmem %s24796_s10, 591872  ;;  %p24798_p7 = scmp.lt.s32.totalorder %s25155_s9, %s24796_s10 }
  0x2c   : > { %p24793_p10 = pnand %p24791_p8, %p24777_p9  ;;  %p24799_p12 = scmp.lt.s32.totalorder %s24797_s11, %s24790_s29 }
  0x2e   : > { %p24794_p0 = pneg %p24793_p10  ;;  %p24800_p13 = por %p24799_p12, %p24798_p7 }
  0x30   : > { %p24801_p2 = pnand %p24800_p13, %p24794_p0 }
  0x32   : > { %24804 = shalt.err (!%p24801_p2)
}
  0x33   : > { %s25022_s21 = smov 4352   ;;  %s25023_s4 = smov 1088  }
  0x34   : > { %s25024_s6 = smov 68   ;;  %p220_p0 = scmp.lt.s32.totalorder %s25019_s25, 33 }
  0x35   : > { %21240 = dma.hbm_to_vmem [thread:$0]  (!%p25149_p6), %s25160_s22, 295936, %s25155_s9, %s25163_s30, %s25022_s21, %s25023_s4, %s25024_s6  }
  0x36   : > { %p28223_p3 = scmp.ge.s32.totalorder %s25019_s25, 1  ;;  %s25200_s28 = ssub.s32 %s25011_s23, %s28269_s26 }
  0x37   : > { %s41_s7 = sadd.s32 1, %s24999_s20  ;;  %p39_p7 = scmp.eq.s32.totalorder %s25200_s28, 0 }
  0x38   : > { %p25194_p5 = pnand %p28223_p3, %p220_p0  ;;  %p48_p9 = scmp.ne.s32.totalorder %s24999_s20, %s24995_s19 }
  0x39   : > { %s158_s29 = sand.u32 1, %s24999_s20   ;;  %p28225_p4 = scmp.eq.s32.totalorder %s25019_s25, 0 }
  0x3a   : > { %s28224_s3 = scalar_select %p25194_p5, 1, 0 }
  0x3b   : > { %s25210_s8 = scalar_select %p39_p7, %s24999_s20, %s41_s7  }
  0x3c   : > { %p50_p8 = por %p28225_p4, %p48_p9  ;;  %s21218_s5 = smul.u32 272, %s158_s29 }
  0x3d   : > { %s20754_s22 = smul.u32 2176, %s25011_s23  ;;  %p28226_p6 = scmp.lt.s32.totalorder %s25019_s25, 32 }
  0x3e   : > { %s28228_s0 = sld [smem:[#allocation19_spill]]  ;;  %s162_s4 = scalar_lea.vmem [#allocation2], %s21218_s5 }
  0x3f   : > { %p25217_p10 = pnand %p28226_p6, %p50_p8  ;;  %s169_s6 = sshll.u32 %s162_s4, 4  ;;  %s25226_s6 = int_to_ptr.vmem [resolvable:$true] %s169_s6 }
  0x40   : > { %s25228_s7 = scalar_lea.sflag [#allocation3], %s158_s29 }
  0x41   : > { %p24807_p13 = pneg %p25217_p10 }
  0x44   : > { %s25224_s21 = scalar_lea.hbm %s28228_s0, %s20754_s22  ;;  %s24810_s11 = scalar_lea.hbm %s28228_s0, 34816 }
  0x45   : > { %s24805_s1 = scalar_lea.hbm %s25224_s21, 4352  ;;  %p24811_p3 = scmp.lt.u32.totalorder %s25224_s21, %s28228_s0 }
  0x46   : > { %p24806_p12 = scmp.ne.s32.totalorder %s25224_s21, %s24805_s1  ;;  %p24812_p7 = scmp.lt.u32.totalorder %s24810_s11, %s24805_s1 }
  0x47   : > { %p24814_p4 = scmp.lt.u32.totalorder %s24805_s1, %s25224_s21 }
  0x48   : > { %p24808_p2 = pnand %p24807_p13, %p24806_p12  ;;  %p24813_p9 = por %p24812_p7, %p24811_p3 }
  0x4a   : > { %p24809_p0 = pneg %p24808_p2  ;;  %p24815_p8 = por %p24814_p4, %p24813_p9 }
  0x4c   : > { %p24816_p6 = pnand %p24815_p8, %p24809_p0 }
  0x4e   : > { %24819 = shalt.err (!%p24816_p6)
}
  0x4f   : > { %s24820_s29 = scalar_lea.vmem %s25226_s6, 4352  ;;  %s25025_s5 = smov [#allocation2]  }
  0x50   : > { %p24821_p12 = scmp.ne.s32.totalorder %s25226_s6, %s24820_s29  ;;  %s24825_s4 = sshll.u32 %s25025_s5, 4  ;;  %s24826_s4 = int_to_ptr.vmem [resolvable:$false] %s24825_s4 }
  0x51   : > { %s24827_s23 = scalar_lea.vmem %s24826_s4, 8704  ;;  %p24828_p5 = scmp.lt.s32.totalorder %s25226_s6, %s24826_s4 }
  0x52   : > { %p24823_p2 = pnand %p24821_p12, %p24807_p13  ;;  %p24829_p3 = scmp.lt.s32.totalorder %s24827_s23, %s24820_s29 }
  0x54   : > { %p24824_p11 = pneg %p24823_p2  ;;  %p24830_p7 = por %p24829_p3, %p24828_p5 }
  0x56   : > { %p24831_p9 = pnand %p24830_p7, %p24824_p11 }
  0x58   : > { %24834 = shalt.err (!%p24831_p9)
}
  0x59   : > { %s25026_s1 = smov 17408   ;;  %s25027_s26 = smov 2176  }
  0x5a   : > { %s25028_s22 = smov 136   ;;  %s25257_s10 = sadd.s32 4294967295, %s25019_s25  }
  0x5b   : > { %21237 = dma.hbm_to_vmem [thread:$0]  (!%p25217_p10), %s25224_s21, 4352, %s25226_s6, %s25228_s7, %s25026_s1, %s25027_s26, %s25028_s22  }
  0x5c   : > { %s18429_s11 = sadd.s32 4294967294, %s25019_s25   ;;  %s34_s29 = sadd.s32 1, %s25015_s24 }
  0x5d   : > { %s28271_s29 = smov (!%p25129_p1, %s34_s29), %s25015_s24  ;;  %p55_p5 = scmp.eq.s32.totalorder %s25257_s10, 0 }
  0x5e   : > { %s95_s9 = sadd.s32 1, %s24975_s14  ;;  %p36_p11 = scmp.ge.s32.totalorder %s28271_s29, 4 }
  0x5f   : > { %p102_p10 = scmp.ne.s32.totalorder %s24975_s14, %s24971_s13  ;;  %p28229_p13 = scmp.ne.s32.totalorder %s24995_s19, %s24991_s18 }
  0x60   : > { %p28231_p4 = scmp.ne.s32.totalorder %s24983_s16, %s24979_s15  ;;  %s28273_s29 = smov (%p36_p11, %s28271_s29), 0 }
  0x61   : > { %p25273_p0 = por %p55_p5, %p28229_p13  ;;  %28233 = sst [smem:[#allocation18_spill]] %s28273_s29 }
  0x62   : > { %p25282_p1 = por %p28231_p4, %p55_p5  ;;  %p28234_p8 = scmp.eq.s32.totalorder %s25019_s25, 0 }
  0x63   : > { %s28230_s21 = scalar_select %p25273_p0, 1, 0 }
  0x64   : > { %s28232_s27 = scalar_select %p25282_p1, 1, 0 }
  0x65   : > { %p25293_p6 = por %p102_p10, %p28234_p8  ;;  %p108_p12 = scmp.ne.s32.totalorder %s24971_s13, %s24967_s12 }
  0x66   : > { %s65_s15 = ssub.s32 %s25015_s24, %s28273_s29  ;;  %p132_p2 = scmp.eq.s32.totalorder %s25257_s10, 31 }
  0x67   : > { %s66_s6 = sor.u32 %s65_s15, %s25200_s28  ;;  %p93_p3 = scmp.eq.s32.totalorder %s65_s15, 0 }
  0x68   : > { %p67_p7 = scmp.eq.s32.totalorder %s66_s6, 0  ;;  %p25308_p9 = por %p108_p12, %p55_p5 }
  0x69   : > { %s25313_s5 = scalar_select %p93_p3, %s24975_s14, %s95_s9  }
  0x6a   : > { %s28236_s7 = scalar_select %p25308_p9, 1, 0 }
  0x6b   : > { %s28237_s4 = sadd.s32 1, %s24987_s17  ;;  %p25323_p11 = por %p132_p2, %p102_p10 }
  0x6c   : > { %s25318_s23 = scalar_select %p67_p7, %s24987_s17, %s28237_s4  }
  0x6d   : > { %s28238_s1 = scalar_select %p25323_p11, 1, 0 }
  0x6e   : > { %p138_p13 = scmp.eq.s32.totalorder %s18429_s11, 31  ;;  %s205_s28 = sand.u32 1, %s24975_s14  }
  0x6f   : > { %s20755_s26 = smul.u32 272, %s25015_s24  ;;  %p28240_p5 = scmp.lt.s32.totalorder %s25019_s25, 32 }
  0x70   : > { %p25332_p4 = por %p138_p13, %p108_p12  ;;  %s21221_s15 = smul.u32 17, %s205_s28 }
  0x71   : > { %p25340_p8 = pnand %p28240_p5, %p25293_p6  ;;  %s25347_s11 = scalar_lea.hbm %s28199_s2, %s20755_s26 }
  0x72   : > { %s28239_s22 = scalar_select %p25332_p4, 1, 0 }
  0x73   : > { %s207_s0 = scalar_lea.vmem [#allocation7], %s21221_s15  ;;  %s24835_s18 = scalar_lea.hbm %s25347_s11, 272 }
  0x74   : > { %s215_s29 = sshll.u32 %s207_s0, 4  ;;  %p24836_p10 = scmp.ne.s32.totalorder %s25347_s11, %s24835_s18  ;;  %s216_s29 = int_to_ptr.vmem [resolvable:$true] %s215_s29 }
  0x75   : > { %p24837_p6 = pneg %p25340_p8  ;;  %s24840_s26 = scalar_lea.hbm %s28199_s2, 1088 }
  0x76   : > { %p24841_p3 = scmp.lt.u32.totalorder %s25347_s11, %s28199_s2  ;;  %p24842_p7 = scmp.lt.u32.totalorder %s24840_s26, %s24835_s18 }
  0x77   : > { %p24838_p12 = pnand %p24837_p6, %p24836_p10  ;;  %p24844_p5 = scmp.lt.u32.totalorder %s24835_s18, %s25347_s11 }
  0x78   : > { %p24843_p13 = por %p24842_p7, %p24841_p3 }
  0x79   : > { %p24839_p2 = pneg %p24838_p12 }
  0x7a   : > { %p24845_p4 = por %p24844_p5, %p24843_p13 }
  0x7c   : > { %p24846_p11 = pnand %p24845_p4, %p24839_p2 }
  0x7e   : > { %24849 = shalt.err (!%p24846_p11)
}
  0x7f   : > { %s24850_s0 = scalar_lea.vmem %s216_s29, 272  ;;  %s25029_s15 = smov [#allocation7]  }
  0x80   : > { %p24851_p9 = scmp.ne.s32.totalorder %s216_s29, %s24850_s0  ;;  %s24855_s28 = sshll.u32 %s25029_s15, 4  ;;  %s24856_s28 = int_to_ptr.vmem [resolvable:$false] %s24855_s28 }
  0x81   : > { %s24857_s6 = scalar_lea.vmem %s24856_s28, 544  ;;  %p24858_p1 = scmp.lt.s32.totalorder %s216_s29, %s24856_s28 }
  0x82   : > { %p24853_p10 = pnand %p24851_p9, %p24837_p6  ;;  %p24859_p0 = scmp.lt.s32.totalorder %s24857_s6, %s24850_s0 }
  0x84   : > { %p24854_p12 = pneg %p24853_p10  ;;  %p24860_p3 = por %p24859_p0, %p24858_p1 }
  0x86   : > { %p24861_p7 = pnand %p24860_p3, %p24854_p12 }
  0x88   : > { %24864 = shalt.err (!%p24861_p7)
}
  0x89   : > { %21243 = dma.hbm_to_vmem [thread:$0]  (!%p25340_p8), %s25347_s11, 272, %s216_s29, %s25163_s30  }
  0x8a   : > { %p28242_p11 = scmp.ne.s32.totalorder %s28224_s3, 0 }
  0x8b   : > { %s226_s24 = sand.u32 (!%p28242_p11), 1, %s24995_s19   ;;  %p28243_p9 = scmp.ne.s32.totalorder (!%p28242_p11), %s28230_s21, 0 }
  0x8c   : > { %224 = sbr.rel (%p28242_p11) target bundleno = 2783 (0xadf), region = 32  ;;  %s227_s26 = scalar_lea.sflag (!%p28242_p11), [#allocation3], %s226_s24 }
  0x8d   : > { %s21222_s18 = smul.u32 (!%p28242_p11), 272, %s226_s24 }
  0x8f   : > { %s25374_s4 = scalar_lea.vmem (!%p28242_p11), [#allocation2], %s21222_s18 }
  0x93   : > { %24950 = dma.done.wait (%p28243_p9), %s227_s26, 4352  }
  0x94   : > { %24952 = vsyncadd (%p28243_p9), %s227_s26, 4294962944  ;;  %s235_s9 = sand.u32 1, %s25257_s10   ;;  %s237_s30 = sand.u32 1, %s24983_s16  }
  0x95   : > { %s21223_s29 = smul.u32 18496, %s237_s30  ;;  %s236_s3 = scalar_lea.sflag [#allocation6], %s235_s9 }
  0x96   : > { %p28244_p0 = scmp.ne.s32.totalorder %s28232_s27, 0 }
  0x97   : > { %s25382_s11 = scalar_lea.vmem [#allocation5], %s21223_s29 }
  0x98   : > { %24954 = dma.done.wait (%p28244_p0), %s236_s3, 295936  }
  0x99   : > { %24956 = vsyncadd (%p28244_p0), %s236_s3, 4294671360  ;;  %s25389_s0 = sand.u32 1, %s24971_s13   ;;  %p28245_p1 = scmp.ne.s32.totalorder %s28236_s7, 0 }
  0x9a   : > { %s21224_s21 = smul.u32 17, %s25389_s0 }
  0x9c   : > { %s248_s15 = scalar_lea.vmem [#allocation7], %s21224_s21 }
  0x9d   : > { %24958 = dma.done.wait (%p28245_p1), %s236_s3, 272  }
  0x9e   : > { %24960 = vsyncadd (%p28245_p1), %s236_s3, 4294967024  ;;  %s21225_s10 = smul.u32 272, %s25389_s0  ;;  %s28246_s6 = sld [smem:[#allocation13_spill]] }
  0xa0   : > { %s25397_s28 = scalar_lea.vmem [#allocation8], %s21225_s10 }
  0xa4   : > { %p18436_p4 = scmp.ne.s32.totalorder %s28246_s6, 0 }
  0xa5   : > { %v297_v0 = vlaneseq (!%p18436_p4)  ;;  %v18437_v1 = vld [vmem:[%s248_s15 + $0x10] ss:$0 sm:$0xff] (!%p18436_p4)  ;;  %v291_v3 = vld [vmem:[%s248_s15] sm:$0xff] (!%p18436_p4)  ;;  %v292_v12 = vld [vmem:[%s248_s15 + $0x8] sm:$0xff] (!%p18436_p4) }
  0xa6   : > { %290 = sbr.rel (%p18436_p4) target bundleno = 189 (0xbd), region = 48  ;;  %398 = vst [vmem:[%s25397_s28 + $0x80] sm:$0xff] (!%p18436_p4), %v18437_v1  ;;  %415 = vst [vmem:[%s25397_s28 + $0x108] sm:$0xff] (!%p18436_p4), %v18437_v1 }
  0xa7   : > { %v298_v2 = vshrl.u32 (!%p18436_p4), %v297_v0, 7 }
  0xa9   : > { %v299_v4 = vsub.s32 (!%p18436_p4), 0, %v298_v2  ;;  %v303_v5 = vsub.s32 (!%p18436_p4), 1, %v298_v2  ;;  %v307_v6 = vsub.s32 (!%p18436_p4), 2, %v298_v2  ;;  %v311_v7 = vsub.s32 (!%p18436_p4), 3, %v298_v2 }
  0xaa   : > { %v315_v8 = vsub.s32 (!%p18436_p4), 4, %v298_v2  ;;  %v319_v9 = vsub.s32 (!%p18436_p4), 5, %v298_v2  ;;  %v323_v10 = vsub.s32 (!%p18436_p4), 6, %v298_v2  ;;  %v327_v11 = vsub.s32 (!%p18436_p4), 7, %v298_v2 }
  0xab   : > { %v300_v13 = vrot.slane (!%p18436_p4), %v291_v3, %v299_v4  ;;  %v304_v14 = vrot.slane (!%p18436_p4), %v291_v3, %v303_v5  ;;  %v308_v15 = vrot.slane (!%p18436_p4), %v291_v3, %v307_v6  ;;  %v312_v16 = vrot.slane (!%p18436_p4), %v291_v3, %v311_v7 }
  0xac   : > { %v316_v17 = vrot.slane (!%p18436_p4), %v291_v3, %v315_v8  ;;  %v320_v18 = vrot.slane (!%p18436_p4), %v291_v3, %v319_v9  ;;  %v324_v19 = vrot.slane (!%p18436_p4), %v291_v3, %v323_v10  ;;  %v328_v20 = vrot.slane (!%p18436_p4), %v291_v3, %v327_v11 }
  0xad   : > { %382 = vst [vmem:[%s25397_s28] sm:$0xff] %v300_v13  ;;  %399 = vst [vmem:[%s25397_s28 + $0x88] sm:$0xff] %v300_v13  ;;  %v332_v21 = vrot.slane %v292_v12, %v299_v4  ;;  %v336_v22 = vrot.slane %v292_v12, %v303_v5  ;;  %v340_v23 = vrot.slane %v292_v12, %v307_v6 }
  0xae   : > { %383 = vst [vmem:[%s25397_s28 + $0x8] sm:$0xff] %v304_v14  ;;  %400 = vst [vmem:[%s25397_s28 + $0x90] sm:$0xff] %v304_v14  ;;  %v344_v24 = vrot.slane %v292_v12, %v311_v7  ;;  %v348_v25 = vrot.slane %v292_v12, %v315_v8  ;;  %v352_v26 = vrot.slane %v292_v12, %v319_v9 }
  0xaf   : > { %384 = vst [vmem:[%s25397_s28 + $0x10] sm:$0xff] %v308_v15  ;;  %401 = vst [vmem:[%s25397_s28 + $0x98] sm:$0xff] %v308_v15  ;;  %v356_v27 = vrot.slane %v292_v12, %v323_v10  ;;  %v360_v28 = vrot.slane %v292_v12, %v327_v11 }
  0xb0   : > { %385 = vst [vmem:[%s25397_s28 + $0x18] sm:$0xff] %v312_v16  ;;  %402 = vst [vmem:[%s25397_s28 + $0xa0] sm:$0xff] %v312_v16 }
  0xb1   : > { %386 = vst [vmem:[%s25397_s28 + $0x20] sm:$0xff] %v316_v17  ;;  %403 = vst [vmem:[%s25397_s28 + $0xa8] sm:$0xff] %v316_v17 }
  0xb2   : > { %387 = vst [vmem:[%s25397_s28 + $0x28] sm:$0xff] %v320_v18  ;;  %404 = vst [vmem:[%s25397_s28 + $0xb0] sm:$0xff] %v320_v18 }
  0xb3   : > { %388 = vst [vmem:[%s25397_s28 + $0x30] sm:$0xff] %v324_v19  ;;  %405 = vst [vmem:[%s25397_s28 + $0xb8] sm:$0xff] %v324_v19 }
  0xb4   : > { %389 = vst [vmem:[%s25397_s28 + $0x38] sm:$0xff] %v328_v20  ;;  %406 = vst [vmem:[%s25397_s28 + $0xc0] sm:$0xff] %v328_v20 }
  0xb5   : > { %390 = vst [vmem:[%s25397_s28 + $0x40] sm:$0xff] %v332_v21  ;;  %407 = vst [vmem:[%s25397_s28 + $0xc8] sm:$0xff] %v332_v21 }
  0xb6   : > { %391 = vst [vmem:[%s25397_s28 + $0x48] sm:$0xff] %v336_v22  ;;  %408 = vst [vmem:[%s25397_s28 + $0xd0] sm:$0xff] %v336_v22 }
  0xb7   : > { %392 = vst [vmem:[%s25397_s28 + $0x50] sm:$0xff] %v340_v23  ;;  %409 = vst [vmem:[%s25397_s28 + $0xd8] sm:$0xff] %v340_v23 }
  0xb8   : > { %393 = vst [vmem:[%s25397_s28 + $0x58] sm:$0xff] %v344_v24  ;;  %410 = vst [vmem:[%s25397_s28 + $0xe0] sm:$0xff] %v344_v24 }
  0xb9   : > { %394 = vst [vmem:[%s25397_s28 + $0x60] sm:$0xff] %v348_v25  ;;  %411 = vst [vmem:[%s25397_s28 + $0xe8] sm:$0xff] %v348_v25 }
  0xba   : > { %395 = vst [vmem:[%s25397_s28 + $0x68] sm:$0xff] %v352_v26  ;;  %412 = vst [vmem:[%s25397_s28 + $0xf0] sm:$0xff] %v352_v26 }
  0xbb   : > { %396 = vst [vmem:[%s25397_s28 + $0x70] sm:$0xff] %v356_v27  ;;  %413 = vst [vmem:[%s25397_s28 + $0xf8] sm:$0xff] %v356_v27 }
  0xbc   : > { %397 = vst [vmem:[%s25397_s28 + $0x78] sm:$0xff] %v360_v28  ;;  %414 = vst [vmem:[%s25397_s28 + $0x100] sm:$0xff] %v360_v28 }
  0xbd PF: > { %v21375_v29 = vld [vmem:[%s25382_s11 + $0x4] ss:$68 sps:$4 sm:$0xff]   ;;  %v21377_v30 = vld [vmem:[%s25382_s11 + $0xc] ss:$68 sps:$4 sm:$0xff]   ;;  %v21383_v34 = vld [vmem:[%s25382_s11 + $0x94] ss:$68 sps:$4 sm:$0xff]  }
  0xbe   : > { %14645 = vmatprep.subr.bf16.mxu0 %v21375_v29  ;;  %v21379_v31 = vld [vmem:[%s25382_s11] ss:$68 sps:$4 sm:$0xff]   ;;  %v21380_v32 = vld [vmem:[%s25382_s11 + $0x8] ss:$68 sps:$4 sm:$0xff]   ;;  %15032 = vmatprep.subr.bf16.mxu1 %v21377_v30  ;;  %v21386_v36 = vld [vmem:[%s25382_s11 + $0x90] ss:$68 sps:$4 sm:$0xff]  }
  0xbf   : > { %v21381_v33 = vld [vmem:[%s25382_s11 + $0x8c] ss:$68 sps:$4 sm:$0xff]   ;;  %14646 = vmatpush1.bf16.msra.mxu0 %v21379_v31  ;;  %15033 = vmatpush1.bf16.msra.mxu1 %v21380_v32  ;;  %v21387_v37 = vld [vmem:[%s25382_s11 + $0x114] ss:$68 sps:$4 sm:$0xff]   ;;  %v21389_v38 = vld [vmem:[%s25382_s11 + $0x11c] ss:$68 sps:$4 sm:$0xff]  }
  0xc0   : > { %v21385_v35 = vld [vmem:[%s25382_s11 + $0x88] ss:$68 sps:$4 sm:$0xff]   ;;  %14647 = vmatprep.subr.bf16.mxu0 %v21381_v33  ;;  %15034 = vmatprep.subr.bf16.mxu1 %v21383_v34  ;;  %v21391_v39 = vld [vmem:[%s25382_s11 + $0x110] ss:$68 sps:$4 sm:$0xff]   ;;  %v21392_v40 = vld [vmem:[%s25382_s11 + $0x118] ss:$68 sps:$4 sm:$0xff]  }
  0xc1   : > { %v21393_v41 = vld [vmem:[%s25382_s11 + $0x19c] ss:$68 sps:$4 sm:$0xff]   ;;  %v21395_v42 = vld [vmem:[%s25382_s11 + $0x1a4] ss:$68 sps:$4 sm:$0xff]   ;;  %v21401_v46 = vld [vmem:[%s25382_s11 + $0x22c] ss:$68 sps:$4 sm:$0xff]  }
  0xc2   : > { %v21397_v43 = vld [vmem:[%s25382_s11 + $0x198] ss:$68 sps:$4 sm:$0xff]   ;;  %v21398_v44 = vld [vmem:[%s25382_s11 + $0x1a0] ss:$68 sps:$4 sm:$0xff]   ;;  %v21404_v48 = vld [vmem:[%s25382_s11 + $0x228] ss:$68 sps:$4 sm:$0xff]  }
  0xc3   : > { %14648 = vmatpush1.bf16.msra.mxu0 %v21385_v35  ;;  %15035 = vmatpush1.bf16.msra.mxu1 %v21386_v36  ;;  %v21399_v45 = vld [vmem:[%s25382_s11 + $0x224] ss:$68 sps:$4 sm:$0xff]   ;;  %v21405_v49 = vld [vmem:[%s25382_s11 + $0x2ac] ss:$68 sps:$4 sm:$0xff]   ;;  %v21407_v50 = vld [vmem:[%s25382_s11 + $0x2b4] ss:$68 sps:$4 sm:$0xff]  }
  0xc4   : > { %14649 = vmatprep.subr.bf16.mxu0 %v21387_v37  ;;  %15036 = vmatprep.subr.bf16.mxu1 %v21389_v38  ;;  %v21403_v47 = vld [vmem:[%s25382_s11 + $0x220] ss:$68 sps:$4 sm:$0xff]   ;;  %v21409_v51 = vld [vmem:[%s25382_s11 + $0x2a8] ss:$68 sps:$4 sm:$0xff]   ;;  %v21410_v52 = vld [vmem:[%s25382_s11 + $0x2b0] ss:$68 sps:$4 sm:$0xff]  }
  0xc5   : > { %v21411_v53 = vld [vmem:[%s25382_s11 + $0x334] ss:$68 sps:$4 sm:$0xff]   ;;  %v21413_v54 = vld [vmem:[%s25382_s11 + $0x33c] ss:$68 sps:$4 sm:$0xff]   ;;  %v21419_v58 = vld [vmem:[%s25382_s11 + $0x3c4] ss:$68 sps:$4 sm:$0xff]  }
  0xc6   : > { %v21415_v55 = vld [vmem:[%s25382_s11 + $0x330] ss:$68 sps:$4 sm:$0xff]   ;;  %v21416_v56 = vld [vmem:[%s25382_s11 + $0x338] ss:$68 sps:$4 sm:$0xff]   ;;  %v21422_v60 = vld [vmem:[%s25382_s11 + $0x3c0] ss:$68 sps:$4 sm:$0xff]  }
  0xc7   : > { %14650 = vmatpush1.bf16.msra.mxu0 %v21391_v39  ;;  %15037 = vmatpush1.bf16.msra.mxu1 %v21392_v40  ;;  %v21417_v57 = vld [vmem:[%s25382_s11 + $0x3bc] ss:$68 sps:$4 sm:$0xff]   ;;  %v21423_v61 = vld [vmem:[%s25382_s11 + $0x444] ss:$68 sps:$4 sm:$0xff]   ;;  %v21425_v62 = vld [vmem:[%s25382_s11 + $0x44c] ss:$68 sps:$4 sm:$0xff]  }
  0xc8   : > { %14651 = vmatprep.subr.bf16.mxu0 %v21393_v41  ;;  %15038 = vmatprep.subr.bf16.mxu1 %v21395_v42  ;;  %v21421_v59 = vld [vmem:[%s25382_s11 + $0x3b8] ss:$68 sps:$4 sm:$0xff]   ;;  %v21427_v63 = vld [vmem:[%s25382_s11 + $0x440] ss:$68 sps:$4 sm:$0xff]   ;;  %v21428_v0 = vld [vmem:[%s25382_s11 + $0x448] ss:$68 sps:$4 sm:$0xff]  }
  0xc9   : > { %v21429_v1 = vld [vmem:[%s25382_s11 + $0x4cc] ss:$68 sps:$4 sm:$0xff]   ;;  %v21431_v2 = vld [vmem:[%s25382_s11 + $0x4d4] ss:$68 sps:$4 sm:$0xff]   ;;  %v21437_v6 = vld [vmem:[%s25382_s11 + $0x55c] ss:$68 sps:$4 sm:$0xff]  }
  0xca   : > { %v21433_v3 = vld [vmem:[%s25382_s11 + $0x4c8] ss:$68 sps:$4 sm:$0xff]   ;;  %v21434_v4 = vld [vmem:[%s25382_s11 + $0x4d0] ss:$68 sps:$4 sm:$0xff]   ;;  %v21440_v8 = vld [vmem:[%s25382_s11 + $0x558] ss:$68 sps:$4 sm:$0xff]  }
  0xcb   : > { %14652 = vmatpush1.bf16.msra.mxu0 %v21397_v43  ;;  %15039 = vmatpush1.bf16.msra.mxu1 %v21398_v44  ;;  %v21435_v5 = vld [vmem:[%s25382_s11 + $0x554] ss:$68 sps:$4 sm:$0xff]   ;;  %v21441_v9 = vld [vmem:[%s25382_s11 + $0x5dc] ss:$68 sps:$4 sm:$0xff]   ;;  %v21443_v10 = vld [vmem:[%s25382_s11 + $0x5e4] ss:$68 sps:$4 sm:$0xff]  }
  0xcc   : > { %14653 = vmatprep.subr.bf16.mxu0 %v21399_v45  ;;  %15040 = vmatprep.subr.bf16.mxu1 %v21401_v46  ;;  %v21439_v7 = vld [vmem:[%s25382_s11 + $0x550] ss:$68 sps:$4 sm:$0xff]   ;;  %v451_v11 = vld [vmem:[%s25374_s4 + $0x8] sm:$0xff]  ;;  %v21446_v14 = vld [vmem:[%s25382_s11 + $0x5e0] ss:$68 sps:$4 sm:$0xff]   ;;  %vm25032_vm0 = vmmov 0  }
  0xcd   : > { %v468_v12 = vld [vmem:[%s25374_s4 + $0x90] sm:$0xff]  ;;  %v21445_v13 = vld [vmem:[%s25382_s11 + $0x5d8] ss:$68 sps:$4 sm:$0xff]   ;;  %v21452_v19 = vld [vmem:[%s25382_s11 + $0x668] ss:$68 sps:$4 sm:$0xff]   ;;  %s28247_s27 = sld [smem:[#allocation13_spill]] }
  0xce   : > { %v25484_v15 = vpack.c.bf16 %v468_v12, %v451_v11  ;;  %v21447_v16 = vld [vmem:[%s25382_s11 + $0x664] ss:$68 sps:$4 sm:$0xff]   ;;  %v21449_v17 = vld [vmem:[%s25382_s11 + $0x66c] ss:$68 sps:$4 sm:$0xff]   ;;  %v21455_v21 = vld [vmem:[%s25382_s11 + $0x6f4] ss:$68 sps:$4 sm:$0xff]  }
  0xcf   : > { %14654 = vmatpush1.bf16.msra.mxu0 %v21403_v47  ;;  %15041 = vmatpush1.bf16.msra.mxu1 %v21404_v48  ;;  %v21451_v18 = vld [vmem:[%s25382_s11 + $0x660] ss:$68 sps:$4 sm:$0xff]   ;;  %v21453_v20 = vld [vmem:[%s25382_s11 + $0x6ec] ss:$68 sps:$4 sm:$0xff]   ;;  %v21459_v24 = vld [vmem:[%s25382_s11 + $0x774] ss:$68 sps:$4 sm:$0xff]  }
  0xd0   : > { %14655 = vmatprep.subr.bf16.mxu0 %v21405_v49  ;;  %15042 = vmatprep.subr.bf16.mxu1 %v21407_v50  ;;  %v21457_v22 = vld [vmem:[%s25382_s11 + $0x6e8] ss:$68 sps:$4 sm:$0xff]   ;;  %v21458_v23 = vld [vmem:[%s25382_s11 + $0x6f0] ss:$68 sps:$4 sm:$0xff]   ;;  %v21461_v25 = vld [vmem:[%s25382_s11 + $0x77c] ss:$68 sps:$4 sm:$0xff]  }
  0xd1   : > { %14677 = vmatprep.mubr.bf16.mxu0 %v25484_v15  ;;  %15064 = vmatprep.mubr.bf16.mxu1 %v25484_v15  ;;  %v21463_v26 = vld [vmem:[%s25382_s11 + $0x770] ss:$68 sps:$4 sm:$0xff]   ;;  %v21464_v27 = vld [vmem:[%s25382_s11 + $0x778] ss:$68 sps:$4 sm:$0xff]   ;;  %v21467_v29 = vld [vmem:[%s25382_s11 + $0x804] ss:$68 sps:$4 sm:$0xff]  }
  0xd2   : > { %v21465_v28 = vld [vmem:[%s25382_s11 + $0x7fc] ss:$68 sps:$4 sm:$0xff]   ;;  %v21473_v32 = vld [vmem:[%s25382_s11 + $0x884] ss:$68 sps:$4 sm:$0xff]   ;;  %v21476_v35 = vld [vmem:[%s25382_s11 + $0x88c] ss:$68 sps:$4 sm:$0xff]  }
  0xd3   : > { %14656 = vmatpush1.bf16.msra.mxu0 %v21409_v51  ;;  %15043 = vmatpush1.bf16.msra.mxu1 %v21410_v52  ;;  %v21469_v30 = vld [vmem:[%s25382_s11 + $0x7f8] ss:$68 sps:$4 sm:$0xff]   ;;  %v21470_v31 = vld [vmem:[%s25382_s11 + $0x800] ss:$68 sps:$4 sm:$0xff]   ;;  %v21474_v37 = vld [vmem:[%s25382_s11 + $0x888] ss:$68 sps:$4 sm:$0xff]  }
  0xd4   : > { %14657 = vmatprep.subr.bf16.mxu0 %v21411_v53  ;;  %15044 = vmatprep.subr.bf16.mxu1 %v21413_v54  ;;  %v450_v33 = vld [vmem:[%s25374_s4] sm:$0xff]  ;;  %v467_v34 = vld [vmem:[%s25374_s4 + $0x88] sm:$0xff]  ;;  %p20750_p8 = scmp.ne.s32.totalorder %s28247_s27, 7 }
  0xd5   : > { %v21471_v36 = vld [vmem:[%s25382_s11 + $0x880] ss:$68 sps:$4 sm:$0xff]   ;;  %v25510_v38 = vpack.c.bf16 %v467_v34, %v450_v33  ;;  %v21479_v39 = vld [vmem:[%s25382_s11 + $0x90c] ss:$68 sps:$4 sm:$0xff]   ;;  %v21482_v40 = vld [vmem:[%s25382_s11 + $0x914] ss:$68 sps:$4 sm:$0xff]  }
  0xd6   : > { %v21477_v41 = vld [vmem:[%s25382_s11 + $0x908] ss:$68 sps:$4 sm:$0xff]   ;;  %v21480_v42 = vld [vmem:[%s25382_s11 + $0x910] ss:$68 sps:$4 sm:$0xff]   ;;  %v21488_v44 = vld [vmem:[%s25382_s11 + $0x99c] ss:$68 sps:$4 sm:$0xff]  }
  0xd7   : > { %14658 = vmatpush1.bf16.msra.mxu0 %v21415_v55  ;;  %15045 = vmatpush1.bf16.msra.mxu1 %v21416_v56  ;;  %v21485_v43 = vld [vmem:[%s25382_s11 + $0x994] ss:$68 sps:$4 sm:$0xff]   ;;  %v21491_v47 = vld [vmem:[%s25382_s11 + $0xa1c] ss:$68 sps:$4 sm:$0xff]   ;;  %v21494_v48 = vld [vmem:[%s25382_s11 + $0xa24] ss:$68 sps:$4 sm:$0xff]  }
  0xd8   : > { %14659 = vmatprep.subr.bf16.mxu0 %v21417_v57  ;;  %15046 = vmatprep.subr.bf16.mxu1 %v21419_v58  ;;  %v21483_v45 = vld [vmem:[%s25382_s11 + $0x990] ss:$68 sps:$4 sm:$0xff]   ;;  %v21486_v46 = vld [vmem:[%s25382_s11 + $0x998] ss:$68 sps:$4 sm:$0xff]   ;;  %v21492_v50 = vld [vmem:[%s25382_s11 + $0xa20] ss:$68 sps:$4 sm:$0xff]  }
  0xd9   : > { %v21489_v49 = vld [vmem:[%s25382_s11 + $0xa18] ss:$68 sps:$4 sm:$0xff]   ;;  %v21497_v51 = vld [vmem:[%s25382_s11 + $0xaa4] ss:$68 sps:$4 sm:$0xff]   ;;  %v21500_v52 = vld [vmem:[%s25382_s11 + $0xaac] ss:$68 sps:$4 sm:$0xff]  }
  0xda   : > { %v21495_v53 = vld [vmem:[%s25382_s11 + $0xaa0] ss:$68 sps:$4 sm:$0xff]   ;;  %v21498_v54 = vld [vmem:[%s25382_s11 + $0xaa8] ss:$68 sps:$4 sm:$0xff]   ;;  %v21506_v56 = vld [vmem:[%s25382_s11 + $0xb34] ss:$68 sps:$4 sm:$0xff]  }
  0xdb   : > { %14660 = vmatpush1.bf16.msra.mxu0 %v21421_v59  ;;  %15047 = vmatpush1.bf16.msra.mxu1 %v21422_v60  ;;  %v21503_v55 = vld [vmem:[%s25382_s11 + $0xb2c] ss:$68 sps:$4 sm:$0xff]   ;;  %v21509_v59 = vld [vmem:[%s25382_s11 + $0xbb4] ss:$68 sps:$4 sm:$0xff]   ;;  %v21512_v60 = vld [vmem:[%s25382_s11 + $0xbbc] ss:$68 sps:$4 sm:$0xff]  }
  0xdc   : > { %14661 = vmatprep.subr.bf16.mxu0 %v21423_v61  ;;  %15048 = vmatprep.subr.bf16.mxu1 %v21425_v62  ;;  %v21501_v57 = vld [vmem:[%s25382_s11 + $0xb28] ss:$68 sps:$4 sm:$0xff]   ;;  %v21504_v58 = vld [vmem:[%s25382_s11 + $0xb30] ss:$68 sps:$4 sm:$0xff]   ;;  %v21558_v34 = vld [vmem:[%s25382_s11 + $0xff8] ss:$68 sps:$4 sm:$0xff]  }
  0xdd   : > { %v453_v61 = vld [vmem:[%s25374_s4 + $0x18] sm:$0xff]  ;;  %v470_v62 = vld [vmem:[%s25374_s4 + $0xa0] sm:$0xff] }
  0xde   : > { %v21530_v11 = vld [vmem:[%s25382_s11 + $0xd54] ss:$68 sps:$4 sm:$0xff]   ;;  %v21525_v12 = vld [vmem:[%s25382_s11 + $0xd48] ss:$68 sps:$4 sm:$0xff]  }
  0xdf   : > { %14662 = vmatpush1.bf16.msra.mxu0 %v21427_v63  ;;  %15049 = vmatpush1.bf16.msra.mxu1 %v21428_v0  ;;  %v21507_v63 = vld [vmem:[%s25382_s11 + $0xbb0] ss:$68 sps:$4 sm:$0xff]   ;;  %v21510_v0 = vld [vmem:[%s25382_s11 + $0xbb8] ss:$68 sps:$4 sm:$0xff]  }
  0xe0   : > { %14663 = vmatprep.subr.bf16.mxu0 %v21429_v1  ;;  %15050 = vmatprep.subr.bf16.mxu1 %v21431_v2  ;;  %v25540_v1 = vpack.c.bf16 %v470_v62, %v453_v61  ;;  %v21515_v2 = vld [vmem:[%s25382_s11 + $0xc3c] ss:$68 sps:$4 sm:$0xff]   ;;  %v21555_v33 = vld [vmem:[%s25382_s11 + $0xff0] ss:$68 sps:$4 sm:$0xff]   ;;  %v21593_v62 = vld [vmem:[%s25382_s11 + $0x1324] ss:$68 sps:$4 sm:$0xff]  }
  0xe1   : > { %v21588_v61 = vld [vmem:[%s25382_s11 + $0x12a0] ss:$68 sps:$4 sm:$0xff]  }
  0xe3   : > { %14664 = vmatpush1.bf16.msra.mxu0 %v21433_v3  ;;  %15051 = vmatpush1.bf16.msra.mxu1 %v21434_v4  ;;  %v21518_v3 = vld [vmem:[%s25382_s11 + $0xc44] ss:$68 sps:$4 sm:$0xff]   ;;  %v21513_v4 = vld [vmem:[%s25382_s11 + $0xc38] ss:$68 sps:$4 sm:$0xff]  }
  0xe4   : > { %14665 = vmatprep.subr.bf16.mxu0 %v21435_v5  ;;  %15052 = vmatprep.subr.bf16.mxu1 %v21437_v6  ;;  %v21516_v5 = vld [vmem:[%s25382_s11 + $0xc40] ss:$68 sps:$4 sm:$0xff]  }
  0xe5   : > { %v21521_v6 = vld [vmem:[%s25382_s11 + $0xcc4] ss:$68 sps:$4 sm:$0xff]  }
  0xe7   : > { %14666 = vmatpush1.bf16.msra.mxu0 %v21439_v7  ;;  %15053 = vmatpush1.bf16.msra.mxu1 %v21440_v8  ;;  %v21524_v7 = vld [vmem:[%s25382_s11 + $0xccc] ss:$68 sps:$4 sm:$0xff]   ;;  %v21519_v8 = vld [vmem:[%s25382_s11 + $0xcc0] ss:$68 sps:$4 sm:$0xff]  }
  0xe8   : > { %14667 = vmatprep.subr.bf16.mxu0 %v21441_v9  ;;  %15054 = vmatprep.subr.bf16.mxu1 %v21443_v10  ;;  %v21522_v9 = vld [vmem:[%s25382_s11 + $0xcc8] ss:$68 sps:$4 sm:$0xff]  }
  0xe9   : > { %v21527_v10 = vld [vmem:[%s25382_s11 + $0xd4c] ss:$68 sps:$4 sm:$0xff]  }
  0xeb   : > { %14668 = vmatpush1.bf16.msra.mxu0 %v21445_v13  ;;  %15055 = vmatpush1.bf16.msra.mxu1 %v21446_v14  ;;  %v21528_v13 = vld [vmem:[%s25382_s11 + $0xd50] ss:$68 sps:$4 sm:$0xff]  }
  0xec   : > { %14669 = vmatprep.subr.bf16.mxu0 %v21447_v16  ;;  %15056 = vmatprep.subr.bf16.mxu1 %v21449_v17  ;;  %v21533_v14 = vld [vmem:[%s25382_s11 + $0xdd4] ss:$68 sps:$4 sm:$0xff]   ;;  %v21536_v16 = vld [vmem:[%s25382_s11 + $0xddc] ss:$68 sps:$4 sm:$0xff]  }
  0xed   : > { %v21531_v17 = vld [vmem:[%s25382_s11 + $0xdd0] ss:$68 sps:$4 sm:$0xff]  }
  0xef   : > { %14670 = vmatpush1.bf16.msra.mxu0 %v21451_v18  ;;  %15057 = vmatpush1.bf16.msra.mxu1 %v21452_v19  ;;  %v21534_v18 = vld [vmem:[%s25382_s11 + $0xdd8] ss:$68 sps:$4 sm:$0xff]  }
  0xf0   : > { %14671 = vmatprep.subr.bf16.mxu0 %v21453_v20  ;;  %15058 = vmatprep.subr.bf16.mxu1 %v21455_v21  ;;  %v21539_v19 = vld [vmem:[%s25382_s11 + $0xe5c] ss:$68 sps:$4 sm:$0xff]   ;;  %v21542_v20 = vld [vmem:[%s25382_s11 + $0xe64] ss:$68 sps:$4 sm:$0xff]  }
  0xf1   : > { %v21537_v21 = vld [vmem:[%s25382_s11 + $0xe58] ss:$68 sps:$4 sm:$0xff]  }
  0xf3   : > { %14672 = vmatpush1.bf16.msra.mxu0 %v21457_v22  ;;  %15059 = vmatpush1.bf16.msra.mxu1 %v21458_v23  ;;  %v21540_v22 = vld [vmem:[%s25382_s11 + $0xe60] ss:$68 sps:$4 sm:$0xff]  }
  0xf4   : > { %14673 = vmatprep.subr.bf16.mxu0 %v21459_v24  ;;  %15060 = vmatprep.subr.bf16.mxu1 %v21461_v25  ;;  %v21545_v23 = vld [vmem:[%s25382_s11 + $0xee4] ss:$68 sps:$4 sm:$0xff]   ;;  %v21548_v24 = vld [vmem:[%s25382_s11 + $0xeec] ss:$68 sps:$4 sm:$0xff]  }
  0xf5   : > { %v21543_v25 = vld [vmem:[%s25382_s11 + $0xee0] ss:$68 sps:$4 sm:$0xff]  }
  0xf7   : > { %14674 = vmatpush1.bf16.msra.mxu0 %v21463_v26  ;;  %15061 = vmatpush1.bf16.msra.mxu1 %v21464_v27  ;;  %v21546_v26 = vld [vmem:[%s25382_s11 + $0xee8] ss:$68 sps:$4 sm:$0xff]  }
  0xf8   : > { %14675 = vmatprep.subr.bf16.mxu0 %v21465_v28  ;;  %15062 = vmatprep.subr.bf16.mxu1 %v21467_v29  ;;  %v21551_v27 = vld [vmem:[%s25382_s11 + $0xf6c] ss:$68 sps:$4 sm:$0xff]   ;;  %v21554_v28 = vld [vmem:[%s25382_s11 + $0xf74] ss:$68 sps:$4 sm:$0xff]  }
  0xf9   : > { %v21549_v29 = vld [vmem:[%s25382_s11 + $0xf68] ss:$68 sps:$4 sm:$0xff]  }
  0xfb   : > { %14676 = vmatpush1.bf16.msra.mxu0 %v21469_v30  ;;  %15063 = vmatpush1.bf16.msra.mxu1 %v21470_v31  ;;  %v21552_v30 = vld [vmem:[%s25382_s11 + $0xf70] ss:$68 sps:$4 sm:$0xff]  }
  0xfc   : > { %14688 = vmatprep.subr.bf16.mxu0 %v21473_v32  ;;  %15075 = vmatprep.subr.bf16.mxu1 %v21476_v35  ;;  %v21557_v31 = vld [vmem:[%s25382_s11 + $0xff4] ss:$68 sps:$4 sm:$0xff]   ;;  %v21560_v32 = vld [vmem:[%s25382_s11 + $0xffc] ss:$68 sps:$4 sm:$0xff]  }
  0xfd   : > { %v21563_v35 = vld [vmem:[%s25382_s11 + $0x107c] ss:$68 sps:$4 sm:$0xff]  }
  0xfe   : > { %14678 = vmatmul.mubr.bf16.vlgmr.msra.gmra.mrb[0].mxu0 %v25510_v38  ;;  %15065 = vmatmul.mubr.bf16.vlgmr.msra.gmra.mrb[0].mxu1 %v25510_v38 }
  0xff   : > { %14689 = vmatpush1.bf16.msra.mxu0 %v21471_v36  ;;  %15076 = vmatpush1.bf16.msra.mxu1 %v21474_v37  ;;  %v21566_v36 = vld [vmem:[%s25382_s11 + $0x1084] ss:$68 sps:$4 sm:$0xff]   ;;  %v21561_v37 = vld [vmem:[%s25382_s11 + $0x1078] ss:$68 sps:$4 sm:$0xff]  }
 0x100   : > { %14690 = vmatprep.subr.bf16.mxu0 %v21479_v39  ;;  %15077 = vmatprep.subr.bf16.mxu1 %v21482_v40  ;;  %v21564_v39 = vld [vmem:[%s25382_s11 + $0x1080] ss:$68 sps:$4 sm:$0xff]  }
 0x101   : > { %14720 = vmatprep.mubr.bf16.mxu0 %v25540_v1  ;;  %15107 = vmatprep.mubr.bf16.mxu1 %v25540_v1  ;;  %v21569_v40 = vld [vmem:[%s25382_s11 + $0x1104] ss:$68 sps:$4 sm:$0xff]  }
 0x103   : > { %14691 = vmatpush1.bf16.msra.mxu0 %v21477_v41  ;;  %15078 = vmatpush1.bf16.msra.mxu1 %v21480_v42  ;;  %v452_v41 = vld [vmem:[%s25374_s4 + $0x10] sm:$0xff]  ;;  %v469_v42 = vld [vmem:[%s25374_s4 + $0x98] sm:$0xff] }
 0x104   : > { %14692 = vmatprep.subr.bf16.mxu0 %v21485_v43  ;;  %15079 = vmatprep.subr.bf16.mxu1 %v21488_v44  ;;  %v21572_v43 = vld [vmem:[%s25382_s11 + $0x110c] ss:$68 sps:$4 sm:$0xff]   ;;  %v21567_v44 = vld [vmem:[%s25382_s11 + $0x1100] ss:$68 sps:$4 sm:$0xff]  }
 0x107   : > { %14693 = vmatpush1.bf16.msra.mxu0 %v21483_v45  ;;  %15080 = vmatpush1.bf16.msra.mxu1 %v21486_v46  ;;  %v21570_v45 = vld [vmem:[%s25382_s11 + $0x1108] ss:$68 sps:$4 sm:$0xff]   ;;  %v25586_v46 = vpack.c.bf16 %v469_v42, %v452_v41  ;;  %v21653_v41 = vld [vmem:[%s25382_s11 + $0x1874] ss:$68 sps:$4 sm:$0xff]   ;;  %v21656_v42 = vld [vmem:[%s25382_s11 + $0x187c] ss:$68 sps:$4 sm:$0xff]  }
 0x108   : > { %14694 = vmatprep.subr.bf16.mxu0 %v21491_v47  ;;  %15081 = vmatprep.subr.bf16.mxu1 %v21494_v48  ;;  %v21575_v47 = vld [vmem:[%s25382_s11 + $0x118c] ss:$68 sps:$4 sm:$0xff]   ;;  %v21578_v48 = vld [vmem:[%s25382_s11 + $0x1194] ss:$68 sps:$4 sm:$0xff]  }
 0x10b   : > { %14695 = vmatpush1.bf16.msra.mxu0 %v21489_v49  ;;  %15082 = vmatpush1.bf16.msra.mxu1 %v21492_v50  ;;  %v455_v49 = vld [vmem:[%s25374_s4 + $0x28] sm:$0xff]  ;;  %v472_v50 = vld [vmem:[%s25374_s4 + $0xb0] sm:$0xff] }
 0x10c   : > { %14696 = vmatprep.subr.bf16.mxu0 %v21497_v51  ;;  %15083 = vmatprep.subr.bf16.mxu1 %v21500_v52  ;;  %v21573_v51 = vld [vmem:[%s25382_s11 + $0x1188] ss:$68 sps:$4 sm:$0xff]   ;;  %v21576_v52 = vld [vmem:[%s25382_s11 + $0x1190] ss:$68 sps:$4 sm:$0xff]  }
 0x10f   : > { %14697 = vmatpush1.bf16.msra.mxu0 %v21495_v53  ;;  %15084 = vmatpush1.bf16.msra.mxu1 %v21498_v54  ;;  %v25596_v53 = vpack.c.bf16 %v472_v50, %v455_v49  ;;  %v21581_v54 = vld [vmem:[%s25382_s11 + $0x1214] ss:$68 sps:$4 sm:$0xff]   ;;  %v21660_v49 = vld [vmem:[%s25382_s11 + $0x1900] ss:$68 sps:$4 sm:$0xff]  }
 0x110   : > { %14698 = vmatprep.subr.bf16.mxu0 %v21503_v55  ;;  %15085 = vmatprep.subr.bf16.mxu1 %v21506_v56  ;;  %v21584_v55 = vld [vmem:[%s25382_s11 + $0x121c] ss:$68 sps:$4 sm:$0xff]   ;;  %v21579_v56 = vld [vmem:[%s25382_s11 + $0x1210] ss:$68 sps:$4 sm:$0xff]   ;;  %v21665_v50 = vld [vmem:[%s25382_s11 + $0x1984] ss:$68 sps:$4 sm:$0xff]  }
 0x113   : > { %14699 = vmatpush1.bf16.msra.mxu0 %v21501_v57  ;;  %15086 = vmatpush1.bf16.msra.mxu1 %v21504_v58  ;;  %v21582_v57 = vld [vmem:[%s25382_s11 + $0x1218] ss:$68 sps:$4 sm:$0xff]  }
 0x114   : > { %14700 = vmatprep.subr.bf16.mxu0 %v21509_v59  ;;  %15087 = vmatprep.subr.bf16.mxu1 %v21512_v60  ;;  %v21587_v58 = vld [vmem:[%s25382_s11 + $0x129c] ss:$68 sps:$4 sm:$0xff]   ;;  %v21590_v59 = vld [vmem:[%s25382_s11 + $0x12a4] ss:$68 sps:$4 sm:$0xff]  }
 0x115   : > { %v21585_v60 = vld [vmem:[%s25382_s11 + $0x1298] ss:$68 sps:$4 sm:$0xff]  }
 0x117   : > { %14701 = vmatpush1.bf16.msra.mxu0 %v21507_v63  ;;  %15088 = vmatpush1.bf16.msra.mxu1 %v21510_v0  ;;  %v21596_v63 = vld [vmem:[%s25382_s11 + $0x132c] ss:$68 sps:$4 sm:$0xff]   ;;  %v21591_v0 = vld [vmem:[%s25382_s11 + $0x1320] ss:$68 sps:$4 sm:$0xff]  }
 0x118   : > { %14702 = vmatprep.subr.bf16.mxu0 %v21515_v2  ;;  %15089 = vmatprep.subr.bf16.mxu1 %v21518_v3  ;;  %v21594_v2 = vld [vmem:[%s25382_s11 + $0x1328] ss:$68 sps:$4 sm:$0xff]  }
 0x119   : > { %v21599_v3 = vld [vmem:[%s25382_s11 + $0x13ac] ss:$68 sps:$4 sm:$0xff]  }
 0x11b   : > { %14703 = vmatpush1.bf16.msra.mxu0 %v21513_v4  ;;  %15090 = vmatpush1.bf16.msra.mxu1 %v21516_v5  ;;  %v21602_v4 = vld [vmem:[%s25382_s11 + $0x13b4] ss:$68 sps:$4 sm:$0xff]   ;;  %v21597_v5 = vld [vmem:[%s25382_s11 + $0x13a8] ss:$68 sps:$4 sm:$0xff]  }
 0x11c   : > { %14704 = vmatprep.subr.bf16.mxu0 %v21521_v6  ;;  %15091 = vmatprep.subr.bf16.mxu1 %v21524_v7  ;;  %v21600_v6 = vld [vmem:[%s25382_s11 + $0x13b0] ss:$68 sps:$4 sm:$0xff]  }
 0x11d   : > { %v21605_v7 = vld [vmem:[%s25382_s11 + $0x1434] ss:$68 sps:$4 sm:$0xff]  }
 0x11f   : > { %14705 = vmatpush1.bf16.msra.mxu0 %v21519_v8  ;;  %15092 = vmatpush1.bf16.msra.mxu1 %v21522_v9  ;;  %v21608_v8 = vld [vmem:[%s25382_s11 + $0x143c] ss:$68 sps:$4 sm:$0xff]   ;;  %v21603_v9 = vld [vmem:[%s25382_s11 + $0x1430] ss:$68 sps:$4 sm:$0xff]  }
 0x120   : > { %14706 = vmatprep.subr.bf16.mxu0 %v21527_v10  ;;  %15093 = vmatprep.subr.bf16.mxu1 %v21530_v11  ;;  %v21606_v10 = vld [vmem:[%s25382_s11 + $0x1438] ss:$68 sps:$4 sm:$0xff]  }
 0x121   : > { %v21611_v11 = vld [vmem:[%s25382_s11 + $0x14bc] ss:$68 sps:$4 sm:$0xff]  }
 0x123   : > { %14707 = vmatpush1.bf16.msra.mxu0 %v21525_v12  ;;  %15094 = vmatpush1.bf16.msra.mxu1 %v21528_v13  ;;  %v21614_v12 = vld [vmem:[%s25382_s11 + $0x14c4] ss:$68 sps:$4 sm:$0xff]   ;;  %v21609_v13 = vld [vmem:[%s25382_s11 + $0x14b8] ss:$68 sps:$4 sm:$0xff]  }
 0x124   : > { %14708 = vmatprep.subr.bf16.mxu0 %v21533_v14  ;;  %15095 = vmatprep.subr.bf16.mxu1 %v21536_v16  ;;  %v21612_v14 = vld [vmem:[%s25382_s11 + $0x14c0] ss:$68 sps:$4 sm:$0xff]  }
 0x125   : > { %v21617_v16 = vld [vmem:[%s25382_s11 + $0x1544] ss:$68 sps:$4 sm:$0xff]  }
 0x127   : > { %14709 = vmatpush1.bf16.msra.mxu0 %v21531_v17  ;;  %15096 = vmatpush1.bf16.msra.mxu1 %v21534_v18  ;;  %v21620_v17 = vld [vmem:[%s25382_s11 + $0x154c] ss:$68 sps:$4 sm:$0xff]   ;;  %v21615_v18 = vld [vmem:[%s25382_s11 + $0x1540] ss:$68 sps:$4 sm:$0xff]  }
 0x128   : > { %14710 = vmatprep.subr.bf16.mxu0 %v21539_v19  ;;  %15097 = vmatprep.subr.bf16.mxu1 %v21542_v20  ;;  %v21618_v19 = vld [vmem:[%s25382_s11 + $0x1548] ss:$68 sps:$4 sm:$0xff]  }
 0x129   : > { %v21623_v20 = vld [vmem:[%s25382_s11 + $0x15cc] ss:$68 sps:$4 sm:$0xff]  }
 0x12b   : > { %14711 = vmatpush1.bf16.msra.mxu0 %v21537_v21  ;;  %15098 = vmatpush1.bf16.msra.mxu1 %v21540_v22  ;;  %v21626_v21 = vld [vmem:[%s25382_s11 + $0x15d4] ss:$68 sps:$4 sm:$0xff]   ;;  %v21621_v22 = vld [vmem:[%s25382_s11 + $0x15c8] ss:$68 sps:$4 sm:$0xff]  }
 0x12c   : > { %14712 = vmatprep.subr.bf16.mxu0 %v21545_v23  ;;  %15099 = vmatprep.subr.bf16.mxu1 %v21548_v24  ;;  %v21624_v23 = vld [vmem:[%s25382_s11 + $0x15d0] ss:$68 sps:$4 sm:$0xff]  }
 0x12d   : > { %v21629_v24 = vld [vmem:[%s25382_s11 + $0x1654] ss:$68 sps:$4 sm:$0xff]  }
 0x12f   : > { %14713 = vmatpush1.bf16.msra.mxu0 %v21543_v25  ;;  %15100 = vmatpush1.bf16.msra.mxu1 %v21546_v26  ;;  %v21632_v25 = vld [vmem:[%s25382_s11 + $0x165c] ss:$68 sps:$4 sm:$0xff]   ;;  %v21627_v26 = vld [vmem:[%s25382_s11 + $0x1650] ss:$68 sps:$4 sm:$0xff]  }
 0x130   : > { %14714 = vmatprep.subr.bf16.mxu0 %v21551_v27  ;;  %15101 = vmatprep.subr.bf16.mxu1 %v21554_v28  ;;  %v21630_v27 = vld [vmem:[%s25382_s11 + $0x1658] ss:$68 sps:$4 sm:$0xff]  }
 0x131   : > { %v21635_v28 = vld [vmem:[%s25382_s11 + $0x16dc] ss:$68 sps:$4 sm:$0xff]  }
 0x133   : > { %14715 = vmatpush1.bf16.msra.mxu0 %v21549_v29  ;;  %15102 = vmatpush1.bf16.msra.mxu1 %v21552_v30  ;;  %v21638_v29 = vld [vmem:[%s25382_s11 + $0x16e4] ss:$68 sps:$4 sm:$0xff]   ;;  %v21633_v30 = vld [vmem:[%s25382_s11 + $0x16d8] ss:$68 sps:$4 sm:$0xff]  }
 0x134   : > { %14716 = vmatprep.subr.bf16.mxu0 %v21557_v31  ;;  %15103 = vmatprep.subr.bf16.mxu1 %v21560_v32  ;;  %v21636_v31 = vld [vmem:[%s25382_s11 + $0x16e0] ss:$68 sps:$4 sm:$0xff]  }
 0x135   : > { %v21641_v32 = vld [vmem:[%s25382_s11 + $0x1764] ss:$68 sps:$4 sm:$0xff]  }
 0x137   : > { %14717 = vmatpush1.bf16.msra.mxu0 %v21555_v33  ;;  %15104 = vmatpush1.bf16.msra.mxu1 %v21558_v34  ;;  %v21644_v33 = vld [vmem:[%s25382_s11 + $0x176c] ss:$68 sps:$4 sm:$0xff]   ;;  %v21639_v34 = vld [vmem:[%s25382_s11 + $0x1760] ss:$68 sps:$4 sm:$0xff]  }
 0x138   : > { %14718 = vmatprep.subr.bf16.mxu0 %v21563_v35  ;;  %15105 = vmatprep.subr.bf16.mxu1 %v21566_v36  ;;  %v21642_v35 = vld [vmem:[%s25382_s11 + $0x1768] ss:$68 sps:$4 sm:$0xff]  }
 0x139   : > { %v21647_v36 = vld [vmem:[%s25382_s11 + $0x17ec] ss:$68 sps:$4 sm:$0xff]  }
 0x13b   : > { %14719 = vmatpush1.bf16.msra.mxu0 %v21561_v37  ;;  %15106 = vmatpush1.bf16.msra.mxu1 %v21564_v39  ;;  %v21650_v37 = vld [vmem:[%s25382_s11 + $0x17f4] ss:$68 sps:$4 sm:$0xff]   ;;  %v21645_v39 = vld [vmem:[%s25382_s11 + $0x17e8] ss:$68 sps:$4 sm:$0xff]  }
 0x13c   : > { %14731 = vmatprep.subr.bf16.mxu0 %v21569_v40  ;;  %15118 = vmatprep.subr.bf16.mxu1 %v21572_v43  ;;  %v21648_v40 = vld [vmem:[%s25382_s11 + $0x17f0] ss:$68 sps:$4 sm:$0xff]  }
 0x13d   : > { %v21651_v43 = vld [vmem:[%s25382_s11 + $0x1870] ss:$68 sps:$4 sm:$0xff]  }
 0x13e   : > { %14721 = vmatmul.mubr.bf16.vlgmr.msra.gmra.mrb[0].mxu0 %v25586_v46  ;;  %15108 = vmatmul.mubr.bf16.vlgmr.msra.gmra.mrb[0].mxu1 %v25586_v46 }
 0x13f   : > { %14732 = vmatpush1.bf16.msra.mxu0 %v21567_v44  ;;  %15119 = vmatpush1.bf16.msra.mxu1 %v21570_v45  ;;  %v21654_v44 = vld [vmem:[%s25382_s11 + $0x1878] ss:$68 sps:$4 sm:$0xff]  }
 0x140   : > { %14733 = vmatprep.subr.bf16.mxu0 %v21575_v47  ;;  %15120 = vmatprep.subr.bf16.mxu1 %v21578_v48  ;;  %v21659_v45 = vld [vmem:[%s25382_s11 + $0x18fc] ss:$68 sps:$4 sm:$0xff]   ;;  %v21662_v47 = vld [vmem:[%s25382_s11 + $0x1904] ss:$68 sps:$4 sm:$0xff]  }
 0x141   : > { %14763 = vmatprep.mubr.bf16.mxu0 %v25596_v53  ;;  %15150 = vmatprep.mubr.bf16.mxu1 %v25596_v53  ;;  %v21657_v48 = vld [vmem:[%s25382_s11 + $0x18f8] ss:$68 sps:$4 sm:$0xff]  }
 0x143   : > { %14734 = vmatpush1.bf16.msra.mxu0 %v21573_v51  ;;  %15121 = vmatpush1.bf16.msra.mxu1 %v21576_v52  ;;  %v454_v51 = vld [vmem:[%s25374_s4 + $0x20] sm:$0xff]  ;;  %v471_v52 = vld [vmem:[%s25374_s4 + $0xa8] sm:$0xff] }
 0x144   : > { %14735 = vmatprep.subr.bf16.mxu0 %v21581_v54  ;;  %15122 = vmatprep.subr.bf16.mxu1 %v21584_v55  ;;  %v21668_v54 = vld [vmem:[%s25382_s11 + $0x198c] ss:$68 sps:$4 sm:$0xff]   ;;  %v21663_v55 = vld [vmem:[%s25382_s11 + $0x1980] ss:$68 sps:$4 sm:$0xff]  }
 0x147   : > { %14736 = vmatpush1.bf16.msra.mxu0 %v21579_v56  ;;  %15123 = vmatpush1.bf16.msra.mxu1 %v21582_v57  ;;  %v21666_v56 = vld [vmem:[%s25382_s11 + $0x1988] ss:$68 sps:$4 sm:$0xff]   ;;  %v25662_v57 = vpack.c.bf16 %v471_v52, %v454_v51  ;;  %v21744_v52 = vld [vmem:[%s25382_s11 + $0x2070] ss:$68 sps:$4 sm:$0xff]  }
 0x148   : > { %14737 = vmatprep.subr.bf16.mxu0 %v21587_v58  ;;  %15124 = vmatprep.subr.bf16.mxu1 %v21590_v59  ;;  %v457_v58 = vld [vmem:[%s25374_s4 + $0x38] sm:$0xff]  ;;  %v474_v59 = vld [vmem:[%s25374_s4 + $0xc0] sm:$0xff] }
 0x149   : > { %v21741_v51 = vld [vmem:[%s25382_s11 + $0x2068] ss:$68 sps:$4 sm:$0xff]  }
 0x14b   : > { %14738 = vmatpush1.bf16.msra.mxu0 %v21585_v60  ;;  %15125 = vmatpush1.bf16.msra.mxu1 %v21588_v61  ;;  %v21671_v60 = vld [vmem:[%s25382_s11 + $0x1a0c] ss:$68 sps:$4 sm:$0xff]   ;;  %v21674_v61 = vld [vmem:[%s25382_s11 + $0x1a14] ss:$68 sps:$4 sm:$0xff]  }
 0x14c   : > { %14739 = vmatprep.subr.bf16.mxu0 %v21593_v62  ;;  %15126 = vmatprep.subr.bf16.mxu1 %v21596_v63  ;;  %v25668_v62 = vpack.c.bf16 %v474_v59, %v457_v58  ;;  %v21669_v63 = vld [vmem:[%s25382_s11 + $0x1a08] ss:$68 sps:$4 sm:$0xff]   ;;  %v21750_v58 = vld [vmem:[%s25382_s11 + $0x20f8] ss:$68 sps:$4 sm:$0xff]  }
 0x14d   : > { %v21755_v59 = vld [vmem:[%s25382_s11 + $0x217c] ss:$68 sps:$4 sm:$0xff]  }
 0x14f   : > { %14740 = vmatpush1.bf16.msra.mxu0 %v21591_v0  ;;  %15127 = vmatpush1.bf16.msra.mxu1 %v21594_v2  ;;  %v21672_v0 = vld [vmem:[%s25382_s11 + $0x1a10] ss:$68 sps:$4 sm:$0xff]  }
 0x150   : > { %14741 = vmatprep.subr.bf16.mxu0 %v21599_v3  ;;  %15128 = vmatprep.subr.bf16.mxu1 %v21602_v4  ;;  %v21677_v2 = vld [vmem:[%s25382_s11 + $0x1a94] ss:$68 sps:$4 sm:$0xff]   ;;  %v21680_v3 = vld [vmem:[%s25382_s11 + $0x1a9c] ss:$68 sps:$4 sm:$0xff]  }
 0x151   : > { %v21675_v4 = vld [vmem:[%s25382_s11 + $0x1a90] ss:$68 sps:$4 sm:$0xff]  }
 0x153   : > { %14742 = vmatpush1.bf16.msra.mxu0 %v21597_v5  ;;  %15129 = vmatpush1.bf16.msra.mxu1 %v21600_v6  ;;  %v21678_v5 = vld [vmem:[%s25382_s11 + $0x1a98] ss:$68 sps:$4 sm:$0xff]  }
 0x154   : > { %14743 = vmatprep.subr.bf16.mxu0 %v21605_v7  ;;  %15130 = vmatprep.subr.bf16.mxu1 %v21608_v8  ;;  %v21683_v6 = vld [vmem:[%s25382_s11 + $0x1b1c] ss:$68 sps:$4 sm:$0xff]   ;;  %v21686_v7 = vld [vmem:[%s25382_s11 + $0x1b24] ss:$68 sps:$4 sm:$0xff]  }
 0x155   : > { %v21681_v8 = vld [vmem:[%s25382_s11 + $0x1b18] ss:$68 sps:$4 sm:$0xff]  }
 0x157   : > { %14744 = vmatpush1.bf16.msra.mxu0 %v21603_v9  ;;  %15131 = vmatpush1.bf16.msra.mxu1 %v21606_v10  ;;  %v21684_v9 = vld [vmem:[%s25382_s11 + $0x1b20] ss:$68 sps:$4 sm:$0xff]  }
 0x158   : > { %14745 = vmatprep.subr.bf16.mxu0 %v21611_v11  ;;  %15132 = vmatprep.subr.bf16.mxu1 %v21614_v12  ;;  %v21689_v10 = vld [vmem:[%s25382_s11 + $0x1ba4] ss:$68 sps:$4 sm:$0xff]   ;;  %v21692_v11 = vld [vmem:[%s25382_s11 + $0x1bac] ss:$68 sps:$4 sm:$0xff]  }
 0x159   : > { %v21687_v12 = vld [vmem:[%s25382_s11 + $0x1ba0] ss:$68 sps:$4 sm:$0xff]  }
 0x15b   : > { %14746 = vmatpush1.bf16.msra.mxu0 %v21609_v13  ;;  %15133 = vmatpush1.bf16.msra.mxu1 %v21612_v14  ;;  %v21690_v13 = vld [vmem:[%s25382_s11 + $0x1ba8] ss:$68 sps:$4 sm:$0xff]  }
 0x15c   : > { %14747 = vmatprep.subr.bf16.mxu0 %v21617_v16  ;;  %15134 = vmatprep.subr.bf16.mxu1 %v21620_v17  ;;  %v21695_v14 = vld [vmem:[%s25382_s11 + $0x1c2c] ss:$68 sps:$4 sm:$0xff]   ;;  %v21698_v16 = vld [vmem:[%s25382_s11 + $0x1c34] ss:$68 sps:$4 sm:$0xff]  }
 0x15d   : > { %v21693_v17 = vld [vmem:[%s25382_s11 + $0x1c28] ss:$68 sps:$4 sm:$0xff]  }
 0x15f   : > { %14748 = vmatpush1.bf16.msra.mxu0 %v21615_v18  ;;  %15135 = vmatpush1.bf16.msra.mxu1 %v21618_v19  ;;  %v21696_v18 = vld [vmem:[%s25382_s11 + $0x1c30] ss:$68 sps:$4 sm:$0xff]  }
 0x160   : > { %14749 = vmatprep.subr.bf16.mxu0 %v21623_v20  ;;  %15136 = vmatprep.subr.bf16.mxu1 %v21626_v21  ;;  %v21701_v19 = vld [vmem:[%s25382_s11 + $0x1cb4] ss:$68 sps:$4 sm:$0xff]   ;;  %v21704_v20 = vld [vmem:[%s25382_s11 + $0x1cbc] ss:$68 sps:$4 sm:$0xff]  }
 0x161   : > { %v21699_v21 = vld [vmem:[%s25382_s11 + $0x1cb0] ss:$68 sps:$4 sm:$0xff]  }
 0x163   : > { %14750 = vmatpush1.bf16.msra.mxu0 %v21621_v22  ;;  %15137 = vmatpush1.bf16.msra.mxu1 %v21624_v23  ;;  %v21702_v22 = vld [vmem:[%s25382_s11 + $0x1cb8] ss:$68 sps:$4 sm:$0xff]  }
 0x164   : > { %14751 = vmatprep.subr.bf16.mxu0 %v21629_v24  ;;  %15138 = vmatprep.subr.bf16.mxu1 %v21632_v25  ;;  %v21707_v23 = vld [vmem:[%s25382_s11 + $0x1d3c] ss:$68 sps:$4 sm:$0xff]   ;;  %v21710_v24 = vld [vmem:[%s25382_s11 + $0x1d44] ss:$68 sps:$4 sm:$0xff]  }
 0x165   : > { %v21705_v25 = vld [vmem:[%s25382_s11 + $0x1d38] ss:$68 sps:$4 sm:$0xff]  }
 0x167   : > { %14752 = vmatpush1.bf16.msra.mxu0 %v21627_v26  ;;  %15139 = vmatpush1.bf16.msra.mxu1 %v21630_v27  ;;  %v21708_v26 = vld [vmem:[%s25382_s11 + $0x1d40] ss:$68 sps:$4 sm:$0xff]  }
 0x168   : > { %14753 = vmatprep.subr.bf16.mxu0 %v21635_v28  ;;  %15140 = vmatprep.subr.bf16.mxu1 %v21638_v29  ;;  %v21713_v27 = vld [vmem:[%s25382_s11 + $0x1dc4] ss:$68 sps:$4 sm:$0xff]   ;;  %v21716_v28 = vld [vmem:[%s25382_s11 + $0x1dcc] ss:$68 sps:$4 sm:$0xff]  }
 0x169   : > { %v21711_v29 = vld [vmem:[%s25382_s11 + $0x1dc0] ss:$68 sps:$4 sm:$0xff]  }
 0x16b   : > { %14754 = vmatpush1.bf16.msra.mxu0 %v21633_v30  ;;  %15141 = vmatpush1.bf16.msra.mxu1 %v21636_v31  ;;  %v21714_v30 = vld [vmem:[%s25382_s11 + $0x1dc8] ss:$68 sps:$4 sm:$0xff]  }
 0x16c   : > { %14755 = vmatprep.subr.bf16.mxu0 %v21641_v32  ;;  %15142 = vmatprep.subr.bf16.mxu1 %v21644_v33  ;;  %v21719_v31 = vld [vmem:[%s25382_s11 + $0x1e4c] ss:$68 sps:$4 sm:$0xff]   ;;  %v21722_v32 = vld [vmem:[%s25382_s11 + $0x1e54] ss:$68 sps:$4 sm:$0xff]  }
 0x16d   : > { %v21717_v33 = vld [vmem:[%s25382_s11 + $0x1e48] ss:$68 sps:$4 sm:$0xff]  }
 0x16f   : > { %14756 = vmatpush1.bf16.msra.mxu0 %v21639_v34  ;;  %15143 = vmatpush1.bf16.msra.mxu1 %v21642_v35  ;;  %v21720_v34 = vld [vmem:[%s25382_s11 + $0x1e50] ss:$68 sps:$4 sm:$0xff]  }
 0x170   : > { %14757 = vmatprep.subr.bf16.mxu0 %v21647_v36  ;;  %15144 = vmatprep.subr.bf16.mxu1 %v21650_v37  ;;  %v21725_v35 = vld [vmem:[%s25382_s11 + $0x1ed4] ss:$68 sps:$4 sm:$0xff]   ;;  %v21728_v36 = vld [vmem:[%s25382_s11 + $0x1edc] ss:$68 sps:$4 sm:$0xff]  }
 0x171   : > { %v21723_v37 = vld [vmem:[%s25382_s11 + $0x1ed0] ss:$68 sps:$4 sm:$0xff]  }
 0x173   : > { %14758 = vmatpush1.bf16.msra.mxu0 %v21645_v39  ;;  %15145 = vmatpush1.bf16.msra.mxu1 %v21648_v40  ;;  %v21726_v39 = vld [vmem:[%s25382_s11 + $0x1ed8] ss:$68 sps:$4 sm:$0xff]  }
 0x174   : > { %14759 = vmatprep.subr.bf16.mxu0 %v21653_v41  ;;  %15146 = vmatprep.subr.bf16.mxu1 %v21656_v42  ;;  %v21731_v40 = vld [vmem:[%s25382_s11 + $0x1f5c] ss:$68 sps:$4 sm:$0xff]   ;;  %v21734_v41 = vld [vmem:[%s25382_s11 + $0x1f64] ss:$68 sps:$4 sm:$0xff]  }
 0x175   : > { %v21729_v42 = vld [vmem:[%s25382_s11 + $0x1f58] ss:$68 sps:$4 sm:$0xff]  }
 0x177   : > { %14760 = vmatpush1.bf16.msra.mxu0 %v21651_v43  ;;  %15147 = vmatpush1.bf16.msra.mxu1 %v21654_v44  ;;  %v21732_v43 = vld [vmem:[%s25382_s11 + $0x1f60] ss:$68 sps:$4 sm:$0xff]  }
 0x178   : > { %14761 = vmatprep.subr.bf16.mxu0 %v21659_v45  ;;  %15148 = vmatprep.subr.bf16.mxu1 %v21662_v47  ;;  %v21737_v44 = vld [vmem:[%s25382_s11 + $0x1fe4] ss:$68 sps:$4 sm:$0xff]   ;;  %v21740_v45 = vld [vmem:[%s25382_s11 + $0x1fec] ss:$68 sps:$4 sm:$0xff]  }
 0x179   : > { %v21735_v47 = vld [vmem:[%s25382_s11 + $0x1fe0] ss:$68 sps:$4 sm:$0xff]  }
 0x17b   : > { %14762 = vmatpush1.bf16.msra.mxu0 %v21657_v48  ;;  %15149 = vmatpush1.bf16.msra.mxu1 %v21660_v49  ;;  %v21738_v48 = vld [vmem:[%s25382_s11 + $0x1fe8] ss:$68 sps:$4 sm:$0xff]  }
 0x17c   : > { %14774 = vmatprep.subr.bf16.mxu0 %v21665_v50  ;;  %15161 = vmatprep.subr.bf16.mxu1 %v21668_v54  ;;  %v21743_v49 = vld [vmem:[%s25382_s11 + $0x206c] ss:$68 sps:$4 sm:$0xff]   ;;  %v21746_v50 = vld [vmem:[%s25382_s11 + $0x2074] ss:$68 sps:$4 sm:$0xff]  }
 0x17d   : > { %v21749_v54 = vld [vmem:[%s25382_s11 + $0x20f4] ss:$68 sps:$4 sm:$0xff]  }
 0x17e   : > { %14764 = vmatmul.mubr.bf16.vlgmr.msra.gmra.mrb[0].mxu0 %v25662_v57  ;;  %15151 = vmatmul.mubr.bf16.vlgmr.msra.gmra.mrb[0].mxu1 %v25662_v57 }
 0x17f   : > { %14775 = vmatpush1.bf16.msra.mxu0 %v21663_v55  ;;  %15162 = vmatpush1.bf16.msra.mxu1 %v21666_v56  ;;  %v21752_v55 = vld [vmem:[%s25382_s11 + $0x20fc] ss:$68 sps:$4 sm:$0xff]   ;;  %v21747_v56 = vld [vmem:[%s25382_s11 + $0x20f0] ss:$68 sps:$4 sm:$0xff]  }
 0x180   : > { %14776 = vmatprep.subr.bf16.mxu0 %v21671_v60  ;;  %15163 = vmatprep.subr.bf16.mxu1 %v21674_v61  ;;  %v21758_v60 = vld [vmem:[%s25382_s11 + $0x2184] ss:$68 sps:$4 sm:$0xff]   ;;  %v21753_v61 = vld [vmem:[%s25382_s11 + $0x2178] ss:$68 sps:$4 sm:$0xff]  }
 0x181   : > { %14806 = vmatprep.mubr.bf16.mxu0 %v25668_v62  ;;  %15193 = vmatprep.mubr.bf16.mxu1 %v25668_v62 }
 0x183   : > { %14777 = vmatpush1.bf16.msra.mxu0 %v21669_v63  ;;  %15164 = vmatpush1.bf16.msra.mxu1 %v21672_v0  ;;  %v21756_v63 = vld [vmem:[%s25382_s11 + $0x2180] ss:$68 sps:$4 sm:$0xff]  }
 0x184   : > { %14778 = vmatprep.subr.bf16.mxu0 %v21677_v2  ;;  %15165 = vmatprep.subr.bf16.mxu1 %v21680_v3  ;;  %v21761_v0 = vld [vmem:[%s25382_s11 + $0x2204] ss:$68 sps:$4 sm:$0xff]  }
 0x185   : > { %v456_v2 = vld [vmem:[%s25374_s4 + $0x30] sm:$0xff]  ;;  %v473_v3 = vld [vmem:[%s25374_s4 + $0xb8] sm:$0xff] }
 0x187   : > { %14779 = vmatpush1.bf16.msra.mxu0 %v21675_v4  ;;  %15166 = vmatpush1.bf16.msra.mxu1 %v21678_v5  ;;  %v21764_v4 = vld [vmem:[%s25382_s11 + $0x220c] ss:$68 sps:$4 sm:$0xff]   ;;  %v21759_v5 = vld [vmem:[%s25382_s11 + $0x2200] ss:$68 sps:$4 sm:$0xff]  }
 0x188   : > { %14780 = vmatprep.subr.bf16.mxu0 %v21683_v6  ;;  %15167 = vmatprep.subr.bf16.mxu1 %v21686_v7  ;;  %v21762_v6 = vld [vmem:[%s25382_s11 + $0x2208] ss:$68 sps:$4 sm:$0xff]   ;;  %v25738_v7 = vpack.c.bf16 %v473_v3, %v456_v2  ;;  %v21842_v3 = vld [vmem:[%s25382_s11 + $0x28f4] ss:$68 sps:$4 sm:$0xff]  }
 0x189   : > { %v21839_v2 = vld [vmem:[%s25382_s11 + $0x28ec] ss:$68 sps:$4 sm:$0xff]  }
 0x18b   : > { %14781 = vmatpush1.bf16.msra.mxu0 %v21681_v8  ;;  %15168 = vmatpush1.bf16.msra.mxu1 %v21684_v9  ;;  %v459_v8 = vld [vmem:[%s25374_s4 + $0x48] sm:$0xff]  ;;  %v476_v9 = vld [vmem:[%s25374_s4 + $0xd0] sm:$0xff] }
 0x18c   : > { %14782 = vmatprep.subr.bf16.mxu0 %v21689_v10  ;;  %15169 = vmatprep.subr.bf16.mxu1 %v21692_v11  ;;  %v21767_v10 = vld [vmem:[%s25382_s11 + $0x228c] ss:$68 sps:$4 sm:$0xff]   ;;  %v21770_v11 = vld [vmem:[%s25382_s11 + $0x2294] ss:$68 sps:$4 sm:$0xff]  }
 0x18f   : > { %14783 = vmatpush1.bf16.msra.mxu0 %v21687_v12  ;;  %15170 = vmatpush1.bf16.msra.mxu1 %v21690_v13  ;;  %v25744_v12 = vpack.c.bf16 %v476_v9, %v459_v8  ;;  %v21765_v13 = vld [vmem:[%s25382_s11 + $0x2288] ss:$68 sps:$4 sm:$0xff]   ;;  %v21848_v8 = vld [vmem:[%s25382_s11 + $0x297c] ss:$68 sps:$4 sm:$0xff]   ;;  %v21843_v9 = vld [vmem:[%s25382_s11 + $0x2970] ss:$68 sps:$4 sm:$0xff]  }
 0x190   : > { %14784 = vmatprep.subr.bf16.mxu0 %v21695_v14  ;;  %15171 = vmatprep.subr.bf16.mxu1 %v21698_v16  ;;  %v21768_v14 = vld [vmem:[%s25382_s11 + $0x2290] ss:$68 sps:$4 sm:$0xff]  }
 0x191   : > { %v21773_v16 = vld [vmem:[%s25382_s11 + $0x2314] ss:$68 sps:$4 sm:$0xff]  }
 0x193   : > { %14785 = vmatpush1.bf16.msra.mxu0 %v21693_v17  ;;  %15172 = vmatpush1.bf16.msra.mxu1 %v21696_v18  ;;  %v21776_v17 = vld [vmem:[%s25382_s11 + $0x231c] ss:$68 sps:$4 sm:$0xff]   ;;  %v21771_v18 = vld [vmem:[%s25382_s11 + $0x2310] ss:$68 sps:$4 sm:$0xff]  }
 0x194   : > { %14786 = vmatprep.subr.bf16.mxu0 %v21701_v19  ;;  %15173 = vmatprep.subr.bf16.mxu1 %v21704_v20  ;;  %v21774_v19 = vld [vmem:[%s25382_s11 + $0x2318] ss:$68 sps:$4 sm:$0xff]  }
 0x195   : > { %v21779_v20 = vld [vmem:[%s25382_s11 + $0x239c] ss:$68 sps:$4 sm:$0xff]  }
 0x197   : > { %14787 = vmatpush1.bf16.msra.mxu0 %v21699_v21  ;;  %15174 = vmatpush1.bf16.msra.mxu1 %v21702_v22  ;;  %v21782_v21 = vld [vmem:[%s25382_s11 + $0x23a4] ss:$68 sps:$4 sm:$0xff]   ;;  %v21777_v22 = vld [vmem:[%s25382_s11 + $0x2398] ss:$68 sps:$4 sm:$0xff]  }
 0x198   : > { %14788 = vmatprep.subr.bf16.mxu0 %v21707_v23  ;;  %15175 = vmatprep.subr.bf16.mxu1 %v21710_v24  ;;  %v21780_v23 = vld [vmem:[%s25382_s11 + $0x23a0] ss:$68 sps:$4 sm:$0xff]  }
 0x199   : > { %v21785_v24 = vld [vmem:[%s25382_s11 + $0x2424] ss:$68 sps:$4 sm:$0xff]  }
 0x19b   : > { %14789 = vmatpush1.bf16.msra.mxu0 %v21705_v25  ;;  %15176 = vmatpush1.bf16.msra.mxu1 %v21708_v26  ;;  %v21788_v25 = vld [vmem:[%s25382_s11 + $0x242c] ss:$68 sps:$4 sm:$0xff]   ;;  %v21783_v26 = vld [vmem:[%s25382_s11 + $0x2420] ss:$68 sps:$4 sm:$0xff]  }
 0x19c   : > { %14790 = vmatprep.subr.bf16.mxu0 %v21713_v27  ;;  %15177 = vmatprep.subr.bf16.mxu1 %v21716_v28  ;;  %v21786_v27 = vld [vmem:[%s25382_s11 + $0x2428] ss:$68 sps:$4 sm:$0xff]  }
 0x19d   : > { %v21791_v28 = vld [vmem:[%s25382_s11 + $0x24ac] ss:$68 sps:$4 sm:$0xff]  }
 0x19f   : > { %14791 = vmatpush1.bf16.msra.mxu0 %v21711_v29  ;;  %15178 = vmatpush1.bf16.msra.mxu1 %v21714_v30  ;;  %v21794_v29 = vld [vmem:[%s25382_s11 + $0x24b4] ss:$68 sps:$4 sm:$0xff]   ;;  %v21789_v30 = vld [vmem:[%s25382_s11 + $0x24a8] ss:$68 sps:$4 sm:$0xff]  }
 0x1a0   : > { %14792 = vmatprep.subr.bf16.mxu0 %v21719_v31  ;;  %15179 = vmatprep.subr.bf16.mxu1 %v21722_v32  ;;  %v21792_v31 = vld [vmem:[%s25382_s11 + $0x24b0] ss:$68 sps:$4 sm:$0xff]  }
 0x1a1   : > { %v21797_v32 = vld [vmem:[%s25382_s11 + $0x2534] ss:$68 sps:$4 sm:$0xff]  }
 0x1a3   : > { %14793 = vmatpush1.bf16.msra.mxu0 %v21717_v33  ;;  %15180 = vmatpush1.bf16.msra.mxu1 %v21720_v34  ;;  %v21800_v33 = vld [vmem:[%s25382_s11 + $0x253c] ss:$68 sps:$4 sm:$0xff]   ;;  %v21795_v34 = vld [vmem:[%s25382_s11 + $0x2530] ss:$68 sps:$4 sm:$0xff]  }
 0x1a4   : > { %14794 = vmatprep.subr.bf16.mxu0 %v21725_v35  ;;  %15181 = vmatprep.subr.bf16.mxu1 %v21728_v36  ;;  %v21798_v35 = vld [vmem:[%s25382_s11 + $0x2538] ss:$68 sps:$4 sm:$0xff]  }
 0x1a5   : > { %v21803_v36 = vld [vmem:[%s25382_s11 + $0x25bc] ss:$68 sps:$4 sm:$0xff]  }
 0x1a7   : > { %14795 = vmatpush1.bf16.msra.mxu0 %v21723_v37  ;;  %15182 = vmatpush1.bf16.msra.mxu1 %v21726_v39  ;;  %v21806_v37 = vld [vmem:[%s25382_s11 + $0x25c4] ss:$68 sps:$4 sm:$0xff]   ;;  %v21801_v39 = vld [vmem:[%s25382_s11 + $0x25b8] ss:$68 sps:$4 sm:$0xff]  }
 0x1a8   : > { %14796 = vmatprep.subr.bf16.mxu0 %v21731_v40  ;;  %15183 = vmatprep.subr.bf16.mxu1 %v21734_v41  ;;  %v21804_v40 = vld [vmem:[%s25382_s11 + $0x25c0] ss:$68 sps:$4 sm:$0xff]  }
 0x1a9   : > { %v21809_v41 = vld [vmem:[%s25382_s11 + $0x2644] ss:$68 sps:$4 sm:$0xff]  }
 0x1ab   : > { %14797 = vmatpush1.bf16.msra.mxu0 %v21729_v42  ;;  %15184 = vmatpush1.bf16.msra.mxu1 %v21732_v43  ;;  %v21812_v42 = vld [vmem:[%s25382_s11 + $0x264c] ss:$68 sps:$4 sm:$0xff]   ;;  %v21807_v43 = vld [vmem:[%s25382_s11 + $0x2640] ss:$68 sps:$4 sm:$0xff]  }
 0x1ac   : > { %14798 = vmatprep.subr.bf16.mxu0 %v21737_v44  ;;  %15185 = vmatprep.subr.bf16.mxu1 %v21740_v45  ;;  %v21810_v44 = vld [vmem:[%s25382_s11 + $0x2648] ss:$68 sps:$4 sm:$0xff]  }
 0x1ad   : > { %v21815_v45 = vld [vmem:[%s25382_s11 + $0x26cc] ss:$68 sps:$4 sm:$0xff]  }
 0x1af   : > { %14799 = vmatpush1.bf16.msra.mxu0 %v21735_v47  ;;  %15186 = vmatpush1.bf16.msra.mxu1 %v21738_v48  ;;  %v21818_v47 = vld [vmem:[%s25382_s11 + $0x26d4] ss:$68 sps:$4 sm:$0xff]   ;;  %v21813_v48 = vld [vmem:[%s25382_s11 + $0x26c8] ss:$68 sps:$4 sm:$0xff]  }
 0x1b0   : > { %14800 = vmatprep.subr.bf16.mxu0 %v21743_v49  ;;  %15187 = vmatprep.subr.bf16.mxu1 %v21746_v50  ;;  %v21816_v49 = vld [vmem:[%s25382_s11 + $0x26d0] ss:$68 sps:$4 sm:$0xff]  }
 0x1b1   : > { %v21821_v50 = vld [vmem:[%s25382_s11 + $0x2754] ss:$68 sps:$4 sm:$0xff]  }
 0x1b3   : > { %14801 = vmatpush1.bf16.msra.mxu0 %v21741_v51  ;;  %15188 = vmatpush1.bf16.msra.mxu1 %v21744_v52  ;;  %v21824_v51 = vld [vmem:[%s25382_s11 + $0x275c] ss:$68 sps:$4 sm:$0xff]   ;;  %v21819_v52 = vld [vmem:[%s25382_s11 + $0x2750] ss:$68 sps:$4 sm:$0xff]  }
 0x1b4   : > { %14802 = vmatprep.subr.bf16.mxu0 %v21749_v54  ;;  %15189 = vmatprep.subr.bf16.mxu1 %v21752_v55  ;;  %v21822_v54 = vld [vmem:[%s25382_s11 + $0x2758] ss:$68 sps:$4 sm:$0xff]  }
 0x1b5   : > { %v21827_v55 = vld [vmem:[%s25382_s11 + $0x27dc] ss:$68 sps:$4 sm:$0xff]  }
 0x1b7   : > { %14803 = vmatpush1.bf16.msra.mxu0 %v21747_v56  ;;  %15190 = vmatpush1.bf16.msra.mxu1 %v21750_v58  ;;  %v21830_v56 = vld [vmem:[%s25382_s11 + $0x27e4] ss:$68 sps:$4 sm:$0xff]   ;;  %v21825_v58 = vld [vmem:[%s25382_s11 + $0x27d8] ss:$68 sps:$4 sm:$0xff]  }
 0x1b8   : > { %14804 = vmatprep.subr.bf16.mxu0 %v21755_v59  ;;  %15191 = vmatprep.subr.bf16.mxu1 %v21758_v60  ;;  %v21828_v59 = vld [vmem:[%s25382_s11 + $0x27e0] ss:$68 sps:$4 sm:$0xff]  }
 0x1b9   : > { %v21833_v60 = vld [vmem:[%s25382_s11 + $0x2864] ss:$68 sps:$4 sm:$0xff]  }
 0x1bb   : > { %14805 = vmatpush1.bf16.msra.mxu0 %v21753_v61  ;;  %15192 = vmatpush1.bf16.msra.mxu1 %v21756_v63  ;;  %v21836_v61 = vld [vmem:[%s25382_s11 + $0x286c] ss:$68 sps:$4 sm:$0xff]   ;;  %v21831_v63 = vld [vmem:[%s25382_s11 + $0x2860] ss:$68 sps:$4 sm:$0xff]  }
 0x1bc   : > { %14817 = vmatprep.subr.bf16.mxu0 %v21761_v0  ;;  %15204 = vmatprep.subr.bf16.mxu1 %v21764_v4  ;;  %v21834_v0 = vld [vmem:[%s25382_s11 + $0x2868] ss:$68 sps:$4 sm:$0xff]  }
 0x1bd   : > { %v21837_v4 = vld [vmem:[%s25382_s11 + $0x28e8] ss:$68 sps:$4 sm:$0xff]  }
 0x1be   : > { %14807 = vmatmul.mubr.bf16.vlgmr.msra.gmra.mrb[0].mxu0 %v25738_v7  ;;  %15194 = vmatmul.mubr.bf16.vlgmr.msra.gmra.mrb[0].mxu1 %v25738_v7 }
 0x1bf   : > { %14818 = vmatpush1.bf16.msra.mxu0 %v21759_v5  ;;  %15205 = vmatpush1.bf16.msra.mxu1 %v21762_v6  ;;  %v21840_v5 = vld [vmem:[%s25382_s11 + $0x28f0] ss:$68 sps:$4 sm:$0xff]  }
 0x1c0   : > { %14819 = vmatprep.subr.bf16.mxu0 %v21767_v10  ;;  %15206 = vmatprep.subr.bf16.mxu1 %v21770_v11  ;;  %v21845_v6 = vld [vmem:[%s25382_s11 + $0x2974] ss:$68 sps:$4 sm:$0xff]   ;;  %v21851_v11 = vld [vmem:[%s25382_s11 + $0x29fc] ss:$68 sps:$4 sm:$0xff]  }
 0x1c1   : > { %14849 = vmatprep.mubr.bf16.mxu0 %v25744_v12  ;;  %15236 = vmatprep.mubr.bf16.mxu1 %v25744_v12  ;;  %v21846_v10 = vld [vmem:[%s25382_s11 + $0x2978] ss:$68 sps:$4 sm:$0xff]  }
 0x1c3   : > { %14820 = vmatpush1.bf16.msra.mxu0 %v21765_v13  ;;  %15207 = vmatpush1.bf16.msra.mxu1 %v21768_v14  ;;  %v21854_v13 = vld [vmem:[%s25382_s11 + $0x2a04] ss:$68 sps:$4 sm:$0xff]   ;;  %v21849_v14 = vld [vmem:[%s25382_s11 + $0x29f8] ss:$68 sps:$4 sm:$0xff]  }
 0x1c4   : > { %14821 = vmatprep.subr.bf16.mxu0 %v21773_v16  ;;  %15208 = vmatprep.subr.bf16.mxu1 %v21776_v17  ;;  %v21852_v16 = vld [vmem:[%s25382_s11 + $0x2a00] ss:$68 sps:$4 sm:$0xff]  }
 0x1c5   : > { %v21857_v17 = vld [vmem:[%s25382_s11 + $0x2a84] ss:$68 sps:$4 sm:$0xff]  }
 0x1c7   : > { %14822 = vmatpush1.bf16.msra.mxu0 %v21771_v18  ;;  %15209 = vmatpush1.bf16.msra.mxu1 %v21774_v19  ;;  %v21860_v18 = vld [vmem:[%s25382_s11 + $0x2a8c] ss:$68 sps:$4 sm:$0xff]  }
 0x1c8   : > { %14823 = vmatprep.subr.bf16.mxu0 %v21779_v20  ;;  %15210 = vmatprep.subr.bf16.mxu1 %v21782_v21  ;;  %v458_v19 = vld [vmem:[%s25374_s4 + $0x40] sm:$0xff]  ;;  %v475_v20 = vld [vmem:[%s25374_s4 + $0xc8] sm:$0xff]  ;;  %v461_v21 = vld [vmem:[%s25374_s4 + $0x58] sm:$0xff] }
 0x1cb   : > { %14824 = vmatpush1.bf16.msra.mxu0 %v21777_v22  ;;  %15211 = vmatpush1.bf16.msra.mxu1 %v21780_v23  ;;  %v478_v22 = vld [vmem:[%s25374_s4 + $0xe0] sm:$0xff]  ;;  %v25814_v23 = vpack.c.bf16 %v475_v20, %v458_v19  ;;  %v21930_v19 = vld [vmem:[%s25382_s11 + $0x30e8] ss:$68 sps:$4 sm:$0xff]  }
 0x1cc   : > { %14825 = vmatprep.subr.bf16.mxu0 %v21785_v24  ;;  %15212 = vmatprep.subr.bf16.mxu1 %v21788_v25  ;;  %v21855_v24 = vld [vmem:[%s25382_s11 + $0x2a80] ss:$68 sps:$4 sm:$0xff]   ;;  %v21858_v25 = vld [vmem:[%s25382_s11 + $0x2a88] ss:$68 sps:$4 sm:$0xff]  }
 0x1cd   : > { %v21935_v20 = vld [vmem:[%s25382_s11 + $0x316c] ss:$68 sps:$4 sm:$0xff]  }
 0x1cf   : > { %14826 = vmatpush1.bf16.msra.mxu0 %v21783_v26  ;;  %15213 = vmatpush1.bf16.msra.mxu1 %v21786_v27  ;;  %v21863_v26 = vld [vmem:[%s25382_s11 + $0x2b0c] ss:$68 sps:$4 sm:$0xff]   ;;  %v21866_v27 = vld [vmem:[%s25382_s11 + $0x2b14] ss:$68 sps:$4 sm:$0xff]  }
 0x1d0   : > { %14827 = vmatprep.subr.bf16.mxu0 %v21791_v28  ;;  %15214 = vmatprep.subr.bf16.mxu1 %v21794_v29  ;;  %v25820_v28 = vpack.c.bf16 %v478_v22, %v461_v21  ;;  %v21861_v29 = vld [vmem:[%s25382_s11 + $0x2b08] ss:$68 sps:$4 sm:$0xff]   ;;  %v21938_v21 = vld [vmem:[%s25382_s11 + $0x3174] ss:$68 sps:$4 sm:$0xff]  }
 0x1d1   : > { %v21933_v22 = vld [vmem:[%s25382_s11 + $0x3168] ss:$68 sps:$4 sm:$0xff]  }
 0x1d3   : > { %14828 = vmatpush1.bf16.msra.mxu0 %v21789_v30  ;;  %15215 = vmatpush1.bf16.msra.mxu1 %v21792_v31  ;;  %v21864_v30 = vld [vmem:[%s25382_s11 + $0x2b10] ss:$68 sps:$4 sm:$0xff]  }
 0x1d4   : > { %14829 = vmatprep.subr.bf16.mxu0 %v21797_v32  ;;  %15216 = vmatprep.subr.bf16.mxu1 %v21800_v33  ;;  %v21869_v31 = vld [vmem:[%s25382_s11 + $0x2b94] ss:$68 sps:$4 sm:$0xff]   ;;  %v21872_v32 = vld [vmem:[%s25382_s11 + $0x2b9c] ss:$68 sps:$4 sm:$0xff]  }
 0x1d5   : > { %v21867_v33 = vld [vmem:[%s25382_s11 + $0x2b90] ss:$68 sps:$4 sm:$0xff]  }
 0x1d7   : > { %14830 = vmatpush1.bf16.msra.mxu0 %v21795_v34  ;;  %15217 = vmatpush1.bf16.msra.mxu1 %v21798_v35  ;;  %v21870_v34 = vld [vmem:[%s25382_s11 + $0x2b98] ss:$68 sps:$4 sm:$0xff]  }
 0x1d8   : > { %14831 = vmatprep.subr.bf16.mxu0 %v21803_v36  ;;  %15218 = vmatprep.subr.bf16.mxu1 %v21806_v37  ;;  %v21875_v35 = vld [vmem:[%s25382_s11 + $0x2c1c] ss:$68 sps:$4 sm:$0xff]   ;;  %v21878_v36 = vld [vmem:[%s25382_s11 + $0x2c24] ss:$68 sps:$4 sm:$0xff]  }
 0x1d9   : > { %v21873_v37 = vld [vmem:[%s25382_s11 + $0x2c18] ss:$68 sps:$4 sm:$0xff]  }
 0x1db   : > { %14832 = vmatpush1.bf16.msra.mxu0 %v21801_v39  ;;  %15219 = vmatpush1.bf16.msra.mxu1 %v21804_v40  ;;  %v21876_v39 = vld [vmem:[%s25382_s11 + $0x2c20] ss:$68 sps:$4 sm:$0xff]  }
 0x1dc   : > { %14833 = vmatprep.subr.bf16.mxu0 %v21809_v41  ;;  %15220 = vmatprep.subr.bf16.mxu1 %v21812_v42  ;;  %v21881_v40 = vld [vmem:[%s25382_s11 + $0x2ca4] ss:$68 sps:$4 sm:$0xff]   ;;  %v21884_v41 = vld [vmem:[%s25382_s11 + $0x2cac] ss:$68 sps:$4 sm:$0xff]  }
 0x1dd   : > { %v21879_v42 = vld [vmem:[%s25382_s11 + $0x2ca0] ss:$68 sps:$4 sm:$0xff]  }
 0x1df   : > { %14834 = vmatpush1.bf16.msra.mxu0 %v21807_v43  ;;  %15221 = vmatpush1.bf16.msra.mxu1 %v21810_v44  ;;  %v21882_v43 = vld [vmem:[%s25382_s11 + $0x2ca8] ss:$68 sps:$4 sm:$0xff]  }
 0x1e0   : > { %14835 = vmatprep.subr.bf16.mxu0 %v21815_v45  ;;  %15222 = vmatprep.subr.bf16.mxu1 %v21818_v47  ;;  %v21887_v44 = vld [vmem:[%s25382_s11 + $0x2d2c] ss:$68 sps:$4 sm:$0xff]   ;;  %v21890_v45 = vld [vmem:[%s25382_s11 + $0x2d34] ss:$68 sps:$4 sm:$0xff]  }
 0x1e1   : > { %v21885_v47 = vld [vmem:[%s25382_s11 + $0x2d28] ss:$68 sps:$4 sm:$0xff]  }
 0x1e3   : > { %14836 = vmatpush1.bf16.msra.mxu0 %v21813_v48  ;;  %15223 = vmatpush1.bf16.msra.mxu1 %v21816_v49  ;;  %v21888_v48 = vld [vmem:[%s25382_s11 + $0x2d30] ss:$68 sps:$4 sm:$0xff]  }
 0x1e4   : > { %14837 = vmatprep.subr.bf16.mxu0 %v21821_v50  ;;  %15224 = vmatprep.subr.bf16.mxu1 %v21824_v51  ;;  %v21893_v49 = vld [vmem:[%s25382_s11 + $0x2db4] ss:$68 sps:$4 sm:$0xff]   ;;  %v21896_v50 = vld [vmem:[%s25382_s11 + $0x2dbc] ss:$68 sps:$4 sm:$0xff]  }
 0x1e5   : > { %v21891_v51 = vld [vmem:[%s25382_s11 + $0x2db0] ss:$68 sps:$4 sm:$0xff]  }
 0x1e7   : > { %14838 = vmatpush1.bf16.msra.mxu0 %v21819_v52  ;;  %15225 = vmatpush1.bf16.msra.mxu1 %v21822_v54  ;;  %v21894_v52 = vld [vmem:[%s25382_s11 + $0x2db8] ss:$68 sps:$4 sm:$0xff]  }
 0x1e8   : > { %14839 = vmatprep.subr.bf16.mxu0 %v21827_v55  ;;  %15226 = vmatprep.subr.bf16.mxu1 %v21830_v56  ;;  %v21899_v54 = vld [vmem:[%s25382_s11 + $0x2e3c] ss:$68 sps:$4 sm:$0xff]   ;;  %v21902_v55 = vld [vmem:[%s25382_s11 + $0x2e44] ss:$68 sps:$4 sm:$0xff]  }
 0x1e9   : > { %v21897_v56 = vld [vmem:[%s25382_s11 + $0x2e38] ss:$68 sps:$4 sm:$0xff]  }
 0x1eb   : > { %14840 = vmatpush1.bf16.msra.mxu0 %v21825_v58  ;;  %15227 = vmatpush1.bf16.msra.mxu1 %v21828_v59  ;;  %v21900_v58 = vld [vmem:[%s25382_s11 + $0x2e40] ss:$68 sps:$4 sm:$0xff]  }
 0x1ec   : > { %14841 = vmatprep.subr.bf16.mxu0 %v21833_v60  ;;  %15228 = vmatprep.subr.bf16.mxu1 %v21836_v61  ;;  %v21905_v59 = vld [vmem:[%s25382_s11 + $0x2ec4] ss:$68 sps:$4 sm:$0xff]   ;;  %v21908_v60 = vld [vmem:[%s25382_s11 + $0x2ecc] ss:$68 sps:$4 sm:$0xff]  }
 0x1ed   : > { %v21903_v61 = vld [vmem:[%s25382_s11 + $0x2ec0] ss:$68 sps:$4 sm:$0xff]  }
 0x1ef   : > { %14842 = vmatpush1.bf16.msra.mxu0 %v21831_v63  ;;  %15229 = vmatpush1.bf16.msra.mxu1 %v21834_v0  ;;  %v21906_v63 = vld [vmem:[%s25382_s11 + $0x2ec8] ss:$68 sps:$4 sm:$0xff]  }
 0x1f0   : > { %14843 = vmatprep.subr.bf16.mxu0 %v21839_v2  ;;  %15230 = vmatprep.subr.bf16.mxu1 %v21842_v3  ;;  %v21911_v0 = vld [vmem:[%s25382_s11 + $0x2f4c] ss:$68 sps:$4 sm:$0xff]   ;;  %v21914_v2 = vld [vmem:[%s25382_s11 + $0x2f54] ss:$68 sps:$4 sm:$0xff]  }
 0x1f1   : > { %v21909_v3 = vld [vmem:[%s25382_s11 + $0x2f48] ss:$68 sps:$4 sm:$0xff]  }
 0x1f3   : > { %14844 = vmatpush1.bf16.msra.mxu0 %v21837_v4  ;;  %15231 = vmatpush1.bf16.msra.mxu1 %v21840_v5  ;;  %v21912_v4 = vld [vmem:[%s25382_s11 + $0x2f50] ss:$68 sps:$4 sm:$0xff]  }
 0x1f4   : > { %14845 = vmatprep.subr.bf16.mxu0 %v21845_v6  ;;  %15232 = vmatprep.subr.bf16.mxu1 %v21848_v8  ;;  %v21917_v5 = vld [vmem:[%s25382_s11 + $0x2fd4] ss:$68 sps:$4 sm:$0xff]   ;;  %v21920_v6 = vld [vmem:[%s25382_s11 + $0x2fdc] ss:$68 sps:$4 sm:$0xff]  }
 0x1f5   : > { %v21915_v8 = vld [vmem:[%s25382_s11 + $0x2fd0] ss:$68 sps:$4 sm:$0xff]  }
 0x1f7   : > { %14846 = vmatpush1.bf16.msra.mxu0 %v21843_v9  ;;  %15233 = vmatpush1.bf16.msra.mxu1 %v21846_v10  ;;  %v21918_v9 = vld [vmem:[%s25382_s11 + $0x2fd8] ss:$68 sps:$4 sm:$0xff]  }
 0x1f8   : > { %14847 = vmatprep.subr.bf16.mxu0 %v21851_v11  ;;  %15234 = vmatprep.subr.bf16.mxu1 %v21854_v13  ;;  %v21923_v10 = vld [vmem:[%s25382_s11 + $0x305c] ss:$68 sps:$4 sm:$0xff]   ;;  %v21926_v11 = vld [vmem:[%s25382_s11 + $0x3064] ss:$68 sps:$4 sm:$0xff]  }
 0x1f9   : > { %v21921_v13 = vld [vmem:[%s25382_s11 + $0x3058] ss:$68 sps:$4 sm:$0xff]  }
 0x1fb   : > { %14848 = vmatpush1.bf16.msra.mxu0 %v21849_v14  ;;  %15235 = vmatpush1.bf16.msra.mxu1 %v21852_v16  ;;  %v21924_v14 = vld [vmem:[%s25382_s11 + $0x3060] ss:$68 sps:$4 sm:$0xff]  }
 0x1fc   : > { %14860 = vmatprep.subr.bf16.mxu0 %v21857_v17  ;;  %15247 = vmatprep.subr.bf16.mxu1 %v21860_v18  ;;  %v21929_v16 = vld [vmem:[%s25382_s11 + $0x30e4] ss:$68 sps:$4 sm:$0xff]   ;;  %v21932_v17 = vld [vmem:[%s25382_s11 + $0x30ec] ss:$68 sps:$4 sm:$0xff]  }
 0x1fd   : > { %v21927_v18 = vld [vmem:[%s25382_s11 + $0x30e0] ss:$68 sps:$4 sm:$0xff]  }
 0x1fe   : > { %14850 = vmatmul.mubr.bf16.vlgmr.msra.gmra.mrb[0].mxu0 %v25814_v23  ;;  %15237 = vmatmul.mubr.bf16.vlgmr.msra.gmra.mrb[0].mxu1 %v25814_v23 }
 0x1ff   : > { %14861 = vmatpush1.bf16.msra.mxu0 %v21855_v24  ;;  %15248 = vmatpush1.bf16.msra.mxu1 %v21858_v25  ;;  %v21936_v24 = vld [vmem:[%s25382_s11 + $0x3170] ss:$68 sps:$4 sm:$0xff]  }
 0x200   : > { %14862 = vmatprep.subr.bf16.mxu0 %v21863_v26  ;;  %15249 = vmatprep.subr.bf16.mxu1 %v21866_v27  ;;  %v21941_v25 = vld [vmem:[%s25382_s11 + $0x31f4] ss:$68 sps:$4 sm:$0xff]   ;;  %v21944_v26 = vld [vmem:[%s25382_s11 + $0x31fc] ss:$68 sps:$4 sm:$0xff]  }
 0x201   : > { %14892 = vmatprep.mubr.bf16.mxu0 %v25820_v28  ;;  %15279 = vmatprep.mubr.bf16.mxu1 %v25820_v28  ;;  %v21939_v27 = vld [vmem:[%s25382_s11 + $0x31f0] ss:$68 sps:$4 sm:$0xff]  }
 0x203   : > { %14863 = vmatpush1.bf16.msra.mxu0 %v21861_v29  ;;  %15250 = vmatpush1.bf16.msra.mxu1 %v21864_v30  ;;  %v21942_v29 = vld [vmem:[%s25382_s11 + $0x31f8] ss:$68 sps:$4 sm:$0xff]  }
 0x204   : > { %14864 = vmatprep.subr.bf16.mxu0 %v21869_v31  ;;  %15251 = vmatprep.subr.bf16.mxu1 %v21872_v32  ;;  %v21947_v30 = vld [vmem:[%s25382_s11 + $0x327c] ss:$68 sps:$4 sm:$0xff]   ;;  %v21950_v31 = vld [vmem:[%s25382_s11 + $0x3284] ss:$68 sps:$4 sm:$0xff]  }
 0x205   : > { %v21945_v32 = vld [vmem:[%s25382_s11 + $0x3278] ss:$68 sps:$4 sm:$0xff]  }
 0x207   : > { %14865 = vmatpush1.bf16.msra.mxu0 %v21867_v33  ;;  %15252 = vmatpush1.bf16.msra.mxu1 %v21870_v34  ;;  %v21948_v33 = vld [vmem:[%s25382_s11 + $0x3280] ss:$68 sps:$4 sm:$0xff]  }
 0x208   : > { %14866 = vmatprep.subr.bf16.mxu0 %v21875_v35  ;;  %15253 = vmatprep.subr.bf16.mxu1 %v21878_v36  ;;  %v21953_v34 = vld [vmem:[%s25382_s11 + $0x3304] ss:$68 sps:$4 sm:$0xff]   ;;  %v21956_v35 = vld [vmem:[%s25382_s11 + $0x330c] ss:$68 sps:$4 sm:$0xff]  }
 0x209   : > { %v460_v36 = vld [vmem:[%s25374_s4 + $0x50] sm:$0xff] }
 0x20b   : > { %14867 = vmatpush1.bf16.msra.mxu0 %v21873_v37  ;;  %15254 = vmatpush1.bf16.msra.mxu1 %v21876_v39  ;;  %v477_v37 = vld [vmem:[%s25374_s4 + $0xd8] sm:$0xff]  ;;  %v463_v39 = vld [vmem:[%s25374_s4 + $0x68] sm:$0xff] }
 0x20c   : > { %14868 = vmatprep.subr.bf16.mxu0 %v21881_v40  ;;  %15255 = vmatprep.subr.bf16.mxu1 %v21884_v41  ;;  %v480_v40 = vld [vmem:[%s25374_s4 + $0xf0] sm:$0xff]  ;;  %v25890_v41 = vpack.c.bf16 %v477_v37, %v460_v36 }
 0x20d   : > { %v22028_v36 = vld [vmem:[%s25382_s11 + $0x396c] ss:$68 sps:$4 sm:$0xff]   ;;  %v22023_v37 = vld [vmem:[%s25382_s11 + $0x3960] ss:$68 sps:$4 sm:$0xff]  }
 0x20f   : > { %14869 = vmatpush1.bf16.msra.mxu0 %v21879_v42  ;;  %15256 = vmatpush1.bf16.msra.mxu1 %v21882_v43  ;;  %v21951_v42 = vld [vmem:[%s25382_s11 + $0x3300] ss:$68 sps:$4 sm:$0xff]   ;;  %v21954_v43 = vld [vmem:[%s25382_s11 + $0x3308] ss:$68 sps:$4 sm:$0xff]  }
 0x210   : > { %14870 = vmatprep.subr.bf16.mxu0 %v21887_v44  ;;  %15257 = vmatprep.subr.bf16.mxu1 %v21890_v45  ;;  %v21959_v44 = vld [vmem:[%s25382_s11 + $0x338c] ss:$68 sps:$4 sm:$0xff]   ;;  %v21962_v45 = vld [vmem:[%s25382_s11 + $0x3394] ss:$68 sps:$4 sm:$0xff]  }
 0x213   : > { %14871 = vmatpush1.bf16.msra.mxu0 %v21885_v47  ;;  %15258 = vmatpush1.bf16.msra.mxu1 %v21888_v48  ;;  %v25896_v47 = vpack.c.bf16 %v480_v40, %v463_v39  ;;  %v21957_v48 = vld [vmem:[%s25382_s11 + $0x3388] ss:$68 sps:$4 sm:$0xff]  }
 0x214   : > { %14872 = vmatprep.subr.bf16.mxu0 %v21893_v49  ;;  %15259 = vmatprep.subr.bf16.mxu1 %v21896_v50  ;;  %v21960_v49 = vld [vmem:[%s25382_s11 + $0x3390] ss:$68 sps:$4 sm:$0xff]   ;;  %v22026_v39 = vld [vmem:[%s25382_s11 + $0x3968] ss:$68 sps:$4 sm:$0xff]  }
 0x215   : > { %v21965_v50 = vld [vmem:[%s25382_s11 + $0x3414] ss:$68 sps:$4 sm:$0xff]   ;;  %v22031_v40 = vld [vmem:[%s25382_s11 + $0x39ec] ss:$68 sps:$4 sm:$0xff]  }
 0x217   : > { %14873 = vmatpush1.bf16.msra.mxu0 %v21891_v51  ;;  %15260 = vmatpush1.bf16.msra.mxu1 %v21894_v52  ;;  %v21968_v51 = vld [vmem:[%s25382_s11 + $0x341c] ss:$68 sps:$4 sm:$0xff]   ;;  %v21963_v52 = vld [vmem:[%s25382_s11 + $0x3410] ss:$68 sps:$4 sm:$0xff]  }
 0x218   : > { %14874 = vmatprep.subr.bf16.mxu0 %v21899_v54  ;;  %15261 = vmatprep.subr.bf16.mxu1 %v21902_v55  ;;  %v21966_v54 = vld [vmem:[%s25382_s11 + $0x3418] ss:$68 sps:$4 sm:$0xff]  }
 0x219   : > { %v21971_v55 = vld [vmem:[%s25382_s11 + $0x349c] ss:$68 sps:$4 sm:$0xff]  }
 0x21b   : > { %14875 = vmatpush1.bf16.msra.mxu0 %v21897_v56  ;;  %15262 = vmatpush1.bf16.msra.mxu1 %v21900_v58  ;;  %v21974_v56 = vld [vmem:[%s25382_s11 + $0x34a4] ss:$68 sps:$4 sm:$0xff]   ;;  %v21969_v58 = vld [vmem:[%s25382_s11 + $0x3498] ss:$68 sps:$4 sm:$0xff]  }
 0x21c   : > { %14876 = vmatprep.subr.bf16.mxu0 %v21905_v59  ;;  %15263 = vmatprep.subr.bf16.mxu1 %v21908_v60  ;;  %v21972_v59 = vld [vmem:[%s25382_s11 + $0x34a0] ss:$68 sps:$4 sm:$0xff]  }
 0x21d   : > { %v21977_v60 = vld [vmem:[%s25382_s11 + $0x3524] ss:$68 sps:$4 sm:$0xff]  }
 0x21f   : > { %14877 = vmatpush1.bf16.msra.mxu0 %v21903_v61  ;;  %15264 = vmatpush1.bf16.msra.mxu1 %v21906_v63  ;;  %v21980_v61 = vld [vmem:[%s25382_s11 + $0x352c] ss:$68 sps:$4 sm:$0xff]   ;;  %v21975_v63 = vld [vmem:[%s25382_s11 + $0x3520] ss:$68 sps:$4 sm:$0xff]  }
 0x220   : > { %14878 = vmatprep.subr.bf16.mxu0 %v21911_v0  ;;  %15265 = vmatprep.subr.bf16.mxu1 %v21914_v2  ;;  %v21978_v0 = vld [vmem:[%s25382_s11 + $0x3528] ss:$68 sps:$4 sm:$0xff]  }
 0x221   : > { %v21983_v2 = vld [vmem:[%s25382_s11 + $0x35ac] ss:$68 sps:$4 sm:$0xff]  }
 0x223   : > { %14879 = vmatpush1.bf16.msra.mxu0 %v21909_v3  ;;  %15266 = vmatpush1.bf16.msra.mxu1 %v21912_v4  ;;  %v21986_v3 = vld [vmem:[%s25382_s11 + $0x35b4] ss:$68 sps:$4 sm:$0xff]   ;;  %v21981_v4 = vld [vmem:[%s25382_s11 + $0x35a8] ss:$68 sps:$4 sm:$0xff]  }
 0x224   : > { %14880 = vmatprep.subr.bf16.mxu0 %v21917_v5  ;;  %15267 = vmatprep.subr.bf16.mxu1 %v21920_v6  ;;  %v21984_v5 = vld [vmem:[%s25382_s11 + $0x35b0] ss:$68 sps:$4 sm:$0xff]  }
 0x225   : > { %v21989_v6 = vld [vmem:[%s25382_s11 + $0x3634] ss:$68 sps:$4 sm:$0xff]  }
 0x227   : > { %14881 = vmatpush1.bf16.msra.mxu0 %v21915_v8  ;;  %15268 = vmatpush1.bf16.msra.mxu1 %v21918_v9  ;;  %v21992_v8 = vld [vmem:[%s25382_s11 + $0x363c] ss:$68 sps:$4 sm:$0xff]   ;;  %v21987_v9 = vld [vmem:[%s25382_s11 + $0x3630] ss:$68 sps:$4 sm:$0xff]  }
 0x228   : > { %14882 = vmatprep.subr.bf16.mxu0 %v21923_v10  ;;  %15269 = vmatprep.subr.bf16.mxu1 %v21926_v11  ;;  %v21990_v10 = vld [vmem:[%s25382_s11 + $0x3638] ss:$68 sps:$4 sm:$0xff]  }
 0x229   : > { %v21995_v11 = vld [vmem:[%s25382_s11 + $0x36bc] ss:$68 sps:$4 sm:$0xff]  }
 0x22b   : > { %14883 = vmatpush1.bf16.msra.mxu0 %v21921_v13  ;;  %15270 = vmatpush1.bf16.msra.mxu1 %v21924_v14  ;;  %v21998_v13 = vld [vmem:[%s25382_s11 + $0x36c4] ss:$68 sps:$4 sm:$0xff]   ;;  %v21993_v14 = vld [vmem:[%s25382_s11 + $0x36b8] ss:$68 sps:$4 sm:$0xff]  }
 0x22c   : > { %14884 = vmatprep.subr.bf16.mxu0 %v21929_v16  ;;  %15271 = vmatprep.subr.bf16.mxu1 %v21932_v17  ;;  %v21996_v16 = vld [vmem:[%s25382_s11 + $0x36c0] ss:$68 sps:$4 sm:$0xff]  }
 0x22d   : > { %v22001_v17 = vld [vmem:[%s25382_s11 + $0x3744] ss:$68 sps:$4 sm:$0xff]  }
 0x22f   : > { %14885 = vmatpush1.bf16.msra.mxu0 %v21927_v18  ;;  %15272 = vmatpush1.bf16.msra.mxu1 %v21930_v19  ;;  %v22004_v18 = vld [vmem:[%s25382_s11 + $0x374c] ss:$68 sps:$4 sm:$0xff]   ;;  %v21999_v19 = vld [vmem:[%s25382_s11 + $0x3740] ss:$68 sps:$4 sm:$0xff]  }
 0x230   : > { %14886 = vmatprep.subr.bf16.mxu0 %v21935_v20  ;;  %15273 = vmatprep.subr.bf16.mxu1 %v21938_v21  ;;  %v22002_v20 = vld [vmem:[%s25382_s11 + $0x3748] ss:$68 sps:$4 sm:$0xff]  }
 0x231   : > { %v22007_v21 = vld [vmem:[%s25382_s11 + $0x37cc] ss:$68 sps:$4 sm:$0xff]  }
 0x233   : > { %14887 = vmatpush1.bf16.msra.mxu0 %v21933_v22  ;;  %15274 = vmatpush1.bf16.msra.mxu1 %v21936_v24  ;;  %v22010_v22 = vld [vmem:[%s25382_s11 + $0x37d4] ss:$68 sps:$4 sm:$0xff]   ;;  %v22005_v24 = vld [vmem:[%s25382_s11 + $0x37c8] ss:$68 sps:$4 sm:$0xff]  }
 0x234   : > { %14888 = vmatprep.subr.bf16.mxu0 %v21941_v25  ;;  %15275 = vmatprep.subr.bf16.mxu1 %v21944_v26  ;;  %v22008_v25 = vld [vmem:[%s25382_s11 + $0x37d0] ss:$68 sps:$4 sm:$0xff]  }
 0x235   : > { %v22013_v26 = vld [vmem:[%s25382_s11 + $0x3854] ss:$68 sps:$4 sm:$0xff]  }
 0x237   : > { %14889 = vmatpush1.bf16.msra.mxu0 %v21939_v27  ;;  %15276 = vmatpush1.bf16.msra.mxu1 %v21942_v29  ;;  %v22016_v27 = vld [vmem:[%s25382_s11 + $0x385c] ss:$68 sps:$4 sm:$0xff]   ;;  %v22011_v29 = vld [vmem:[%s25382_s11 + $0x3850] ss:$68 sps:$4 sm:$0xff]  }
 0x238   : > { %14890 = vmatprep.subr.bf16.mxu0 %v21947_v30  ;;  %15277 = vmatprep.subr.bf16.mxu1 %v21950_v31  ;;  %v22014_v30 = vld [vmem:[%s25382_s11 + $0x3858] ss:$68 sps:$4 sm:$0xff]  }
 0x239   : > { %v22019_v31 = vld [vmem:[%s25382_s11 + $0x38dc] ss:$68 sps:$4 sm:$0xff]  }
 0x23b   : > { %14891 = vmatpush1.bf16.msra.mxu0 %v21945_v32  ;;  %15278 = vmatpush1.bf16.msra.mxu1 %v21948_v33  ;;  %v22022_v32 = vld [vmem:[%s25382_s11 + $0x38e4] ss:$68 sps:$4 sm:$0xff]   ;;  %v22017_v33 = vld [vmem:[%s25382_s11 + $0x38d8] ss:$68 sps:$4 sm:$0xff]  }
 0x23c   : > { %14903 = vmatprep.subr.bf16.mxu0 %v21953_v34  ;;  %15290 = vmatprep.subr.bf16.mxu1 %v21956_v35  ;;  %v22020_v34 = vld [vmem:[%s25382_s11 + $0x38e0] ss:$68 sps:$4 sm:$0xff]  }
 0x23d   : > { %v22025_v35 = vld [vmem:[%s25382_s11 + $0x3964] ss:$68 sps:$4 sm:$0xff]  }
 0x23e   : > { %14893 = vmatmul.mubr.bf16.vlgmr.msra.gmra.mrb[0].mxu0 %v25890_v41  ;;  %15280 = vmatmul.mubr.bf16.vlgmr.msra.gmra.mrb[0].mxu1 %v25890_v41 }
 0x23f   : > { %14904 = vmatpush1.bf16.msra.mxu0 %v21951_v42  ;;  %15291 = vmatpush1.bf16.msra.mxu1 %v21954_v43  ;;  %v22034_v42 = vld [vmem:[%s25382_s11 + $0x39f4] ss:$68 sps:$4 sm:$0xff]   ;;  %v22029_v43 = vld [vmem:[%s25382_s11 + $0x39e8] ss:$68 sps:$4 sm:$0xff]  }
 0x240   : > { %14905 = vmatprep.subr.bf16.mxu0 %v21959_v44  ;;  %15292 = vmatprep.subr.bf16.mxu1 %v21962_v45  ;;  %v22032_v44 = vld [vmem:[%s25382_s11 + $0x39f0] ss:$68 sps:$4 sm:$0xff]  }
 0x241   : > { %14935 = vmatprep.mubr.bf16.mxu0 %v25896_v47  ;;  %15322 = vmatprep.mubr.bf16.mxu1 %v25896_v47  ;;  %v22037_v45 = vld [vmem:[%s25382_s11 + $0x3a74] ss:$68 sps:$4 sm:$0xff]  }
 0x243   : > { %14906 = vmatpush1.bf16.msra.mxu0 %v21957_v48  ;;  %15293 = vmatpush1.bf16.msra.mxu1 %v21960_v49  ;;  %v22040_v48 = vld [vmem:[%s25382_s11 + $0x3a7c] ss:$68 sps:$4 sm:$0xff]   ;;  %v22035_v49 = vld [vmem:[%s25382_s11 + $0x3a70] ss:$68 sps:$4 sm:$0xff]  }
 0x244   : > { %14907 = vmatprep.subr.bf16.mxu0 %v21965_v50  ;;  %15294 = vmatprep.subr.bf16.mxu1 %v21968_v51  ;;  %v22038_v50 = vld [vmem:[%s25382_s11 + $0x3a78] ss:$68 sps:$4 sm:$0xff]  }
 0x245   : > { %v22043_v51 = vld [vmem:[%s25382_s11 + $0x3afc] ss:$68 sps:$4 sm:$0xff]  }
 0x247   : > { %14908 = vmatpush1.bf16.msra.mxu0 %v21963_v52  ;;  %15295 = vmatpush1.bf16.msra.mxu1 %v21966_v54  ;;  %v22046_v52 = vld [vmem:[%s25382_s11 + $0x3b04] ss:$68 sps:$4 sm:$0xff]   ;;  %v22041_v54 = vld [vmem:[%s25382_s11 + $0x3af8] ss:$68 sps:$4 sm:$0xff]  }
 0x248   : > { %14909 = vmatprep.subr.bf16.mxu0 %v21971_v55  ;;  %15296 = vmatprep.subr.bf16.mxu1 %v21974_v56  ;;  %v22044_v55 = vld [vmem:[%s25382_s11 + $0x3b00] ss:$68 sps:$4 sm:$0xff]  }
 0x249   : > { %v22049_v56 = vld [vmem:[%s25382_s11 + $0x3b84] ss:$68 sps:$4 sm:$0xff]  }
 0x24b   : > { %14910 = vmatpush1.bf16.msra.mxu0 %v21969_v58  ;;  %15297 = vmatpush1.bf16.msra.mxu1 %v21972_v59  ;;  %v22052_v58 = vld [vmem:[%s25382_s11 + $0x3b8c] ss:$68 sps:$4 sm:$0xff]  }
 0x24c   : > { %14911 = vmatprep.subr.bf16.mxu0 %v21977_v60  ;;  %15298 = vmatprep.subr.bf16.mxu1 %v21980_v61  ;;  %v462_v59 = vld [vmem:[%s25374_s4 + $0x60] sm:$0xff]  ;;  %v479_v60 = vld [vmem:[%s25374_s4 + $0xe8] sm:$0xff]  ;;  %v465_v61 = vld [vmem:[%s25374_s4 + $0x78] sm:$0xff] }
 0x24f   : > { %14912 = vmatpush1.bf16.msra.mxu0 %v21975_v63  ;;  %15299 = vmatpush1.bf16.msra.mxu1 %v21978_v0  ;;  %v482_v63 = vld [vmem:[%s25374_s4 + $0x100] sm:$0xff]  ;;  %v25966_v0 = vpack.c.bf16 %v479_v60, %v462_v59 }
 0x250   : > { %14913 = vmatprep.subr.bf16.mxu0 %v21983_v2  ;;  %15300 = vmatprep.subr.bf16.mxu1 %v21986_v3  ;;  %v22047_v2 = vld [vmem:[%s25382_s11 + $0x3b80] ss:$68 sps:$4 sm:$0xff]   ;;  %v22050_v3 = vld [vmem:[%s25382_s11 + $0x3b88] ss:$68 sps:$4 sm:$0xff]  }
 0x251   : > { %v22116_v59 = vld [vmem:[%s25382_s11 + $0x4160] ss:$68 sps:$4 sm:$0xff]  }
 0x252   : > { %v22121_v60 = vld [vmem:[%s25382_s11 + $0x41e4] ss:$68 sps:$4 sm:$0xff]  }
 0x253   : > { %14914 = vmatpush1.bf16.msra.mxu0 %v21981_v4  ;;  %15301 = vmatpush1.bf16.msra.mxu1 %v21984_v5  ;;  %v22055_v4 = vld [vmem:[%s25382_s11 + $0x3c0c] ss:$68 sps:$4 sm:$0xff]   ;;  %v22058_v5 = vld [vmem:[%s25382_s11 + $0x3c14] ss:$68 sps:$4 sm:$0xff]  }
 0x254   : > { %14915 = vmatprep.subr.bf16.mxu0 %v21989_v6  ;;  %15302 = vmatprep.subr.bf16.mxu1 %v21992_v8  ;;  %v25972_v6 = vpack.c.bf16 %v482_v63, %v465_v61  ;;  %v22053_v8 = vld [vmem:[%s25382_s11 + $0x3c08] ss:$68 sps:$4 sm:$0xff]   ;;  %v22119_v63 = vld [vmem:[%s25382_s11 + $0x41e0] ss:$68 sps:$4 sm:$0xff]  }
 0x255   : > { %v22124_v61 = vld [vmem:[%s25382_s11 + $0x41ec] ss:$68 sps:$4 sm:$0xff]  }
 0x257   : > { %14916 = vmatpush1.bf16.msra.mxu0 %v21987_v9  ;;  %15303 = vmatpush1.bf16.msra.mxu1 %v21990_v10  ;;  %v22056_v9 = vld [vmem:[%s25382_s11 + $0x3c10] ss:$68 sps:$4 sm:$0xff]  }
 0x258   : > { %14917 = vmatprep.subr.bf16.mxu0 %v21995_v11  ;;  %15304 = vmatprep.subr.bf16.mxu1 %v21998_v13  ;;  %v22061_v10 = vld [vmem:[%s25382_s11 + $0x3c94] ss:$68 sps:$4 sm:$0xff]   ;;  %v22064_v11 = vld [vmem:[%s25382_s11 + $0x3c9c] ss:$68 sps:$4 sm:$0xff]  }
 0x259   : > { %v22059_v13 = vld [vmem:[%s25382_s11 + $0x3c90] ss:$68 sps:$4 sm:$0xff]  }
 0x25b   : > { %14918 = vmatpush1.bf16.msra.mxu0 %v21993_v14  ;;  %15305 = vmatpush1.bf16.msra.mxu1 %v21996_v16  ;;  %v22062_v14 = vld [vmem:[%s25382_s11 + $0x3c98] ss:$68 sps:$4 sm:$0xff]  }
 0x25c   : > { %14919 = vmatprep.subr.bf16.mxu0 %v22001_v17  ;;  %15306 = vmatprep.subr.bf16.mxu1 %v22004_v18  ;;  %v22067_v16 = vld [vmem:[%s25382_s11 + $0x3d1c] ss:$68 sps:$4 sm:$0xff]   ;;  %v22070_v17 = vld [vmem:[%s25382_s11 + $0x3d24] ss:$68 sps:$4 sm:$0xff]  }
 0x25d   : > { %v22065_v18 = vld [vmem:[%s25382_s11 + $0x3d18] ss:$68 sps:$4 sm:$0xff]  }
 0x25f   : > { %14920 = vmatpush1.bf16.msra.mxu0 %v21999_v19  ;;  %15307 = vmatpush1.bf16.msra.mxu1 %v22002_v20  ;;  %v22068_v19 = vld [vmem:[%s25382_s11 + $0x3d20] ss:$68 sps:$4 sm:$0xff]  }
 0x260   : > { %14921 = vmatprep.subr.bf16.mxu0 %v22007_v21  ;;  %15308 = vmatprep.subr.bf16.mxu1 %v22010_v22  ;;  %v22073_v20 = vld [vmem:[%s25382_s11 + $0x3da4] ss:$68 sps:$4 sm:$0xff]   ;;  %v22076_v21 = vld [vmem:[%s25382_s11 + $0x3dac] ss:$68 sps:$4 sm:$0xff]  }
 0x261   : > { %v22071_v22 = vld [vmem:[%s25382_s11 + $0x3da0] ss:$68 sps:$4 sm:$0xff]  }
 0x263   : > { %14922 = vmatpush1.bf16.msra.mxu0 %v22005_v24  ;;  %15309 = vmatpush1.bf16.msra.mxu1 %v22008_v25  ;;  %v22074_v24 = vld [vmem:[%s25382_s11 + $0x3da8] ss:$68 sps:$4 sm:$0xff]  }
 0x264   : > { %14923 = vmatprep.subr.bf16.mxu0 %v22013_v26  ;;  %15310 = vmatprep.subr.bf16.mxu1 %v22016_v27  ;;  %v22079_v25 = vld [vmem:[%s25382_s11 + $0x3e2c] ss:$68 sps:$4 sm:$0xff]   ;;  %v22082_v26 = vld [vmem:[%s25382_s11 + $0x3e34] ss:$68 sps:$4 sm:$0xff]  }
 0x265   : > { %v22077_v27 = vld [vmem:[%s25382_s11 + $0x3e28] ss:$68 sps:$4 sm:$0xff]  }
 0x267   : > { %14924 = vmatpush1.bf16.msra.mxu0 %v22011_v29  ;;  %15311 = vmatpush1.bf16.msra.mxu1 %v22014_v30  ;;  %v22080_v29 = vld [vmem:[%s25382_s11 + $0x3e30] ss:$68 sps:$4 sm:$0xff]  }
 0x268   : > { %14925 = vmatprep.subr.bf16.mxu0 %v22019_v31  ;;  %15312 = vmatprep.subr.bf16.mxu1 %v22022_v32  ;;  %v22085_v30 = vld [vmem:[%s25382_s11 + $0x3eb4] ss:$68 sps:$4 sm:$0xff]   ;;  %v22088_v31 = vld [vmem:[%s25382_s11 + $0x3ebc] ss:$68 sps:$4 sm:$0xff]  }
 0x269   : > { %v22083_v32 = vld [vmem:[%s25382_s11 + $0x3eb0] ss:$68 sps:$4 sm:$0xff]  }
 0x26b   : > { %14926 = vmatpush1.bf16.msra.mxu0 %v22017_v33  ;;  %15313 = vmatpush1.bf16.msra.mxu1 %v22020_v34  ;;  %v22086_v33 = vld [vmem:[%s25382_s11 + $0x3eb8] ss:$68 sps:$4 sm:$0xff]  }
 0x26c   : > { %14927 = vmatprep.subr.bf16.mxu0 %v22025_v35  ;;  %15314 = vmatprep.subr.bf16.mxu1 %v22028_v36  ;;  %v22091_v34 = vld [vmem:[%s25382_s11 + $0x3f3c] ss:$68 sps:$4 sm:$0xff]   ;;  %v22094_v35 = vld [vmem:[%s25382_s11 + $0x3f44] ss:$68 sps:$4 sm:$0xff]  }
 0x26d   : > { %v22089_v36 = vld [vmem:[%s25382_s11 + $0x3f38] ss:$68 sps:$4 sm:$0xff]  }
 0x26f   : > { %14928 = vmatpush1.bf16.msra.mxu0 %v22023_v37  ;;  %15315 = vmatpush1.bf16.msra.mxu1 %v22026_v39  ;;  %v22092_v37 = vld [vmem:[%s25382_s11 + $0x3f40] ss:$68 sps:$4 sm:$0xff]  }
 0x270   : > { %14929 = vmatprep.subr.bf16.mxu0 %v22031_v40  ;;  %15316 = vmatprep.subr.bf16.mxu1 %v22034_v42  ;;  %v22097_v39 = vld [vmem:[%s25382_s11 + $0x3fc4] ss:$68 sps:$4 sm:$0xff]   ;;  %v22100_v40 = vld [vmem:[%s25382_s11 + $0x3fcc] ss:$68 sps:$4 sm:$0xff]  }
 0x271   : > { %v22095_v42 = vld [vmem:[%s25382_s11 + $0x3fc0] ss:$68 sps:$4 sm:$0xff]  }
 0x273   : > { %14930 = vmatpush1.bf16.msra.mxu0 %v22029_v43  ;;  %15317 = vmatpush1.bf16.msra.mxu1 %v22032_v44  ;;  %v22098_v43 = vld [vmem:[%s25382_s11 + $0x3fc8] ss:$68 sps:$4 sm:$0xff]  }
 0x274   : > { %14931 = vmatprep.subr.bf16.mxu0 %v22037_v45  ;;  %15318 = vmatprep.subr.bf16.mxu1 %v22040_v48  ;;  %v22103_v44 = vld [vmem:[%s25382_s11 + $0x404c] ss:$68 sps:$4 sm:$0xff]   ;;  %v22106_v45 = vld [vmem:[%s25382_s11 + $0x4054] ss:$68 sps:$4 sm:$0xff]  }
 0x275   : > { %v22101_v48 = vld [vmem:[%s25382_s11 + $0x4048] ss:$68 sps:$4 sm:$0xff]  }
 0x277   : > { %14932 = vmatpush1.bf16.msra.mxu0 %v22035_v49  ;;  %15319 = vmatpush1.bf16.msra.mxu1 %v22038_v50  ;;  %v22104_v49 = vld [vmem:[%s25382_s11 + $0x4050] ss:$68 sps:$4 sm:$0xff]  }
 0x278   : > { %14933 = vmatprep.subr.bf16.mxu0 %v22043_v51  ;;  %15320 = vmatprep.subr.bf16.mxu1 %v22046_v52  ;;  %v22109_v50 = vld [vmem:[%s25382_s11 + $0x40d4] ss:$68 sps:$4 sm:$0xff]   ;;  %v22112_v51 = vld [vmem:[%s25382_s11 + $0x40dc] ss:$68 sps:$4 sm:$0xff]  }
 0x279   : > { %v22107_v52 = vld [vmem:[%s25382_s11 + $0x40d0] ss:$68 sps:$4 sm:$0xff]  }
 0x27b   : > { %14934 = vmatpush1.bf16.msra.mxu0 %v22041_v54  ;;  %15321 = vmatpush1.bf16.msra.mxu1 %v22044_v55  ;;  %v22110_v54 = vld [vmem:[%s25382_s11 + $0x40d8] ss:$68 sps:$4 sm:$0xff]  }
 0x27c   : > { %14946 = vmatprep.subr.bf16.mxu0 %v22049_v56  ;;  %15333 = vmatprep.subr.bf16.mxu1 %v22052_v58  ;;  %v22115_v55 = vld [vmem:[%s25382_s11 + $0x415c] ss:$68 sps:$4 sm:$0xff]   ;;  %v22118_v56 = vld [vmem:[%s25382_s11 + $0x4164] ss:$68 sps:$4 sm:$0xff]  }
 0x27d   : > { %v22113_v58 = vld [vmem:[%s25382_s11 + $0x4158] ss:$68 sps:$4 sm:$0xff]  }
 0x27e   : > { %14936 = vmatmul.mubr.bf16.vlgmr.msra.gmra.mrb[0].mxu0 %v25966_v0  ;;  %15323 = vmatmul.mubr.bf16.vlgmr.msra.gmra.mrb[0].mxu1 %v25966_v0 }
 0x27f   : > { %14947 = vmatpush1.bf16.msra.mxu0 %v22047_v2  ;;  %15334 = vmatpush1.bf16.msra.mxu1 %v22050_v3  ;;  %v22122_v2 = vld [vmem:[%s25382_s11 + $0x41e8] ss:$68 sps:$4 sm:$0xff]  }
 0x280   : > { %14948 = vmatprep.subr.bf16.mxu0 %v22055_v4  ;;  %15335 = vmatprep.subr.bf16.mxu1 %v22058_v5  ;;  %v22127_v3 = vld [vmem:[%s25382_s11 + $0x426c] ss:$68 sps:$4 sm:$0xff]   ;;  %v22130_v4 = vld [vmem:[%s25382_s11 + $0x4274] ss:$68 sps:$4 sm:$0xff]  }
 0x281   : > { %14978 = vmatprep.mubr.bf16.mxu0 %v25972_v6  ;;  %15365 = vmatprep.mubr.bf16.mxu1 %v25972_v6  ;;  %v22125_v5 = vld [vmem:[%s25382_s11 + $0x4268] ss:$68 sps:$4 sm:$0xff]  }
 0x283   : > { %14949 = vmatpush1.bf16.msra.mxu0 %v22053_v8  ;;  %15336 = vmatpush1.bf16.msra.mxu1 %v22056_v9  ;;  %v22128_v8 = vld [vmem:[%s25382_s11 + $0x4270] ss:$68 sps:$4 sm:$0xff]  }
 0x284   : > { %14950 = vmatprep.subr.bf16.mxu0 %v22061_v10  ;;  %15337 = vmatprep.subr.bf16.mxu1 %v22064_v11  ;;  %v22133_v9 = vld [vmem:[%s25382_s11 + $0x42f4] ss:$68 sps:$4 sm:$0xff]   ;;  %v22136_v10 = vld [vmem:[%s25382_s11 + $0x42fc] ss:$68 sps:$4 sm:$0xff]  }
 0x285   : > { %v22131_v11 = vld [vmem:[%s25382_s11 + $0x42f0] ss:$68 sps:$4 sm:$0xff]  }
 0x287   : > { %14951 = vmatpush1.bf16.msra.mxu0 %v22059_v13  ;;  %15338 = vmatpush1.bf16.msra.mxu1 %v22062_v14  ;;  %v22134_v13 = vld [vmem:[%s25382_s11 + $0x42f8] ss:$68 sps:$4 sm:$0xff]  }
 0x288   : > { %14952 = vmatprep.subr.bf16.mxu0 %v22067_v16  ;;  %15339 = vmatprep.subr.bf16.mxu1 %v22070_v17  ;;  %v22139_v14 = vld [vmem:[%s25382_s11 + $0x437c] ss:$68 sps:$4 sm:$0xff]   ;;  %v22142_v16 = vld [vmem:[%s25382_s11 + $0x4384] ss:$68 sps:$4 sm:$0xff]  }
 0x289   : > { %v22137_v17 = vld [vmem:[%s25382_s11 + $0x4378] ss:$68 sps:$4 sm:$0xff]  }
 0x28b   : > { %14953 = vmatpush1.bf16.msra.mxu0 %v22065_v18  ;;  %15340 = vmatpush1.bf16.msra.mxu1 %v22068_v19  ;;  %v22140_v18 = vld [vmem:[%s25382_s11 + $0x4380] ss:$68 sps:$4 sm:$0xff]  }
 0x28c   : > { %14954 = vmatprep.subr.bf16.mxu0 %v22073_v20  ;;  %15341 = vmatprep.subr.bf16.mxu1 %v22076_v21  ;;  %v464_v19 = vld [vmem:[%s25374_s4 + $0x70] sm:$0xff]  ;;  %v481_v20 = vld [vmem:[%s25374_s4 + $0xf8] sm:$0xff] }
 0x28d   : > { %v22145_v21 = vld [vmem:[%s25382_s11 + $0x4404] ss:$68 sps:$4 sm:$0xff]  }
 0x28f   : > { %14955 = vmatpush1.bf16.msra.mxu0 %v22071_v22  ;;  %15342 = vmatpush1.bf16.msra.mxu1 %v22074_v24  ;;  %v22148_v22 = vld [vmem:[%s25382_s11 + $0x440c] ss:$68 sps:$4 sm:$0xff]   ;;  %v26040_v24 = vpack.c.bf16 %v481_v20, %v464_v19  ;;  %v22203_v19 = vld [vmem:[%s25382_s11 + $0x120] ss:$68 sps:$4 sm:$0xff]  }
 0x290   : > { %14956 = vmatprep.subr.bf16.mxu0 %v22079_v25  ;;  %15343 = vmatprep.subr.bf16.mxu1 %v22082_v26  ;;  %v22143_v25 = vld [vmem:[%s25382_s11 + $0x4400] ss:$68 sps:$4 sm:$0xff]   ;;  %v22146_v26 = vld [vmem:[%s25382_s11 + $0x4408] ss:$68 sps:$4 sm:$0xff]  }
 0x291   : > { %v22206_v20 = vld [vmem:[%s25382_s11 + $0x128] ss:$68 sps:$4 sm:$0xff]  }
 0x293   : > { %14957 = vmatpush1.bf16.msra.mxu0 %v22077_v27  ;;  %15344 = vmatpush1.bf16.msra.mxu1 %v22080_v29  ;;  %v22151_v27 = vld [vmem:[%s25382_s11 + $0x448c] ss:$68 sps:$4 sm:$0xff]   ;;  %v22154_v29 = vld [vmem:[%s25382_s11 + $0x4494] ss:$68 sps:$4 sm:$0xff]  }
 0x294   : > { %14958 = vmatprep.subr.bf16.mxu0 %v22085_v30  ;;  %15345 = vmatprep.subr.bf16.mxu1 %v22088_v31  ;;  %v22149_v30 = vld [vmem:[%s25382_s11 + $0x4488] ss:$68 sps:$4 sm:$0xff]   ;;  %v22152_v31 = vld [vmem:[%s25382_s11 + $0x4490] ss:$68 sps:$4 sm:$0xff]  }
 0x297   : > { %14959 = vmatpush1.bf16.msra.mxu0 %v22083_v32  ;;  %15346 = vmatpush1.bf16.msra.mxu1 %v22086_v33  ;;  %v22157_v32 = vld [vmem:[%s25382_s11 + $0x4514] ss:$68 sps:$4 sm:$0xff]   ;;  %v22160_v33 = vld [vmem:[%s25382_s11 + $0x451c] ss:$68 sps:$4 sm:$0xff]  }
 0x298   : > { %14960 = vmatprep.subr.bf16.mxu0 %v22091_v34  ;;  %15347 = vmatprep.subr.bf16.mxu1 %v22094_v35  ;;  %v25030_v34 = vmov 0   ;;  %v22155_v35 = vld [vmem:[%s25382_s11 + $0x4510] ss:$68 sps:$4 sm:$0xff]  }
 0x29b   : > { %14961 = vmatpush1.bf16.msra.mxu0 %v22089_v36  ;;  %15348 = vmatpush1.bf16.msra.mxu1 %v22092_v37  ;;  %v22158_v36 = vld [vmem:[%s25382_s11 + $0x4518] ss:$68 sps:$4 sm:$0xff]  }
 0x29c   : > { %14962 = vmatprep.subr.bf16.mxu0 %v22097_v39  ;;  %15349 = vmatprep.subr.bf16.mxu1 %v22100_v40  ;;  %v22163_v37 = vld [vmem:[%s25382_s11 + $0x459c] ss:$68 sps:$4 sm:$0xff]   ;;  %v22166_v39 = vld [vmem:[%s25382_s11 + $0x45a4] ss:$68 sps:$4 sm:$0xff]  }
 0x29d   : > { %v22161_v40 = vld [vmem:[%s25382_s11 + $0x4598] ss:$68 sps:$4 sm:$0xff]  }
 0x29f   : > { %14963 = vmatpush1.bf16.msra.mxu0 %v22095_v42  ;;  %15350 = vmatpush1.bf16.msra.mxu1 %v22098_v43  ;;  %v22164_v42 = vld [vmem:[%s25382_s11 + $0x45a0] ss:$68 sps:$4 sm:$0xff]  }
 0x2a0   : > { %14964 = vmatprep.subr.bf16.mxu0 %v22103_v44  ;;  %15351 = vmatprep.subr.bf16.mxu1 %v22106_v45  ;;  %v22169_v43 = vld [vmem:[%s25382_s11 + $0x4624] ss:$68 sps:$4 sm:$0xff]   ;;  %v22172_v44 = vld [vmem:[%s25382_s11 + $0x462c] ss:$68 sps:$4 sm:$0xff]  }
 0x2a1   : > { %v22167_v45 = vld [vmem:[%s25382_s11 + $0x4620] ss:$68 sps:$4 sm:$0xff]  }
 0x2a3   : > { %14965 = vmatpush1.bf16.msra.mxu0 %v22101_v48  ;;  %15352 = vmatpush1.bf16.msra.mxu1 %v22104_v49  ;;  %v22170_v48 = vld [vmem:[%s25382_s11 + $0x4628] ss:$68 sps:$4 sm:$0xff]  }
 0x2a4   : > { %14966 = vmatprep.subr.bf16.mxu0 %v22109_v50  ;;  %15353 = vmatprep.subr.bf16.mxu1 %v22112_v51  ;;  %v22175_v49 = vld [vmem:[%s25382_s11 + $0x46ac] ss:$68 sps:$4 sm:$0xff]   ;;  %v22178_v50 = vld [vmem:[%s25382_s11 + $0x46b4] ss:$68 sps:$4 sm:$0xff]  }
 0x2a5   : > { %v22173_v51 = vld [vmem:[%s25382_s11 + $0x46a8] ss:$68 sps:$4 sm:$0xff]  }
 0x2a7   : > { %14967 = vmatpush1.bf16.msra.mxu0 %v22107_v52  ;;  %15354 = vmatpush1.bf16.msra.mxu1 %v22110_v54  ;;  %v22176_v52 = vld [vmem:[%s25382_s11 + $0x46b0] ss:$68 sps:$4 sm:$0xff]  }
 0x2a8   : > { %14968 = vmatprep.subr.bf16.mxu0 %v22115_v55  ;;  %15355 = vmatprep.subr.bf16.mxu1 %v22118_v56  ;;  %v22181_v54 = vld [vmem:[%s25382_s11 + $0x4734] ss:$68 sps:$4 sm:$0xff]   ;;  %v22184_v55 = vld [vmem:[%s25382_s11 + $0x473c] ss:$68 sps:$4 sm:$0xff]  }
 0x2a9   : > { %v22179_v56 = vld [vmem:[%s25382_s11 + $0x4730] ss:$68 sps:$4 sm:$0xff]  }
 0x2ab   : > { %14969 = vmatpush1.bf16.msra.mxu0 %v22113_v58  ;;  %15356 = vmatpush1.bf16.msra.mxu1 %v22116_v59  ;;  %v22182_v58 = vld [vmem:[%s25382_s11 + $0x4738] ss:$68 sps:$4 sm:$0xff]  }
 0x2ac   : > { %14970 = vmatprep.subr.bf16.mxu0 %v22121_v60  ;;  %15357 = vmatprep.subr.bf16.mxu1 %v22124_v61  ;;  %v22187_v59 = vld [vmem:[%s25382_s11 + $0x47bc] ss:$68 sps:$4 sm:$0xff]   ;;  %v22190_v60 = vld [vmem:[%s25382_s11 + $0x47c4] ss:$68 sps:$4 sm:$0xff]  }
 0x2ad   : > { %v22185_v61 = vld [vmem:[%s25382_s11 + $0x47b8] ss:$68 sps:$4 sm:$0xff]  }
 0x2af   : > { %14971 = vmatpush1.bf16.msra.mxu0 %v22119_v63  ;;  %15358 = vmatpush1.bf16.msra.mxu1 %v22122_v2  ;;  %v22188_v63 = vld [vmem:[%s25382_s11 + $0x47c0] ss:$68 sps:$4 sm:$0xff]  }
 0x2b0   : > { %14972 = vmatprep.subr.bf16.mxu0 %v22127_v3  ;;  %15359 = vmatprep.subr.bf16.mxu1 %v22130_v4  ;;  %v466_v2 = vld [vmem:[%s25374_s4 + $0x80] sm:$0xff]  ;;  %v483_v3 = vld [vmem:[%s25374_s4 + $0x108] sm:$0xff] }
 0x2b1   : > { %v22193_v4 = vld [vmem:[%s25382_s11 + $0x14] ss:$68 sps:$4 sm:$0xff]  }
 0x2b3   : > { %14973 = vmatpush1.bf16.msra.mxu0 %v22125_v5  ;;  %15360 = vmatpush1.bf16.msra.mxu1 %v22128_v8  ;;  %v22196_v5 = vld [vmem:[%s25382_s11 + $0x1c] ss:$68 sps:$4 sm:$0xff]   ;;  %v26080_v8 = vpack.c.bf16 %v483_v3, %v466_v2  ;;  %v22259_v2 = vld [vmem:[%s25382_s11 + $0x5ec] ss:$68 sps:$4 sm:$0xff]   ;;  %v22262_v3 = vld [vmem:[%s25382_s11 + $0x5f4] ss:$68 sps:$4 sm:$0xff]  }
 0x2b4   : > { %14974 = vmatprep.subr.bf16.mxu0 %v22133_v9  ;;  %15361 = vmatprep.subr.bf16.mxu1 %v22136_v10  ;;  %v22191_v9 = vld [vmem:[%s25382_s11 + $0x10] ss:$68 sps:$4 sm:$0xff]   ;;  %v22194_v10 = vld [vmem:[%s25382_s11 + $0x18] ss:$68 sps:$4 sm:$0xff]  }
 0x2b7   : > { %14975 = vmatpush1.bf16.msra.mxu0 %v22131_v11  ;;  %15362 = vmatpush1.bf16.msra.mxu1 %v22134_v13  ;;  %v22199_v11 = vld [vmem:[%s25382_s11 + $0x9c] ss:$68 sps:$4 sm:$0xff]   ;;  %v22202_v13 = vld [vmem:[%s25382_s11 + $0xa4] ss:$68 sps:$4 sm:$0xff]  }
 0x2b8   : > { %14976 = vmatprep.subr.bf16.mxu0 %v22139_v14  ;;  %15363 = vmatprep.subr.bf16.mxu1 %v22142_v16  ;;  %v22197_v14 = vld [vmem:[%s25382_s11 + $0x98] ss:$68 sps:$4 sm:$0xff]   ;;  %v22200_v16 = vld [vmem:[%s25382_s11 + $0xa0] ss:$68 sps:$4 sm:$0xff]  }
 0x2bb   : > { %14977 = vmatpush1.bf16.msra.mxu0 %v22137_v17  ;;  %15364 = vmatpush1.bf16.msra.mxu1 %v22140_v18  ;;  %v22205_v17 = vld [vmem:[%s25382_s11 + $0x124] ss:$68 sps:$4 sm:$0xff]   ;;  %v22208_v18 = vld [vmem:[%s25382_s11 + $0x12c] ss:$68 sps:$4 sm:$0xff]  }
 0x2bc   : > { %14989 = vmatprep.subr.bf16.mxu0 %v22145_v21  ;;  %15376 = vmatprep.subr.bf16.mxu1 %v22148_v22  ;;  %v22211_v21 = vld [vmem:[%s25382_s11 + $0x1ac] ss:$68 sps:$4 sm:$0xff]   ;;  %v22214_v22 = vld [vmem:[%s25382_s11 + $0x1b4] ss:$68 sps:$4 sm:$0xff]  }
 0x2be   : > { %14979 = vmatmul.mubr.bf16.vlgmr.msra.gmra.mrb[0].mxu0 %v26040_v24  ;;  %15366 = vmatmul.mubr.bf16.vlgmr.msra.gmra.mrb[0].mxu1 %v26040_v24 }
 0x2bf   : > { %14990 = vmatpush1.bf16.msra.mxu0 %v22143_v25  ;;  %15377 = vmatpush1.bf16.msra.mxu1 %v22146_v26  ;;  %v22209_v25 = vld [vmem:[%s25382_s11 + $0x1a8] ss:$68 sps:$4 sm:$0xff]   ;;  %v22212_v26 = vld [vmem:[%s25382_s11 + $0x1b0] ss:$68 sps:$4 sm:$0xff]  }
 0x2c0   : > { %14991 = vmatprep.subr.bf16.mxu0 %v22151_v27  ;;  %15378 = vmatprep.subr.bf16.mxu1 %v22154_v29  ;;  %v22217_v27 = vld [vmem:[%s25382_s11 + $0x234] ss:$68 sps:$4 sm:$0xff]   ;;  %v22220_v29 = vld [vmem:[%s25382_s11 + $0x23c] ss:$68 sps:$4 sm:$0xff]  }
 0x2c1   : > { %15021 = vmatprep.mubr.bf16.mxu0 %v25030_v34  ;;  %15408 = vmatprep.mubr.bf16.mxu1 %v25030_v34 }
 0x2c3   : > { %14992 = vmatpush1.bf16.msra.mxu0 %v22149_v30  ;;  %15379 = vmatpush1.bf16.msra.mxu1 %v22152_v31  ;;  %v22215_v30 = vld [vmem:[%s25382_s11 + $0x230] ss:$68 sps:$4 sm:$0xff]   ;;  %v22218_v31 = vld [vmem:[%s25382_s11 + $0x238] ss:$68 sps:$4 sm:$0xff]  }
 0x2c4   : > { %14993 = vmatprep.subr.bf16.mxu0 %v22157_v32  ;;  %15380 = vmatprep.subr.bf16.mxu1 %v22160_v33  ;;  %v22223_v32 = vld [vmem:[%s25382_s11 + $0x2bc] ss:$68 sps:$4 sm:$0xff]   ;;  %v22226_v33 = vld [vmem:[%s25382_s11 + $0x2c4] ss:$68 sps:$4 sm:$0xff]  }
 0x2c7   : > { %14994 = vmatpush1.bf16.msra.mxu0 %v22155_v35  ;;  %15381 = vmatpush1.bf16.msra.mxu1 %v22158_v36  ;;  %v22221_v35 = vld [vmem:[%s25382_s11 + $0x2b8] ss:$68 sps:$4 sm:$0xff]   ;;  %v22224_v36 = vld [vmem:[%s25382_s11 + $0x2c0] ss:$68 sps:$4 sm:$0xff]  }
 0x2c8   : > { %14995 = vmatprep.subr.bf16.mxu0 %v22163_v37  ;;  %15382 = vmatprep.subr.bf16.mxu1 %v22166_v39  ;;  %v22229_v37 = vld [vmem:[%s25382_s11 + $0x344] ss:$68 sps:$4 sm:$0xff]   ;;  %v22232_v39 = vld [vmem:[%s25382_s11 + $0x34c] ss:$68 sps:$4 sm:$0xff]  }
 0x2cb   : > { %14996 = vmatpush1.bf16.msra.mxu0 %v22161_v40  ;;  %15383 = vmatpush1.bf16.msra.mxu1 %v22164_v42  ;;  %v22227_v40 = vld [vmem:[%s25382_s11 + $0x340] ss:$68 sps:$4 sm:$0xff]   ;;  %v22230_v42 = vld [vmem:[%s25382_s11 + $0x348] ss:$68 sps:$4 sm:$0xff]  }
 0x2cc   : > { %14997 = vmatprep.subr.bf16.mxu0 %v22169_v43  ;;  %15384 = vmatprep.subr.bf16.mxu1 %v22172_v44  ;;  %v22235_v43 = vld [vmem:[%s25382_s11 + $0x3cc] ss:$68 sps:$4 sm:$0xff]   ;;  %v22238_v44 = vld [vmem:[%s25382_s11 + $0x3d4] ss:$68 sps:$4 sm:$0xff]  }
 0x2cf   : > { %14998 = vmatpush1.bf16.msra.mxu0 %v22167_v45  ;;  %15385 = vmatpush1.bf16.msra.mxu1 %v22170_v48  ;;  %v22233_v45 = vld [vmem:[%s25382_s11 + $0x3c8] ss:$68 sps:$4 sm:$0xff]   ;;  %v22236_v48 = vld [vmem:[%s25382_s11 + $0x3d0] ss:$68 sps:$4 sm:$0xff]  }
 0x2d0   : > { %14999 = vmatprep.subr.bf16.mxu0 %v22175_v49  ;;  %15386 = vmatprep.subr.bf16.mxu1 %v22178_v50  ;;  %v22241_v49 = vld [vmem:[%s25382_s11 + $0x454] ss:$68 sps:$4 sm:$0xff]   ;;  %v22244_v50 = vld [vmem:[%s25382_s11 + $0x45c] ss:$68 sps:$4 sm:$0xff]  }
 0x2d3   : > { %15000 = vmatpush1.bf16.msra.mxu0 %v22173_v51  ;;  %15387 = vmatpush1.bf16.msra.mxu1 %v22176_v52  ;;  %v22239_v51 = vld [vmem:[%s25382_s11 + $0x450] ss:$68 sps:$4 sm:$0xff]   ;;  %v22242_v52 = vld [vmem:[%s25382_s11 + $0x458] ss:$68 sps:$4 sm:$0xff]  }
 0x2d4   : > { %15001 = vmatprep.subr.bf16.mxu0 %v22181_v54  ;;  %15388 = vmatprep.subr.bf16.mxu1 %v22184_v55  ;;  %v22247_v54 = vld [vmem:[%s25382_s11 + $0x4dc] ss:$68 sps:$4 sm:$0xff]   ;;  %v22250_v55 = vld [vmem:[%s25382_s11 + $0x4e4] ss:$68 sps:$4 sm:$0xff]  }
 0x2d7   : > { %15002 = vmatpush1.bf16.msra.mxu0 %v22179_v56  ;;  %15389 = vmatpush1.bf16.msra.mxu1 %v22182_v58  ;;  %v22245_v56 = vld [vmem:[%s25382_s11 + $0x4d8] ss:$68 sps:$4 sm:$0xff]   ;;  %v22248_v58 = vld [vmem:[%s25382_s11 + $0x4e0] ss:$68 sps:$4 sm:$0xff]  }
 0x2d8   : > { %15003 = vmatprep.subr.bf16.mxu0 %v22187_v59  ;;  %15390 = vmatprep.subr.bf16.mxu1 %v22190_v60  ;;  %v22253_v59 = vld [vmem:[%s25382_s11 + $0x564] ss:$68 sps:$4 sm:$0xff]   ;;  %v22256_v60 = vld [vmem:[%s25382_s11 + $0x56c] ss:$68 sps:$4 sm:$0xff]  }
 0x2db   : > { %15004 = vmatpush1.bf16.msra.mxu0 %v22185_v61  ;;  %15391 = vmatpush1.bf16.msra.mxu1 %v22188_v63  ;;  %v22251_v61 = vld [vmem:[%s25382_s11 + $0x560] ss:$68 sps:$4 sm:$0xff]   ;;  %v22254_v63 = vld [vmem:[%s25382_s11 + $0x568] ss:$68 sps:$4 sm:$0xff]  }
 0x2dc   : > { %15419 = vmatprep.subr.bf16.mxu0 %v22193_v4  ;;  %15806 = vmatprep.subr.bf16.mxu1 %v22196_v5  ;;  %v22257_v4 = vld [vmem:[%s25382_s11 + $0x5e8] ss:$68 sps:$4 sm:$0xff]   ;;  %v22260_v5 = vld [vmem:[%s25382_s11 + $0x5f0] ss:$68 sps:$4 sm:$0xff]  }
 0x2de   : > { %15022 = vmatmul.mubr.bf16.vlgmr.msra.gmra.mrb[0].mxu0 %v26080_v8  ;;  %15409 = vmatmul.mubr.bf16.vlgmr.msra.gmra.mrb[0].mxu1 %v26080_v8 }
 0x2df   : > { %15420 = vmatpush1.bf16.msra.mxu0 %v22191_v9  ;;  %15807 = vmatpush1.bf16.msra.mxu1 %v22194_v10  ;;  %v22265_v9 = vld [vmem:[%s25382_s11 + $0x674] ss:$68 sps:$4 sm:$0xff]   ;;  %v22268_v10 = vld [vmem:[%s25382_s11 + $0x67c] ss:$68 sps:$4 sm:$0xff]  }
 0x2e0   : > { %15421 = vmatprep.subr.bf16.mxu0 %v22199_v11  ;;  %15808 = vmatprep.subr.bf16.mxu1 %v22202_v13  ;;  %v22263_v11 = vld [vmem:[%s25382_s11 + $0x670] ss:$68 sps:$4 sm:$0xff]   ;;  %v22266_v13 = vld [vmem:[%s25382_s11 + $0x678] ss:$68 sps:$4 sm:$0xff]  }
 0x2e1   : > { %15451 = vmatprep.mubr.bf16.mxu0 %v25484_v15  ;;  %15838 = vmatprep.mubr.bf16.mxu1 %v25484_v15 }
 0x2e3   : > { %15422 = vmatpush1.bf16.msra.mxu0 %v22197_v14  ;;  %15809 = vmatpush1.bf16.msra.mxu1 %v22200_v16  ;;  %v22271_v14 = vld [vmem:[%s25382_s11 + $0x6fc] ss:$68 sps:$4 sm:$0xff]   ;;  %v22274_v16 = vld [vmem:[%s25382_s11 + $0x704] ss:$68 sps:$4 sm:$0xff]  }
 0x2e4   : > { %15423 = vmatprep.subr.bf16.mxu0 %v22205_v17  ;;  %15810 = vmatprep.subr.bf16.mxu1 %v22208_v18  ;;  %v22269_v17 = vld [vmem:[%s25382_s11 + $0x6f8] ss:$68 sps:$4 sm:$0xff]   ;;  %v22272_v18 = vld [vmem:[%s25382_s11 + $0x700] ss:$68 sps:$4 sm:$0xff]  }
 0x2e7   : > { %15424 = vmatpush1.bf16.msra.mxu0 %v22203_v19  ;;  %15811 = vmatpush1.bf16.msra.mxu1 %v22206_v20  ;;  %v22277_v19 = vld [vmem:[%s25382_s11 + $0x784] ss:$68 sps:$4 sm:$0xff]   ;;  %v22280_v20 = vld [vmem:[%s25382_s11 + $0x78c] ss:$68 sps:$4 sm:$0xff]  }
 0x2e8   : > { %15425 = vmatprep.subr.bf16.mxu0 %v22211_v21  ;;  %15812 = vmatprep.subr.bf16.mxu1 %v22214_v22  ;;  %v22275_v21 = vld [vmem:[%s25382_s11 + $0x780] ss:$68 sps:$4 sm:$0xff]   ;;  %v22278_v22 = vld [vmem:[%s25382_s11 + $0x788] ss:$68 sps:$4 sm:$0xff]  }
 0x2eb   : > { %15426 = vmatpush1.bf16.msra.mxu0 %v22209_v25  ;;  %15813 = vmatpush1.bf16.msra.mxu1 %v22212_v26  ;;  %v22283_v25 = vld [vmem:[%s25382_s11 + $0x80c] ss:$68 sps:$4 sm:$0xff]   ;;  %v22286_v26 = vld [vmem:[%s25382_s11 + $0x814] ss:$68 sps:$4 sm:$0xff]  }
 0x2ec   : > { %15427 = vmatprep.subr.bf16.mxu0 %v22217_v27  ;;  %15814 = vmatprep.subr.bf16.mxu1 %v22220_v29  ;;  %v22281_v27 = vld [vmem:[%s25382_s11 + $0x808] ss:$68 sps:$4 sm:$0xff]   ;;  %v22284_v29 = vld [vmem:[%s25382_s11 + $0x810] ss:$68 sps:$4 sm:$0xff]  }
 0x2ef   : > { %15428 = vmatpush1.bf16.msra.mxu0 %v22215_v30  ;;  %15815 = vmatpush1.bf16.msra.mxu1 %v22218_v31  ;;  %v22289_v30 = vld [vmem:[%s25382_s11 + $0x894] ss:$68 sps:$4 sm:$0xff]   ;;  %v22292_v31 = vld [vmem:[%s25382_s11 + $0x89c] ss:$68 sps:$4 sm:$0xff]  }
 0x2f0   : > { %15429 = vmatprep.subr.bf16.mxu0 %v22223_v32  ;;  %15816 = vmatprep.subr.bf16.mxu1 %v22226_v33  ;;  %v22287_v32 = vld [vmem:[%s25382_s11 + $0x890] ss:$68 sps:$4 sm:$0xff]   ;;  %v22290_v33 = vld [vmem:[%s25382_s11 + $0x898] ss:$68 sps:$4 sm:$0xff]  }
 0x2f3   : > { %15430 = vmatpush1.bf16.msra.mxu0 %v22221_v35  ;;  %15817 = vmatpush1.bf16.msra.mxu1 %v22224_v36  ;;  %v22295_v35 = vld [vmem:[%s25382_s11 + $0x91c] ss:$68 sps:$4 sm:$0xff]   ;;  %v22298_v36 = vld [vmem:[%s25382_s11 + $0x924] ss:$68 sps:$4 sm:$0xff]  }
 0x2f4   : > { %15431 = vmatprep.subr.bf16.mxu0 %v22229_v37  ;;  %15818 = vmatprep.subr.bf16.mxu1 %v22232_v39  ;;  %v22293_v37 = vld [vmem:[%s25382_s11 + $0x918] ss:$68 sps:$4 sm:$0xff]   ;;  %v22296_v39 = vld [vmem:[%s25382_s11 + $0x920] ss:$68 sps:$4 sm:$0xff]  }
 0x2f7   : > { %15432 = vmatpush1.bf16.msra.mxu0 %v22227_v40  ;;  %15819 = vmatpush1.bf16.msra.mxu1 %v22230_v42  ;;  %v22301_v40 = vld [vmem:[%s25382_s11 + $0x9a4] ss:$68 sps:$4 sm:$0xff]   ;;  %v22304_v42 = vld [vmem:[%s25382_s11 + $0x9ac] ss:$68 sps:$4 sm:$0xff]  }
 0x2f8   : > { %15433 = vmatprep.subr.bf16.mxu0 %v22235_v43  ;;  %15820 = vmatprep.subr.bf16.mxu1 %v22238_v44  ;;  %v22299_v43 = vld [vmem:[%s25382_s11 + $0x9a0] ss:$68 sps:$4 sm:$0xff]   ;;  %v22302_v44 = vld [vmem:[%s25382_s11 + $0x9a8] ss:$68 sps:$4 sm:$0xff]  }
 0x2fb   : > { %15434 = vmatpush1.bf16.msra.mxu0 %v22233_v45  ;;  %15821 = vmatpush1.bf16.msra.mxu1 %v22236_v48  ;;  %v22307_v45 = vld [vmem:[%s25382_s11 + $0xa2c] ss:$68 sps:$4 sm:$0xff]   ;;  %v22310_v48 = vld [vmem:[%s25382_s11 + $0xa34] ss:$68 sps:$4 sm:$0xff]  }
 0x2fc   : > { %15435 = vmatprep.subr.bf16.mxu0 %v22241_v49  ;;  %15822 = vmatprep.subr.bf16.mxu1 %v22244_v50  ;;  %v22305_v49 = vld [vmem:[%s25382_s11 + $0xa28] ss:$68 sps:$4 sm:$0xff]   ;;  %v22308_v50 = vld [vmem:[%s25382_s11 + $0xa30] ss:$68 sps:$4 sm:$0xff]  }
 0x2ff   : > { %15436 = vmatpush1.bf16.msra.mxu0 %v22239_v51  ;;  %15823 = vmatpush1.bf16.msra.mxu1 %v22242_v52  ;;  %v22313_v51 = vld [vmem:[%s25382_s11 + $0xab4] ss:$68 sps:$4 sm:$0xff]   ;;  %v22316_v52 = vld [vmem:[%s25382_s11 + $0xabc] ss:$68 sps:$4 sm:$0xff]  }
 0x300   : > { %15437 = vmatprep.subr.bf16.mxu0 %v22247_v54  ;;  %15824 = vmatprep.subr.bf16.mxu1 %v22250_v55  ;;  %v22311_v54 = vld [vmem:[%s25382_s11 + $0xab0] ss:$68 sps:$4 sm:$0xff]   ;;  %v22314_v55 = vld [vmem:[%s25382_s11 + $0xab8] ss:$68 sps:$4 sm:$0xff]  }
 0x303   : > { %15438 = vmatpush1.bf16.msra.mxu0 %v22245_v56  ;;  %15825 = vmatpush1.bf16.msra.mxu1 %v22248_v58  ;;  %v22319_v56 = vld [vmem:[%s25382_s11 + $0xb3c] ss:$68 sps:$4 sm:$0xff]   ;;  %v22322_v58 = vld [vmem:[%s25382_s11 + $0xb44] ss:$68 sps:$4 sm:$0xff]  }
 0x304   : > { %15439 = vmatprep.subr.bf16.mxu0 %v22253_v59  ;;  %15826 = vmatprep.subr.bf16.mxu1 %v22256_v60  ;;  %v22317_v59 = vld [vmem:[%s25382_s11 + $0xb38] ss:$68 sps:$4 sm:$0xff]   ;;  %v22320_v60 = vld [vmem:[%s25382_s11 + $0xb40] ss:$68 sps:$4 sm:$0xff]  }
 0x307   : > { %15440 = vmatpush1.bf16.msra.mxu0 %v22251_v61  ;;  %15827 = vmatpush1.bf16.msra.mxu1 %v22254_v63  ;;  %v22325_v61 = vld [vmem:[%s25382_s11 + $0xbc4] ss:$68 sps:$4 sm:$0xff]   ;;  %v22328_v63 = vld [vmem:[%s25382_s11 + $0xbcc] ss:$68 sps:$4 sm:$0xff]  }
 0x308   : > { %15441 = vmatprep.subr.bf16.mxu0 %v22259_v2  ;;  %15828 = vmatprep.subr.bf16.mxu1 %v22262_v3  ;;  %v22323_v2 = vld [vmem:[%s25382_s11 + $0xbc0] ss:$68 sps:$4 sm:$0xff]   ;;  %v22326_v3 = vld [vmem:[%s25382_s11 + $0xbc8] ss:$68 sps:$4 sm:$0xff]  }
 0x30b   : > { %15442 = vmatpush1.bf16.msra.mxu0 %v22257_v4  ;;  %15829 = vmatpush1.bf16.msra.mxu1 %v22260_v5  ;;  %v22331_v4 = vld [vmem:[%s25382_s11 + $0xc4c] ss:$68 sps:$4 sm:$0xff]   ;;  %v22334_v5 = vld [vmem:[%s25382_s11 + $0xc54] ss:$68 sps:$4 sm:$0xff]  }
 0x30c   : > { %15443 = vmatprep.subr.bf16.mxu0 %v22265_v9  ;;  %15830 = vmatprep.subr.bf16.mxu1 %v22268_v10  ;;  %v22329_v9 = vld [vmem:[%s25382_s11 + $0xc48] ss:$68 sps:$4 sm:$0xff]   ;;  %v22332_v10 = vld [vmem:[%s25382_s11 + $0xc50] ss:$68 sps:$4 sm:$0xff]  }
 0x30f   : > { %15444 = vmatpush1.bf16.msra.mxu0 %v22263_v11  ;;  %15831 = vmatpush1.bf16.msra.mxu1 %v22266_v13  ;;  %v22337_v11 = vld [vmem:[%s25382_s11 + $0xcd4] ss:$68 sps:$4 sm:$0xff]   ;;  %v22340_v13 = vld [vmem:[%s25382_s11 + $0xcdc] ss:$68 sps:$4 sm:$0xff]  }
 0x310   : > { %15445 = vmatprep.subr.bf16.mxu0 %v22271_v14  ;;  %15832 = vmatprep.subr.bf16.mxu1 %v22274_v16  ;;  %v22335_v14 = vld [vmem:[%s25382_s11 + $0xcd0] ss:$68 sps:$4 sm:$0xff]   ;;  %v22338_v16 = vld [vmem:[%s25382_s11 + $0xcd8] ss:$68 sps:$4 sm:$0xff]  }
 0x313   : > { %15446 = vmatpush1.bf16.msra.mxu0 %v22269_v17  ;;  %15833 = vmatpush1.bf16.msra.mxu1 %v22272_v18  ;;  %v22343_v17 = vld [vmem:[%s25382_s11 + $0xd5c] ss:$68 sps:$4 sm:$0xff]   ;;  %v22346_v18 = vld [vmem:[%s25382_s11 + $0xd64] ss:$68 sps:$4 sm:$0xff]  }
 0x314   : > { %15447 = vmatprep.subr.bf16.mxu0 %v22277_v19  ;;  %15834 = vmatprep.subr.bf16.mxu1 %v22280_v20  ;;  %v22341_v19 = vld [vmem:[%s25382_s11 + $0xd58] ss:$68 sps:$4 sm:$0xff]   ;;  %v22344_v20 = vld [vmem:[%s25382_s11 + $0xd60] ss:$68 sps:$4 sm:$0xff]  }
 0x317   : > { %15448 = vmatpush1.bf16.msra.mxu0 %v22275_v21  ;;  %15835 = vmatpush1.bf16.msra.mxu1 %v22278_v22  ;;  %v22349_v21 = vld [vmem:[%s25382_s11 + $0xde4] ss:$68 sps:$4 sm:$0xff]   ;;  %v22352_v22 = vld [vmem:[%s25382_s11 + $0xdec] ss:$68 sps:$4 sm:$0xff]  }
 0x318   : > { %15449 = vmatprep.subr.bf16.mxu0 %v22283_v25  ;;  %15836 = vmatprep.subr.bf16.mxu1 %v22286_v26  ;;  %v22347_v25 = vld [vmem:[%s25382_s11 + $0xde0] ss:$68 sps:$4 sm:$0xff]   ;;  %v22350_v26 = vld [vmem:[%s25382_s11 + $0xde8] ss:$68 sps:$4 sm:$0xff]  }
 0x31b   : > { %15450 = vmatpush1.bf16.msra.mxu0 %v22281_v27  ;;  %15837 = vmatpush1.bf16.msra.mxu1 %v22284_v29  ;;  %v22355_v27 = vld [vmem:[%s25382_s11 + $0xe6c] ss:$68 sps:$4 sm:$0xff]   ;;  %v22358_v29 = vld [vmem:[%s25382_s11 + $0xe74] ss:$68 sps:$4 sm:$0xff]  }
 0x31c   : > { %15462 = vmatprep.subr.bf16.mxu0 %v22289_v30  ;;  %15849 = vmatprep.subr.bf16.mxu1 %v22292_v31  ;;  %v22353_v30 = vld [vmem:[%s25382_s11 + $0xe68] ss:$68 sps:$4 sm:$0xff]   ;;  %v22356_v31 = vld [vmem:[%s25382_s11 + $0xe70] ss:$68 sps:$4 sm:$0xff]  }
 0x31e   : > { %15452 = vmatmul.mubr.bf16.vlgmr.msra.gmra.mrb[4].mxu0 %v25510_v38  ;;  %15839 = vmatmul.mubr.bf16.vlgmr.msra.gmra.mrb[4].mxu1 %v25510_v38 }
 0x31f   : > { %15463 = vmatpush1.bf16.msra.mxu0 %v22287_v32  ;;  %15850 = vmatpush1.bf16.msra.mxu1 %v22290_v33  ;;  %v22361_v32 = vld [vmem:[%s25382_s11 + $0xef4] ss:$68 sps:$4 sm:$0xff]   ;;  %v22364_v33 = vld [vmem:[%s25382_s11 + $0xefc] ss:$68 sps:$4 sm:$0xff]  }
 0x320   : > { %15464 = vmatprep.subr.bf16.mxu0 %v22295_v35  ;;  %15851 = vmatprep.subr.bf16.mxu1 %v22298_v36  ;;  %v22359_v35 = vld [vmem:[%s25382_s11 + $0xef0] ss:$68 sps:$4 sm:$0xff]   ;;  %v22362_v36 = vld [vmem:[%s25382_s11 + $0xef8] ss:$68 sps:$4 sm:$0xff]  }
 0x321   : > { %15494 = vmatprep.mubr.bf16.mxu0 %v25540_v1  ;;  %15881 = vmatprep.mubr.bf16.mxu1 %v25540_v1 }
 0x323   : > { %15465 = vmatpush1.bf16.msra.mxu0 %v22293_v37  ;;  %15852 = vmatpush1.bf16.msra.mxu1 %v22296_v39  ;;  %v22367_v37 = vld [vmem:[%s25382_s11 + $0xf7c] ss:$68 sps:$4 sm:$0xff]   ;;  %v22370_v39 = vld [vmem:[%s25382_s11 + $0xf84] ss:$68 sps:$4 sm:$0xff]  }
 0x324   : > { %15466 = vmatprep.subr.bf16.mxu0 %v22301_v40  ;;  %15853 = vmatprep.subr.bf16.mxu1 %v22304_v42  ;;  %v22365_v40 = vld [vmem:[%s25382_s11 + $0xf78] ss:$68 sps:$4 sm:$0xff]   ;;  %v22368_v42 = vld [vmem:[%s25382_s11 + $0xf80] ss:$68 sps:$4 sm:$0xff]  }
 0x327   : > { %15467 = vmatpush1.bf16.msra.mxu0 %v22299_v43  ;;  %15854 = vmatpush1.bf16.msra.mxu1 %v22302_v44  ;;  %v22373_v43 = vld [vmem:[%s25382_s11 + $0x1004] ss:$68 sps:$4 sm:$0xff]   ;;  %v22376_v44 = vld [vmem:[%s25382_s11 + $0x100c] ss:$68 sps:$4 sm:$0xff]  }
 0x328   : > { %15468 = vmatprep.subr.bf16.mxu0 %v22307_v45  ;;  %15855 = vmatprep.subr.bf16.mxu1 %v22310_v48  ;;  %v22371_v45 = vld [vmem:[%s25382_s11 + $0x1000] ss:$68 sps:$4 sm:$0xff]   ;;  %v22374_v48 = vld [vmem:[%s25382_s11 + $0x1008] ss:$68 sps:$4 sm:$0xff]  }
 0x32b   : > { %15469 = vmatpush1.bf16.msra.mxu0 %v22305_v49  ;;  %15856 = vmatpush1.bf16.msra.mxu1 %v22308_v50  ;;  %v22379_v49 = vld [vmem:[%s25382_s11 + $0x108c] ss:$68 sps:$4 sm:$0xff]   ;;  %v22382_v50 = vld [vmem:[%s25382_s11 + $0x1094] ss:$68 sps:$4 sm:$0xff]  }
 0x32c   : > { %15470 = vmatprep.subr.bf16.mxu0 %v22313_v51  ;;  %15857 = vmatprep.subr.bf16.mxu1 %v22316_v52  ;;  %v22377_v51 = vld [vmem:[%s25382_s11 + $0x1088] ss:$68 sps:$4 sm:$0xff]   ;;  %v22380_v52 = vld [vmem:[%s25382_s11 + $0x1090] ss:$68 sps:$4 sm:$0xff]  }
 0x32f   : > { %15471 = vmatpush1.bf16.msra.mxu0 %v22311_v54  ;;  %15858 = vmatpush1.bf16.msra.mxu1 %v22314_v55  ;;  %v22385_v54 = vld [vmem:[%s25382_s11 + $0x1114] ss:$68 sps:$4 sm:$0xff]   ;;  %v22388_v55 = vld [vmem:[%s25382_s11 + $0x111c] ss:$68 sps:$4 sm:$0xff]  }
 0x330   : > { %15472 = vmatprep.subr.bf16.mxu0 %v22319_v56  ;;  %15859 = vmatprep.subr.bf16.mxu1 %v22322_v58  ;;  %v22383_v56 = vld [vmem:[%s25382_s11 + $0x1110] ss:$68 sps:$4 sm:$0xff]   ;;  %v22386_v58 = vld [vmem:[%s25382_s11 + $0x1118] ss:$68 sps:$4 sm:$0xff]  }
 0x333   : > { %15473 = vmatpush1.bf16.msra.mxu0 %v22317_v59  ;;  %15860 = vmatpush1.bf16.msra.mxu1 %v22320_v60  ;;  %v22391_v59 = vld [vmem:[%s25382_s11 + $0x119c] ss:$68 sps:$4 sm:$0xff]   ;;  %v22394_v60 = vld [vmem:[%s25382_s11 + $0x11a4] ss:$68 sps:$4 sm:$0xff]  }
 0x334   : > { %15474 = vmatprep.subr.bf16.mxu0 %v22325_v61  ;;  %15861 = vmatprep.subr.bf16.mxu1 %v22328_v63  ;;  %v22389_v61 = vld [vmem:[%s25382_s11 + $0x1198] ss:$68 sps:$4 sm:$0xff]   ;;  %v22392_v63 = vld [vmem:[%s25382_s11 + $0x11a0] ss:$68 sps:$4 sm:$0xff]  }
 0x337   : > { %15475 = vmatpush1.bf16.msra.mxu0 %v22323_v2  ;;  %15862 = vmatpush1.bf16.msra.mxu1 %v22326_v3  ;;  %v22397_v2 = vld [vmem:[%s25382_s11 + $0x1224] ss:$68 sps:$4 sm:$0xff]   ;;  %v22400_v3 = vld [vmem:[%s25382_s11 + $0x122c] ss:$68 sps:$4 sm:$0xff]  }
 0x338   : > { %15476 = vmatprep.subr.bf16.mxu0 %v22331_v4  ;;  %15863 = vmatprep.subr.bf16.mxu1 %v22334_v5  ;;  %v22395_v4 = vld [vmem:[%s25382_s11 + $0x1220] ss:$68 sps:$4 sm:$0xff]   ;;  %v22398_v5 = vld [vmem:[%s25382_s11 + $0x1228] ss:$68 sps:$4 sm:$0xff]  }
 0x33b   : > { %15477 = vmatpush1.bf16.msra.mxu0 %v22329_v9  ;;  %15864 = vmatpush1.bf16.msra.mxu1 %v22332_v10  ;;  %v22403_v9 = vld [vmem:[%s25382_s11 + $0x12ac] ss:$68 sps:$4 sm:$0xff]   ;;  %v22406_v10 = vld [vmem:[%s25382_s11 + $0x12b4] ss:$68 sps:$4 sm:$0xff]  }
 0x33c   : > { %15478 = vmatprep.subr.bf16.mxu0 %v22337_v11  ;;  %15865 = vmatprep.subr.bf16.mxu1 %v22340_v13  ;;  %v22401_v11 = vld [vmem:[%s25382_s11 + $0x12a8] ss:$68 sps:$4 sm:$0xff]   ;;  %v22404_v13 = vld [vmem:[%s25382_s11 + $0x12b0] ss:$68 sps:$4 sm:$0xff]  }
 0x33f   : > { %15479 = vmatpush1.bf16.msra.mxu0 %v22335_v14  ;;  %15866 = vmatpush1.bf16.msra.mxu1 %v22338_v16  ;;  %v22409_v14 = vld [vmem:[%s25382_s11 + $0x1334] ss:$68 sps:$4 sm:$0xff]   ;;  %v22412_v16 = vld [vmem:[%s25382_s11 + $0x133c] ss:$68 sps:$4 sm:$0xff]  }
 0x340   : > { %15480 = vmatprep.subr.bf16.mxu0 %v22343_v17  ;;  %15867 = vmatprep.subr.bf16.mxu1 %v22346_v18  ;;  %v22407_v17 = vld [vmem:[%s25382_s11 + $0x1330] ss:$68 sps:$4 sm:$0xff]   ;;  %v22410_v18 = vld [vmem:[%s25382_s11 + $0x1338] ss:$68 sps:$4 sm:$0xff]  }
 0x343   : > { %15481 = vmatpush1.bf16.msra.mxu0 %v22341_v19  ;;  %15868 = vmatpush1.bf16.msra.mxu1 %v22344_v20  ;;  %v22415_v19 = vld [vmem:[%s25382_s11 + $0x13bc] ss:$68 sps:$4 sm:$0xff]   ;;  %v22418_v20 = vld [vmem:[%s25382_s11 + $0x13c4] ss:$68 sps:$4 sm:$0xff]  }
 0x344   : > { %15482 = vmatprep.subr.bf16.mxu0 %v22349_v21  ;;  %15869 = vmatprep.subr.bf16.mxu1 %v22352_v22  ;;  %v22413_v21 = vld [vmem:[%s25382_s11 + $0x13b8] ss:$68 sps:$4 sm:$0xff]   ;;  %v22416_v22 = vld [vmem:[%s25382_s11 + $0x13c0] ss:$68 sps:$4 sm:$0xff]  }
 0x347   : > { %15483 = vmatpush1.bf16.msra.mxu0 %v22347_v25  ;;  %15870 = vmatpush1.bf16.msra.mxu1 %v22350_v26  ;;  %v22421_v25 = vld [vmem:[%s25382_s11 + $0x1444] ss:$68 sps:$4 sm:$0xff]   ;;  %v22424_v26 = vld [vmem:[%s25382_s11 + $0x144c] ss:$68 sps:$4 sm:$0xff]  }
 0x348   : > { %15484 = vmatprep.subr.bf16.mxu0 %v22355_v27  ;;  %15871 = vmatprep.subr.bf16.mxu1 %v22358_v29  ;;  %v22419_v27 = vld [vmem:[%s25382_s11 + $0x1440] ss:$68 sps:$4 sm:$0xff]   ;;  %v22422_v29 = vld [vmem:[%s25382_s11 + $0x1448] ss:$68 sps:$4 sm:$0xff]  }
 0x34b   : > { %15485 = vmatpush1.bf16.msra.mxu0 %v22353_v30  ;;  %15872 = vmatpush1.bf16.msra.mxu1 %v22356_v31  ;;  %v22427_v30 = vld [vmem:[%s25382_s11 + $0x14cc] ss:$68 sps:$4 sm:$0xff]   ;;  %v22430_v31 = vld [vmem:[%s25382_s11 + $0x14d4] ss:$68 sps:$4 sm:$0xff]  }
 0x34c   : > { %15486 = vmatprep.subr.bf16.mxu0 %v22361_v32  ;;  %15873 = vmatprep.subr.bf16.mxu1 %v22364_v33  ;;  %v22425_v32 = vld [vmem:[%s25382_s11 + $0x14c8] ss:$68 sps:$4 sm:$0xff]   ;;  %v22428_v33 = vld [vmem:[%s25382_s11 + $0x14d0] ss:$68 sps:$4 sm:$0xff]  }
 0x34f   : > { %15487 = vmatpush1.bf16.msra.mxu0 %v22359_v35  ;;  %15874 = vmatpush1.bf16.msra.mxu1 %v22362_v36  ;;  %v22433_v35 = vld [vmem:[%s25382_s11 + $0x1554] ss:$68 sps:$4 sm:$0xff]   ;;  %v22436_v36 = vld [vmem:[%s25382_s11 + $0x155c] ss:$68 sps:$4 sm:$0xff]  }
 0x350   : > { %15488 = vmatprep.subr.bf16.mxu0 %v22367_v37  ;;  %15875 = vmatprep.subr.bf16.mxu1 %v22370_v39  ;;  %v22431_v37 = vld [vmem:[%s25382_s11 + $0x1550] ss:$68 sps:$4 sm:$0xff]   ;;  %v22434_v39 = vld [vmem:[%s25382_s11 + $0x1558] ss:$68 sps:$4 sm:$0xff]  }
 0x353   : > { %15489 = vmatpush1.bf16.msra.mxu0 %v22365_v40  ;;  %15876 = vmatpush1.bf16.msra.mxu1 %v22368_v42  ;;  %v22439_v40 = vld [vmem:[%s25382_s11 + $0x15dc] ss:$68 sps:$4 sm:$0xff]   ;;  %v22442_v42 = vld [vmem:[%s25382_s11 + $0x15e4] ss:$68 sps:$4 sm:$0xff]  }
 0x354   : > { %15490 = vmatprep.subr.bf16.mxu0 %v22373_v43  ;;  %15877 = vmatprep.subr.bf16.mxu1 %v22376_v44  ;;  %v22437_v43 = vld [vmem:[%s25382_s11 + $0x15d8] ss:$68 sps:$4 sm:$0xff]   ;;  %v22440_v44 = vld [vmem:[%s25382_s11 + $0x15e0] ss:$68 sps:$4 sm:$0xff]  }
 0x357   : > { %15491 = vmatpush1.bf16.msra.mxu0 %v22371_v45  ;;  %15878 = vmatpush1.bf16.msra.mxu1 %v22374_v48  ;;  %v22445_v45 = vld [vmem:[%s25382_s11 + $0x1664] ss:$68 sps:$4 sm:$0xff]   ;;  %v22448_v48 = vld [vmem:[%s25382_s11 + $0x166c] ss:$68 sps:$4 sm:$0xff]  }
 0x358   : > { %15492 = vmatprep.subr.bf16.mxu0 %v22379_v49  ;;  %15879 = vmatprep.subr.bf16.mxu1 %v22382_v50  ;;  %v22443_v49 = vld [vmem:[%s25382_s11 + $0x1660] ss:$68 sps:$4 sm:$0xff]   ;;  %v22446_v50 = vld [vmem:[%s25382_s11 + $0x1668] ss:$68 sps:$4 sm:$0xff]  }
 0x35b   : > { %15493 = vmatpush1.bf16.msra.mxu0 %v22377_v51  ;;  %15880 = vmatpush1.bf16.msra.mxu1 %v22380_v52  ;;  %v22451_v51 = vld [vmem:[%s25382_s11 + $0x16ec] ss:$68 sps:$4 sm:$0xff]   ;;  %v22454_v52 = vld [vmem:[%s25382_s11 + $0x16f4] ss:$68 sps:$4 sm:$0xff]  }
 0x35c   : > { %15505 = vmatprep.subr.bf16.mxu0 %v22385_v54  ;;  %15892 = vmatprep.subr.bf16.mxu1 %v22388_v55  ;;  %v22449_v54 = vld [vmem:[%s25382_s11 + $0x16e8] ss:$68 sps:$4 sm:$0xff]   ;;  %v22452_v55 = vld [vmem:[%s25382_s11 + $0x16f0] ss:$68 sps:$4 sm:$0xff]  }
 0x35e   : > { %15495 = vmatmul.mubr.bf16.vlgmr.msra.gmra.mrb[4].mxu0 %v25586_v46  ;;  %15882 = vmatmul.mubr.bf16.vlgmr.msra.gmra.mrb[4].mxu1 %v25586_v46 }
 0x35f   : > { %15506 = vmatpush1.bf16.msra.mxu0 %v22383_v56  ;;  %15893 = vmatpush1.bf16.msra.mxu1 %v22386_v58  ;;  %v22457_v56 = vld [vmem:[%s25382_s11 + $0x1774] ss:$68 sps:$4 sm:$0xff]   ;;  %v22460_v58 = vld [vmem:[%s25382_s11 + $0x177c] ss:$68 sps:$4 sm:$0xff]  }
 0x360   : > { %15507 = vmatprep.subr.bf16.mxu0 %v22391_v59  ;;  %15894 = vmatprep.subr.bf16.mxu1 %v22394_v60  ;;  %v22455_v59 = vld [vmem:[%s25382_s11 + $0x1770] ss:$68 sps:$4 sm:$0xff]   ;;  %v22458_v60 = vld [vmem:[%s25382_s11 + $0x1778] ss:$68 sps:$4 sm:$0xff]  }
 0x361   : > { %15537 = vmatprep.mubr.bf16.mxu0 %v25596_v53  ;;  %15924 = vmatprep.mubr.bf16.mxu1 %v25596_v53 }
 0x363   : > { %15508 = vmatpush1.bf16.msra.mxu0 %v22389_v61  ;;  %15895 = vmatpush1.bf16.msra.mxu1 %v22392_v63  ;;  %v22463_v61 = vld [vmem:[%s25382_s11 + $0x17fc] ss:$68 sps:$4 sm:$0xff]   ;;  %v22466_v63 = vld [vmem:[%s25382_s11 + $0x1804] ss:$68 sps:$4 sm:$0xff]  }
 0x364   : > { %15509 = vmatprep.subr.bf16.mxu0 %v22397_v2  ;;  %15896 = vmatprep.subr.bf16.mxu1 %v22400_v3  ;;  %v22461_v2 = vld [vmem:[%s25382_s11 + $0x17f8] ss:$68 sps:$4 sm:$0xff]   ;;  %v22464_v3 = vld [vmem:[%s25382_s11 + $0x1800] ss:$68 sps:$4 sm:$0xff]  }
 0x367   : > { %15510 = vmatpush1.bf16.msra.mxu0 %v22395_v4  ;;  %15897 = vmatpush1.bf16.msra.mxu1 %v22398_v5  ;;  %v22469_v4 = vld [vmem:[%s25382_s11 + $0x1884] ss:$68 sps:$4 sm:$0xff]   ;;  %v22472_v5 = vld [vmem:[%s25382_s11 + $0x188c] ss:$68 sps:$4 sm:$0xff]  }
 0x368   : > { %15511 = vmatprep.subr.bf16.mxu0 %v22403_v9  ;;  %15898 = vmatprep.subr.bf16.mxu1 %v22406_v10  ;;  %v22467_v9 = vld [vmem:[%s25382_s11 + $0x1880] ss:$68 sps:$4 sm:$0xff]   ;;  %v22470_v10 = vld [vmem:[%s25382_s11 + $0x1888] ss:$68 sps:$4 sm:$0xff]  }
 0x36b   : > { %15512 = vmatpush1.bf16.msra.mxu0 %v22401_v11  ;;  %15899 = vmatpush1.bf16.msra.mxu1 %v22404_v13  ;;  %v22475_v11 = vld [vmem:[%s25382_s11 + $0x190c] ss:$68 sps:$4 sm:$0xff]   ;;  %v22478_v13 = vld [vmem:[%s25382_s11 + $0x1914] ss:$68 sps:$4 sm:$0xff]  }
 0x36c   : > { %15513 = vmatprep.subr.bf16.mxu0 %v22409_v14  ;;  %15900 = vmatprep.subr.bf16.mxu1 %v22412_v16  ;;  %v22473_v14 = vld [vmem:[%s25382_s11 + $0x1908] ss:$68 sps:$4 sm:$0xff]   ;;  %v22476_v16 = vld [vmem:[%s25382_s11 + $0x1910] ss:$68 sps:$4 sm:$0xff]  }
 0x36f   : > { %15514 = vmatpush1.bf16.msra.mxu0 %v22407_v17  ;;  %15901 = vmatpush1.bf16.msra.mxu1 %v22410_v18  ;;  %v22481_v17 = vld [vmem:[%s25382_s11 + $0x1994] ss:$68 sps:$4 sm:$0xff]   ;;  %v22484_v18 = vld [vmem:[%s25382_s11 + $0x199c] ss:$68 sps:$4 sm:$0xff]  }
 0x370   : > { %15515 = vmatprep.subr.bf16.mxu0 %v22415_v19  ;;  %15902 = vmatprep.subr.bf16.mxu1 %v22418_v20  ;;  %v22479_v19 = vld [vmem:[%s25382_s11 + $0x1990] ss:$68 sps:$4 sm:$0xff]   ;;  %v22482_v20 = vld [vmem:[%s25382_s11 + $0x1998] ss:$68 sps:$4 sm:$0xff]  }
 0x373   : > { %15516 = vmatpush1.bf16.msra.mxu0 %v22413_v21  ;;  %15903 = vmatpush1.bf16.msra.mxu1 %v22416_v22  ;;  %v22487_v21 = vld [vmem:[%s25382_s11 + $0x1a1c] ss:$68 sps:$4 sm:$0xff]   ;;  %v22490_v22 = vld [vmem:[%s25382_s11 + $0x1a24] ss:$68 sps:$4 sm:$0xff]  }
 0x374   : > { %15517 = vmatprep.subr.bf16.mxu0 %v22421_v25  ;;  %15904 = vmatprep.subr.bf16.mxu1 %v22424_v26  ;;  %v22485_v25 = vld [vmem:[%s25382_s11 + $0x1a18] ss:$68 sps:$4 sm:$0xff]   ;;  %v22488_v26 = vld [vmem:[%s25382_s11 + $0x1a20] ss:$68 sps:$4 sm:$0xff]  }
 0x377   : > { %15518 = vmatpush1.bf16.msra.mxu0 %v22419_v27  ;;  %15905 = vmatpush1.bf16.msra.mxu1 %v22422_v29  ;;  %v22493_v27 = vld [vmem:[%s25382_s11 + $0x1aa4] ss:$68 sps:$4 sm:$0xff]   ;;  %v22496_v29 = vld [vmem:[%s25382_s11 + $0x1aac] ss:$68 sps:$4 sm:$0xff]  }
 0x378   : > { %15519 = vmatprep.subr.bf16.mxu0 %v22427_v30  ;;  %15906 = vmatprep.subr.bf16.mxu1 %v22430_v31  ;;  %v22491_v30 = vld [vmem:[%s25382_s11 + $0x1aa0] ss:$68 sps:$4 sm:$0xff]   ;;  %v22494_v31 = vld [vmem:[%s25382_s11 + $0x1aa8] ss:$68 sps:$4 sm:$0xff]  }
 0x37b   : > { %15520 = vmatpush1.bf16.msra.mxu0 %v22425_v32  ;;  %15907 = vmatpush1.bf16.msra.mxu1 %v22428_v33  ;;  %v22499_v32 = vld [vmem:[%s25382_s11 + $0x1b2c] ss:$68 sps:$4 sm:$0xff]   ;;  %v22502_v33 = vld [vmem:[%s25382_s11 + $0x1b34] ss:$68 sps:$4 sm:$0xff]  }
 0x37c   : > { %15521 = vmatprep.subr.bf16.mxu0 %v22433_v35  ;;  %15908 = vmatprep.subr.bf16.mxu1 %v22436_v36  ;;  %v22497_v35 = vld [vmem:[%s25382_s11 + $0x1b28] ss:$68 sps:$4 sm:$0xff]   ;;  %v22500_v36 = vld [vmem:[%s25382_s11 + $0x1b30] ss:$68 sps:$4 sm:$0xff]  }
 0x37f   : > { %15522 = vmatpush1.bf16.msra.mxu0 %v22431_v37  ;;  %15909 = vmatpush1.bf16.msra.mxu1 %v22434_v39  ;;  %v22505_v37 = vld [vmem:[%s25382_s11 + $0x1bb4] ss:$68 sps:$4 sm:$0xff]   ;;  %v22508_v39 = vld [vmem:[%s25382_s11 + $0x1bbc] ss:$68 sps:$4 sm:$0xff]  }
 0x380   : > { %15523 = vmatprep.subr.bf16.mxu0 %v22439_v40  ;;  %15910 = vmatprep.subr.bf16.mxu1 %v22442_v42  ;;  %v22503_v40 = vld [vmem:[%s25382_s11 + $0x1bb0] ss:$68 sps:$4 sm:$0xff]   ;;  %v22506_v42 = vld [vmem:[%s25382_s11 + $0x1bb8] ss:$68 sps:$4 sm:$0xff]  }
 0x383   : > { %15524 = vmatpush1.bf16.msra.mxu0 %v22437_v43  ;;  %15911 = vmatpush1.bf16.msra.mxu1 %v22440_v44  ;;  %v22511_v43 = vld [vmem:[%s25382_s11 + $0x1c3c] ss:$68 sps:$4 sm:$0xff]   ;;  %v22514_v44 = vld [vmem:[%s25382_s11 + $0x1c44] ss:$68 sps:$4 sm:$0xff]  }
 0x384   : > { %15525 = vmatprep.subr.bf16.mxu0 %v22445_v45  ;;  %15912 = vmatprep.subr.bf16.mxu1 %v22448_v48  ;;  %v416_v45 = vld [vmem:[%s25397_s28] sm:$0xff]  ;;  %v418_v48 = vld [vmem:[%s25397_s28 + $0x10] sm:$0xff] }
 0x387   : > { %15526 = vmatpush1.bf16.msra.mxu0 %v22443_v49  ;;  %15913 = vmatpush1.bf16.msra.mxu1 %v22446_v50  ;;  %v22509_v49 = vld [vmem:[%s25382_s11 + $0x1c38] ss:$68 sps:$4 sm:$0xff]   ;;  %v22512_v50 = vld [vmem:[%s25382_s11 + $0x1c40] ss:$68 sps:$4 sm:$0xff]  }
 0x388   : > { %15527 = vmatprep.subr.bf16.mxu0 %v22451_v51  ;;  %15914 = vmatprep.subr.bf16.mxu1 %v22454_v52  ;;  %v417_v51 = vld [vmem:[%s25397_s28 + $0x8] sm:$0xff]  ;;  %v419_v52 = vld [vmem:[%s25397_s28 + $0x18] sm:$0xff] }
 0x38b   : > { %15528 = vmatpush1.bf16.msra.mxu0 %v22449_v54  ;;  %15915 = vmatpush1.bf16.msra.mxu1 %v22452_v55  ;;  %v433_v54 = vld [vmem:[%s25397_s28 + $0x88] sm:$0xff]  ;;  %v435_v55 = vld [vmem:[%s25397_s28 + $0x98] sm:$0xff] }
 0x38c   : > { %15529 = vmatprep.subr.bf16.mxu0 %v22457_v56  ;;  %15916 = vmatprep.subr.bf16.mxu1 %v22460_v58  ;;  %v434_v56 = vld [vmem:[%s25397_s28 + $0x90] sm:$0xff]  ;;  %v436_v58 = vld [vmem:[%s25397_s28 + $0xa0] sm:$0xff] }
 0x38f   : > { %15530 = vmatpush1.bf16.msra.mxu0 %v22455_v59  ;;  %15917 = vmatpush1.bf16.msra.mxu1 %v22458_v60  ;;  %v22517_v59 = vld [vmem:[%s25382_s11 + $0x1cc4] ss:$68 sps:$4 sm:$0xff]   ;;  %v22520_v60 = vld [vmem:[%s25382_s11 + $0x1ccc] ss:$68 sps:$4 sm:$0xff]  }
 0x390   : > { %15531 = vmatprep.subr.bf16.mxu0 %v22463_v61  ;;  %15918 = vmatprep.subr.bf16.mxu1 %v22466_v63 }
 0x393   : > { %15532 = vmatpush1.bf16.msra.mxu0 %v22461_v2  ;;  %15919 = vmatpush1.bf16.msra.mxu1 %v22464_v3 }
 0x394   : > { %15533 = vmatprep.subr.bf16.mxu0 %v22469_v4  ;;  %15920 = vmatprep.subr.bf16.mxu1 %v22472_v5 }
 0x397   : > { %15534 = vmatpush1.bf16.msra.mxu0 %v22467_v9  ;;  %15921 = vmatpush1.bf16.msra.mxu1 %v22470_v10 }
 0x398   : > { %15535 = vmatprep.subr.bf16.mxu0 %v22475_v11  ;;  %15922 = vmatprep.subr.bf16.mxu1 %v22478_v13 }
 0x39b   : > { %15536 = vmatpush1.bf16.msra.mxu0 %v22473_v14  ;;  %15923 = vmatpush1.bf16.msra.mxu1 %v22476_v16  ;;  %v22515_v14 = vld [vmem:[%s25382_s11 + $0x1cc0] ss:$68 sps:$4 sm:$0xff]   ;;  %v22518_v16 = vld [vmem:[%s25382_s11 + $0x1cc8] ss:$68 sps:$4 sm:$0xff]  }
 0x39c   : > { %15548 = vmatprep.subr.bf16.mxu0 %v22481_v17  ;;  %15935 = vmatprep.subr.bf16.mxu1 %v22484_v18 }
 0x39e   : > { %15538 = vmatmul.mubr.bf16.vlgmr.msra.gmra.mrb[4].mxu0 %v25662_v57  ;;  %15925 = vmatmul.mubr.bf16.vlgmr.msra.gmra.mrb[4].mxu1 %v25662_v57 }
 0x39f   : > { %15549 = vmatpush1.bf16.msra.mxu0 %v22479_v19  ;;  %15936 = vmatpush1.bf16.msra.mxu1 %v22482_v20 }
 0x3a0   : > { %15550 = vmatprep.subr.bf16.mxu0 %v22487_v21  ;;  %15937 = vmatprep.subr.bf16.mxu1 %v22490_v22  ;;  %v22523_v21 = vld [vmem:[%s25382_s11 + $0x1d4c] ss:$68 sps:$4 sm:$0xff]   ;;  %v22526_v22 = vld [vmem:[%s25382_s11 + $0x1d54] ss:$68 sps:$4 sm:$0xff]  }
 0x3a1   : > { %15580 = vmatprep.mubr.bf16.mxu0 %v25668_v62  ;;  %15967 = vmatprep.mubr.bf16.mxu1 %v25668_v62 }
 0x3a3   : > { %15551 = vmatpush1.bf16.msra.mxu0 %v22485_v25  ;;  %15938 = vmatpush1.bf16.msra.mxu1 %v22488_v26 }
 0x3a4   : > { %15552 = vmatprep.subr.bf16.mxu0 %v22493_v27  ;;  %15939 = vmatprep.subr.bf16.mxu1 %v22496_v29  ;;  %v22521_v27 = vld [vmem:[%s25382_s11 + $0x1d48] ss:$68 sps:$4 sm:$0xff]   ;;  %v22524_v29 = vld [vmem:[%s25382_s11 + $0x1d50] ss:$68 sps:$4 sm:$0xff]  }
 0x3a7   : > { %15553 = vmatpush1.bf16.msra.mxu0 %v22491_v30  ;;  %15940 = vmatpush1.bf16.msra.mxu1 %v22494_v31  ;;  %v22529_v30 = vld [vmem:[%s25382_s11 + $0x1dd4] ss:$68 sps:$4 sm:$0xff]   ;;  %v22532_v31 = vld [vmem:[%s25382_s11 + $0x1ddc] ss:$68 sps:$4 sm:$0xff]  }
 0x3a8   : > { %15554 = vmatprep.subr.bf16.mxu0 %v22499_v32  ;;  %15941 = vmatprep.subr.bf16.mxu1 %v22502_v33  ;;  %v22527_v32 = vld [vmem:[%s25382_s11 + $0x1dd0] ss:$68 sps:$4 sm:$0xff]   ;;  %v22530_v33 = vld [vmem:[%s25382_s11 + $0x1dd8] ss:$68 sps:$4 sm:$0xff]  }
 0x3ab   : > { %15555 = vmatpush1.bf16.msra.mxu0 %v22497_v35  ;;  %15942 = vmatpush1.bf16.msra.mxu1 %v22500_v36  ;;  %v22535_v35 = vld [vmem:[%s25382_s11 + $0x1e5c] ss:$68 sps:$4 sm:$0xff]   ;;  %v22538_v36 = vld [vmem:[%s25382_s11 + $0x1e64] ss:$68 sps:$4 sm:$0xff]  }
 0x3ac   : > { %15556 = vmatprep.subr.bf16.mxu0 %v22505_v37  ;;  %15943 = vmatprep.subr.bf16.mxu1 %v22508_v39  ;;  %v22533_v37 = vld [vmem:[%s25382_s11 + $0x1e58] ss:$68 sps:$4 sm:$0xff]   ;;  %v22536_v39 = vld [vmem:[%s25382_s11 + $0x1e60] ss:$68 sps:$4 sm:$0xff]  }
 0x3af   : > { %15557 = vmatpush1.bf16.msra.mxu0 %v22503_v40  ;;  %15944 = vmatpush1.bf16.msra.mxu1 %v22506_v42  ;;  %v22541_v40 = vld [vmem:[%s25382_s11 + $0x1ee4] ss:$68 sps:$4 sm:$0xff]   ;;  %v22544_v42 = vld [vmem:[%s25382_s11 + $0x1eec] ss:$68 sps:$4 sm:$0xff]  }
 0x3b0   : > { %15558 = vmatprep.subr.bf16.mxu0 %v22511_v43  ;;  %15945 = vmatprep.subr.bf16.mxu1 %v22514_v44  ;;  %v22539_v43 = vld [vmem:[%s25382_s11 + $0x1ee0] ss:$68 sps:$4 sm:$0xff]   ;;  %v22542_v44 = vld [vmem:[%s25382_s11 + $0x1ee8] ss:$68 sps:$4 sm:$0xff]  }
 0x3b1   : > { %v15023_v61 = vpop.f32.mrb[0].mxu0  ;;  %v15410_v63 = vpop.f32.mrb[0].mxu1 }
 0x3b2   : > { %v18110_v2 = vadd.f32 %v15023_v61, %v416_v45  ;;  %v18112_v3 = vadd.f32 %v15410_v63, %v418_v48  ;;  %v15025_v4 = vpop.f32.mrb[1].mxu0  ;;  %v15412_v5 = vpop.f32.mrb[1].mxu1  ;;  %v22547_v45 = vld [vmem:[%s25382_s11 + $0x1f6c] ss:$68 sps:$4 sm:$0xff]   ;;  %v22550_v48 = vld [vmem:[%s25382_s11 + $0x1f74] ss:$68 sps:$4 sm:$0xff]  }
 0x3b3   : > { %v18111_v9 = vadd.f32 %v15025_v4, %v417_v51  ;;  %v18113_v10 = vadd.f32 %v15412_v5, %v419_v52  ;;  %v15027_v11 = vpop.f32.mrb[2].mxu0  ;;  %v15414_v13 = vpop.f32.mrb[2].mxu1  ;;  %15559 = vmatpush1.bf16.msra.mxu0 %v22509_v49  ;;  %15946 = vmatpush1.bf16.msra.mxu1 %v22512_v50  ;;  %v22545_v49 = vld [vmem:[%s25382_s11 + $0x1f68] ss:$68 sps:$4 sm:$0xff]   ;;  %v22548_v50 = vld [vmem:[%s25382_s11 + $0x1f70] ss:$68 sps:$4 sm:$0xff]  }
 0x3b4   : > { %18144 = vst [vmem:[%s25397_s28] sm:$0xff] %v18110_v2  ;;  %18146 = vst [vmem:[%s25397_s28 + $0x10] sm:$0xff] %v18112_v3  ;;  %v18127_v17 = vadd.f32 %v15027_v11, %v433_v54  ;;  %v18129_v18 = vadd.f32 %v15414_v13, %v435_v55  ;;  %v15029_v19 = vpop.f32.mrb[3].mxu0  ;;  %v15416_v20 = vpop.f32.mrb[3].mxu1  ;;  %15560 = vmatprep.subr.bf16.mxu0 %v22517_v59  ;;  %15947 = vmatprep.subr.bf16.mxu1 %v22520_v60  ;;  %v22553_v51 = vld [vmem:[%s25382_s11 + $0x1ff4] ss:$68 sps:$4 sm:$0xff]  }
 0x3b5   : > { %18145 = vst [vmem:[%s25397_s28 + $0x8] sm:$0xff] %v18111_v9  ;;  %18147 = vst [vmem:[%s25397_s28 + $0x18] sm:$0xff] %v18113_v10  ;;  %v18128_v25 = vadd.f32 %v15029_v19, %v434_v56  ;;  %v18130_v26 = vadd.f32 %v15416_v20, %v436_v58  ;;  %v22556_v52 = vld [vmem:[%s25382_s11 + $0x1ffc] ss:$68 sps:$4 sm:$0xff]   ;;  %v22551_v54 = vld [vmem:[%s25382_s11 + $0x1ff0] ss:$68 sps:$4 sm:$0xff]  }
 0x3b6   : > { %18161 = vst [vmem:[%s25397_s28 + $0x88] sm:$0xff] %v18127_v17  ;;  %18163 = vst [vmem:[%s25397_s28 + $0x98] sm:$0xff] %v18129_v18  ;;  %v22554_v55 = vld [vmem:[%s25382_s11 + $0x1ff8] ss:$68 sps:$4 sm:$0xff]   ;;  %v22562_v58 = vld [vmem:[%s25382_s11 + $0x2084] ss:$68 sps:$4 sm:$0xff]  }
 0x3b7   : > { %18162 = vst [vmem:[%s25397_s28 + $0x90] sm:$0xff] %v18128_v25  ;;  %18164 = vst [vmem:[%s25397_s28 + $0xa0] sm:$0xff] %v18130_v26  ;;  %15561 = vmatpush1.bf16.msra.mxu0 %v22515_v14  ;;  %15948 = vmatpush1.bf16.msra.mxu1 %v22518_v16  ;;  %v22559_v56 = vld [vmem:[%s25382_s11 + $0x207c] ss:$68 sps:$4 sm:$0xff]   ;;  %v22565_v61 = vld [vmem:[%s25382_s11 + $0x2104] ss:$68 sps:$4 sm:$0xff]  }
 0x3b8   : > { %15562 = vmatprep.subr.bf16.mxu0 %v22523_v21  ;;  %15949 = vmatprep.subr.bf16.mxu1 %v22526_v22  ;;  %v22557_v59 = vld [vmem:[%s25382_s11 + $0x2078] ss:$68 sps:$4 sm:$0xff]   ;;  %v22560_v60 = vld [vmem:[%s25382_s11 + $0x2080] ss:$68 sps:$4 sm:$0xff]   ;;  %v22568_v63 = vld [vmem:[%s25382_s11 + $0x210c] ss:$68 sps:$4 sm:$0xff]  }
 0x3b9   : > { %v22563_v2 = vld [vmem:[%s25382_s11 + $0x2100] ss:$68 sps:$4 sm:$0xff]   ;;  %v22566_v3 = vld [vmem:[%s25382_s11 + $0x2108] ss:$68 sps:$4 sm:$0xff]   ;;  %v22574_v5 = vld [vmem:[%s25382_s11 + $0x2194] ss:$68 sps:$4 sm:$0xff]  }
 0x3ba   : > { %v22571_v4 = vld [vmem:[%s25382_s11 + $0x218c] ss:$68 sps:$4 sm:$0xff]   ;;  %v22577_v11 = vld [vmem:[%s25382_s11 + $0x2214] ss:$68 sps:$4 sm:$0xff]   ;;  %v22580_v13 = vld [vmem:[%s25382_s11 + $0x221c] ss:$68 sps:$4 sm:$0xff]  }
 0x3bb   : > { %15563 = vmatpush1.bf16.msra.mxu0 %v22521_v27  ;;  %15950 = vmatpush1.bf16.msra.mxu1 %v22524_v29  ;;  %v22569_v9 = vld [vmem:[%s25382_s11 + $0x2188] ss:$68 sps:$4 sm:$0xff]   ;;  %v22572_v10 = vld [vmem:[%s25382_s11 + $0x2190] ss:$68 sps:$4 sm:$0xff]   ;;  %v22578_v16 = vld [vmem:[%s25382_s11 + $0x2218] ss:$68 sps:$4 sm:$0xff]  }
 0x3bc   : > { %15564 = vmatprep.subr.bf16.mxu0 %v22529_v30  ;;  %15951 = vmatprep.subr.bf16.mxu1 %v22532_v31  ;;  %v22575_v14 = vld [vmem:[%s25382_s11 + $0x2210] ss:$68 sps:$4 sm:$0xff]   ;;  %v22583_v17 = vld [vmem:[%s25382_s11 + $0x229c] ss:$68 sps:$4 sm:$0xff]   ;;  %v22586_v18 = vld [vmem:[%s25382_s11 + $0x22a4] ss:$68 sps:$4 sm:$0xff]  }
 0x3bd   : > { %v22581_v19 = vld [vmem:[%s25382_s11 + $0x2298] ss:$68 sps:$4 sm:$0xff]   ;;  %v22584_v20 = vld [vmem:[%s25382_s11 + $0x22a0] ss:$68 sps:$4 sm:$0xff]   ;;  %v22592_v22 = vld [vmem:[%s25382_s11 + $0x232c] ss:$68 sps:$4 sm:$0xff]  }
 0x3be   : > { %v22589_v21 = vld [vmem:[%s25382_s11 + $0x2324] ss:$68 sps:$4 sm:$0xff]   ;;  %v22595_v27 = vld [vmem:[%s25382_s11 + $0x23ac] ss:$68 sps:$4 sm:$0xff]   ;;  %v22598_v29 = vld [vmem:[%s25382_s11 + $0x23b4] ss:$68 sps:$4 sm:$0xff]  }
 0x3bf   : > { %15565 = vmatpush1.bf16.msra.mxu0 %v22527_v32  ;;  %15952 = vmatpush1.bf16.msra.mxu1 %v22530_v33  ;;  %v22587_v25 = vld [vmem:[%s25382_s11 + $0x2320] ss:$68 sps:$4 sm:$0xff]   ;;  %v22590_v26 = vld [vmem:[%s25382_s11 + $0x2328] ss:$68 sps:$4 sm:$0xff]   ;;  %v22596_v31 = vld [vmem:[%s25382_s11 + $0x23b0] ss:$68 sps:$4 sm:$0xff]  }
 0x3c0   : > { %15566 = vmatprep.subr.bf16.mxu0 %v22535_v35  ;;  %15953 = vmatprep.subr.bf16.mxu1 %v22538_v36  ;;  %v22593_v30 = vld [vmem:[%s25382_s11 + $0x23a8] ss:$68 sps:$4 sm:$0xff]   ;;  %v22601_v32 = vld [vmem:[%s25382_s11 + $0x2434] ss:$68 sps:$4 sm:$0xff]   ;;  %v22604_v33 = vld [vmem:[%s25382_s11 + $0x243c] ss:$68 sps:$4 sm:$0xff]  }
 0x3c1   : > { %v22599_v35 = vld [vmem:[%s25382_s11 + $0x2430] ss:$68 sps:$4 sm:$0xff]   ;;  %v22602_v36 = vld [vmem:[%s25382_s11 + $0x2438] ss:$68 sps:$4 sm:$0xff]  }
 0x3c3   : > { %15567 = vmatpush1.bf16.msra.mxu0 %v22533_v37  ;;  %15954 = vmatpush1.bf16.msra.mxu1 %v22536_v39  ;;  %v22607_v37 = vld [vmem:[%s25382_s11 + $0x24bc] ss:$68 sps:$4 sm:$0xff]   ;;  %v22610_v39 = vld [vmem:[%s25382_s11 + $0x24c4] ss:$68 sps:$4 sm:$0xff]  }
 0x3c4   : > { %15568 = vmatprep.subr.bf16.mxu0 %v22541_v40  ;;  %15955 = vmatprep.subr.bf16.mxu1 %v22544_v42  ;;  %v22605_v40 = vld [vmem:[%s25382_s11 + $0x24b8] ss:$68 sps:$4 sm:$0xff]   ;;  %v22608_v42 = vld [vmem:[%s25382_s11 + $0x24c0] ss:$68 sps:$4 sm:$0xff]  }
 0x3c7   : > { %15569 = vmatpush1.bf16.msra.mxu0 %v22539_v43  ;;  %15956 = vmatpush1.bf16.msra.mxu1 %v22542_v44  ;;  %v22613_v43 = vld [vmem:[%s25382_s11 + $0x2544] ss:$68 sps:$4 sm:$0xff]   ;;  %v22616_v44 = vld [vmem:[%s25382_s11 + $0x254c] ss:$68 sps:$4 sm:$0xff]  }
 0x3c8   : > { %15570 = vmatprep.subr.bf16.mxu0 %v22547_v45  ;;  %15957 = vmatprep.subr.bf16.mxu1 %v22550_v48  ;;  %v22611_v45 = vld [vmem:[%s25382_s11 + $0x2540] ss:$68 sps:$4 sm:$0xff]   ;;  %v22614_v48 = vld [vmem:[%s25382_s11 + $0x2548] ss:$68 sps:$4 sm:$0xff]  }
 0x3cb   : > { %15571 = vmatpush1.bf16.msra.mxu0 %v22545_v49  ;;  %15958 = vmatpush1.bf16.msra.mxu1 %v22548_v50  ;;  %v22619_v49 = vld [vmem:[%s25382_s11 + $0x25cc] ss:$68 sps:$4 sm:$0xff]   ;;  %v22622_v50 = vld [vmem:[%s25382_s11 + $0x25d4] ss:$68 sps:$4 sm:$0xff]  }
 0x3cc   : > { %15572 = vmatprep.subr.bf16.mxu0 %v22553_v51  ;;  %15959 = vmatprep.subr.bf16.mxu1 %v22556_v52  ;;  %v22617_v51 = vld [vmem:[%s25382_s11 + $0x25c8] ss:$68 sps:$4 sm:$0xff]   ;;  %v22620_v52 = vld [vmem:[%s25382_s11 + $0x25d0] ss:$68 sps:$4 sm:$0xff]  }
 0x3cf   : > { %15573 = vmatpush1.bf16.msra.mxu0 %v22551_v54  ;;  %15960 = vmatpush1.bf16.msra.mxu1 %v22554_v55  ;;  %v22625_v54 = vld [vmem:[%s25382_s11 + $0x2654] ss:$68 sps:$4 sm:$0xff]   ;;  %v22628_v55 = vld [vmem:[%s25382_s11 + $0x265c] ss:$68 sps:$4 sm:$0xff]  }
 0x3d0   : > { %15574 = vmatprep.subr.bf16.mxu0 %v22559_v56  ;;  %15961 = vmatprep.subr.bf16.mxu1 %v22562_v58  ;;  %v22623_v56 = vld [vmem:[%s25382_s11 + $0x2650] ss:$68 sps:$4 sm:$0xff]   ;;  %v22626_v58 = vld [vmem:[%s25382_s11 + $0x2658] ss:$68 sps:$4 sm:$0xff]  }
 0x3d3   : > { %15575 = vmatpush1.bf16.msra.mxu0 %v22557_v59  ;;  %15962 = vmatpush1.bf16.msra.mxu1 %v22560_v60  ;;  %v22631_v59 = vld [vmem:[%s25382_s11 + $0x26dc] ss:$68 sps:$4 sm:$0xff]   ;;  %v22634_v60 = vld [vmem:[%s25382_s11 + $0x26e4] ss:$68 sps:$4 sm:$0xff]  }
 0x3d4   : > { %15576 = vmatprep.subr.bf16.mxu0 %v22565_v61  ;;  %15963 = vmatprep.subr.bf16.mxu1 %v22568_v63  ;;  %v22629_v61 = vld [vmem:[%s25382_s11 + $0x26d8] ss:$68 sps:$4 sm:$0xff]   ;;  %v22632_v63 = vld [vmem:[%s25382_s11 + $0x26e0] ss:$68 sps:$4 sm:$0xff]  }
 0x3d7   : > { %15577 = vmatpush1.bf16.msra.mxu0 %v22563_v2  ;;  %15964 = vmatpush1.bf16.msra.mxu1 %v22566_v3  ;;  %v22637_v2 = vld [vmem:[%s25382_s11 + $0x2764] ss:$68 sps:$4 sm:$0xff]   ;;  %v22640_v3 = vld [vmem:[%s25382_s11 + $0x276c] ss:$68 sps:$4 sm:$0xff]  }
 0x3d8   : > { %15578 = vmatprep.subr.bf16.mxu0 %v22571_v4  ;;  %15965 = vmatprep.subr.bf16.mxu1 %v22574_v5  ;;  %v22635_v4 = vld [vmem:[%s25382_s11 + $0x2760] ss:$68 sps:$4 sm:$0xff]   ;;  %v22638_v5 = vld [vmem:[%s25382_s11 + $0x2768] ss:$68 sps:$4 sm:$0xff]  }
 0x3db   : > { %15579 = vmatpush1.bf16.msra.mxu0 %v22569_v9  ;;  %15966 = vmatpush1.bf16.msra.mxu1 %v22572_v10  ;;  %v22643_v9 = vld [vmem:[%s25382_s11 + $0x27ec] ss:$68 sps:$4 sm:$0xff]   ;;  %v22646_v10 = vld [vmem:[%s25382_s11 + $0x27f4] ss:$68 sps:$4 sm:$0xff]  }
 0x3dc   : > { %15591 = vmatprep.subr.bf16.mxu0 %v22577_v11  ;;  %15978 = vmatprep.subr.bf16.mxu1 %v22580_v13  ;;  %v22641_v11 = vld [vmem:[%s25382_s11 + $0x27e8] ss:$68 sps:$4 sm:$0xff]   ;;  %v22644_v13 = vld [vmem:[%s25382_s11 + $0x27f0] ss:$68 sps:$4 sm:$0xff]  }
 0x3de   : > { %15581 = vmatmul.mubr.bf16.vlgmr.msra.gmra.mrb[4].mxu0 %v25738_v7  ;;  %15968 = vmatmul.mubr.bf16.vlgmr.msra.gmra.mrb[4].mxu1 %v25738_v7 }
 0x3df   : > { %15592 = vmatpush1.bf16.msra.mxu0 %v22575_v14  ;;  %15979 = vmatpush1.bf16.msra.mxu1 %v22578_v16  ;;  %v22649_v14 = vld [vmem:[%s25382_s11 + $0x2874] ss:$68 sps:$4 sm:$0xff]   ;;  %v22652_v16 = vld [vmem:[%s25382_s11 + $0x287c] ss:$68 sps:$4 sm:$0xff]  }
 0x3e0   : > { %15593 = vmatprep.subr.bf16.mxu0 %v22583_v17  ;;  %15980 = vmatprep.subr.bf16.mxu1 %v22586_v18  ;;  %v22647_v17 = vld [vmem:[%s25382_s11 + $0x2870] ss:$68 sps:$4 sm:$0xff]   ;;  %v22650_v18 = vld [vmem:[%s25382_s11 + $0x2878] ss:$68 sps:$4 sm:$0xff]  }
 0x3e1   : > { %15623 = vmatprep.mubr.bf16.mxu0 %v25744_v12  ;;  %16010 = vmatprep.mubr.bf16.mxu1 %v25744_v12 }
 0x3e3   : > { %15594 = vmatpush1.bf16.msra.mxu0 %v22581_v19  ;;  %15981 = vmatpush1.bf16.msra.mxu1 %v22584_v20  ;;  %v22655_v19 = vld [vmem:[%s25382_s11 + $0x28fc] ss:$68 sps:$4 sm:$0xff]   ;;  %v22658_v20 = vld [vmem:[%s25382_s11 + $0x2904] ss:$68 sps:$4 sm:$0xff]  }
 0x3e4   : > { %15595 = vmatprep.subr.bf16.mxu0 %v22589_v21  ;;  %15982 = vmatprep.subr.bf16.mxu1 %v22592_v22  ;;  %v22653_v21 = vld [vmem:[%s25382_s11 + $0x28f8] ss:$68 sps:$4 sm:$0xff]   ;;  %v22656_v22 = vld [vmem:[%s25382_s11 + $0x2900] ss:$68 sps:$4 sm:$0xff]  }
 0x3e7   : > { %15596 = vmatpush1.bf16.msra.mxu0 %v22587_v25  ;;  %15983 = vmatpush1.bf16.msra.mxu1 %v22590_v26  ;;  %v22661_v25 = vld [vmem:[%s25382_s11 + $0x2984] ss:$68 sps:$4 sm:$0xff]   ;;  %v22664_v26 = vld [vmem:[%s25382_s11 + $0x298c] ss:$68 sps:$4 sm:$0xff]  }
 0x3e8   : > { %15597 = vmatprep.subr.bf16.mxu0 %v22595_v27  ;;  %15984 = vmatprep.subr.bf16.mxu1 %v22598_v29  ;;  %v22659_v27 = vld [vmem:[%s25382_s11 + $0x2980] ss:$68 sps:$4 sm:$0xff]   ;;  %v22662_v29 = vld [vmem:[%s25382_s11 + $0x2988] ss:$68 sps:$4 sm:$0xff]  }
 0x3eb   : > { %15598 = vmatpush1.bf16.msra.mxu0 %v22593_v30  ;;  %15985 = vmatpush1.bf16.msra.mxu1 %v22596_v31  ;;  %v22667_v30 = vld [vmem:[%s25382_s11 + $0x2a0c] ss:$68 sps:$4 sm:$0xff]   ;;  %v22670_v31 = vld [vmem:[%s25382_s11 + $0x2a14] ss:$68 sps:$4 sm:$0xff]  }
 0x3ec   : > { %15599 = vmatprep.subr.bf16.mxu0 %v22601_v32  ;;  %15986 = vmatprep.subr.bf16.mxu1 %v22604_v33  ;;  %v22665_v32 = vld [vmem:[%s25382_s11 + $0x2a08] ss:$68 sps:$4 sm:$0xff]   ;;  %v22668_v33 = vld [vmem:[%s25382_s11 + $0x2a10] ss:$68 sps:$4 sm:$0xff]  }
 0x3ef   : > { %15600 = vmatpush1.bf16.msra.mxu0 %v22599_v35  ;;  %15987 = vmatpush1.bf16.msra.mxu1 %v22602_v36  ;;  %v22673_v35 = vld [vmem:[%s25382_s11 + $0x2a94] ss:$68 sps:$4 sm:$0xff]   ;;  %v22676_v36 = vld [vmem:[%s25382_s11 + $0x2a9c] ss:$68 sps:$4 sm:$0xff]  }
 0x3f0   : > { %15601 = vmatprep.subr.bf16.mxu0 %v22607_v37  ;;  %15988 = vmatprep.subr.bf16.mxu1 %v22610_v39  ;;  %v22671_v37 = vld [vmem:[%s25382_s11 + $0x2a90] ss:$68 sps:$4 sm:$0xff]   ;;  %v22674_v39 = vld [vmem:[%s25382_s11 + $0x2a98] ss:$68 sps:$4 sm:$0xff]  }
 0x3f3   : > { %15602 = vmatpush1.bf16.msra.mxu0 %v22605_v40  ;;  %15989 = vmatpush1.bf16.msra.mxu1 %v22608_v42  ;;  %v22679_v40 = vld [vmem:[%s25382_s11 + $0x2b1c] ss:$68 sps:$4 sm:$0xff]   ;;  %v22682_v42 = vld [vmem:[%s25382_s11 + $0x2b24] ss:$68 sps:$4 sm:$0xff]  }
 0x3f4   : > { %15603 = vmatprep.subr.bf16.mxu0 %v22613_v43  ;;  %15990 = vmatprep.subr.bf16.mxu1 %v22616_v44  ;;  %v22677_v43 = vld [vmem:[%s25382_s11 + $0x2b18] ss:$68 sps:$4 sm:$0xff]   ;;  %v22680_v44 = vld [vmem:[%s25382_s11 + $0x2b20] ss:$68 sps:$4 sm:$0xff]  }
 0x3f7   : > { %15604 = vmatpush1.bf16.msra.mxu0 %v22611_v45  ;;  %15991 = vmatpush1.bf16.msra.mxu1 %v22614_v48  ;;  %v22685_v45 = vld [vmem:[%s25382_s11 + $0x2ba4] ss:$68 sps:$4 sm:$0xff]   ;;  %v22688_v48 = vld [vmem:[%s25382_s11 + $0x2bac] ss:$68 sps:$4 sm:$0xff]  }
 0x3f8   : > { %15605 = vmatprep.subr.bf16.mxu0 %v22619_v49  ;;  %15992 = vmatprep.subr.bf16.mxu1 %v22622_v50  ;;  %v22683_v49 = vld [vmem:[%s25382_s11 + $0x2ba0] ss:$68 sps:$4 sm:$0xff]   ;;  %v22686_v50 = vld [vmem:[%s25382_s11 + $0x2ba8] ss:$68 sps:$4 sm:$0xff]  }
 0x3fb   : > { %15606 = vmatpush1.bf16.msra.mxu0 %v22617_v51  ;;  %15993 = vmatpush1.bf16.msra.mxu1 %v22620_v52  ;;  %v22691_v51 = vld [vmem:[%s25382_s11 + $0x2c2c] ss:$68 sps:$4 sm:$0xff]   ;;  %v22694_v52 = vld [vmem:[%s25382_s11 + $0x2c34] ss:$68 sps:$4 sm:$0xff]  }
 0x3fc   : > { %15607 = vmatprep.subr.bf16.mxu0 %v22625_v54  ;;  %15994 = vmatprep.subr.bf16.mxu1 %v22628_v55  ;;  %v22689_v54 = vld [vmem:[%s25382_s11 + $0x2c28] ss:$68 sps:$4 sm:$0xff]   ;;  %v22692_v55 = vld [vmem:[%s25382_s11 + $0x2c30] ss:$68 sps:$4 sm:$0xff]  }
 0x3ff   : > { %15608 = vmatpush1.bf16.msra.mxu0 %v22623_v56  ;;  %15995 = vmatpush1.bf16.msra.mxu1 %v22626_v58  ;;  %v22697_v56 = vld [vmem:[%s25382_s11 + $0x2cb4] ss:$68 sps:$4 sm:$0xff]   ;;  %v22700_v58 = vld [vmem:[%s25382_s11 + $0x2cbc] ss:$68 sps:$4 sm:$0xff]  }
 0x400   : > { %15609 = vmatprep.subr.bf16.mxu0 %v22631_v59  ;;  %15996 = vmatprep.subr.bf16.mxu1 %v22634_v60  ;;  %v22695_v59 = vld [vmem:[%s25382_s11 + $0x2cb0] ss:$68 sps:$4 sm:$0xff]   ;;  %v22698_v60 = vld [vmem:[%s25382_s11 + $0x2cb8] ss:$68 sps:$4 sm:$0xff]  }
 0x403   : > { %15610 = vmatpush1.bf16.msra.mxu0 %v22629_v61  ;;  %15997 = vmatpush1.bf16.msra.mxu1 %v22632_v63  ;;  %v22703_v61 = vld [vmem:[%s25382_s11 + $0x2d3c] ss:$68 sps:$4 sm:$0xff]   ;;  %v22706_v63 = vld [vmem:[%s25382_s11 + $0x2d44] ss:$68 sps:$4 sm:$0xff]  }
 0x404   : > { %15611 = vmatprep.subr.bf16.mxu0 %v22637_v2  ;;  %15998 = vmatprep.subr.bf16.mxu1 %v22640_v3  ;;  %v22701_v2 = vld [vmem:[%s25382_s11 + $0x2d38] ss:$68 sps:$4 sm:$0xff]   ;;  %v22704_v3 = vld [vmem:[%s25382_s11 + $0x2d40] ss:$68 sps:$4 sm:$0xff]  }
 0x407   : > { %15612 = vmatpush1.bf16.msra.mxu0 %v22635_v4  ;;  %15999 = vmatpush1.bf16.msra.mxu1 %v22638_v5  ;;  %v22709_v4 = vld [vmem:[%s25382_s11 + $0x2dc4] ss:$68 sps:$4 sm:$0xff]   ;;  %v22712_v5 = vld [vmem:[%s25382_s11 + $0x2dcc] ss:$68 sps:$4 sm:$0xff]  }
 0x408   : > { %15613 = vmatprep.subr.bf16.mxu0 %v22643_v9  ;;  %16000 = vmatprep.subr.bf16.mxu1 %v22646_v10  ;;  %v22707_v9 = vld [vmem:[%s25382_s11 + $0x2dc0] ss:$68 sps:$4 sm:$0xff]   ;;  %v22710_v10 = vld [vmem:[%s25382_s11 + $0x2dc8] ss:$68 sps:$4 sm:$0xff]  }
 0x40b   : > { %15614 = vmatpush1.bf16.msra.mxu0 %v22641_v11  ;;  %16001 = vmatpush1.bf16.msra.mxu1 %v22644_v13  ;;  %v22715_v11 = vld [vmem:[%s25382_s11 + $0x2e4c] ss:$68 sps:$4 sm:$0xff]   ;;  %v22718_v13 = vld [vmem:[%s25382_s11 + $0x2e54] ss:$68 sps:$4 sm:$0xff]  }
 0x40c   : > { %15615 = vmatprep.subr.bf16.mxu0 %v22649_v14  ;;  %16002 = vmatprep.subr.bf16.mxu1 %v22652_v16  ;;  %v22713_v14 = vld [vmem:[%s25382_s11 + $0x2e48] ss:$68 sps:$4 sm:$0xff]   ;;  %v22716_v16 = vld [vmem:[%s25382_s11 + $0x2e50] ss:$68 sps:$4 sm:$0xff]  }
 0x40f   : > { %15616 = vmatpush1.bf16.msra.mxu0 %v22647_v17  ;;  %16003 = vmatpush1.bf16.msra.mxu1 %v22650_v18  ;;  %v22721_v17 = vld [vmem:[%s25382_s11 + $0x2ed4] ss:$68 sps:$4 sm:$0xff]   ;;  %v22724_v18 = vld [vmem:[%s25382_s11 + $0x2edc] ss:$68 sps:$4 sm:$0xff]  }
 0x410   : > { %15617 = vmatprep.subr.bf16.mxu0 %v22655_v19  ;;  %16004 = vmatprep.subr.bf16.mxu1 %v22658_v20  ;;  %v22719_v19 = vld [vmem:[%s25382_s11 + $0x2ed0] ss:$68 sps:$4 sm:$0xff]   ;;  %v22722_v20 = vld [vmem:[%s25382_s11 + $0x2ed8] ss:$68 sps:$4 sm:$0xff]  }
 0x413   : > { %15618 = vmatpush1.bf16.msra.mxu0 %v22653_v21  ;;  %16005 = vmatpush1.bf16.msra.mxu1 %v22656_v22  ;;  %v22727_v21 = vld [vmem:[%s25382_s11 + $0x2f5c] ss:$68 sps:$4 sm:$0xff]   ;;  %v22730_v22 = vld [vmem:[%s25382_s11 + $0x2f64] ss:$68 sps:$4 sm:$0xff]  }
 0x414   : > { %15619 = vmatprep.subr.bf16.mxu0 %v22661_v25  ;;  %16006 = vmatprep.subr.bf16.mxu1 %v22664_v26  ;;  %v22725_v25 = vld [vmem:[%s25382_s11 + $0x2f58] ss:$68 sps:$4 sm:$0xff]   ;;  %v22728_v26 = vld [vmem:[%s25382_s11 + $0x2f60] ss:$68 sps:$4 sm:$0xff]  }
 0x417   : > { %15620 = vmatpush1.bf16.msra.mxu0 %v22659_v27  ;;  %16007 = vmatpush1.bf16.msra.mxu1 %v22662_v29  ;;  %v22733_v27 = vld [vmem:[%s25382_s11 + $0x2fe4] ss:$68 sps:$4 sm:$0xff]   ;;  %v22736_v29 = vld [vmem:[%s25382_s11 + $0x2fec] ss:$68 sps:$4 sm:$0xff]  }
 0x418   : > { %15621 = vmatprep.subr.bf16.mxu0 %v22667_v30  ;;  %16008 = vmatprep.subr.bf16.mxu1 %v22670_v31  ;;  %v22731_v30 = vld [vmem:[%s25382_s11 + $0x2fe0] ss:$68 sps:$4 sm:$0xff]   ;;  %v22734_v31 = vld [vmem:[%s25382_s11 + $0x2fe8] ss:$68 sps:$4 sm:$0xff]  }
 0x41b   : > { %15622 = vmatpush1.bf16.msra.mxu0 %v22665_v32  ;;  %16009 = vmatpush1.bf16.msra.mxu1 %v22668_v33  ;;  %v22739_v32 = vld [vmem:[%s25382_s11 + $0x306c] ss:$68 sps:$4 sm:$0xff]   ;;  %v22742_v33 = vld [vmem:[%s25382_s11 + $0x3074] ss:$68 sps:$4 sm:$0xff]  }
 0x41c   : > { %15634 = vmatprep.subr.bf16.mxu0 %v22673_v35  ;;  %16021 = vmatprep.subr.bf16.mxu1 %v22676_v36  ;;  %v22737_v35 = vld [vmem:[%s25382_s11 + $0x3068] ss:$68 sps:$4 sm:$0xff]   ;;  %v22740_v36 = vld [vmem:[%s25382_s11 + $0x3070] ss:$68 sps:$4 sm:$0xff]  }
 0x41e   : > { %15624 = vmatmul.mubr.bf16.vlgmr.msra.gmra.mrb[4].mxu0 %v25814_v23  ;;  %16011 = vmatmul.mubr.bf16.vlgmr.msra.gmra.mrb[4].mxu1 %v25814_v23 }
 0x41f   : > { %15635 = vmatpush1.bf16.msra.mxu0 %v22671_v37  ;;  %16022 = vmatpush1.bf16.msra.mxu1 %v22674_v39  ;;  %v22745_v37 = vld [vmem:[%s25382_s11 + $0x30f4] ss:$68 sps:$4 sm:$0xff]   ;;  %v22748_v39 = vld [vmem:[%s25382_s11 + $0x30fc] ss:$68 sps:$4 sm:$0xff]  }
 0x420   : > { %15636 = vmatprep.subr.bf16.mxu0 %v22679_v40  ;;  %16023 = vmatprep.subr.bf16.mxu1 %v22682_v42  ;;  %v22743_v40 = vld [vmem:[%s25382_s11 + $0x30f0] ss:$68 sps:$4 sm:$0xff]   ;;  %v22746_v42 = vld [vmem:[%s25382_s11 + $0x30f8] ss:$68 sps:$4 sm:$0xff]  }
 0x421   : > { %15666 = vmatprep.mubr.bf16.mxu0 %v25820_v28  ;;  %16053 = vmatprep.mubr.bf16.mxu1 %v25820_v28 }
 0x423   : > { %15637 = vmatpush1.bf16.msra.mxu0 %v22677_v43  ;;  %16024 = vmatpush1.bf16.msra.mxu1 %v22680_v44  ;;  %v22751_v43 = vld [vmem:[%s25382_s11 + $0x317c] ss:$68 sps:$4 sm:$0xff]   ;;  %v22754_v44 = vld [vmem:[%s25382_s11 + $0x3184] ss:$68 sps:$4 sm:$0xff]  }
 0x424   : > { %15638 = vmatprep.subr.bf16.mxu0 %v22685_v45  ;;  %16025 = vmatprep.subr.bf16.mxu1 %v22688_v48  ;;  %v22749_v45 = vld [vmem:[%s25382_s11 + $0x3178] ss:$68 sps:$4 sm:$0xff]   ;;  %v22752_v48 = vld [vmem:[%s25382_s11 + $0x3180] ss:$68 sps:$4 sm:$0xff]  }
 0x427   : > { %15639 = vmatpush1.bf16.msra.mxu0 %v22683_v49  ;;  %16026 = vmatpush1.bf16.msra.mxu1 %v22686_v50  ;;  %v22757_v49 = vld [vmem:[%s25382_s11 + $0x3204] ss:$68 sps:$4 sm:$0xff]   ;;  %v22760_v50 = vld [vmem:[%s25382_s11 + $0x320c] ss:$68 sps:$4 sm:$0xff]  }
 0x428   : > { %15640 = vmatprep.subr.bf16.mxu0 %v22691_v51  ;;  %16027 = vmatprep.subr.bf16.mxu1 %v22694_v52  ;;  %v22755_v51 = vld [vmem:[%s25382_s11 + $0x3200] ss:$68 sps:$4 sm:$0xff]   ;;  %v22758_v52 = vld [vmem:[%s25382_s11 + $0x3208] ss:$68 sps:$4 sm:$0xff]  }
 0x42b   : > { %15641 = vmatpush1.bf16.msra.mxu0 %v22689_v54  ;;  %16028 = vmatpush1.bf16.msra.mxu1 %v22692_v55  ;;  %v22763_v54 = vld [vmem:[%s25382_s11 + $0x328c] ss:$68 sps:$4 sm:$0xff]   ;;  %v22766_v55 = vld [vmem:[%s25382_s11 + $0x3294] ss:$68 sps:$4 sm:$0xff]  }
 0x42c   : > { %15642 = vmatprep.subr.bf16.mxu0 %v22697_v56  ;;  %16029 = vmatprep.subr.bf16.mxu1 %v22700_v58  ;;  %v22761_v56 = vld [vmem:[%s25382_s11 + $0x3288] ss:$68 sps:$4 sm:$0xff]   ;;  %v22764_v58 = vld [vmem:[%s25382_s11 + $0x3290] ss:$68 sps:$4 sm:$0xff]  }
 0x42f   : > { %15643 = vmatpush1.bf16.msra.mxu0 %v22695_v59  ;;  %16030 = vmatpush1.bf16.msra.mxu1 %v22698_v60  ;;  %v22769_v59 = vld [vmem:[%s25382_s11 + $0x3314] ss:$68 sps:$4 sm:$0xff]   ;;  %v22772_v60 = vld [vmem:[%s25382_s11 + $0x331c] ss:$68 sps:$4 sm:$0xff]  }
 0x430   : > { %15644 = vmatprep.subr.bf16.mxu0 %v22703_v61  ;;  %16031 = vmatprep.subr.bf16.mxu1 %v22706_v63  ;;  %v22767_v61 = vld [vmem:[%s25382_s11 + $0x3310] ss:$68 sps:$4 sm:$0xff]   ;;  %v22770_v63 = vld [vmem:[%s25382_s11 + $0x3318] ss:$68 sps:$4 sm:$0xff]  }
 0x433   : > { %15645 = vmatpush1.bf16.msra.mxu0 %v22701_v2  ;;  %16032 = vmatpush1.bf16.msra.mxu1 %v22704_v3  ;;  %v22775_v2 = vld [vmem:[%s25382_s11 + $0x339c] ss:$68 sps:$4 sm:$0xff]   ;;  %v22778_v3 = vld [vmem:[%s25382_s11 + $0x33a4] ss:$68 sps:$4 sm:$0xff]  }
 0x434   : > { %15646 = vmatprep.subr.bf16.mxu0 %v22709_v4  ;;  %16033 = vmatprep.subr.bf16.mxu1 %v22712_v5  ;;  %v22773_v4 = vld [vmem:[%s25382_s11 + $0x3398] ss:$68 sps:$4 sm:$0xff]   ;;  %v22776_v5 = vld [vmem:[%s25382_s11 + $0x33a0] ss:$68 sps:$4 sm:$0xff]  }
 0x437   : > { %15647 = vmatpush1.bf16.msra.mxu0 %v22707_v9  ;;  %16034 = vmatpush1.bf16.msra.mxu1 %v22710_v10  ;;  %v22781_v9 = vld [vmem:[%s25382_s11 + $0x3424] ss:$68 sps:$4 sm:$0xff]   ;;  %v22784_v10 = vld [vmem:[%s25382_s11 + $0x342c] ss:$68 sps:$4 sm:$0xff]  }
 0x438   : > { %15648 = vmatprep.subr.bf16.mxu0 %v22715_v11  ;;  %16035 = vmatprep.subr.bf16.mxu1 %v22718_v13  ;;  %v22779_v11 = vld [vmem:[%s25382_s11 + $0x3420] ss:$68 sps:$4 sm:$0xff]   ;;  %v22782_v13 = vld [vmem:[%s25382_s11 + $0x3428] ss:$68 sps:$4 sm:$0xff]  }
 0x43b   : > { %15649 = vmatpush1.bf16.msra.mxu0 %v22713_v14  ;;  %16036 = vmatpush1.bf16.msra.mxu1 %v22716_v16  ;;  %v22787_v14 = vld [vmem:[%s25382_s11 + $0x34ac] ss:$68 sps:$4 sm:$0xff]   ;;  %v22790_v16 = vld [vmem:[%s25382_s11 + $0x34b4] ss:$68 sps:$4 sm:$0xff]  }
 0x43c   : > { %15650 = vmatprep.subr.bf16.mxu0 %v22721_v17  ;;  %16037 = vmatprep.subr.bf16.mxu1 %v22724_v18  ;;  %v22785_v17 = vld [vmem:[%s25382_s11 + $0x34a8] ss:$68 sps:$4 sm:$0xff]   ;;  %v22788_v18 = vld [vmem:[%s25382_s11 + $0x34b0] ss:$68 sps:$4 sm:$0xff]  }
 0x43f   : > { %15651 = vmatpush1.bf16.msra.mxu0 %v22719_v19  ;;  %16038 = vmatpush1.bf16.msra.mxu1 %v22722_v20  ;;  %v22793_v19 = vld [vmem:[%s25382_s11 + $0x3534] ss:$68 sps:$4 sm:$0xff]   ;;  %v22796_v20 = vld [vmem:[%s25382_s11 + $0x353c] ss:$68 sps:$4 sm:$0xff]  }
 0x440   : > { %15652 = vmatprep.subr.bf16.mxu0 %v22727_v21  ;;  %16039 = vmatprep.subr.bf16.mxu1 %v22730_v22  ;;  %v22791_v21 = vld [vmem:[%s25382_s11 + $0x3530] ss:$68 sps:$4 sm:$0xff]   ;;  %v22794_v22 = vld [vmem:[%s25382_s11 + $0x3538] ss:$68 sps:$4 sm:$0xff]  }
 0x443   : > { %15653 = vmatpush1.bf16.msra.mxu0 %v22725_v25  ;;  %16040 = vmatpush1.bf16.msra.mxu1 %v22728_v26  ;;  %v22799_v25 = vld [vmem:[%s25382_s11 + $0x35bc] ss:$68 sps:$4 sm:$0xff]   ;;  %v22802_v26 = vld [vmem:[%s25382_s11 + $0x35c4] ss:$68 sps:$4 sm:$0xff]  }
 0x444   : > { %15654 = vmatprep.subr.bf16.mxu0 %v22733_v27  ;;  %16041 = vmatprep.subr.bf16.mxu1 %v22736_v29  ;;  %v22797_v27 = vld [vmem:[%s25382_s11 + $0x35b8] ss:$68 sps:$4 sm:$0xff]   ;;  %v22800_v29 = vld [vmem:[%s25382_s11 + $0x35c0] ss:$68 sps:$4 sm:$0xff]  }
 0x447   : > { %15655 = vmatpush1.bf16.msra.mxu0 %v22731_v30  ;;  %16042 = vmatpush1.bf16.msra.mxu1 %v22734_v31  ;;  %v22805_v30 = vld [vmem:[%s25382_s11 + $0x3644] ss:$68 sps:$4 sm:$0xff]   ;;  %v22808_v31 = vld [vmem:[%s25382_s11 + $0x364c] ss:$68 sps:$4 sm:$0xff]  }
 0x448   : > { %15656 = vmatprep.subr.bf16.mxu0 %v22739_v32  ;;  %16043 = vmatprep.subr.bf16.mxu1 %v22742_v33  ;;  %v22803_v32 = vld [vmem:[%s25382_s11 + $0x3640] ss:$68 sps:$4 sm:$0xff]   ;;  %v22806_v33 = vld [vmem:[%s25382_s11 + $0x3648] ss:$68 sps:$4 sm:$0xff]  }
 0x44b   : > { %15657 = vmatpush1.bf16.msra.mxu0 %v22737_v35  ;;  %16044 = vmatpush1.bf16.msra.mxu1 %v22740_v36  ;;  %v22811_v35 = vld [vmem:[%s25382_s11 + $0x36cc] ss:$68 sps:$4 sm:$0xff]   ;;  %v22814_v36 = vld [vmem:[%s25382_s11 + $0x36d4] ss:$68 sps:$4 sm:$0xff]  }
 0x44c   : > { %15658 = vmatprep.subr.bf16.mxu0 %v22745_v37  ;;  %16045 = vmatprep.subr.bf16.mxu1 %v22748_v39  ;;  %v22809_v37 = vld [vmem:[%s25382_s11 + $0x36c8] ss:$68 sps:$4 sm:$0xff]   ;;  %v22812_v39 = vld [vmem:[%s25382_s11 + $0x36d0] ss:$68 sps:$4 sm:$0xff]  }
 0x44f   : > { %15659 = vmatpush1.bf16.msra.mxu0 %v22743_v40  ;;  %16046 = vmatpush1.bf16.msra.mxu1 %v22746_v42  ;;  %v22817_v40 = vld [vmem:[%s25382_s11 + $0x3754] ss:$68 sps:$4 sm:$0xff]   ;;  %v22820_v42 = vld [vmem:[%s25382_s11 + $0x375c] ss:$68 sps:$4 sm:$0xff]  }
 0x450   : > { %15660 = vmatprep.subr.bf16.mxu0 %v22751_v43  ;;  %16047 = vmatprep.subr.bf16.mxu1 %v22754_v44  ;;  %v22815_v43 = vld [vmem:[%s25382_s11 + $0x3750] ss:$68 sps:$4 sm:$0xff]   ;;  %v22818_v44 = vld [vmem:[%s25382_s11 + $0x3758] ss:$68 sps:$4 sm:$0xff]  }
 0x453   : > { %15661 = vmatpush1.bf16.msra.mxu0 %v22749_v45  ;;  %16048 = vmatpush1.bf16.msra.mxu1 %v22752_v48  ;;  %v22823_v45 = vld [vmem:[%s25382_s11 + $0x37dc] ss:$68 sps:$4 sm:$0xff]   ;;  %v22826_v48 = vld [vmem:[%s25382_s11 + $0x37e4] ss:$68 sps:$4 sm:$0xff]  }
 0x454   : > { %15662 = vmatprep.subr.bf16.mxu0 %v22757_v49  ;;  %16049 = vmatprep.subr.bf16.mxu1 %v22760_v50  ;;  %v22821_v49 = vld [vmem:[%s25382_s11 + $0x37d8] ss:$68 sps:$4 sm:$0xff]   ;;  %v22824_v50 = vld [vmem:[%s25382_s11 + $0x37e0] ss:$68 sps:$4 sm:$0xff]  }
 0x457   : > { %15663 = vmatpush1.bf16.msra.mxu0 %v22755_v51  ;;  %16050 = vmatpush1.bf16.msra.mxu1 %v22758_v52  ;;  %v22829_v51 = vld [vmem:[%s25382_s11 + $0x3864] ss:$68 sps:$4 sm:$0xff]   ;;  %v22832_v52 = vld [vmem:[%s25382_s11 + $0x386c] ss:$68 sps:$4 sm:$0xff]  }
 0x458   : > { %15664 = vmatprep.subr.bf16.mxu0 %v22763_v54  ;;  %16051 = vmatprep.subr.bf16.mxu1 %v22766_v55  ;;  %v22827_v54 = vld [vmem:[%s25382_s11 + $0x3860] ss:$68 sps:$4 sm:$0xff]   ;;  %v22830_v55 = vld [vmem:[%s25382_s11 + $0x3868] ss:$68 sps:$4 sm:$0xff]  }
 0x45b   : > { %15665 = vmatpush1.bf16.msra.mxu0 %v22761_v56  ;;  %16052 = vmatpush1.bf16.msra.mxu1 %v22764_v58  ;;  %v22835_v56 = vld [vmem:[%s25382_s11 + $0x38ec] ss:$68 sps:$4 sm:$0xff]   ;;  %v22838_v58 = vld [vmem:[%s25382_s11 + $0x38f4] ss:$68 sps:$4 sm:$0xff]  }
 0x45c   : > { %15677 = vmatprep.subr.bf16.mxu0 %v22769_v59  ;;  %16064 = vmatprep.subr.bf16.mxu1 %v22772_v60  ;;  %v22833_v59 = vld [vmem:[%s25382_s11 + $0x38e8] ss:$68 sps:$4 sm:$0xff]   ;;  %v22836_v60 = vld [vmem:[%s25382_s11 + $0x38f0] ss:$68 sps:$4 sm:$0xff]  }
 0x45e   : > { %15667 = vmatmul.mubr.bf16.vlgmr.msra.gmra.mrb[4].mxu0 %v25890_v41  ;;  %16054 = vmatmul.mubr.bf16.vlgmr.msra.gmra.mrb[4].mxu1 %v25890_v41 }
 0x45f   : > { %15678 = vmatpush1.bf16.msra.mxu0 %v22767_v61  ;;  %16065 = vmatpush1.bf16.msra.mxu1 %v22770_v63  ;;  %v22841_v61 = vld [vmem:[%s25382_s11 + $0x3974] ss:$68 sps:$4 sm:$0xff]   ;;  %v22844_v63 = vld [vmem:[%s25382_s11 + $0x397c] ss:$68 sps:$4 sm:$0xff]  }
 0x460   : > { %15679 = vmatprep.subr.bf16.mxu0 %v22775_v2  ;;  %16066 = vmatprep.subr.bf16.mxu1 %v22778_v3  ;;  %v22839_v2 = vld [vmem:[%s25382_s11 + $0x3970] ss:$68 sps:$4 sm:$0xff]   ;;  %v22842_v3 = vld [vmem:[%s25382_s11 + $0x3978] ss:$68 sps:$4 sm:$0xff]  }
 0x461   : > { %15709 = vmatprep.mubr.bf16.mxu0 %v25896_v47  ;;  %16096 = vmatprep.mubr.bf16.mxu1 %v25896_v47 }
 0x463   : > { %15680 = vmatpush1.bf16.msra.mxu0 %v22773_v4  ;;  %16067 = vmatpush1.bf16.msra.mxu1 %v22776_v5  ;;  %v22847_v4 = vld [vmem:[%s25382_s11 + $0x39fc] ss:$68 sps:$4 sm:$0xff]   ;;  %v22850_v5 = vld [vmem:[%s25382_s11 + $0x3a04] ss:$68 sps:$4 sm:$0xff]  }
 0x464   : > { %15681 = vmatprep.subr.bf16.mxu0 %v22781_v9  ;;  %16068 = vmatprep.subr.bf16.mxu1 %v22784_v10  ;;  %v22845_v9 = vld [vmem:[%s25382_s11 + $0x39f8] ss:$68 sps:$4 sm:$0xff]   ;;  %v22848_v10 = vld [vmem:[%s25382_s11 + $0x3a00] ss:$68 sps:$4 sm:$0xff]  }
 0x467   : > { %15682 = vmatpush1.bf16.msra.mxu0 %v22779_v11  ;;  %16069 = vmatpush1.bf16.msra.mxu1 %v22782_v13  ;;  %v22853_v11 = vld [vmem:[%s25382_s11 + $0x3a84] ss:$68 sps:$4 sm:$0xff]   ;;  %v22856_v13 = vld [vmem:[%s25382_s11 + $0x3a8c] ss:$68 sps:$4 sm:$0xff]  }
 0x468   : > { %15683 = vmatprep.subr.bf16.mxu0 %v22787_v14  ;;  %16070 = vmatprep.subr.bf16.mxu1 %v22790_v16  ;;  %v22851_v14 = vld [vmem:[%s25382_s11 + $0x3a80] ss:$68 sps:$4 sm:$0xff]   ;;  %v22854_v16 = vld [vmem:[%s25382_s11 + $0x3a88] ss:$68 sps:$4 sm:$0xff]  }
 0x46b   : > { %15684 = vmatpush1.bf16.msra.mxu0 %v22785_v17  ;;  %16071 = vmatpush1.bf16.msra.mxu1 %v22788_v18  ;;  %v22859_v17 = vld [vmem:[%s25382_s11 + $0x3b0c] ss:$68 sps:$4 sm:$0xff]   ;;  %v22862_v18 = vld [vmem:[%s25382_s11 + $0x3b14] ss:$68 sps:$4 sm:$0xff]  }
 0x46c   : > { %15685 = vmatprep.subr.bf16.mxu0 %v22793_v19  ;;  %16072 = vmatprep.subr.bf16.mxu1 %v22796_v20  ;;  %v22857_v19 = vld [vmem:[%s25382_s11 + $0x3b08] ss:$68 sps:$4 sm:$0xff]   ;;  %v22860_v20 = vld [vmem:[%s25382_s11 + $0x3b10] ss:$68 sps:$4 sm:$0xff]  }
 0x46f   : > { %15686 = vmatpush1.bf16.msra.mxu0 %v22791_v21  ;;  %16073 = vmatpush1.bf16.msra.mxu1 %v22794_v22  ;;  %v22865_v21 = vld [vmem:[%s25382_s11 + $0x3b94] ss:$68 sps:$4 sm:$0xff]   ;;  %v22868_v22 = vld [vmem:[%s25382_s11 + $0x3b9c] ss:$68 sps:$4 sm:$0xff]  }
 0x470   : > { %15687 = vmatprep.subr.bf16.mxu0 %v22799_v25  ;;  %16074 = vmatprep.subr.bf16.mxu1 %v22802_v26  ;;  %v22863_v25 = vld [vmem:[%s25382_s11 + $0x3b90] ss:$68 sps:$4 sm:$0xff]   ;;  %v22866_v26 = vld [vmem:[%s25382_s11 + $0x3b98] ss:$68 sps:$4 sm:$0xff]  }
 0x473   : > { %15688 = vmatpush1.bf16.msra.mxu0 %v22797_v27  ;;  %16075 = vmatpush1.bf16.msra.mxu1 %v22800_v29  ;;  %v22871_v27 = vld [vmem:[%s25382_s11 + $0x3c1c] ss:$68 sps:$4 sm:$0xff]   ;;  %v22874_v29 = vld [vmem:[%s25382_s11 + $0x3c24] ss:$68 sps:$4 sm:$0xff]  }
 0x474   : > { %15689 = vmatprep.subr.bf16.mxu0 %v22805_v30  ;;  %16076 = vmatprep.subr.bf16.mxu1 %v22808_v31  ;;  %v22869_v30 = vld [vmem:[%s25382_s11 + $0x3c18] ss:$68 sps:$4 sm:$0xff]   ;;  %v22872_v31 = vld [vmem:[%s25382_s11 + $0x3c20] ss:$68 sps:$4 sm:$0xff]  }
 0x477   : > { %15690 = vmatpush1.bf16.msra.mxu0 %v22803_v32  ;;  %16077 = vmatpush1.bf16.msra.mxu1 %v22806_v33  ;;  %v22877_v32 = vld [vmem:[%s25382_s11 + $0x3ca4] ss:$68 sps:$4 sm:$0xff]   ;;  %v22880_v33 = vld [vmem:[%s25382_s11 + $0x3cac] ss:$68 sps:$4 sm:$0xff]  }
 0x478   : > { %15691 = vmatprep.subr.bf16.mxu0 %v22811_v35  ;;  %16078 = vmatprep.subr.bf16.mxu1 %v22814_v36  ;;  %v22875_v35 = vld [vmem:[%s25382_s11 + $0x3ca0] ss:$68 sps:$4 sm:$0xff]   ;;  %v22878_v36 = vld [vmem:[%s25382_s11 + $0x3ca8] ss:$68 sps:$4 sm:$0xff]  }
 0x47b   : > { %15692 = vmatpush1.bf16.msra.mxu0 %v22809_v37  ;;  %16079 = vmatpush1.bf16.msra.mxu1 %v22812_v39  ;;  %v22883_v37 = vld [vmem:[%s25382_s11 + $0x3d2c] ss:$68 sps:$4 sm:$0xff]   ;;  %v22886_v39 = vld [vmem:[%s25382_s11 + $0x3d34] ss:$68 sps:$4 sm:$0xff]  }
 0x47c   : > { %15693 = vmatprep.subr.bf16.mxu0 %v22817_v40  ;;  %16080 = vmatprep.subr.bf16.mxu1 %v22820_v42  ;;  %v22881_v40 = vld [vmem:[%s25382_s11 + $0x3d28] ss:$68 sps:$4 sm:$0xff]   ;;  %v22884_v42 = vld [vmem:[%s25382_s11 + $0x3d30] ss:$68 sps:$4 sm:$0xff]  }
 0x47f   : > { %15694 = vmatpush1.bf16.msra.mxu0 %v22815_v43  ;;  %16081 = vmatpush1.bf16.msra.mxu1 %v22818_v44  ;;  %v22889_v43 = vld [vmem:[%s25382_s11 + $0x3db4] ss:$68 sps:$4 sm:$0xff]   ;;  %v22892_v44 = vld [vmem:[%s25382_s11 + $0x3dbc] ss:$68 sps:$4 sm:$0xff]  }
 0x480   : > { %15695 = vmatprep.subr.bf16.mxu0 %v22823_v45  ;;  %16082 = vmatprep.subr.bf16.mxu1 %v22826_v48  ;;  %v22887_v45 = vld [vmem:[%s25382_s11 + $0x3db0] ss:$68 sps:$4 sm:$0xff]   ;;  %v22890_v48 = vld [vmem:[%s25382_s11 + $0x3db8] ss:$68 sps:$4 sm:$0xff]  }
 0x483   : > { %15696 = vmatpush1.bf16.msra.mxu0 %v22821_v49  ;;  %16083 = vmatpush1.bf16.msra.mxu1 %v22824_v50  ;;  %v22895_v49 = vld [vmem:[%s25382_s11 + $0x3e3c] ss:$68 sps:$4 sm:$0xff]   ;;  %v22898_v50 = vld [vmem:[%s25382_s11 + $0x3e44] ss:$68 sps:$4 sm:$0xff]  }
 0x484   : > { %15697 = vmatprep.subr.bf16.mxu0 %v22829_v51  ;;  %16084 = vmatprep.subr.bf16.mxu1 %v22832_v52  ;;  %v22893_v51 = vld [vmem:[%s25382_s11 + $0x3e38] ss:$68 sps:$4 sm:$0xff]   ;;  %v22896_v52 = vld [vmem:[%s25382_s11 + $0x3e40] ss:$68 sps:$4 sm:$0xff]  }
 0x487   : > { %15698 = vmatpush1.bf16.msra.mxu0 %v22827_v54  ;;  %16085 = vmatpush1.bf16.msra.mxu1 %v22830_v55  ;;  %v22901_v54 = vld [vmem:[%s25382_s11 + $0x3ec4] ss:$68 sps:$4 sm:$0xff]   ;;  %v22904_v55 = vld [vmem:[%s25382_s11 + $0x3ecc] ss:$68 sps:$4 sm:$0xff]  }
 0x488   : > { %15699 = vmatprep.subr.bf16.mxu0 %v22835_v56  ;;  %16086 = vmatprep.subr.bf16.mxu1 %v22838_v58  ;;  %v22899_v56 = vld [vmem:[%s25382_s11 + $0x3ec0] ss:$68 sps:$4 sm:$0xff]   ;;  %v22902_v58 = vld [vmem:[%s25382_s11 + $0x3ec8] ss:$68 sps:$4 sm:$0xff]  }
 0x48b   : > { %15700 = vmatpush1.bf16.msra.mxu0 %v22833_v59  ;;  %16087 = vmatpush1.bf16.msra.mxu1 %v22836_v60  ;;  %v22907_v59 = vld [vmem:[%s25382_s11 + $0x3f4c] ss:$68 sps:$4 sm:$0xff]   ;;  %v22910_v60 = vld [vmem:[%s25382_s11 + $0x3f54] ss:$68 sps:$4 sm:$0xff]  }
 0x48c   : > { %15701 = vmatprep.subr.bf16.mxu0 %v22841_v61  ;;  %16088 = vmatprep.subr.bf16.mxu1 %v22844_v63  ;;  %v22905_v61 = vld [vmem:[%s25382_s11 + $0x3f48] ss:$68 sps:$4 sm:$0xff]   ;;  %v22908_v63 = vld [vmem:[%s25382_s11 + $0x3f50] ss:$68 sps:$4 sm:$0xff]  }
 0x48f   : > { %15702 = vmatpush1.bf16.msra.mxu0 %v22839_v2  ;;  %16089 = vmatpush1.bf16.msra.mxu1 %v22842_v3  ;;  %v22913_v2 = vld [vmem:[%s25382_s11 + $0x3fd4] ss:$68 sps:$4 sm:$0xff]   ;;  %v22916_v3 = vld [vmem:[%s25382_s11 + $0x3fdc] ss:$68 sps:$4 sm:$0xff]  }
 0x490   : > { %15703 = vmatprep.subr.bf16.mxu0 %v22847_v4  ;;  %16090 = vmatprep.subr.bf16.mxu1 %v22850_v5  ;;  %v22911_v4 = vld [vmem:[%s25382_s11 + $0x3fd0] ss:$68 sps:$4 sm:$0xff]   ;;  %v22914_v5 = vld [vmem:[%s25382_s11 + $0x3fd8] ss:$68 sps:$4 sm:$0xff]  }
 0x493   : > { %15704 = vmatpush1.bf16.msra.mxu0 %v22845_v9  ;;  %16091 = vmatpush1.bf16.msra.mxu1 %v22848_v10  ;;  %v22919_v9 = vld [vmem:[%s25382_s11 + $0x405c] ss:$68 sps:$4 sm:$0xff]   ;;  %v22922_v10 = vld [vmem:[%s25382_s11 + $0x4064] ss:$68 sps:$4 sm:$0xff]  }
 0x494   : > { %15705 = vmatprep.subr.bf16.mxu0 %v22853_v11  ;;  %16092 = vmatprep.subr.bf16.mxu1 %v22856_v13  ;;  %v22917_v11 = vld [vmem:[%s25382_s11 + $0x4058] ss:$68 sps:$4 sm:$0xff]   ;;  %v22920_v13 = vld [vmem:[%s25382_s11 + $0x4060] ss:$68 sps:$4 sm:$0xff]  }
 0x497   : > { %15706 = vmatpush1.bf16.msra.mxu0 %v22851_v14  ;;  %16093 = vmatpush1.bf16.msra.mxu1 %v22854_v16  ;;  %v22925_v14 = vld [vmem:[%s25382_s11 + $0x40e4] ss:$68 sps:$4 sm:$0xff]   ;;  %v22928_v16 = vld [vmem:[%s25382_s11 + $0x40ec] ss:$68 sps:$4 sm:$0xff]  }
 0x498   : > { %15707 = vmatprep.subr.bf16.mxu0 %v22859_v17  ;;  %16094 = vmatprep.subr.bf16.mxu1 %v22862_v18  ;;  %v22923_v17 = vld [vmem:[%s25382_s11 + $0x40e0] ss:$68 sps:$4 sm:$0xff]   ;;  %v22926_v18 = vld [vmem:[%s25382_s11 + $0x40e8] ss:$68 sps:$4 sm:$0xff]  }
 0x49b   : > { %15708 = vmatpush1.bf16.msra.mxu0 %v22857_v19  ;;  %16095 = vmatpush1.bf16.msra.mxu1 %v22860_v20  ;;  %v22931_v19 = vld [vmem:[%s25382_s11 + $0x416c] ss:$68 sps:$4 sm:$0xff]   ;;  %v22934_v20 = vld [vmem:[%s25382_s11 + $0x4174] ss:$68 sps:$4 sm:$0xff]  }
 0x49c   : > { %15720 = vmatprep.subr.bf16.mxu0 %v22865_v21  ;;  %16107 = vmatprep.subr.bf16.mxu1 %v22868_v22  ;;  %v22929_v21 = vld [vmem:[%s25382_s11 + $0x4168] ss:$68 sps:$4 sm:$0xff]   ;;  %v22932_v22 = vld [vmem:[%s25382_s11 + $0x4170] ss:$68 sps:$4 sm:$0xff]  }
 0x49e   : > { %15710 = vmatmul.mubr.bf16.vlgmr.msra.gmra.mrb[4].mxu0 %v25966_v0  ;;  %16097 = vmatmul.mubr.bf16.vlgmr.msra.gmra.mrb[4].mxu1 %v25966_v0 }
 0x49f   : > { %15721 = vmatpush1.bf16.msra.mxu0 %v22863_v25  ;;  %16108 = vmatpush1.bf16.msra.mxu1 %v22866_v26  ;;  %v22937_v25 = vld [vmem:[%s25382_s11 + $0x41f4] ss:$68 sps:$4 sm:$0xff]   ;;  %v22940_v26 = vld [vmem:[%s25382_s11 + $0x41fc] ss:$68 sps:$4 sm:$0xff]  }
 0x4a0   : > { %15722 = vmatprep.subr.bf16.mxu0 %v22871_v27  ;;  %16109 = vmatprep.subr.bf16.mxu1 %v22874_v29  ;;  %v22935_v27 = vld [vmem:[%s25382_s11 + $0x41f0] ss:$68 sps:$4 sm:$0xff]   ;;  %v22938_v29 = vld [vmem:[%s25382_s11 + $0x41f8] ss:$68 sps:$4 sm:$0xff]  }
 0x4a1   : > { %15752 = vmatprep.mubr.bf16.mxu0 %v25972_v6  ;;  %16139 = vmatprep.mubr.bf16.mxu1 %v25972_v6 }
 0x4a3   : > { %15723 = vmatpush1.bf16.msra.mxu0 %v22869_v30  ;;  %16110 = vmatpush1.bf16.msra.mxu1 %v22872_v31  ;;  %v22943_v30 = vld [vmem:[%s25382_s11 + $0x427c] ss:$68 sps:$4 sm:$0xff]   ;;  %v22946_v31 = vld [vmem:[%s25382_s11 + $0x4284] ss:$68 sps:$4 sm:$0xff]  }
 0x4a4   : > { %15724 = vmatprep.subr.bf16.mxu0 %v22877_v32  ;;  %16111 = vmatprep.subr.bf16.mxu1 %v22880_v33  ;;  %v22941_v32 = vld [vmem:[%s25382_s11 + $0x4278] ss:$68 sps:$4 sm:$0xff]   ;;  %v22944_v33 = vld [vmem:[%s25382_s11 + $0x4280] ss:$68 sps:$4 sm:$0xff]  }
 0x4a7   : > { %15725 = vmatpush1.bf16.msra.mxu0 %v22875_v35  ;;  %16112 = vmatpush1.bf16.msra.mxu1 %v22878_v36  ;;  %v22949_v35 = vld [vmem:[%s25382_s11 + $0x4304] ss:$68 sps:$4 sm:$0xff]   ;;  %v22952_v36 = vld [vmem:[%s25382_s11 + $0x430c] ss:$68 sps:$4 sm:$0xff]  }
 0x4a8   : > { %15726 = vmatprep.subr.bf16.mxu0 %v22883_v37  ;;  %16113 = vmatprep.subr.bf16.mxu1 %v22886_v39  ;;  %v22947_v37 = vld [vmem:[%s25382_s11 + $0x4300] ss:$68 sps:$4 sm:$0xff]   ;;  %v22950_v39 = vld [vmem:[%s25382_s11 + $0x4308] ss:$68 sps:$4 sm:$0xff]  }
 0x4ab   : > { %15727 = vmatpush1.bf16.msra.mxu0 %v22881_v40  ;;  %16114 = vmatpush1.bf16.msra.mxu1 %v22884_v42  ;;  %v22955_v40 = vld [vmem:[%s25382_s11 + $0x438c] ss:$68 sps:$4 sm:$0xff]   ;;  %v22958_v42 = vld [vmem:[%s25382_s11 + $0x4394] ss:$68 sps:$4 sm:$0xff]  }
 0x4ac   : > { %15728 = vmatprep.subr.bf16.mxu0 %v22889_v43  ;;  %16115 = vmatprep.subr.bf16.mxu1 %v22892_v44  ;;  %v22953_v43 = vld [vmem:[%s25382_s11 + $0x4388] ss:$68 sps:$4 sm:$0xff]   ;;  %v22956_v44 = vld [vmem:[%s25382_s11 + $0x4390] ss:$68 sps:$4 sm:$0xff]  }
 0x4af   : > { %15729 = vmatpush1.bf16.msra.mxu0 %v22887_v45  ;;  %16116 = vmatpush1.bf16.msra.mxu1 %v22890_v48  ;;  %v22961_v45 = vld [vmem:[%s25382_s11 + $0x4414] ss:$68 sps:$4 sm:$0xff]   ;;  %v22964_v48 = vld [vmem:[%s25382_s11 + $0x441c] ss:$68 sps:$4 sm:$0xff]  }
 0x4b0   : > { %15730 = vmatprep.subr.bf16.mxu0 %v22895_v49  ;;  %16117 = vmatprep.subr.bf16.mxu1 %v22898_v50  ;;  %v22959_v49 = vld [vmem:[%s25382_s11 + $0x4410] ss:$68 sps:$4 sm:$0xff]   ;;  %v22962_v50 = vld [vmem:[%s25382_s11 + $0x4418] ss:$68 sps:$4 sm:$0xff]  }
 0x4b3   : > { %15731 = vmatpush1.bf16.msra.mxu0 %v22893_v51  ;;  %16118 = vmatpush1.bf16.msra.mxu1 %v22896_v52  ;;  %v22967_v51 = vld [vmem:[%s25382_s11 + $0x449c] ss:$68 sps:$4 sm:$0xff]   ;;  %v22970_v52 = vld [vmem:[%s25382_s11 + $0x44a4] ss:$68 sps:$4 sm:$0xff]  }
 0x4b4   : > { %15732 = vmatprep.subr.bf16.mxu0 %v22901_v54  ;;  %16119 = vmatprep.subr.bf16.mxu1 %v22904_v55  ;;  %v22965_v54 = vld [vmem:[%s25382_s11 + $0x4498] ss:$68 sps:$4 sm:$0xff]   ;;  %v22968_v55 = vld [vmem:[%s25382_s11 + $0x44a0] ss:$68 sps:$4 sm:$0xff]  }
 0x4b7   : > { %15733 = vmatpush1.bf16.msra.mxu0 %v22899_v56  ;;  %16120 = vmatpush1.bf16.msra.mxu1 %v22902_v58  ;;  %v22973_v56 = vld [vmem:[%s25382_s11 + $0x4524] ss:$68 sps:$4 sm:$0xff]   ;;  %v22976_v58 = vld [vmem:[%s25382_s11 + $0x452c] ss:$68 sps:$4 sm:$0xff]  }
 0x4b8   : > { %15734 = vmatprep.subr.bf16.mxu0 %v22907_v59  ;;  %16121 = vmatprep.subr.bf16.mxu1 %v22910_v60  ;;  %v22971_v59 = vld [vmem:[%s25382_s11 + $0x4520] ss:$68 sps:$4 sm:$0xff]   ;;  %v22974_v60 = vld [vmem:[%s25382_s11 + $0x4528] ss:$68 sps:$4 sm:$0xff]  }
 0x4bb   : > { %15735 = vmatpush1.bf16.msra.mxu0 %v22905_v61  ;;  %16122 = vmatpush1.bf16.msra.mxu1 %v22908_v63  ;;  %v22979_v61 = vld [vmem:[%s25382_s11 + $0x45ac] ss:$68 sps:$4 sm:$0xff]   ;;  %v22982_v63 = vld [vmem:[%s25382_s11 + $0x45b4] ss:$68 sps:$4 sm:$0xff]  }
 0x4bc   : > { %15736 = vmatprep.subr.bf16.mxu0 %v22913_v2  ;;  %16123 = vmatprep.subr.bf16.mxu1 %v22916_v3  ;;  %v22977_v2 = vld [vmem:[%s25382_s11 + $0x45a8] ss:$68 sps:$4 sm:$0xff]   ;;  %v22980_v3 = vld [vmem:[%s25382_s11 + $0x45b0] ss:$68 sps:$4 sm:$0xff]  }
 0x4bf   : > { %15737 = vmatpush1.bf16.msra.mxu0 %v22911_v4  ;;  %16124 = vmatpush1.bf16.msra.mxu1 %v22914_v5  ;;  %v22985_v4 = vld [vmem:[%s25382_s11 + $0x4634] ss:$68 sps:$4 sm:$0xff]   ;;  %v22988_v5 = vld [vmem:[%s25382_s11 + $0x463c] ss:$68 sps:$4 sm:$0xff]  }
 0x4c0   : > { %15738 = vmatprep.subr.bf16.mxu0 %v22919_v9  ;;  %16125 = vmatprep.subr.bf16.mxu1 %v22922_v10  ;;  %v22983_v9 = vld [vmem:[%s25382_s11 + $0x4630] ss:$68 sps:$4 sm:$0xff]   ;;  %v22986_v10 = vld [vmem:[%s25382_s11 + $0x4638] ss:$68 sps:$4 sm:$0xff]  }
 0x4c3   : > { %15739 = vmatpush1.bf16.msra.mxu0 %v22917_v11  ;;  %16126 = vmatpush1.bf16.msra.mxu1 %v22920_v13  ;;  %v22991_v11 = vld [vmem:[%s25382_s11 + $0x46bc] ss:$68 sps:$4 sm:$0xff]   ;;  %v22994_v13 = vld [vmem:[%s25382_s11 + $0x46c4] ss:$68 sps:$4 sm:$0xff]  }
 0x4c4   : > { %15740 = vmatprep.subr.bf16.mxu0 %v22925_v14  ;;  %16127 = vmatprep.subr.bf16.mxu1 %v22928_v16  ;;  %v22989_v14 = vld [vmem:[%s25382_s11 + $0x46b8] ss:$68 sps:$4 sm:$0xff]   ;;  %v22992_v16 = vld [vmem:[%s25382_s11 + $0x46c0] ss:$68 sps:$4 sm:$0xff]  }
 0x4c7   : > { %15741 = vmatpush1.bf16.msra.mxu0 %v22923_v17  ;;  %16128 = vmatpush1.bf16.msra.mxu1 %v22926_v18  ;;  %v22997_v17 = vld [vmem:[%s25382_s11 + $0x4744] ss:$68 sps:$4 sm:$0xff]   ;;  %v23000_v18 = vld [vmem:[%s25382_s11 + $0x474c] ss:$68 sps:$4 sm:$0xff]  }
 0x4c8   : > { %15742 = vmatprep.subr.bf16.mxu0 %v22931_v19  ;;  %16129 = vmatprep.subr.bf16.mxu1 %v22934_v20  ;;  %v22995_v19 = vld [vmem:[%s25382_s11 + $0x4740] ss:$68 sps:$4 sm:$0xff]   ;;  %v22998_v20 = vld [vmem:[%s25382_s11 + $0x4748] ss:$68 sps:$4 sm:$0xff]  }
 0x4cb   : > { %15743 = vmatpush1.bf16.msra.mxu0 %v22929_v21  ;;  %16130 = vmatpush1.bf16.msra.mxu1 %v22932_v22  ;;  %v23003_v21 = vld [vmem:[%s25382_s11 + $0x47cc] ss:$68 sps:$4 sm:$0xff]   ;;  %v23006_v22 = vld [vmem:[%s25382_s11 + $0x47d4] ss:$68 sps:$4 sm:$0xff]  }
 0x4cc   : > { %15744 = vmatprep.subr.bf16.mxu0 %v22937_v25  ;;  %16131 = vmatprep.subr.bf16.mxu1 %v22940_v26  ;;  %v23001_v25 = vld [vmem:[%s25382_s11 + $0x47c8] ss:$68 sps:$4 sm:$0xff]   ;;  %v23004_v26 = vld [vmem:[%s25382_s11 + $0x47d0] ss:$68 sps:$4 sm:$0xff]  }
 0x4cf   : > { %15745 = vmatpush1.bf16.msra.mxu0 %v22935_v27  ;;  %16132 = vmatpush1.bf16.msra.mxu1 %v22938_v29  ;;  %v23009_v27 = vld [vmem:[%s25382_s11 + $0x24] ss:$68 sps:$4 sm:$0xff]   ;;  %v23012_v29 = vld [vmem:[%s25382_s11 + $0x2c] ss:$68 sps:$4 sm:$0xff]  }
 0x4d0   : > { %15746 = vmatprep.subr.bf16.mxu0 %v22943_v30  ;;  %16133 = vmatprep.subr.bf16.mxu1 %v22946_v31  ;;  %v23007_v30 = vld [vmem:[%s25382_s11 + $0x20] ss:$68 sps:$4 sm:$0xff]   ;;  %v23010_v31 = vld [vmem:[%s25382_s11 + $0x28] ss:$68 sps:$4 sm:$0xff]  }
 0x4d3   : > { %15747 = vmatpush1.bf16.msra.mxu0 %v22941_v32  ;;  %16134 = vmatpush1.bf16.msra.mxu1 %v22944_v33  ;;  %v23015_v32 = vld [vmem:[%s25382_s11 + $0xac] ss:$68 sps:$4 sm:$0xff]   ;;  %v23018_v33 = vld [vmem:[%s25382_s11 + $0xb4] ss:$68 sps:$4 sm:$0xff]  }
 0x4d4   : > { %15748 = vmatprep.subr.bf16.mxu0 %v22949_v35  ;;  %16135 = vmatprep.subr.bf16.mxu1 %v22952_v36  ;;  %v23013_v35 = vld [vmem:[%s25382_s11 + $0xa8] ss:$68 sps:$4 sm:$0xff]   ;;  %v23016_v36 = vld [vmem:[%s25382_s11 + $0xb0] ss:$68 sps:$4 sm:$0xff]  }
 0x4d7   : > { %15749 = vmatpush1.bf16.msra.mxu0 %v22947_v37  ;;  %16136 = vmatpush1.bf16.msra.mxu1 %v22950_v39  ;;  %v23021_v37 = vld [vmem:[%s25382_s11 + $0x134] ss:$68 sps:$4 sm:$0xff]   ;;  %v23024_v39 = vld [vmem:[%s25382_s11 + $0x13c] ss:$68 sps:$4 sm:$0xff]  }
 0x4d8   : > { %15750 = vmatprep.subr.bf16.mxu0 %v22955_v40  ;;  %16137 = vmatprep.subr.bf16.mxu1 %v22958_v42  ;;  %v23019_v40 = vld [vmem:[%s25382_s11 + $0x130] ss:$68 sps:$4 sm:$0xff]   ;;  %v23022_v42 = vld [vmem:[%s25382_s11 + $0x138] ss:$68 sps:$4 sm:$0xff]  }
 0x4db   : > { %15751 = vmatpush1.bf16.msra.mxu0 %v22953_v43  ;;  %16138 = vmatpush1.bf16.msra.mxu1 %v22956_v44  ;;  %v23027_v43 = vld [vmem:[%s25382_s11 + $0x1bc] ss:$68 sps:$4 sm:$0xff]   ;;  %v23030_v44 = vld [vmem:[%s25382_s11 + $0x1c4] ss:$68 sps:$4 sm:$0xff]  }
 0x4dc   : > { %15763 = vmatprep.subr.bf16.mxu0 %v22961_v45  ;;  %16150 = vmatprep.subr.bf16.mxu1 %v22964_v48  ;;  %v23025_v45 = vld [vmem:[%s25382_s11 + $0x1b8] ss:$68 sps:$4 sm:$0xff]   ;;  %v23028_v48 = vld [vmem:[%s25382_s11 + $0x1c0] ss:$68 sps:$4 sm:$0xff]  }
 0x4de   : > { %15753 = vmatmul.mubr.bf16.vlgmr.msra.gmra.mrb[4].mxu0 %v26040_v24  ;;  %16140 = vmatmul.mubr.bf16.vlgmr.msra.gmra.mrb[4].mxu1 %v26040_v24 }
 0x4df   : > { %15764 = vmatpush1.bf16.msra.mxu0 %v22959_v49  ;;  %16151 = vmatpush1.bf16.msra.mxu1 %v22962_v50  ;;  %v23033_v49 = vld [vmem:[%s25382_s11 + $0x244] ss:$68 sps:$4 sm:$0xff]   ;;  %v23036_v50 = vld [vmem:[%s25382_s11 + $0x24c] ss:$68 sps:$4 sm:$0xff]  }
 0x4e0   : > { %15765 = vmatprep.subr.bf16.mxu0 %v22967_v51  ;;  %16152 = vmatprep.subr.bf16.mxu1 %v22970_v52  ;;  %v23031_v51 = vld [vmem:[%s25382_s11 + $0x240] ss:$68 sps:$4 sm:$0xff]   ;;  %v23034_v52 = vld [vmem:[%s25382_s11 + $0x248] ss:$68 sps:$4 sm:$0xff]  }
 0x4e1   : > { %15795 = vmatprep.mubr.bf16.mxu0 %v25030_v34  ;;  %16182 = vmatprep.mubr.bf16.mxu1 %v25030_v34 }
 0x4e3   : > { %15766 = vmatpush1.bf16.msra.mxu0 %v22965_v54  ;;  %16153 = vmatpush1.bf16.msra.mxu1 %v22968_v55  ;;  %v23039_v54 = vld [vmem:[%s25382_s11 + $0x2cc] ss:$68 sps:$4 sm:$0xff]   ;;  %v23042_v55 = vld [vmem:[%s25382_s11 + $0x2d4] ss:$68 sps:$4 sm:$0xff]  }
 0x4e4   : > { %15767 = vmatprep.subr.bf16.mxu0 %v22973_v56  ;;  %16154 = vmatprep.subr.bf16.mxu1 %v22976_v58  ;;  %v23037_v56 = vld [vmem:[%s25382_s11 + $0x2c8] ss:$68 sps:$4 sm:$0xff]   ;;  %v23040_v58 = vld [vmem:[%s25382_s11 + $0x2d0] ss:$68 sps:$4 sm:$0xff]  }
 0x4e7   : > { %15768 = vmatpush1.bf16.msra.mxu0 %v22971_v59  ;;  %16155 = vmatpush1.bf16.msra.mxu1 %v22974_v60  ;;  %v23045_v59 = vld [vmem:[%s25382_s11 + $0x354] ss:$68 sps:$4 sm:$0xff]   ;;  %v23048_v60 = vld [vmem:[%s25382_s11 + $0x35c] ss:$68 sps:$4 sm:$0xff]  }
 0x4e8   : > { %15769 = vmatprep.subr.bf16.mxu0 %v22979_v61  ;;  %16156 = vmatprep.subr.bf16.mxu1 %v22982_v63  ;;  %v23043_v61 = vld [vmem:[%s25382_s11 + $0x350] ss:$68 sps:$4 sm:$0xff]   ;;  %v23046_v63 = vld [vmem:[%s25382_s11 + $0x358] ss:$68 sps:$4 sm:$0xff]  }
 0x4eb   : > { %15770 = vmatpush1.bf16.msra.mxu0 %v22977_v2  ;;  %16157 = vmatpush1.bf16.msra.mxu1 %v22980_v3  ;;  %v23051_v2 = vld [vmem:[%s25382_s11 + $0x3dc] ss:$68 sps:$4 sm:$0xff]   ;;  %v23054_v3 = vld [vmem:[%s25382_s11 + $0x3e4] ss:$68 sps:$4 sm:$0xff]  }
 0x4ec   : > { %15771 = vmatprep.subr.bf16.mxu0 %v22985_v4  ;;  %16158 = vmatprep.subr.bf16.mxu1 %v22988_v5  ;;  %v23049_v4 = vld [vmem:[%s25382_s11 + $0x3d8] ss:$68 sps:$4 sm:$0xff]   ;;  %v23052_v5 = vld [vmem:[%s25382_s11 + $0x3e0] ss:$68 sps:$4 sm:$0xff]  }
 0x4ef   : > { %15772 = vmatpush1.bf16.msra.mxu0 %v22983_v9  ;;  %16159 = vmatpush1.bf16.msra.mxu1 %v22986_v10  ;;  %v23057_v9 = vld [vmem:[%s25382_s11 + $0x464] ss:$68 sps:$4 sm:$0xff]   ;;  %v23060_v10 = vld [vmem:[%s25382_s11 + $0x46c] ss:$68 sps:$4 sm:$0xff]  }
 0x4f0   : > { %15773 = vmatprep.subr.bf16.mxu0 %v22991_v11  ;;  %16160 = vmatprep.subr.bf16.mxu1 %v22994_v13  ;;  %v23055_v11 = vld [vmem:[%s25382_s11 + $0x460] ss:$68 sps:$4 sm:$0xff]   ;;  %v23058_v13 = vld [vmem:[%s25382_s11 + $0x468] ss:$68 sps:$4 sm:$0xff]  }
 0x4f3   : > { %15774 = vmatpush1.bf16.msra.mxu0 %v22989_v14  ;;  %16161 = vmatpush1.bf16.msra.mxu1 %v22992_v16  ;;  %v23063_v14 = vld [vmem:[%s25382_s11 + $0x4ec] ss:$68 sps:$4 sm:$0xff]   ;;  %v23066_v16 = vld [vmem:[%s25382_s11 + $0x4f4] ss:$68 sps:$4 sm:$0xff]  }
 0x4f4   : > { %15775 = vmatprep.subr.bf16.mxu0 %v22997_v17  ;;  %16162 = vmatprep.subr.bf16.mxu1 %v23000_v18  ;;  %v23061_v17 = vld [vmem:[%s25382_s11 + $0x4e8] ss:$68 sps:$4 sm:$0xff]   ;;  %v23064_v18 = vld [vmem:[%s25382_s11 + $0x4f0] ss:$68 sps:$4 sm:$0xff]  }
 0x4f7   : > { %15776 = vmatpush1.bf16.msra.mxu0 %v22995_v19  ;;  %16163 = vmatpush1.bf16.msra.mxu1 %v22998_v20  ;;  %v23069_v19 = vld [vmem:[%s25382_s11 + $0x574] ss:$68 sps:$4 sm:$0xff]   ;;  %v23072_v20 = vld [vmem:[%s25382_s11 + $0x57c] ss:$68 sps:$4 sm:$0xff]  }
 0x4f8   : > { %15777 = vmatprep.subr.bf16.mxu0 %v23003_v21  ;;  %16164 = vmatprep.subr.bf16.mxu1 %v23006_v22  ;;  %v23067_v21 = vld [vmem:[%s25382_s11 + $0x570] ss:$68 sps:$4 sm:$0xff]   ;;  %v23070_v22 = vld [vmem:[%s25382_s11 + $0x578] ss:$68 sps:$4 sm:$0xff]  }
 0x4fb   : > { %15778 = vmatpush1.bf16.msra.mxu0 %v23001_v25  ;;  %16165 = vmatpush1.bf16.msra.mxu1 %v23004_v26  ;;  %v23075_v25 = vld [vmem:[%s25382_s11 + $0x5fc] ss:$68 sps:$4 sm:$0xff]   ;;  %v23078_v26 = vld [vmem:[%s25382_s11 + $0x604] ss:$68 sps:$4 sm:$0xff]  }
 0x4fc   : > { %16193 = vmatprep.subr.bf16.mxu0 %v23009_v27  ;;  %16580 = vmatprep.subr.bf16.mxu1 %v23012_v29  ;;  %v23073_v27 = vld [vmem:[%s25382_s11 + $0x5f8] ss:$68 sps:$4 sm:$0xff]   ;;  %v23076_v29 = vld [vmem:[%s25382_s11 + $0x600] ss:$68 sps:$4 sm:$0xff]  }
 0x4fe   : > { %15796 = vmatmul.mubr.bf16.vlgmr.msra.gmra.mrb[4].mxu0 %v26080_v8  ;;  %16183 = vmatmul.mubr.bf16.vlgmr.msra.gmra.mrb[4].mxu1 %v26080_v8 }
 0x4ff   : > { %16194 = vmatpush1.bf16.msra.mxu0 %v23007_v30  ;;  %16581 = vmatpush1.bf16.msra.mxu1 %v23010_v31  ;;  %v23081_v30 = vld [vmem:[%s25382_s11 + $0x684] ss:$68 sps:$4 sm:$0xff]   ;;  %v23084_v31 = vld [vmem:[%s25382_s11 + $0x68c] ss:$68 sps:$4 sm:$0xff]  }
 0x500   : > { %16195 = vmatprep.subr.bf16.mxu0 %v23015_v32  ;;  %16582 = vmatprep.subr.bf16.mxu1 %v23018_v33  ;;  %v23079_v32 = vld [vmem:[%s25382_s11 + $0x680] ss:$68 sps:$4 sm:$0xff]   ;;  %v23082_v33 = vld [vmem:[%s25382_s11 + $0x688] ss:$68 sps:$4 sm:$0xff]  }
 0x501   : > { %16225 = vmatprep.mubr.bf16.mxu0 %v25484_v15  ;;  %16612 = vmatprep.mubr.bf16.mxu1 %v25484_v15 }
 0x503   : > { %16196 = vmatpush1.bf16.msra.mxu0 %v23013_v35  ;;  %16583 = vmatpush1.bf16.msra.mxu1 %v23016_v36  ;;  %v23087_v35 = vld [vmem:[%s25382_s11 + $0x70c] ss:$68 sps:$4 sm:$0xff]   ;;  %v23090_v36 = vld [vmem:[%s25382_s11 + $0x714] ss:$68 sps:$4 sm:$0xff]  }
 0x504   : > { %16197 = vmatprep.subr.bf16.mxu0 %v23021_v37  ;;  %16584 = vmatprep.subr.bf16.mxu1 %v23024_v39  ;;  %v23085_v37 = vld [vmem:[%s25382_s11 + $0x708] ss:$68 sps:$4 sm:$0xff]   ;;  %v23088_v39 = vld [vmem:[%s25382_s11 + $0x710] ss:$68 sps:$4 sm:$0xff]  }
 0x507   : > { %16198 = vmatpush1.bf16.msra.mxu0 %v23019_v40  ;;  %16585 = vmatpush1.bf16.msra.mxu1 %v23022_v42  ;;  %v23093_v40 = vld [vmem:[%s25382_s11 + $0x794] ss:$68 sps:$4 sm:$0xff]   ;;  %v23096_v42 = vld [vmem:[%s25382_s11 + $0x79c] ss:$68 sps:$4 sm:$0xff]  }
 0x508   : > { %16199 = vmatprep.subr.bf16.mxu0 %v23027_v43  ;;  %16586 = vmatprep.subr.bf16.mxu1 %v23030_v44  ;;  %v23091_v43 = vld [vmem:[%s25382_s11 + $0x790] ss:$68 sps:$4 sm:$0xff]   ;;  %v23094_v44 = vld [vmem:[%s25382_s11 + $0x798] ss:$68 sps:$4 sm:$0xff]  }
 0x50b   : > { %16200 = vmatpush1.bf16.msra.mxu0 %v23025_v45  ;;  %16587 = vmatpush1.bf16.msra.mxu1 %v23028_v48  ;;  %v23099_v45 = vld [vmem:[%s25382_s11 + $0x81c] ss:$68 sps:$4 sm:$0xff]   ;;  %v23102_v48 = vld [vmem:[%s25382_s11 + $0x824] ss:$68 sps:$4 sm:$0xff]  }
 0x50c   : > { %16201 = vmatprep.subr.bf16.mxu0 %v23033_v49  ;;  %16588 = vmatprep.subr.bf16.mxu1 %v23036_v50  ;;  %v23097_v49 = vld [vmem:[%s25382_s11 + $0x818] ss:$68 sps:$4 sm:$0xff]   ;;  %v23100_v50 = vld [vmem:[%s25382_s11 + $0x820] ss:$68 sps:$4 sm:$0xff]  }
 0x50f   : > { %16202 = vmatpush1.bf16.msra.mxu0 %v23031_v51  ;;  %16589 = vmatpush1.bf16.msra.mxu1 %v23034_v52  ;;  %v23105_v51 = vld [vmem:[%s25382_s11 + $0x8a4] ss:$68 sps:$4 sm:$0xff]   ;;  %v23108_v52 = vld [vmem:[%s25382_s11 + $0x8ac] ss:$68 sps:$4 sm:$0xff]  }
 0x510   : > { %16203 = vmatprep.subr.bf16.mxu0 %v23039_v54  ;;  %16590 = vmatprep.subr.bf16.mxu1 %v23042_v55  ;;  %v23103_v54 = vld [vmem:[%s25382_s11 + $0x8a0] ss:$68 sps:$4 sm:$0xff]   ;;  %v23106_v55 = vld [vmem:[%s25382_s11 + $0x8a8] ss:$68 sps:$4 sm:$0xff]  }
 0x513   : > { %16204 = vmatpush1.bf16.msra.mxu0 %v23037_v56  ;;  %16591 = vmatpush1.bf16.msra.mxu1 %v23040_v58  ;;  %v23111_v56 = vld [vmem:[%s25382_s11 + $0x92c] ss:$68 sps:$4 sm:$0xff]   ;;  %v23114_v58 = vld [vmem:[%s25382_s11 + $0x934] ss:$68 sps:$4 sm:$0xff]  }
 0x514   : > { %16205 = vmatprep.subr.bf16.mxu0 %v23045_v59  ;;  %16592 = vmatprep.subr.bf16.mxu1 %v23048_v60  ;;  %v23109_v59 = vld [vmem:[%s25382_s11 + $0x928] ss:$68 sps:$4 sm:$0xff]   ;;  %v23112_v60 = vld [vmem:[%s25382_s11 + $0x930] ss:$68 sps:$4 sm:$0xff]  }
 0x517   : > { %16206 = vmatpush1.bf16.msra.mxu0 %v23043_v61  ;;  %16593 = vmatpush1.bf16.msra.mxu1 %v23046_v63  ;;  %v23117_v61 = vld [vmem:[%s25382_s11 + $0x9b4] ss:$68 sps:$4 sm:$0xff]   ;;  %v23120_v63 = vld [vmem:[%s25382_s11 + $0x9bc] ss:$68 sps:$4 sm:$0xff]  }
 0x518   : > { %16207 = vmatprep.subr.bf16.mxu0 %v23051_v2  ;;  %16594 = vmatprep.subr.bf16.mxu1 %v23054_v3  ;;  %v23115_v2 = vld [vmem:[%s25382_s11 + $0x9b0] ss:$68 sps:$4 sm:$0xff]   ;;  %v23118_v3 = vld [vmem:[%s25382_s11 + $0x9b8] ss:$68 sps:$4 sm:$0xff]  }
 0x51b   : > { %16208 = vmatpush1.bf16.msra.mxu0 %v23049_v4  ;;  %16595 = vmatpush1.bf16.msra.mxu1 %v23052_v5  ;;  %v23123_v4 = vld [vmem:[%s25382_s11 + $0xa3c] ss:$68 sps:$4 sm:$0xff]   ;;  %v23126_v5 = vld [vmem:[%s25382_s11 + $0xa44] ss:$68 sps:$4 sm:$0xff]  }
 0x51c   : > { %16209 = vmatprep.subr.bf16.mxu0 %v23057_v9  ;;  %16596 = vmatprep.subr.bf16.mxu1 %v23060_v10  ;;  %v23121_v9 = vld [vmem:[%s25382_s11 + $0xa38] ss:$68 sps:$4 sm:$0xff]   ;;  %v23124_v10 = vld [vmem:[%s25382_s11 + $0xa40] ss:$68 sps:$4 sm:$0xff]  }
 0x51f   : > { %16210 = vmatpush1.bf16.msra.mxu0 %v23055_v11  ;;  %16597 = vmatpush1.bf16.msra.mxu1 %v23058_v13  ;;  %v23129_v11 = vld [vmem:[%s25382_s11 + $0xac4] ss:$68 sps:$4 sm:$0xff]   ;;  %v23132_v13 = vld [vmem:[%s25382_s11 + $0xacc] ss:$68 sps:$4 sm:$0xff]  }
 0x520   : > { %16211 = vmatprep.subr.bf16.mxu0 %v23063_v14  ;;  %16598 = vmatprep.subr.bf16.mxu1 %v23066_v16  ;;  %v23127_v14 = vld [vmem:[%s25382_s11 + $0xac0] ss:$68 sps:$4 sm:$0xff]   ;;  %v23130_v16 = vld [vmem:[%s25382_s11 + $0xac8] ss:$68 sps:$4 sm:$0xff]  }
 0x523   : > { %16212 = vmatpush1.bf16.msra.mxu0 %v23061_v17  ;;  %16599 = vmatpush1.bf16.msra.mxu1 %v23064_v18  ;;  %v23135_v17 = vld [vmem:[%s25382_s11 + $0xb4c] ss:$68 sps:$4 sm:$0xff]   ;;  %v23138_v18 = vld [vmem:[%s25382_s11 + $0xb54] ss:$68 sps:$4 sm:$0xff]  }
 0x524   : > { %16213 = vmatprep.subr.bf16.mxu0 %v23069_v19  ;;  %16600 = vmatprep.subr.bf16.mxu1 %v23072_v20  ;;  %v23133_v19 = vld [vmem:[%s25382_s11 + $0xb48] ss:$68 sps:$4 sm:$0xff]   ;;  %v23136_v20 = vld [vmem:[%s25382_s11 + $0xb50] ss:$68 sps:$4 sm:$0xff]  }
 0x527   : > { %16214 = vmatpush1.bf16.msra.mxu0 %v23067_v21  ;;  %16601 = vmatpush1.bf16.msra.mxu1 %v23070_v22  ;;  %v23141_v21 = vld [vmem:[%s25382_s11 + $0xbd4] ss:$68 sps:$4 sm:$0xff]   ;;  %v23144_v22 = vld [vmem:[%s25382_s11 + $0xbdc] ss:$68 sps:$4 sm:$0xff]  }
 0x528   : > { %16215 = vmatprep.subr.bf16.mxu0 %v23075_v25  ;;  %16602 = vmatprep.subr.bf16.mxu1 %v23078_v26  ;;  %v23139_v25 = vld [vmem:[%s25382_s11 + $0xbd0] ss:$68 sps:$4 sm:$0xff]   ;;  %v23142_v26 = vld [vmem:[%s25382_s11 + $0xbd8] ss:$68 sps:$4 sm:$0xff]  }
 0x52b   : > { %16216 = vmatpush1.bf16.msra.mxu0 %v23073_v27  ;;  %16603 = vmatpush1.bf16.msra.mxu1 %v23076_v29  ;;  %v23147_v27 = vld [vmem:[%s25382_s11 + $0xc5c] ss:$68 sps:$4 sm:$0xff]   ;;  %v23150_v29 = vld [vmem:[%s25382_s11 + $0xc64] ss:$68 sps:$4 sm:$0xff]  }
 0x52c   : > { %16217 = vmatprep.subr.bf16.mxu0 %v23081_v30  ;;  %16604 = vmatprep.subr.bf16.mxu1 %v23084_v31  ;;  %v23145_v30 = vld [vmem:[%s25382_s11 + $0xc58] ss:$68 sps:$4 sm:$0xff]   ;;  %v23148_v31 = vld [vmem:[%s25382_s11 + $0xc60] ss:$68 sps:$4 sm:$0xff]  }
 0x52f   : > { %16218 = vmatpush1.bf16.msra.mxu0 %v23079_v32  ;;  %16605 = vmatpush1.bf16.msra.mxu1 %v23082_v33  ;;  %v23153_v32 = vld [vmem:[%s25382_s11 + $0xce4] ss:$68 sps:$4 sm:$0xff]   ;;  %v23156_v33 = vld [vmem:[%s25382_s11 + $0xcec] ss:$68 sps:$4 sm:$0xff]  }
 0x530   : > { %16219 = vmatprep.subr.bf16.mxu0 %v23087_v35  ;;  %16606 = vmatprep.subr.bf16.mxu1 %v23090_v36  ;;  %v23151_v35 = vld [vmem:[%s25382_s11 + $0xce0] ss:$68 sps:$4 sm:$0xff]   ;;  %v23154_v36 = vld [vmem:[%s25382_s11 + $0xce8] ss:$68 sps:$4 sm:$0xff]  }
 0x533   : > { %16220 = vmatpush1.bf16.msra.mxu0 %v23085_v37  ;;  %16607 = vmatpush1.bf16.msra.mxu1 %v23088_v39  ;;  %v23159_v37 = vld [vmem:[%s25382_s11 + $0xd6c] ss:$68 sps:$4 sm:$0xff]   ;;  %v23162_v39 = vld [vmem:[%s25382_s11 + $0xd74] ss:$68 sps:$4 sm:$0xff]  }
 0x534   : > { %16221 = vmatprep.subr.bf16.mxu0 %v23093_v40  ;;  %16608 = vmatprep.subr.bf16.mxu1 %v23096_v42  ;;  %v23157_v40 = vld [vmem:[%s25382_s11 + $0xd68] ss:$68 sps:$4 sm:$0xff]   ;;  %v23160_v42 = vld [vmem:[%s25382_s11 + $0xd70] ss:$68 sps:$4 sm:$0xff]  }
 0x537   : > { %16222 = vmatpush1.bf16.msra.mxu0 %v23091_v43  ;;  %16609 = vmatpush1.bf16.msra.mxu1 %v23094_v44  ;;  %v23165_v43 = vld [vmem:[%s25382_s11 + $0xdf4] ss:$68 sps:$4 sm:$0xff]   ;;  %v23168_v44 = vld [vmem:[%s25382_s11 + $0xdfc] ss:$68 sps:$4 sm:$0xff]  }
 0x538   : > { %16223 = vmatprep.subr.bf16.mxu0 %v23099_v45  ;;  %16610 = vmatprep.subr.bf16.mxu1 %v23102_v48  ;;  %v23163_v45 = vld [vmem:[%s25382_s11 + $0xdf0] ss:$68 sps:$4 sm:$0xff]   ;;  %v23166_v48 = vld [vmem:[%s25382_s11 + $0xdf8] ss:$68 sps:$4 sm:$0xff]  }
 0x53b   : > { %16224 = vmatpush1.bf16.msra.mxu0 %v23097_v49  ;;  %16611 = vmatpush1.bf16.msra.mxu1 %v23100_v50  ;;  %v23171_v49 = vld [vmem:[%s25382_s11 + $0xe7c] ss:$68 sps:$4 sm:$0xff]   ;;  %v23174_v50 = vld [vmem:[%s25382_s11 + $0xe84] ss:$68 sps:$4 sm:$0xff]  }
 0x53c   : > { %16236 = vmatprep.subr.bf16.mxu0 %v23105_v51  ;;  %16623 = vmatprep.subr.bf16.mxu1 %v23108_v52  ;;  %v23169_v51 = vld [vmem:[%s25382_s11 + $0xe78] ss:$68 sps:$4 sm:$0xff]   ;;  %v23172_v52 = vld [vmem:[%s25382_s11 + $0xe80] ss:$68 sps:$4 sm:$0xff]  }
 0x53e   : > { %16226 = vmatmul.mubr.bf16.vlgmr.msra.gmra.mrb[8].mxu0 %v25510_v38  ;;  %16613 = vmatmul.mubr.bf16.vlgmr.msra.gmra.mrb[8].mxu1 %v25510_v38 }
 0x53f   : > { %16237 = vmatpush1.bf16.msra.mxu0 %v23103_v54  ;;  %16624 = vmatpush1.bf16.msra.mxu1 %v23106_v55  ;;  %v23177_v54 = vld [vmem:[%s25382_s11 + $0xf04] ss:$68 sps:$4 sm:$0xff]   ;;  %v23180_v55 = vld [vmem:[%s25382_s11 + $0xf0c] ss:$68 sps:$4 sm:$0xff]  }
 0x540   : > { %16238 = vmatprep.subr.bf16.mxu0 %v23111_v56  ;;  %16625 = vmatprep.subr.bf16.mxu1 %v23114_v58  ;;  %v23175_v56 = vld [vmem:[%s25382_s11 + $0xf00] ss:$68 sps:$4 sm:$0xff]   ;;  %v23178_v58 = vld [vmem:[%s25382_s11 + $0xf08] ss:$68 sps:$4 sm:$0xff]  }
 0x541   : > { %16268 = vmatprep.mubr.bf16.mxu0 %v25540_v1  ;;  %16655 = vmatprep.mubr.bf16.mxu1 %v25540_v1 }
 0x543   : > { %16239 = vmatpush1.bf16.msra.mxu0 %v23109_v59  ;;  %16626 = vmatpush1.bf16.msra.mxu1 %v23112_v60  ;;  %v23183_v59 = vld [vmem:[%s25382_s11 + $0xf8c] ss:$68 sps:$4 sm:$0xff]   ;;  %v23186_v60 = vld [vmem:[%s25382_s11 + $0xf94] ss:$68 sps:$4 sm:$0xff]  }
 0x544   : > { %16240 = vmatprep.subr.bf16.mxu0 %v23117_v61  ;;  %16627 = vmatprep.subr.bf16.mxu1 %v23120_v63  ;;  %v23181_v61 = vld [vmem:[%s25382_s11 + $0xf88] ss:$68 sps:$4 sm:$0xff]   ;;  %v23184_v63 = vld [vmem:[%s25382_s11 + $0xf90] ss:$68 sps:$4 sm:$0xff]  }
 0x547   : > { %16241 = vmatpush1.bf16.msra.mxu0 %v23115_v2  ;;  %16628 = vmatpush1.bf16.msra.mxu1 %v23118_v3  ;;  %v23189_v2 = vld [vmem:[%s25382_s11 + $0x1014] ss:$68 sps:$4 sm:$0xff]   ;;  %v23192_v3 = vld [vmem:[%s25382_s11 + $0x101c] ss:$68 sps:$4 sm:$0xff]  }
 0x548   : > { %16242 = vmatprep.subr.bf16.mxu0 %v23123_v4  ;;  %16629 = vmatprep.subr.bf16.mxu1 %v23126_v5  ;;  %v23187_v4 = vld [vmem:[%s25382_s11 + $0x1010] ss:$68 sps:$4 sm:$0xff]   ;;  %v23190_v5 = vld [vmem:[%s25382_s11 + $0x1018] ss:$68 sps:$4 sm:$0xff]  }
 0x54b   : > { %16243 = vmatpush1.bf16.msra.mxu0 %v23121_v9  ;;  %16630 = vmatpush1.bf16.msra.mxu1 %v23124_v10  ;;  %v23195_v9 = vld [vmem:[%s25382_s11 + $0x109c] ss:$68 sps:$4 sm:$0xff]   ;;  %v23198_v10 = vld [vmem:[%s25382_s11 + $0x10a4] ss:$68 sps:$4 sm:$0xff]  }
 0x54c   : > { %16244 = vmatprep.subr.bf16.mxu0 %v23129_v11  ;;  %16631 = vmatprep.subr.bf16.mxu1 %v23132_v13  ;;  %v23193_v11 = vld [vmem:[%s25382_s11 + $0x1098] ss:$68 sps:$4 sm:$0xff]   ;;  %v23196_v13 = vld [vmem:[%s25382_s11 + $0x10a0] ss:$68 sps:$4 sm:$0xff]  }
 0x54f   : > { %16245 = vmatpush1.bf16.msra.mxu0 %v23127_v14  ;;  %16632 = vmatpush1.bf16.msra.mxu1 %v23130_v16  ;;  %v23201_v14 = vld [vmem:[%s25382_s11 + $0x1124] ss:$68 sps:$4 sm:$0xff]   ;;  %v23204_v16 = vld [vmem:[%s25382_s11 + $0x112c] ss:$68 sps:$4 sm:$0xff]  }
 0x550   : > { %16246 = vmatprep.subr.bf16.mxu0 %v23135_v17  ;;  %16633 = vmatprep.subr.bf16.mxu1 %v23138_v18  ;;  %v23199_v17 = vld [vmem:[%s25382_s11 + $0x1120] ss:$68 sps:$4 sm:$0xff]   ;;  %v23202_v18 = vld [vmem:[%s25382_s11 + $0x1128] ss:$68 sps:$4 sm:$0xff]  }
 0x553   : > { %16247 = vmatpush1.bf16.msra.mxu0 %v23133_v19  ;;  %16634 = vmatpush1.bf16.msra.mxu1 %v23136_v20  ;;  %v23207_v19 = vld [vmem:[%s25382_s11 + $0x11ac] ss:$68 sps:$4 sm:$0xff]   ;;  %v23210_v20 = vld [vmem:[%s25382_s11 + $0x11b4] ss:$68 sps:$4 sm:$0xff]  }
 0x554   : > { %16248 = vmatprep.subr.bf16.mxu0 %v23141_v21  ;;  %16635 = vmatprep.subr.bf16.mxu1 %v23144_v22  ;;  %v23205_v21 = vld [vmem:[%s25382_s11 + $0x11a8] ss:$68 sps:$4 sm:$0xff]   ;;  %v23208_v22 = vld [vmem:[%s25382_s11 + $0x11b0] ss:$68 sps:$4 sm:$0xff]  }
 0x557   : > { %16249 = vmatpush1.bf16.msra.mxu0 %v23139_v25  ;;  %16636 = vmatpush1.bf16.msra.mxu1 %v23142_v26  ;;  %v23213_v25 = vld [vmem:[%s25382_s11 + $0x1234] ss:$68 sps:$4 sm:$0xff]   ;;  %v23216_v26 = vld [vmem:[%s25382_s11 + $0x123c] ss:$68 sps:$4 sm:$0xff]  }
 0x558   : > { %16250 = vmatprep.subr.bf16.mxu0 %v23147_v27  ;;  %16637 = vmatprep.subr.bf16.mxu1 %v23150_v29  ;;  %v23211_v27 = vld [vmem:[%s25382_s11 + $0x1230] ss:$68 sps:$4 sm:$0xff]   ;;  %v23214_v29 = vld [vmem:[%s25382_s11 + $0x1238] ss:$68 sps:$4 sm:$0xff]  }
 0x55b   : > { %16251 = vmatpush1.bf16.msra.mxu0 %v23145_v30  ;;  %16638 = vmatpush1.bf16.msra.mxu1 %v23148_v31  ;;  %v23219_v30 = vld [vmem:[%s25382_s11 + $0x12bc] ss:$68 sps:$4 sm:$0xff]   ;;  %v23222_v31 = vld [vmem:[%s25382_s11 + $0x12c4] ss:$68 sps:$4 sm:$0xff]  }
 0x55c   : > { %16252 = vmatprep.subr.bf16.mxu0 %v23153_v32  ;;  %16639 = vmatprep.subr.bf16.mxu1 %v23156_v33  ;;  %v23217_v32 = vld [vmem:[%s25382_s11 + $0x12b8] ss:$68 sps:$4 sm:$0xff]   ;;  %v23220_v33 = vld [vmem:[%s25382_s11 + $0x12c0] ss:$68 sps:$4 sm:$0xff]  }
 0x55f   : > { %16253 = vmatpush1.bf16.msra.mxu0 %v23151_v35  ;;  %16640 = vmatpush1.bf16.msra.mxu1 %v23154_v36  ;;  %v23225_v35 = vld [vmem:[%s25382_s11 + $0x1344] ss:$68 sps:$4 sm:$0xff]   ;;  %v23228_v36 = vld [vmem:[%s25382_s11 + $0x134c] ss:$68 sps:$4 sm:$0xff]  }
 0x560   : > { %16254 = vmatprep.subr.bf16.mxu0 %v23159_v37  ;;  %16641 = vmatprep.subr.bf16.mxu1 %v23162_v39  ;;  %v23223_v37 = vld [vmem:[%s25382_s11 + $0x1340] ss:$68 sps:$4 sm:$0xff]   ;;  %v23226_v39 = vld [vmem:[%s25382_s11 + $0x1348] ss:$68 sps:$4 sm:$0xff]  }
 0x563   : > { %16255 = vmatpush1.bf16.msra.mxu0 %v23157_v40  ;;  %16642 = vmatpush1.bf16.msra.mxu1 %v23160_v42  ;;  %v23231_v40 = vld [vmem:[%s25382_s11 + $0x13cc] ss:$68 sps:$4 sm:$0xff]   ;;  %v23234_v42 = vld [vmem:[%s25382_s11 + $0x13d4] ss:$68 sps:$4 sm:$0xff]  }
 0x564   : > { %16256 = vmatprep.subr.bf16.mxu0 %v23165_v43  ;;  %16643 = vmatprep.subr.bf16.mxu1 %v23168_v44  ;;  %v23229_v43 = vld [vmem:[%s25382_s11 + $0x13c8] ss:$68 sps:$4 sm:$0xff]   ;;  %v23232_v44 = vld [vmem:[%s25382_s11 + $0x13d0] ss:$68 sps:$4 sm:$0xff]  }
 0x567   : > { %16257 = vmatpush1.bf16.msra.mxu0 %v23163_v45  ;;  %16644 = vmatpush1.bf16.msra.mxu1 %v23166_v48  ;;  %v23237_v45 = vld [vmem:[%s25382_s11 + $0x1454] ss:$68 sps:$4 sm:$0xff]   ;;  %v23240_v48 = vld [vmem:[%s25382_s11 + $0x145c] ss:$68 sps:$4 sm:$0xff]  }
 0x568   : > { %16258 = vmatprep.subr.bf16.mxu0 %v23171_v49  ;;  %16645 = vmatprep.subr.bf16.mxu1 %v23174_v50  ;;  %v23235_v49 = vld [vmem:[%s25382_s11 + $0x1450] ss:$68 sps:$4 sm:$0xff]   ;;  %v23238_v50 = vld [vmem:[%s25382_s11 + $0x1458] ss:$68 sps:$4 sm:$0xff]  }
 0x56b   : > { %16259 = vmatpush1.bf16.msra.mxu0 %v23169_v51  ;;  %16646 = vmatpush1.bf16.msra.mxu1 %v23172_v52  ;;  %v23243_v51 = vld [vmem:[%s25382_s11 + $0x14dc] ss:$68 sps:$4 sm:$0xff]   ;;  %v23246_v52 = vld [vmem:[%s25382_s11 + $0x14e4] ss:$68 sps:$4 sm:$0xff]  }
 0x56c   : > { %16260 = vmatprep.subr.bf16.mxu0 %v23177_v54  ;;  %16647 = vmatprep.subr.bf16.mxu1 %v23180_v55  ;;  %v23241_v54 = vld [vmem:[%s25382_s11 + $0x14d8] ss:$68 sps:$4 sm:$0xff]   ;;  %v23244_v55 = vld [vmem:[%s25382_s11 + $0x14e0] ss:$68 sps:$4 sm:$0xff]  }
 0x56f   : > { %16261 = vmatpush1.bf16.msra.mxu0 %v23175_v56  ;;  %16648 = vmatpush1.bf16.msra.mxu1 %v23178_v58  ;;  %v23249_v56 = vld [vmem:[%s25382_s11 + $0x1564] ss:$68 sps:$4 sm:$0xff]   ;;  %v23252_v58 = vld [vmem:[%s25382_s11 + $0x156c] ss:$68 sps:$4 sm:$0xff]  }
 0x570   : > { %16262 = vmatprep.subr.bf16.mxu0 %v23183_v59  ;;  %16649 = vmatprep.subr.bf16.mxu1 %v23186_v60  ;;  %v23247_v59 = vld [vmem:[%s25382_s11 + $0x1560] ss:$68 sps:$4 sm:$0xff]   ;;  %v23250_v60 = vld [vmem:[%s25382_s11 + $0x1568] ss:$68 sps:$4 sm:$0xff]  }
 0x573   : > { %16263 = vmatpush1.bf16.msra.mxu0 %v23181_v61  ;;  %16650 = vmatpush1.bf16.msra.mxu1 %v23184_v63  ;;  %v23255_v61 = vld [vmem:[%s25382_s11 + $0x15ec] ss:$68 sps:$4 sm:$0xff]   ;;  %v23258_v63 = vld [vmem:[%s25382_s11 + $0x15f4] ss:$68 sps:$4 sm:$0xff]  }
 0x574   : > { %16264 = vmatprep.subr.bf16.mxu0 %v23189_v2  ;;  %16651 = vmatprep.subr.bf16.mxu1 %v23192_v3  ;;  %v23253_v2 = vld [vmem:[%s25382_s11 + $0x15e8] ss:$68 sps:$4 sm:$0xff]   ;;  %v23256_v3 = vld [vmem:[%s25382_s11 + $0x15f0] ss:$68 sps:$4 sm:$0xff]  }
 0x577   : > { %16265 = vmatpush1.bf16.msra.mxu0 %v23187_v4  ;;  %16652 = vmatpush1.bf16.msra.mxu1 %v23190_v5  ;;  %v23261_v4 = vld [vmem:[%s25382_s11 + $0x1674] ss:$68 sps:$4 sm:$0xff]   ;;  %v23264_v5 = vld [vmem:[%s25382_s11 + $0x167c] ss:$68 sps:$4 sm:$0xff]  }
 0x578   : > { %16266 = vmatprep.subr.bf16.mxu0 %v23195_v9  ;;  %16653 = vmatprep.subr.bf16.mxu1 %v23198_v10  ;;  %v23259_v9 = vld [vmem:[%s25382_s11 + $0x1670] ss:$68 sps:$4 sm:$0xff]   ;;  %v23262_v10 = vld [vmem:[%s25382_s11 + $0x1678] ss:$68 sps:$4 sm:$0xff]  }
 0x57b   : > { %16267 = vmatpush1.bf16.msra.mxu0 %v23193_v11  ;;  %16654 = vmatpush1.bf16.msra.mxu1 %v23196_v13  ;;  %v23267_v11 = vld [vmem:[%s25382_s11 + $0x16fc] ss:$68 sps:$4 sm:$0xff]   ;;  %v23270_v13 = vld [vmem:[%s25382_s11 + $0x1704] ss:$68 sps:$4 sm:$0xff]  }
 0x57c   : > { %16279 = vmatprep.subr.bf16.mxu0 %v23201_v14  ;;  %16666 = vmatprep.subr.bf16.mxu1 %v23204_v16  ;;  %v23265_v14 = vld [vmem:[%s25382_s11 + $0x16f8] ss:$68 sps:$4 sm:$0xff]   ;;  %v23268_v16 = vld [vmem:[%s25382_s11 + $0x1700] ss:$68 sps:$4 sm:$0xff]  }
 0x57e   : > { %16269 = vmatmul.mubr.bf16.vlgmr.msra.gmra.mrb[8].mxu0 %v25586_v46  ;;  %16656 = vmatmul.mubr.bf16.vlgmr.msra.gmra.mrb[8].mxu1 %v25586_v46 }
 0x57f   : > { %16280 = vmatpush1.bf16.msra.mxu0 %v23199_v17  ;;  %16667 = vmatpush1.bf16.msra.mxu1 %v23202_v18  ;;  %v23273_v17 = vld [vmem:[%s25382_s11 + $0x1784] ss:$68 sps:$4 sm:$0xff]   ;;  %v23276_v18 = vld [vmem:[%s25382_s11 + $0x178c] ss:$68 sps:$4 sm:$0xff]  }
 0x580   : > { %16281 = vmatprep.subr.bf16.mxu0 %v23207_v19  ;;  %16668 = vmatprep.subr.bf16.mxu1 %v23210_v20  ;;  %v23271_v19 = vld [vmem:[%s25382_s11 + $0x1780] ss:$68 sps:$4 sm:$0xff]   ;;  %v23274_v20 = vld [vmem:[%s25382_s11 + $0x1788] ss:$68 sps:$4 sm:$0xff]  }
 0x581   : > { %16311 = vmatprep.mubr.bf16.mxu0 %v25596_v53  ;;  %16698 = vmatprep.mubr.bf16.mxu1 %v25596_v53 }
 0x583   : > { %16282 = vmatpush1.bf16.msra.mxu0 %v23205_v21  ;;  %16669 = vmatpush1.bf16.msra.mxu1 %v23208_v22  ;;  %v23279_v21 = vld [vmem:[%s25382_s11 + $0x180c] ss:$68 sps:$4 sm:$0xff]   ;;  %v23282_v22 = vld [vmem:[%s25382_s11 + $0x1814] ss:$68 sps:$4 sm:$0xff]  }
 0x584   : > { %16283 = vmatprep.subr.bf16.mxu0 %v23213_v25  ;;  %16670 = vmatprep.subr.bf16.mxu1 %v23216_v26  ;;  %v23277_v25 = vld [vmem:[%s25382_s11 + $0x1808] ss:$68 sps:$4 sm:$0xff]   ;;  %v23280_v26 = vld [vmem:[%s25382_s11 + $0x1810] ss:$68 sps:$4 sm:$0xff]  }
 0x587   : > { %16284 = vmatpush1.bf16.msra.mxu0 %v23211_v27  ;;  %16671 = vmatpush1.bf16.msra.mxu1 %v23214_v29  ;;  %v23285_v27 = vld [vmem:[%s25382_s11 + $0x1894] ss:$68 sps:$4 sm:$0xff]   ;;  %v23288_v29 = vld [vmem:[%s25382_s11 + $0x189c] ss:$68 sps:$4 sm:$0xff]  }
 0x588   : > { %16285 = vmatprep.subr.bf16.mxu0 %v23219_v30  ;;  %16672 = vmatprep.subr.bf16.mxu1 %v23222_v31  ;;  %v23283_v30 = vld [vmem:[%s25382_s11 + $0x1890] ss:$68 sps:$4 sm:$0xff]   ;;  %v23286_v31 = vld [vmem:[%s25382_s11 + $0x1898] ss:$68 sps:$4 sm:$0xff]  }
 0x58b   : > { %16286 = vmatpush1.bf16.msra.mxu0 %v23217_v32  ;;  %16673 = vmatpush1.bf16.msra.mxu1 %v23220_v33  ;;  %v23291_v32 = vld [vmem:[%s25382_s11 + $0x191c] ss:$68 sps:$4 sm:$0xff]   ;;  %v23294_v33 = vld [vmem:[%s25382_s11 + $0x1924] ss:$68 sps:$4 sm:$0xff]  }
 0x58c   : > { %16287 = vmatprep.subr.bf16.mxu0 %v23225_v35  ;;  %16674 = vmatprep.subr.bf16.mxu1 %v23228_v36  ;;  %v23289_v35 = vld [vmem:[%s25382_s11 + $0x1918] ss:$68 sps:$4 sm:$0xff]   ;;  %v23292_v36 = vld [vmem:[%s25382_s11 + $0x1920] ss:$68 sps:$4 sm:$0xff]  }
 0x58f   : > { %16288 = vmatpush1.bf16.msra.mxu0 %v23223_v37  ;;  %16675 = vmatpush1.bf16.msra.mxu1 %v23226_v39  ;;  %v23297_v37 = vld [vmem:[%s25382_s11 + $0x19a4] ss:$68 sps:$4 sm:$0xff]   ;;  %v23300_v39 = vld [vmem:[%s25382_s11 + $0x19ac] ss:$68 sps:$4 sm:$0xff]  }
 0x590   : > { %16289 = vmatprep.subr.bf16.mxu0 %v23231_v40  ;;  %16676 = vmatprep.subr.bf16.mxu1 %v23234_v42  ;;  %v23295_v40 = vld [vmem:[%s25382_s11 + $0x19a0] ss:$68 sps:$4 sm:$0xff]   ;;  %v23298_v42 = vld [vmem:[%s25382_s11 + $0x19a8] ss:$68 sps:$4 sm:$0xff]  }
 0x593   : > { %16290 = vmatpush1.bf16.msra.mxu0 %v23229_v43  ;;  %16677 = vmatpush1.bf16.msra.mxu1 %v23232_v44  ;;  %v23303_v43 = vld [vmem:[%s25382_s11 + $0x1a2c] ss:$68 sps:$4 sm:$0xff]   ;;  %v23306_v44 = vld [vmem:[%s25382_s11 + $0x1a34] ss:$68 sps:$4 sm:$0xff]  }
 0x594   : > { %16291 = vmatprep.subr.bf16.mxu0 %v23237_v45  ;;  %16678 = vmatprep.subr.bf16.mxu1 %v23240_v48  ;;  %v23301_v45 = vld [vmem:[%s25382_s11 + $0x1a28] ss:$68 sps:$4 sm:$0xff]   ;;  %v23304_v48 = vld [vmem:[%s25382_s11 + $0x1a30] ss:$68 sps:$4 sm:$0xff]  }
 0x597   : > { %16292 = vmatpush1.bf16.msra.mxu0 %v23235_v49  ;;  %16679 = vmatpush1.bf16.msra.mxu1 %v23238_v50  ;;  %v23309_v49 = vld [vmem:[%s25382_s11 + $0x1ab4] ss:$68 sps:$4 sm:$0xff]   ;;  %v23312_v50 = vld [vmem:[%s25382_s11 + $0x1abc] ss:$68 sps:$4 sm:$0xff]  }
 0x598   : > { %16293 = vmatprep.subr.bf16.mxu0 %v23243_v51  ;;  %16680 = vmatprep.subr.bf16.mxu1 %v23246_v52  ;;  %v23307_v51 = vld [vmem:[%s25382_s11 + $0x1ab0] ss:$68 sps:$4 sm:$0xff]   ;;  %v23310_v52 = vld [vmem:[%s25382_s11 + $0x1ab8] ss:$68 sps:$4 sm:$0xff]  }
 0x59b   : > { %16294 = vmatpush1.bf16.msra.mxu0 %v23241_v54  ;;  %16681 = vmatpush1.bf16.msra.mxu1 %v23244_v55  ;;  %v23315_v54 = vld [vmem:[%s25382_s11 + $0x1b3c] ss:$68 sps:$4 sm:$0xff]   ;;  %v23318_v55 = vld [vmem:[%s25382_s11 + $0x1b44] ss:$68 sps:$4 sm:$0xff]  }
 0x59c   : > { %16295 = vmatprep.subr.bf16.mxu0 %v23249_v56  ;;  %16682 = vmatprep.subr.bf16.mxu1 %v23252_v58  ;;  %v23313_v56 = vld [vmem:[%s25382_s11 + $0x1b38] ss:$68 sps:$4 sm:$0xff]   ;;  %v23316_v58 = vld [vmem:[%s25382_s11 + $0x1b40] ss:$68 sps:$4 sm:$0xff]  }
 0x59f   : > { %16296 = vmatpush1.bf16.msra.mxu0 %v23247_v59  ;;  %16683 = vmatpush1.bf16.msra.mxu1 %v23250_v60  ;;  %v23321_v59 = vld [vmem:[%s25382_s11 + $0x1bc4] ss:$68 sps:$4 sm:$0xff]   ;;  %v23324_v60 = vld [vmem:[%s25382_s11 + $0x1bcc] ss:$68 sps:$4 sm:$0xff]  }
 0x5a0   : > { %16297 = vmatprep.subr.bf16.mxu0 %v23255_v61  ;;  %16684 = vmatprep.subr.bf16.mxu1 %v23258_v63  ;;  %v23319_v61 = vld [vmem:[%s25382_s11 + $0x1bc0] ss:$68 sps:$4 sm:$0xff]   ;;  %v23322_v63 = vld [vmem:[%s25382_s11 + $0x1bc8] ss:$68 sps:$4 sm:$0xff]  }
 0x5a3   : > { %16298 = vmatpush1.bf16.msra.mxu0 %v23253_v2  ;;  %16685 = vmatpush1.bf16.msra.mxu1 %v23256_v3  ;;  %v23327_v2 = vld [vmem:[%s25382_s11 + $0x1c4c] ss:$68 sps:$4 sm:$0xff]   ;;  %v23330_v3 = vld [vmem:[%s25382_s11 + $0x1c54] ss:$68 sps:$4 sm:$0xff]  }
 0x5a4   : > { %16299 = vmatprep.subr.bf16.mxu0 %v23261_v4  ;;  %16686 = vmatprep.subr.bf16.mxu1 %v23264_v5  ;;  %v420_v4 = vld [vmem:[%s25397_s28 + $0x20] sm:$0xff]  ;;  %v422_v5 = vld [vmem:[%s25397_s28 + $0x30] sm:$0xff] }
 0x5a7   : > { %16300 = vmatpush1.bf16.msra.mxu0 %v23259_v9  ;;  %16687 = vmatpush1.bf16.msra.mxu1 %v23262_v10  ;;  %v23325_v9 = vld [vmem:[%s25382_s11 + $0x1c48] ss:$68 sps:$4 sm:$0xff]   ;;  %v23328_v10 = vld [vmem:[%s25382_s11 + $0x1c50] ss:$68 sps:$4 sm:$0xff]  }
 0x5a8   : > { %16301 = vmatprep.subr.bf16.mxu0 %v23267_v11  ;;  %16688 = vmatprep.subr.bf16.mxu1 %v23270_v13  ;;  %v421_v11 = vld [vmem:[%s25397_s28 + $0x28] sm:$0xff]  ;;  %v423_v13 = vld [vmem:[%s25397_s28 + $0x38] sm:$0xff] }
 0x5ab   : > { %16302 = vmatpush1.bf16.msra.mxu0 %v23265_v14  ;;  %16689 = vmatpush1.bf16.msra.mxu1 %v23268_v16  ;;  %v437_v14 = vld [vmem:[%s25397_s28 + $0xa8] sm:$0xff]  ;;  %v439_v16 = vld [vmem:[%s25397_s28 + $0xb8] sm:$0xff] }
 0x5ac   : > { %16303 = vmatprep.subr.bf16.mxu0 %v23273_v17  ;;  %16690 = vmatprep.subr.bf16.mxu1 %v23276_v18  ;;  %v438_v17 = vld [vmem:[%s25397_s28 + $0xb0] sm:$0xff]  ;;  %v440_v18 = vld [vmem:[%s25397_s28 + $0xc0] sm:$0xff] }
 0x5af   : > { %16304 = vmatpush1.bf16.msra.mxu0 %v23271_v19  ;;  %16691 = vmatpush1.bf16.msra.mxu1 %v23274_v20  ;;  %v23333_v19 = vld [vmem:[%s25382_s11 + $0x1cd4] ss:$68 sps:$4 sm:$0xff]   ;;  %v23336_v20 = vld [vmem:[%s25382_s11 + $0x1cdc] ss:$68 sps:$4 sm:$0xff]  }
 0x5b0   : > { %16305 = vmatprep.subr.bf16.mxu0 %v23279_v21  ;;  %16692 = vmatprep.subr.bf16.mxu1 %v23282_v22 }
 0x5b3   : > { %16306 = vmatpush1.bf16.msra.mxu0 %v23277_v25  ;;  %16693 = vmatpush1.bf16.msra.mxu1 %v23280_v26 }
 0x5b4   : > { %16307 = vmatprep.subr.bf16.mxu0 %v23285_v27  ;;  %16694 = vmatprep.subr.bf16.mxu1 %v23288_v29 }
 0x5b7   : > { %16308 = vmatpush1.bf16.msra.mxu0 %v23283_v30  ;;  %16695 = vmatpush1.bf16.msra.mxu1 %v23286_v31 }
 0x5b8   : > { %16309 = vmatprep.subr.bf16.mxu0 %v23291_v32  ;;  %16696 = vmatprep.subr.bf16.mxu1 %v23294_v33 }
 0x5bb   : > { %16310 = vmatpush1.bf16.msra.mxu0 %v23289_v35  ;;  %16697 = vmatpush1.bf16.msra.mxu1 %v23292_v36  ;;  %v23331_v35 = vld [vmem:[%s25382_s11 + $0x1cd0] ss:$68 sps:$4 sm:$0xff]   ;;  %v23334_v36 = vld [vmem:[%s25382_s11 + $0x1cd8] ss:$68 sps:$4 sm:$0xff]  }
 0x5bc   : > { %16322 = vmatprep.subr.bf16.mxu0 %v23297_v37  ;;  %16709 = vmatprep.subr.bf16.mxu1 %v23300_v39 }
 0x5be   : > { %16312 = vmatmul.mubr.bf16.vlgmr.msra.gmra.mrb[8].mxu0 %v25662_v57  ;;  %16699 = vmatmul.mubr.bf16.vlgmr.msra.gmra.mrb[8].mxu1 %v25662_v57 }
 0x5bf   : > { %16323 = vmatpush1.bf16.msra.mxu0 %v23295_v40  ;;  %16710 = vmatpush1.bf16.msra.mxu1 %v23298_v42 }
 0x5c0   : > { %16324 = vmatprep.subr.bf16.mxu0 %v23303_v43  ;;  %16711 = vmatprep.subr.bf16.mxu1 %v23306_v44  ;;  %v23339_v43 = vld [vmem:[%s25382_s11 + $0x1d5c] ss:$68 sps:$4 sm:$0xff]   ;;  %v23342_v44 = vld [vmem:[%s25382_s11 + $0x1d64] ss:$68 sps:$4 sm:$0xff]  }
 0x5c1   : > { %16354 = vmatprep.mubr.bf16.mxu0 %v25668_v62  ;;  %16741 = vmatprep.mubr.bf16.mxu1 %v25668_v62 }
 0x5c3   : > { %16325 = vmatpush1.bf16.msra.mxu0 %v23301_v45  ;;  %16712 = vmatpush1.bf16.msra.mxu1 %v23304_v48 }
 0x5c4   : > { %16326 = vmatprep.subr.bf16.mxu0 %v23309_v49  ;;  %16713 = vmatprep.subr.bf16.mxu1 %v23312_v50  ;;  %v23337_v49 = vld [vmem:[%s25382_s11 + $0x1d58] ss:$68 sps:$4 sm:$0xff]   ;;  %v23340_v50 = vld [vmem:[%s25382_s11 + $0x1d60] ss:$68 sps:$4 sm:$0xff]  }
 0x5c7   : > { %16327 = vmatpush1.bf16.msra.mxu0 %v23307_v51  ;;  %16714 = vmatpush1.bf16.msra.mxu1 %v23310_v52  ;;  %v23345_v51 = vld [vmem:[%s25382_s11 + $0x1de4] ss:$68 sps:$4 sm:$0xff]   ;;  %v23348_v52 = vld [vmem:[%s25382_s11 + $0x1dec] ss:$68 sps:$4 sm:$0xff]  }
 0x5c8   : > { %16328 = vmatprep.subr.bf16.mxu0 %v23315_v54  ;;  %16715 = vmatprep.subr.bf16.mxu1 %v23318_v55  ;;  %v23343_v54 = vld [vmem:[%s25382_s11 + $0x1de0] ss:$68 sps:$4 sm:$0xff]   ;;  %v23346_v55 = vld [vmem:[%s25382_s11 + $0x1de8] ss:$68 sps:$4 sm:$0xff]  }
 0x5cb   : > { %16329 = vmatpush1.bf16.msra.mxu0 %v23313_v56  ;;  %16716 = vmatpush1.bf16.msra.mxu1 %v23316_v58  ;;  %v23351_v56 = vld [vmem:[%s25382_s11 + $0x1e6c] ss:$68 sps:$4 sm:$0xff]   ;;  %v23354_v58 = vld [vmem:[%s25382_s11 + $0x1e74] ss:$68 sps:$4 sm:$0xff]  }
 0x5cc   : > { %16330 = vmatprep.subr.bf16.mxu0 %v23321_v59  ;;  %16717 = vmatprep.subr.bf16.mxu1 %v23324_v60  ;;  %v23349_v59 = vld [vmem:[%s25382_s11 + $0x1e68] ss:$68 sps:$4 sm:$0xff]   ;;  %v23352_v60 = vld [vmem:[%s25382_s11 + $0x1e70] ss:$68 sps:$4 sm:$0xff]  }
 0x5cf   : > { %16331 = vmatpush1.bf16.msra.mxu0 %v23319_v61  ;;  %16718 = vmatpush1.bf16.msra.mxu1 %v23322_v63  ;;  %v23357_v61 = vld [vmem:[%s25382_s11 + $0x1ef4] ss:$68 sps:$4 sm:$0xff]   ;;  %v23360_v63 = vld [vmem:[%s25382_s11 + $0x1efc] ss:$68 sps:$4 sm:$0xff]  }
 0x5d0   : > { %16332 = vmatprep.subr.bf16.mxu0 %v23327_v2  ;;  %16719 = vmatprep.subr.bf16.mxu1 %v23330_v3  ;;  %v23355_v2 = vld [vmem:[%s25382_s11 + $0x1ef0] ss:$68 sps:$4 sm:$0xff]   ;;  %v23358_v3 = vld [vmem:[%s25382_s11 + $0x1ef8] ss:$68 sps:$4 sm:$0xff]  }
 0x5d1   : > { %v15797_v21 = vpop.f32.mrb[4].mxu0  ;;  %v16184_v22 = vpop.f32.mrb[4].mxu1 }
 0x5d2   : > { %v18114_v25 = vadd.f32 %v15797_v21, %v420_v4  ;;  %v18116_v26 = vadd.f32 %v16184_v22, %v422_v5  ;;  %v15799_v27 = vpop.f32.mrb[5].mxu0  ;;  %v16186_v29 = vpop.f32.mrb[5].mxu1  ;;  %v23363_v4 = vld [vmem:[%s25382_s11 + $0x1f7c] ss:$68 sps:$4 sm:$0xff]   ;;  %v23366_v5 = vld [vmem:[%s25382_s11 + $0x1f84] ss:$68 sps:$4 sm:$0xff]  }
 0x5d3   : > { %v18115_v30 = vadd.f32 %v15799_v27, %v421_v11  ;;  %v18117_v31 = vadd.f32 %v16186_v29, %v423_v13  ;;  %v15801_v32 = vpop.f32.mrb[6].mxu0  ;;  %v16188_v33 = vpop.f32.mrb[6].mxu1  ;;  %16333 = vmatpush1.bf16.msra.mxu0 %v23325_v9  ;;  %16720 = vmatpush1.bf16.msra.mxu1 %v23328_v10  ;;  %v23361_v9 = vld [vmem:[%s25382_s11 + $0x1f78] ss:$68 sps:$4 sm:$0xff]   ;;  %v23364_v10 = vld [vmem:[%s25382_s11 + $0x1f80] ss:$68 sps:$4 sm:$0xff]  }
 0x5d4   : > { %18148 = vst [vmem:[%s25397_s28 + $0x20] sm:$0xff] %v18114_v25  ;;  %18150 = vst [vmem:[%s25397_s28 + $0x30] sm:$0xff] %v18116_v26  ;;  %v18131_v37 = vadd.f32 %v15801_v32, %v437_v14  ;;  %v18133_v39 = vadd.f32 %v16188_v33, %v439_v16  ;;  %v15803_v40 = vpop.f32.mrb[7].mxu0  ;;  %v16190_v42 = vpop.f32.mrb[7].mxu1  ;;  %16334 = vmatprep.subr.bf16.mxu0 %v23333_v19  ;;  %16721 = vmatprep.subr.bf16.mxu1 %v23336_v20  ;;  %v23369_v11 = vld [vmem:[%s25382_s11 + $0x2004] ss:$68 sps:$4 sm:$0xff]  }
 0x5d5   : > { %18149 = vst [vmem:[%s25397_s28 + $0x28] sm:$0xff] %v18115_v30  ;;  %18151 = vst [vmem:[%s25397_s28 + $0x38] sm:$0xff] %v18117_v31  ;;  %v18132_v45 = vadd.f32 %v15803_v40, %v438_v17  ;;  %v18134_v48 = vadd.f32 %v16190_v42, %v440_v18  ;;  %v23372_v13 = vld [vmem:[%s25382_s11 + $0x200c] ss:$68 sps:$4 sm:$0xff]   ;;  %v23367_v14 = vld [vmem:[%s25382_s11 + $0x2000] ss:$68 sps:$4 sm:$0xff]  }
 0x5d6   : > { %18165 = vst [vmem:[%s25397_s28 + $0xa8] sm:$0xff] %v18131_v37  ;;  %18167 = vst [vmem:[%s25397_s28 + $0xb8] sm:$0xff] %v18133_v39  ;;  %v23370_v16 = vld [vmem:[%s25382_s11 + $0x2008] ss:$68 sps:$4 sm:$0xff]   ;;  %v23378_v18 = vld [vmem:[%s25382_s11 + $0x2094] ss:$68 sps:$4 sm:$0xff]  }
 0x5d7   : > { %18166 = vst [vmem:[%s25397_s28 + $0xb0] sm:$0xff] %v18132_v45  ;;  %18168 = vst [vmem:[%s25397_s28 + $0xc0] sm:$0xff] %v18134_v48  ;;  %16335 = vmatpush1.bf16.msra.mxu0 %v23331_v35  ;;  %16722 = vmatpush1.bf16.msra.mxu1 %v23334_v36  ;;  %v23375_v17 = vld [vmem:[%s25382_s11 + $0x208c] ss:$68 sps:$4 sm:$0xff]   ;;  %v23381_v21 = vld [vmem:[%s25382_s11 + $0x2114] ss:$68 sps:$4 sm:$0xff]  }
 0x5d8   : > { %16336 = vmatprep.subr.bf16.mxu0 %v23339_v43  ;;  %16723 = vmatprep.subr.bf16.mxu1 %v23342_v44  ;;  %v23373_v19 = vld [vmem:[%s25382_s11 + $0x2088] ss:$68 sps:$4 sm:$0xff]   ;;  %v23376_v20 = vld [vmem:[%s25382_s11 + $0x2090] ss:$68 sps:$4 sm:$0xff]   ;;  %v23384_v22 = vld [vmem:[%s25382_s11 + $0x211c] ss:$68 sps:$4 sm:$0xff]  }
 0x5d9   : > { %v23379_v25 = vld [vmem:[%s25382_s11 + $0x2110] ss:$68 sps:$4 sm:$0xff]   ;;  %v23382_v26 = vld [vmem:[%s25382_s11 + $0x2118] ss:$68 sps:$4 sm:$0xff]   ;;  %v23390_v29 = vld [vmem:[%s25382_s11 + $0x21a4] ss:$68 sps:$4 sm:$0xff]  }
 0x5da   : > { %v23387_v27 = vld [vmem:[%s25382_s11 + $0x219c] ss:$68 sps:$4 sm:$0xff]   ;;  %v23393_v32 = vld [vmem:[%s25382_s11 + $0x2224] ss:$68 sps:$4 sm:$0xff]   ;;  %v23396_v33 = vld [vmem:[%s25382_s11 + $0x222c] ss:$68 sps:$4 sm:$0xff]  }
 0x5db   : > { %16337 = vmatpush1.bf16.msra.mxu0 %v23337_v49  ;;  %16724 = vmatpush1.bf16.msra.mxu1 %v23340_v50  ;;  %v23385_v30 = vld [vmem:[%s25382_s11 + $0x2198] ss:$68 sps:$4 sm:$0xff]   ;;  %v23388_v31 = vld [vmem:[%s25382_s11 + $0x21a0] ss:$68 sps:$4 sm:$0xff]   ;;  %v23394_v36 = vld [vmem:[%s25382_s11 + $0x2228] ss:$68 sps:$4 sm:$0xff]  }
 0x5dc   : > { %16338 = vmatprep.subr.bf16.mxu0 %v23345_v51  ;;  %16725 = vmatprep.subr.bf16.mxu1 %v23348_v52  ;;  %v23391_v35 = vld [vmem:[%s25382_s11 + $0x2220] ss:$68 sps:$4 sm:$0xff]   ;;  %v23399_v37 = vld [vmem:[%s25382_s11 + $0x22ac] ss:$68 sps:$4 sm:$0xff]   ;;  %v23402_v39 = vld [vmem:[%s25382_s11 + $0x22b4] ss:$68 sps:$4 sm:$0xff]  }
 0x5dd   : > { %v23397_v40 = vld [vmem:[%s25382_s11 + $0x22a8] ss:$68 sps:$4 sm:$0xff]   ;;  %v23400_v42 = vld [vmem:[%s25382_s11 + $0x22b0] ss:$68 sps:$4 sm:$0xff]   ;;  %v23408_v44 = vld [vmem:[%s25382_s11 + $0x233c] ss:$68 sps:$4 sm:$0xff]  }
 0x5de   : > { %v23405_v43 = vld [vmem:[%s25382_s11 + $0x2334] ss:$68 sps:$4 sm:$0xff]   ;;  %v23411_v49 = vld [vmem:[%s25382_s11 + $0x23bc] ss:$68 sps:$4 sm:$0xff]   ;;  %v23414_v50 = vld [vmem:[%s25382_s11 + $0x23c4] ss:$68 sps:$4 sm:$0xff]  }
 0x5df   : > { %16339 = vmatpush1.bf16.msra.mxu0 %v23343_v54  ;;  %16726 = vmatpush1.bf16.msra.mxu1 %v23346_v55  ;;  %v23403_v45 = vld [vmem:[%s25382_s11 + $0x2330] ss:$68 sps:$4 sm:$0xff]   ;;  %v23406_v48 = vld [vmem:[%s25382_s11 + $0x2338] ss:$68 sps:$4 sm:$0xff]   ;;  %v23412_v52 = vld [vmem:[%s25382_s11 + $0x23c0] ss:$68 sps:$4 sm:$0xff]  }
 0x5e0   : > { %16340 = vmatprep.subr.bf16.mxu0 %v23351_v56  ;;  %16727 = vmatprep.subr.bf16.mxu1 %v23354_v58  ;;  %v23409_v51 = vld [vmem:[%s25382_s11 + $0x23b8] ss:$68 sps:$4 sm:$0xff]   ;;  %v23417_v54 = vld [vmem:[%s25382_s11 + $0x2444] ss:$68 sps:$4 sm:$0xff]   ;;  %v23420_v55 = vld [vmem:[%s25382_s11 + $0x244c] ss:$68 sps:$4 sm:$0xff]  }
 0x5e1   : > { %v23415_v56 = vld [vmem:[%s25382_s11 + $0x2440] ss:$68 sps:$4 sm:$0xff]   ;;  %v23418_v58 = vld [vmem:[%s25382_s11 + $0x2448] ss:$68 sps:$4 sm:$0xff]  }
 0x5e3   : > { %16341 = vmatpush1.bf16.msra.mxu0 %v23349_v59  ;;  %16728 = vmatpush1.bf16.msra.mxu1 %v23352_v60  ;;  %v23423_v59 = vld [vmem:[%s25382_s11 + $0x24cc] ss:$68 sps:$4 sm:$0xff]   ;;  %v23426_v60 = vld [vmem:[%s25382_s11 + $0x24d4] ss:$68 sps:$4 sm:$0xff]  }
 0x5e4   : > { %16342 = vmatprep.subr.bf16.mxu0 %v23357_v61  ;;  %16729 = vmatprep.subr.bf16.mxu1 %v23360_v63  ;;  %v23421_v61 = vld [vmem:[%s25382_s11 + $0x24c8] ss:$68 sps:$4 sm:$0xff]   ;;  %v23424_v63 = vld [vmem:[%s25382_s11 + $0x24d0] ss:$68 sps:$4 sm:$0xff]  }
 0x5e7   : > { %16343 = vmatpush1.bf16.msra.mxu0 %v23355_v2  ;;  %16730 = vmatpush1.bf16.msra.mxu1 %v23358_v3  ;;  %v23429_v2 = vld [vmem:[%s25382_s11 + $0x2554] ss:$68 sps:$4 sm:$0xff]   ;;  %v23432_v3 = vld [vmem:[%s25382_s11 + $0x255c] ss:$68 sps:$4 sm:$0xff]  }
 0x5e8   : > { %16344 = vmatprep.subr.bf16.mxu0 %v23363_v4  ;;  %16731 = vmatprep.subr.bf16.mxu1 %v23366_v5  ;;  %v23427_v4 = vld [vmem:[%s25382_s11 + $0x2550] ss:$68 sps:$4 sm:$0xff]   ;;  %v23430_v5 = vld [vmem:[%s25382_s11 + $0x2558] ss:$68 sps:$4 sm:$0xff]  }
 0x5eb   : > { %16345 = vmatpush1.bf16.msra.mxu0 %v23361_v9  ;;  %16732 = vmatpush1.bf16.msra.mxu1 %v23364_v10  ;;  %v23435_v9 = vld [vmem:[%s25382_s11 + $0x25dc] ss:$68 sps:$4 sm:$0xff]   ;;  %v23438_v10 = vld [vmem:[%s25382_s11 + $0x25e4] ss:$68 sps:$4 sm:$0xff]  }
 0x5ec   : > { %16346 = vmatprep.subr.bf16.mxu0 %v23369_v11  ;;  %16733 = vmatprep.subr.bf16.mxu1 %v23372_v13  ;;  %v23433_v11 = vld [vmem:[%s25382_s11 + $0x25d8] ss:$68 sps:$4 sm:$0xff]   ;;  %v23436_v13 = vld [vmem:[%s25382_s11 + $0x25e0] ss:$68 sps:$4 sm:$0xff]  }
 0x5ef   : > { %16347 = vmatpush1.bf16.msra.mxu0 %v23367_v14  ;;  %16734 = vmatpush1.bf16.msra.mxu1 %v23370_v16  ;;  %v23441_v14 = vld [vmem:[%s25382_s11 + $0x2664] ss:$68 sps:$4 sm:$0xff]   ;;  %v23444_v16 = vld [vmem:[%s25382_s11 + $0x266c] ss:$68 sps:$4 sm:$0xff]  }
 0x5f0   : > { %16348 = vmatprep.subr.bf16.mxu0 %v23375_v17  ;;  %16735 = vmatprep.subr.bf16.mxu1 %v23378_v18  ;;  %v23439_v17 = vld [vmem:[%s25382_s11 + $0x2660] ss:$68 sps:$4 sm:$0xff]   ;;  %v23442_v18 = vld [vmem:[%s25382_s11 + $0x2668] ss:$68 sps:$4 sm:$0xff]  }
 0x5f3   : > { %16349 = vmatpush1.bf16.msra.mxu0 %v23373_v19  ;;  %16736 = vmatpush1.bf16.msra.mxu1 %v23376_v20  ;;  %v23447_v19 = vld [vmem:[%s25382_s11 + $0x26ec] ss:$68 sps:$4 sm:$0xff]   ;;  %v23450_v20 = vld [vmem:[%s25382_s11 + $0x26f4] ss:$68 sps:$4 sm:$0xff]  }
 0x5f4   : > { %16350 = vmatprep.subr.bf16.mxu0 %v23381_v21  ;;  %16737 = vmatprep.subr.bf16.mxu1 %v23384_v22  ;;  %v23445_v21 = vld [vmem:[%s25382_s11 + $0x26e8] ss:$68 sps:$4 sm:$0xff]   ;;  %v23448_v22 = vld [vmem:[%s25382_s11 + $0x26f0] ss:$68 sps:$4 sm:$0xff]  }
 0x5f7   : > { %16351 = vmatpush1.bf16.msra.mxu0 %v23379_v25  ;;  %16738 = vmatpush1.bf16.msra.mxu1 %v23382_v26  ;;  %v23453_v25 = vld [vmem:[%s25382_s11 + $0x2774] ss:$68 sps:$4 sm:$0xff]   ;;  %v23456_v26 = vld [vmem:[%s25382_s11 + $0x277c] ss:$68 sps:$4 sm:$0xff]  }
 0x5f8   : > { %16352 = vmatprep.subr.bf16.mxu0 %v23387_v27  ;;  %16739 = vmatprep.subr.bf16.mxu1 %v23390_v29  ;;  %v23451_v27 = vld [vmem:[%s25382_s11 + $0x2770] ss:$68 sps:$4 sm:$0xff]   ;;  %v23454_v29 = vld [vmem:[%s25382_s11 + $0x2778] ss:$68 sps:$4 sm:$0xff]  }
 0x5fb   : > { %16353 = vmatpush1.bf16.msra.mxu0 %v23385_v30  ;;  %16740 = vmatpush1.bf16.msra.mxu1 %v23388_v31  ;;  %v23459_v30 = vld [vmem:[%s25382_s11 + $0x27fc] ss:$68 sps:$4 sm:$0xff]   ;;  %v23462_v31 = vld [vmem:[%s25382_s11 + $0x2804] ss:$68 sps:$4 sm:$0xff]  }
 0x5fc   : > { %16365 = vmatprep.subr.bf16.mxu0 %v23393_v32  ;;  %16752 = vmatprep.subr.bf16.mxu1 %v23396_v33  ;;  %v23457_v32 = vld [vmem:[%s25382_s11 + $0x27f8] ss:$68 sps:$4 sm:$0xff]   ;;  %v23460_v33 = vld [vmem:[%s25382_s11 + $0x2800] ss:$68 sps:$4 sm:$0xff]  }
 0x5fe   : > { %16355 = vmatmul.mubr.bf16.vlgmr.msra.gmra.mrb[8].mxu0 %v25738_v7  ;;  %16742 = vmatmul.mubr.bf16.vlgmr.msra.gmra.mrb[8].mxu1 %v25738_v7 }
 0x5ff   : > { %16366 = vmatpush1.bf16.msra.mxu0 %v23391_v35  ;;  %16753 = vmatpush1.bf16.msra.mxu1 %v23394_v36  ;;  %v23465_v35 = vld [vmem:[%s25382_s11 + $0x2884] ss:$68 sps:$4 sm:$0xff]   ;;  %v23468_v36 = vld [vmem:[%s25382_s11 + $0x288c] ss:$68 sps:$4 sm:$0xff]  }
 0x600   : > { %16367 = vmatprep.subr.bf16.mxu0 %v23399_v37  ;;  %16754 = vmatprep.subr.bf16.mxu1 %v23402_v39  ;;  %v23463_v37 = vld [vmem:[%s25382_s11 + $0x2880] ss:$68 sps:$4 sm:$0xff]   ;;  %v23466_v39 = vld [vmem:[%s25382_s11 + $0x2888] ss:$68 sps:$4 sm:$0xff]  }
 0x601   : > { %16397 = vmatprep.mubr.bf16.mxu0 %v25744_v12  ;;  %16784 = vmatprep.mubr.bf16.mxu1 %v25744_v12 }
 0x603   : > { %16368 = vmatpush1.bf16.msra.mxu0 %v23397_v40  ;;  %16755 = vmatpush1.bf16.msra.mxu1 %v23400_v42  ;;  %v23471_v40 = vld [vmem:[%s25382_s11 + $0x290c] ss:$68 sps:$4 sm:$0xff]   ;;  %v23474_v42 = vld [vmem:[%s25382_s11 + $0x2914] ss:$68 sps:$4 sm:$0xff]  }
 0x604   : > { %16369 = vmatprep.subr.bf16.mxu0 %v23405_v43  ;;  %16756 = vmatprep.subr.bf16.mxu1 %v23408_v44  ;;  %v23469_v43 = vld [vmem:[%s25382_s11 + $0x2908] ss:$68 sps:$4 sm:$0xff]   ;;  %v23472_v44 = vld [vmem:[%s25382_s11 + $0x2910] ss:$68 sps:$4 sm:$0xff]  }
 0x607   : > { %16370 = vmatpush1.bf16.msra.mxu0 %v23403_v45  ;;  %16757 = vmatpush1.bf16.msra.mxu1 %v23406_v48  ;;  %v23477_v45 = vld [vmem:[%s25382_s11 + $0x2994] ss:$68 sps:$4 sm:$0xff]   ;;  %v23480_v48 = vld [vmem:[%s25382_s11 + $0x299c] ss:$68 sps:$4 sm:$0xff]  }
 0x608   : > { %16371 = vmatprep.subr.bf16.mxu0 %v23411_v49  ;;  %16758 = vmatprep.subr.bf16.mxu1 %v23414_v50  ;;  %v23475_v49 = vld [vmem:[%s25382_s11 + $0x2990] ss:$68 sps:$4 sm:$0xff]   ;;  %v23478_v50 = vld [vmem:[%s25382_s11 + $0x2998] ss:$68 sps:$4 sm:$0xff]  }
 0x60b   : > { %16372 = vmatpush1.bf16.msra.mxu0 %v23409_v51  ;;  %16759 = vmatpush1.bf16.msra.mxu1 %v23412_v52  ;;  %v23483_v51 = vld [vmem:[%s25382_s11 + $0x2a1c] ss:$68 sps:$4 sm:$0xff]   ;;  %v23486_v52 = vld [vmem:[%s25382_s11 + $0x2a24] ss:$68 sps:$4 sm:$0xff]  }
 0x60c   : > { %16373 = vmatprep.subr.bf16.mxu0 %v23417_v54  ;;  %16760 = vmatprep.subr.bf16.mxu1 %v23420_v55  ;;  %v23481_v54 = vld [vmem:[%s25382_s11 + $0x2a18] ss:$68 sps:$4 sm:$0xff]   ;;  %v23484_v55 = vld [vmem:[%s25382_s11 + $0x2a20] ss:$68 sps:$4 sm:$0xff]  }
 0x60f   : > { %16374 = vmatpush1.bf16.msra.mxu0 %v23415_v56  ;;  %16761 = vmatpush1.bf16.msra.mxu1 %v23418_v58  ;;  %v23489_v56 = vld [vmem:[%s25382_s11 + $0x2aa4] ss:$68 sps:$4 sm:$0xff]   ;;  %v23492_v58 = vld [vmem:[%s25382_s11 + $0x2aac] ss:$68 sps:$4 sm:$0xff]  }
 0x610   : > { %16375 = vmatprep.subr.bf16.mxu0 %v23423_v59  ;;  %16762 = vmatprep.subr.bf16.mxu1 %v23426_v60  ;;  %v23487_v59 = vld [vmem:[%s25382_s11 + $0x2aa0] ss:$68 sps:$4 sm:$0xff]   ;;  %v23490_v60 = vld [vmem:[%s25382_s11 + $0x2aa8] ss:$68 sps:$4 sm:$0xff]  }
 0x613   : > { %16376 = vmatpush1.bf16.msra.mxu0 %v23421_v61  ;;  %16763 = vmatpush1.bf16.msra.mxu1 %v23424_v63  ;;  %v23495_v61 = vld [vmem:[%s25382_s11 + $0x2b2c] ss:$68 sps:$4 sm:$0xff]   ;;  %v23498_v63 = vld [vmem:[%s25382_s11 + $0x2b34] ss:$68 sps:$4 sm:$0xff]  }
 0x614   : > { %16377 = vmatprep.subr.bf16.mxu0 %v23429_v2  ;;  %16764 = vmatprep.subr.bf16.mxu1 %v23432_v3  ;;  %v23493_v2 = vld [vmem:[%s25382_s11 + $0x2b28] ss:$68 sps:$4 sm:$0xff]   ;;  %v23496_v3 = vld [vmem:[%s25382_s11 + $0x2b30] ss:$68 sps:$4 sm:$0xff]  }
 0x617   : > { %16378 = vmatpush1.bf16.msra.mxu0 %v23427_v4  ;;  %16765 = vmatpush1.bf16.msra.mxu1 %v23430_v5  ;;  %v23501_v4 = vld [vmem:[%s25382_s11 + $0x2bb4] ss:$68 sps:$4 sm:$0xff]   ;;  %v23504_v5 = vld [vmem:[%s25382_s11 + $0x2bbc] ss:$68 sps:$4 sm:$0xff]  }
 0x618   : > { %16379 = vmatprep.subr.bf16.mxu0 %v23435_v9  ;;  %16766 = vmatprep.subr.bf16.mxu1 %v23438_v10  ;;  %v23499_v9 = vld [vmem:[%s25382_s11 + $0x2bb0] ss:$68 sps:$4 sm:$0xff]   ;;  %v23502_v10 = vld [vmem:[%s25382_s11 + $0x2bb8] ss:$68 sps:$4 sm:$0xff]  }
 0x61b   : > { %16380 = vmatpush1.bf16.msra.mxu0 %v23433_v11  ;;  %16767 = vmatpush1.bf16.msra.mxu1 %v23436_v13  ;;  %v23507_v11 = vld [vmem:[%s25382_s11 + $0x2c3c] ss:$68 sps:$4 sm:$0xff]   ;;  %v23510_v13 = vld [vmem:[%s25382_s11 + $0x2c44] ss:$68 sps:$4 sm:$0xff]  }
 0x61c   : > { %16381 = vmatprep.subr.bf16.mxu0 %v23441_v14  ;;  %16768 = vmatprep.subr.bf16.mxu1 %v23444_v16  ;;  %v23505_v14 = vld [vmem:[%s25382_s11 + $0x2c38] ss:$68 sps:$4 sm:$0xff]   ;;  %v23508_v16 = vld [vmem:[%s25382_s11 + $0x2c40] ss:$68 sps:$4 sm:$0xff]  }
 0x61f   : > { %16382 = vmatpush1.bf16.msra.mxu0 %v23439_v17  ;;  %16769 = vmatpush1.bf16.msra.mxu1 %v23442_v18  ;;  %v23513_v17 = vld [vmem:[%s25382_s11 + $0x2cc4] ss:$68 sps:$4 sm:$0xff]   ;;  %v23516_v18 = vld [vmem:[%s25382_s11 + $0x2ccc] ss:$68 sps:$4 sm:$0xff]  }
 0x620   : > { %16383 = vmatprep.subr.bf16.mxu0 %v23447_v19  ;;  %16770 = vmatprep.subr.bf16.mxu1 %v23450_v20  ;;  %v23511_v19 = vld [vmem:[%s25382_s11 + $0x2cc0] ss:$68 sps:$4 sm:$0xff]   ;;  %v23514_v20 = vld [vmem:[%s25382_s11 + $0x2cc8] ss:$68 sps:$4 sm:$0xff]  }
 0x623   : > { %16384 = vmatpush1.bf16.msra.mxu0 %v23445_v21  ;;  %16771 = vmatpush1.bf16.msra.mxu1 %v23448_v22  ;;  %v23519_v21 = vld [vmem:[%s25382_s11 + $0x2d4c] ss:$68 sps:$4 sm:$0xff]   ;;  %v23522_v22 = vld [vmem:[%s25382_s11 + $0x2d54] ss:$68 sps:$4 sm:$0xff]  }
 0x624   : > { %16385 = vmatprep.subr.bf16.mxu0 %v23453_v25  ;;  %16772 = vmatprep.subr.bf16.mxu1 %v23456_v26  ;;  %v23517_v25 = vld [vmem:[%s25382_s11 + $0x2d48] ss:$68 sps:$4 sm:$0xff]   ;;  %v23520_v26 = vld [vmem:[%s25382_s11 + $0x2d50] ss:$68 sps:$4 sm:$0xff]  }
 0x627   : > { %16386 = vmatpush1.bf16.msra.mxu0 %v23451_v27  ;;  %16773 = vmatpush1.bf16.msra.mxu1 %v23454_v29  ;;  %v23525_v27 = vld [vmem:[%s25382_s11 + $0x2dd4] ss:$68 sps:$4 sm:$0xff]   ;;  %v23528_v29 = vld [vmem:[%s25382_s11 + $0x2ddc] ss:$68 sps:$4 sm:$0xff]  }
 0x628   : > { %16387 = vmatprep.subr.bf16.mxu0 %v23459_v30  ;;  %16774 = vmatprep.subr.bf16.mxu1 %v23462_v31  ;;  %v23523_v30 = vld [vmem:[%s25382_s11 + $0x2dd0] ss:$68 sps:$4 sm:$0xff]   ;;  %v23526_v31 = vld [vmem:[%s25382_s11 + $0x2dd8] ss:$68 sps:$4 sm:$0xff]  }
 0x62b   : > { %16388 = vmatpush1.bf16.msra.mxu0 %v23457_v32  ;;  %16775 = vmatpush1.bf16.msra.mxu1 %v23460_v33  ;;  %v23531_v32 = vld [vmem:[%s25382_s11 + $0x2e5c] ss:$68 sps:$4 sm:$0xff]   ;;  %v23534_v33 = vld [vmem:[%s25382_s11 + $0x2e64] ss:$68 sps:$4 sm:$0xff]  }
 0x62c   : > { %16389 = vmatprep.subr.bf16.mxu0 %v23465_v35  ;;  %16776 = vmatprep.subr.bf16.mxu1 %v23468_v36  ;;  %v23529_v35 = vld [vmem:[%s25382_s11 + $0x2e58] ss:$68 sps:$4 sm:$0xff]   ;;  %v23532_v36 = vld [vmem:[%s25382_s11 + $0x2e60] ss:$68 sps:$4 sm:$0xff]  }
 0x62f   : > { %16390 = vmatpush1.bf16.msra.mxu0 %v23463_v37  ;;  %16777 = vmatpush1.bf16.msra.mxu1 %v23466_v39  ;;  %v23537_v37 = vld [vmem:[%s25382_s11 + $0x2ee4] ss:$68 sps:$4 sm:$0xff]   ;;  %v23540_v39 = vld [vmem:[%s25382_s11 + $0x2eec] ss:$68 sps:$4 sm:$0xff]  }
 0x630   : > { %16391 = vmatprep.subr.bf16.mxu0 %v23471_v40  ;;  %16778 = vmatprep.subr.bf16.mxu1 %v23474_v42  ;;  %v23535_v40 = vld [vmem:[%s25382_s11 + $0x2ee0] ss:$68 sps:$4 sm:$0xff]   ;;  %v23538_v42 = vld [vmem:[%s25382_s11 + $0x2ee8] ss:$68 sps:$4 sm:$0xff]  }
 0x633   : > { %16392 = vmatpush1.bf16.msra.mxu0 %v23469_v43  ;;  %16779 = vmatpush1.bf16.msra.mxu1 %v23472_v44  ;;  %v23543_v43 = vld [vmem:[%s25382_s11 + $0x2f6c] ss:$68 sps:$4 sm:$0xff]   ;;  %v23546_v44 = vld [vmem:[%s25382_s11 + $0x2f74] ss:$68 sps:$4 sm:$0xff]  }
 0x634   : > { %16393 = vmatprep.subr.bf16.mxu0 %v23477_v45  ;;  %16780 = vmatprep.subr.bf16.mxu1 %v23480_v48  ;;  %v23541_v45 = vld [vmem:[%s25382_s11 + $0x2f68] ss:$68 sps:$4 sm:$0xff]   ;;  %v23544_v48 = vld [vmem:[%s25382_s11 + $0x2f70] ss:$68 sps:$4 sm:$0xff]  }
 0x637   : > { %16394 = vmatpush1.bf16.msra.mxu0 %v23475_v49  ;;  %16781 = vmatpush1.bf16.msra.mxu1 %v23478_v50  ;;  %v23549_v49 = vld [vmem:[%s25382_s11 + $0x2ff4] ss:$68 sps:$4 sm:$0xff]   ;;  %v23552_v50 = vld [vmem:[%s25382_s11 + $0x2ffc] ss:$68 sps:$4 sm:$0xff]  }
 0x638   : > { %16395 = vmatprep.subr.bf16.mxu0 %v23483_v51  ;;  %16782 = vmatprep.subr.bf16.mxu1 %v23486_v52  ;;  %v23547_v51 = vld [vmem:[%s25382_s11 + $0x2ff0] ss:$68 sps:$4 sm:$0xff]   ;;  %v23550_v52 = vld [vmem:[%s25382_s11 + $0x2ff8] ss:$68 sps:$4 sm:$0xff]  }
 0x63b   : > { %16396 = vmatpush1.bf16.msra.mxu0 %v23481_v54  ;;  %16783 = vmatpush1.bf16.msra.mxu1 %v23484_v55  ;;  %v23555_v54 = vld [vmem:[%s25382_s11 + $0x307c] ss:$68 sps:$4 sm:$0xff]   ;;  %v23558_v55 = vld [vmem:[%s25382_s11 + $0x3084] ss:$68 sps:$4 sm:$0xff]  }
 0x63c   : > { %16408 = vmatprep.subr.bf16.mxu0 %v23489_v56  ;;  %16795 = vmatprep.subr.bf16.mxu1 %v23492_v58  ;;  %v23553_v56 = vld [vmem:[%s25382_s11 + $0x3078] ss:$68 sps:$4 sm:$0xff]   ;;  %v23556_v58 = vld [vmem:[%s25382_s11 + $0x3080] ss:$68 sps:$4 sm:$0xff]  }
 0x63e   : > { %16398 = vmatmul.mubr.bf16.vlgmr.msra.gmra.mrb[8].mxu0 %v25814_v23  ;;  %16785 = vmatmul.mubr.bf16.vlgmr.msra.gmra.mrb[8].mxu1 %v25814_v23 }
 0x63f   : > { %16409 = vmatpush1.bf16.msra.mxu0 %v23487_v59  ;;  %16796 = vmatpush1.bf16.msra.mxu1 %v23490_v60  ;;  %v23561_v59 = vld [vmem:[%s25382_s11 + $0x3104] ss:$68 sps:$4 sm:$0xff]   ;;  %v23564_v60 = vld [vmem:[%s25382_s11 + $0x310c] ss:$68 sps:$4 sm:$0xff]  }
 0x640   : > { %16410 = vmatprep.subr.bf16.mxu0 %v23495_v61  ;;  %16797 = vmatprep.subr.bf16.mxu1 %v23498_v63  ;;  %v23559_v61 = vld [vmem:[%s25382_s11 + $0x3100] ss:$68 sps:$4 sm:$0xff]   ;;  %v23562_v63 = vld [vmem:[%s25382_s11 + $0x3108] ss:$68 sps:$4 sm:$0xff]  }
 0x641   : > { %16440 = vmatprep.mubr.bf16.mxu0 %v25820_v28  ;;  %16827 = vmatprep.mubr.bf16.mxu1 %v25820_v28 }
 0x643   : > { %16411 = vmatpush1.bf16.msra.mxu0 %v23493_v2  ;;  %16798 = vmatpush1.bf16.msra.mxu1 %v23496_v3  ;;  %v23567_v2 = vld [vmem:[%s25382_s11 + $0x318c] ss:$68 sps:$4 sm:$0xff]   ;;  %v23570_v3 = vld [vmem:[%s25382_s11 + $0x3194] ss:$68 sps:$4 sm:$0xff]  }
 0x644   : > { %16412 = vmatprep.subr.bf16.mxu0 %v23501_v4  ;;  %16799 = vmatprep.subr.bf16.mxu1 %v23504_v5  ;;  %v23565_v4 = vld [vmem:[%s25382_s11 + $0x3188] ss:$68 sps:$4 sm:$0xff]   ;;  %v23568_v5 = vld [vmem:[%s25382_s11 + $0x3190] ss:$68 sps:$4 sm:$0xff]  }
 0x647   : > { %16413 = vmatpush1.bf16.msra.mxu0 %v23499_v9  ;;  %16800 = vmatpush1.bf16.msra.mxu1 %v23502_v10  ;;  %v23573_v9 = vld [vmem:[%s25382_s11 + $0x3214] ss:$68 sps:$4 sm:$0xff]   ;;  %v23576_v10 = vld [vmem:[%s25382_s11 + $0x321c] ss:$68 sps:$4 sm:$0xff]  }
 0x648   : > { %16414 = vmatprep.subr.bf16.mxu0 %v23507_v11  ;;  %16801 = vmatprep.subr.bf16.mxu1 %v23510_v13  ;;  %v23571_v11 = vld [vmem:[%s25382_s11 + $0x3210] ss:$68 sps:$4 sm:$0xff]   ;;  %v23574_v13 = vld [vmem:[%s25382_s11 + $0x3218] ss:$68 sps:$4 sm:$0xff]  }
 0x64b   : > { %16415 = vmatpush1.bf16.msra.mxu0 %v23505_v14  ;;  %16802 = vmatpush1.bf16.msra.mxu1 %v23508_v16  ;;  %v23579_v14 = vld [vmem:[%s25382_s11 + $0x329c] ss:$68 sps:$4 sm:$0xff]   ;;  %v23582_v16 = vld [vmem:[%s25382_s11 + $0x32a4] ss:$68 sps:$4 sm:$0xff]  }
 0x64c   : > { %16416 = vmatprep.subr.bf16.mxu0 %v23513_v17  ;;  %16803 = vmatprep.subr.bf16.mxu1 %v23516_v18  ;;  %v23577_v17 = vld [vmem:[%s25382_s11 + $0x3298] ss:$68 sps:$4 sm:$0xff]   ;;  %v23580_v18 = vld [vmem:[%s25382_s11 + $0x32a0] ss:$68 sps:$4 sm:$0xff]  }
 0x64f   : > { %16417 = vmatpush1.bf16.msra.mxu0 %v23511_v19  ;;  %16804 = vmatpush1.bf16.msra.mxu1 %v23514_v20  ;;  %v23585_v19 = vld [vmem:[%s25382_s11 + $0x3324] ss:$68 sps:$4 sm:$0xff]   ;;  %v23588_v20 = vld [vmem:[%s25382_s11 + $0x332c] ss:$68 sps:$4 sm:$0xff]  }
 0x650   : > { %16418 = vmatprep.subr.bf16.mxu0 %v23519_v21  ;;  %16805 = vmatprep.subr.bf16.mxu1 %v23522_v22  ;;  %v23583_v21 = vld [vmem:[%s25382_s11 + $0x3320] ss:$68 sps:$4 sm:$0xff]   ;;  %v23586_v22 = vld [vmem:[%s25382_s11 + $0x3328] ss:$68 sps:$4 sm:$0xff]  }
 0x653   : > { %16419 = vmatpush1.bf16.msra.mxu0 %v23517_v25  ;;  %16806 = vmatpush1.bf16.msra.mxu1 %v23520_v26  ;;  %v23591_v25 = vld [vmem:[%s25382_s11 + $0x33ac] ss:$68 sps:$4 sm:$0xff]   ;;  %v23594_v26 = vld [vmem:[%s25382_s11 + $0x33b4] ss:$68 sps:$4 sm:$0xff]  }
 0x654   : > { %16420 = vmatprep.subr.bf16.mxu0 %v23525_v27  ;;  %16807 = vmatprep.subr.bf16.mxu1 %v23528_v29  ;;  %v23589_v27 = vld [vmem:[%s25382_s11 + $0x33a8] ss:$68 sps:$4 sm:$0xff]   ;;  %v23592_v29 = vld [vmem:[%s25382_s11 + $0x33b0] ss:$68 sps:$4 sm:$0xff]  }
 0x657   : > { %16421 = vmatpush1.bf16.msra.mxu0 %v23523_v30  ;;  %16808 = vmatpush1.bf16.msra.mxu1 %v23526_v31  ;;  %v23597_v30 = vld [vmem:[%s25382_s11 + $0x3434] ss:$68 sps:$4 sm:$0xff]   ;;  %v23600_v31 = vld [vmem:[%s25382_s11 + $0x343c] ss:$68 sps:$4 sm:$0xff]  }
 0x658   : > { %16422 = vmatprep.subr.bf16.mxu0 %v23531_v32  ;;  %16809 = vmatprep.subr.bf16.mxu1 %v23534_v33  ;;  %v23595_v32 = vld [vmem:[%s25382_s11 + $0x3430] ss:$68 sps:$4 sm:$0xff]   ;;  %v23598_v33 = vld [vmem:[%s25382_s11 + $0x3438] ss:$68 sps:$4 sm:$0xff]  }
 0x65b   : > { %16423 = vmatpush1.bf16.msra.mxu0 %v23529_v35  ;;  %16810 = vmatpush1.bf16.msra.mxu1 %v23532_v36  ;;  %v23603_v35 = vld [vmem:[%s25382_s11 + $0x34bc] ss:$68 sps:$4 sm:$0xff]   ;;  %v23606_v36 = vld [vmem:[%s25382_s11 + $0x34c4] ss:$68 sps:$4 sm:$0xff]  }
 0x65c   : > { %16424 = vmatprep.subr.bf16.mxu0 %v23537_v37  ;;  %16811 = vmatprep.subr.bf16.mxu1 %v23540_v39  ;;  %v23601_v37 = vld [vmem:[%s25382_s11 + $0x34b8] ss:$68 sps:$4 sm:$0xff]   ;;  %v23604_v39 = vld [vmem:[%s25382_s11 + $0x34c0] ss:$68 sps:$4 sm:$0xff]  }
 0x65f   : > { %16425 = vmatpush1.bf16.msra.mxu0 %v23535_v40  ;;  %16812 = vmatpush1.bf16.msra.mxu1 %v23538_v42  ;;  %v23609_v40 = vld [vmem:[%s25382_s11 + $0x3544] ss:$68 sps:$4 sm:$0xff]   ;;  %v23612_v42 = vld [vmem:[%s25382_s11 + $0x354c] ss:$68 sps:$4 sm:$0xff]  }
 0x660   : > { %16426 = vmatprep.subr.bf16.mxu0 %v23543_v43  ;;  %16813 = vmatprep.subr.bf16.mxu1 %v23546_v44  ;;  %v23607_v43 = vld [vmem:[%s25382_s11 + $0x3540] ss:$68 sps:$4 sm:$0xff]   ;;  %v23610_v44 = vld [vmem:[%s25382_s11 + $0x3548] ss:$68 sps:$4 sm:$0xff]  }
 0x663   : > { %16427 = vmatpush1.bf16.msra.mxu0 %v23541_v45  ;;  %16814 = vmatpush1.bf16.msra.mxu1 %v23544_v48  ;;  %v23615_v45 = vld [vmem:[%s25382_s11 + $0x35cc] ss:$68 sps:$4 sm:$0xff]   ;;  %v23618_v48 = vld [vmem:[%s25382_s11 + $0x35d4] ss:$68 sps:$4 sm:$0xff]  }
 0x664   : > { %16428 = vmatprep.subr.bf16.mxu0 %v23549_v49  ;;  %16815 = vmatprep.subr.bf16.mxu1 %v23552_v50  ;;  %v23613_v49 = vld [vmem:[%s25382_s11 + $0x35c8] ss:$68 sps:$4 sm:$0xff]   ;;  %v23616_v50 = vld [vmem:[%s25382_s11 + $0x35d0] ss:$68 sps:$4 sm:$0xff]  }
 0x667   : > { %16429 = vmatpush1.bf16.msra.mxu0 %v23547_v51  ;;  %16816 = vmatpush1.bf16.msra.mxu1 %v23550_v52  ;;  %v23621_v51 = vld [vmem:[%s25382_s11 + $0x3654] ss:$68 sps:$4 sm:$0xff]   ;;  %v23624_v52 = vld [vmem:[%s25382_s11 + $0x365c] ss:$68 sps:$4 sm:$0xff]  }
 0x668   : > { %16430 = vmatprep.subr.bf16.mxu0 %v23555_v54  ;;  %16817 = vmatprep.subr.bf16.mxu1 %v23558_v55  ;;  %v23619_v54 = vld [vmem:[%s25382_s11 + $0x3650] ss:$68 sps:$4 sm:$0xff]   ;;  %v23622_v55 = vld [vmem:[%s25382_s11 + $0x3658] ss:$68 sps:$4 sm:$0xff]  }
 0x66b   : > { %16431 = vmatpush1.bf16.msra.mxu0 %v23553_v56  ;;  %16818 = vmatpush1.bf16.msra.mxu1 %v23556_v58  ;;  %v23627_v56 = vld [vmem:[%s25382_s11 + $0x36dc] ss:$68 sps:$4 sm:$0xff]   ;;  %v23630_v58 = vld [vmem:[%s25382_s11 + $0x36e4] ss:$68 sps:$4 sm:$0xff]  }
 0x66c   : > { %16432 = vmatprep.subr.bf16.mxu0 %v23561_v59  ;;  %16819 = vmatprep.subr.bf16.mxu1 %v23564_v60  ;;  %v23625_v59 = vld [vmem:[%s25382_s11 + $0x36d8] ss:$68 sps:$4 sm:$0xff]   ;;  %v23628_v60 = vld [vmem:[%s25382_s11 + $0x36e0] ss:$68 sps:$4 sm:$0xff]  }
 0x66f   : > { %16433 = vmatpush1.bf16.msra.mxu0 %v23559_v61  ;;  %16820 = vmatpush1.bf16.msra.mxu1 %v23562_v63  ;;  %v23633_v61 = vld [vmem:[%s25382_s11 + $0x3764] ss:$68 sps:$4 sm:$0xff]   ;;  %v23636_v63 = vld [vmem:[%s25382_s11 + $0x376c] ss:$68 sps:$4 sm:$0xff]  }
 0x670   : > { %16434 = vmatprep.subr.bf16.mxu0 %v23567_v2  ;;  %16821 = vmatprep.subr.bf16.mxu1 %v23570_v3  ;;  %v23631_v2 = vld [vmem:[%s25382_s11 + $0x3760] ss:$68 sps:$4 sm:$0xff]   ;;  %v23634_v3 = vld [vmem:[%s25382_s11 + $0x3768] ss:$68 sps:$4 sm:$0xff]  }
 0x673   : > { %16435 = vmatpush1.bf16.msra.mxu0 %v23565_v4  ;;  %16822 = vmatpush1.bf16.msra.mxu1 %v23568_v5  ;;  %v23639_v4 = vld [vmem:[%s25382_s11 + $0x37ec] ss:$68 sps:$4 sm:$0xff]   ;;  %v23642_v5 = vld [vmem:[%s25382_s11 + $0x37f4] ss:$68 sps:$4 sm:$0xff]  }
 0x674   : > { %16436 = vmatprep.subr.bf16.mxu0 %v23573_v9  ;;  %16823 = vmatprep.subr.bf16.mxu1 %v23576_v10  ;;  %v23637_v9 = vld [vmem:[%s25382_s11 + $0x37e8] ss:$68 sps:$4 sm:$0xff]   ;;  %v23640_v10 = vld [vmem:[%s25382_s11 + $0x37f0] ss:$68 sps:$4 sm:$0xff]  }
 0x677   : > { %16437 = vmatpush1.bf16.msra.mxu0 %v23571_v11  ;;  %16824 = vmatpush1.bf16.msra.mxu1 %v23574_v13  ;;  %v23645_v11 = vld [vmem:[%s25382_s11 + $0x3874] ss:$68 sps:$4 sm:$0xff]   ;;  %v23648_v13 = vld [vmem:[%s25382_s11 + $0x387c] ss:$68 sps:$4 sm:$0xff]  }
 0x678   : > { %16438 = vmatprep.subr.bf16.mxu0 %v23579_v14  ;;  %16825 = vmatprep.subr.bf16.mxu1 %v23582_v16  ;;  %v23643_v14 = vld [vmem:[%s25382_s11 + $0x3870] ss:$68 sps:$4 sm:$0xff]   ;;  %v23646_v16 = vld [vmem:[%s25382_s11 + $0x3878] ss:$68 sps:$4 sm:$0xff]  }
 0x67b   : > { %16439 = vmatpush1.bf16.msra.mxu0 %v23577_v17  ;;  %16826 = vmatpush1.bf16.msra.mxu1 %v23580_v18  ;;  %v23651_v17 = vld [vmem:[%s25382_s11 + $0x38fc] ss:$68 sps:$4 sm:$0xff]   ;;  %v23654_v18 = vld [vmem:[%s25382_s11 + $0x3904] ss:$68 sps:$4 sm:$0xff]  }
 0x67c   : > { %16451 = vmatprep.subr.bf16.mxu0 %v23585_v19  ;;  %16838 = vmatprep.subr.bf16.mxu1 %v23588_v20  ;;  %v23649_v19 = vld [vmem:[%s25382_s11 + $0x38f8] ss:$68 sps:$4 sm:$0xff]   ;;  %v23652_v20 = vld [vmem:[%s25382_s11 + $0x3900] ss:$68 sps:$4 sm:$0xff]  }
 0x67e   : > { %16441 = vmatmul.mubr.bf16.vlgmr.msra.gmra.mrb[8].mxu0 %v25890_v41  ;;  %16828 = vmatmul.mubr.bf16.vlgmr.msra.gmra.mrb[8].mxu1 %v25890_v41 }
 0x67f   : > { %16452 = vmatpush1.bf16.msra.mxu0 %v23583_v21  ;;  %16839 = vmatpush1.bf16.msra.mxu1 %v23586_v22  ;;  %v23657_v21 = vld [vmem:[%s25382_s11 + $0x3984] ss:$68 sps:$4 sm:$0xff]   ;;  %v23660_v22 = vld [vmem:[%s25382_s11 + $0x398c] ss:$68 sps:$4 sm:$0xff]  }
 0x680   : > { %16453 = vmatprep.subr.bf16.mxu0 %v23591_v25  ;;  %16840 = vmatprep.subr.bf16.mxu1 %v23594_v26  ;;  %v23655_v25 = vld [vmem:[%s25382_s11 + $0x3980] ss:$68 sps:$4 sm:$0xff]   ;;  %v23658_v26 = vld [vmem:[%s25382_s11 + $0x3988] ss:$68 sps:$4 sm:$0xff]  }
 0x681   : > { %16483 = vmatprep.mubr.bf16.mxu0 %v25896_v47  ;;  %16870 = vmatprep.mubr.bf16.mxu1 %v25896_v47 }
 0x683   : > { %16454 = vmatpush1.bf16.msra.mxu0 %v23589_v27  ;;  %16841 = vmatpush1.bf16.msra.mxu1 %v23592_v29  ;;  %v23663_v27 = vld [vmem:[%s25382_s11 + $0x3a0c] ss:$68 sps:$4 sm:$0xff]   ;;  %v23666_v29 = vld [vmem:[%s25382_s11 + $0x3a14] ss:$68 sps:$4 sm:$0xff]  }
 0x684   : > { %16455 = vmatprep.subr.bf16.mxu0 %v23597_v30  ;;  %16842 = vmatprep.subr.bf16.mxu1 %v23600_v31  ;;  %v23661_v30 = vld [vmem:[%s25382_s11 + $0x3a08] ss:$68 sps:$4 sm:$0xff]   ;;  %v23664_v31 = vld [vmem:[%s25382_s11 + $0x3a10] ss:$68 sps:$4 sm:$0xff]  }
 0x687   : > { %16456 = vmatpush1.bf16.msra.mxu0 %v23595_v32  ;;  %16843 = vmatpush1.bf16.msra.mxu1 %v23598_v33  ;;  %v23669_v32 = vld [vmem:[%s25382_s11 + $0x3a94] ss:$68 sps:$4 sm:$0xff]   ;;  %v23672_v33 = vld [vmem:[%s25382_s11 + $0x3a9c] ss:$68 sps:$4 sm:$0xff]  }
 0x688   : > { %16457 = vmatprep.subr.bf16.mxu0 %v23603_v35  ;;  %16844 = vmatprep.subr.bf16.mxu1 %v23606_v36  ;;  %v23667_v35 = vld [vmem:[%s25382_s11 + $0x3a90] ss:$68 sps:$4 sm:$0xff]   ;;  %v23670_v36 = vld [vmem:[%s25382_s11 + $0x3a98] ss:$68 sps:$4 sm:$0xff]  }
 0x68b   : > { %16458 = vmatpush1.bf16.msra.mxu0 %v23601_v37  ;;  %16845 = vmatpush1.bf16.msra.mxu1 %v23604_v39  ;;  %v23675_v37 = vld [vmem:[%s25382_s11 + $0x3b1c] ss:$68 sps:$4 sm:$0xff]   ;;  %v23678_v39 = vld [vmem:[%s25382_s11 + $0x3b24] ss:$68 sps:$4 sm:$0xff]  }
 0x68c   : > { %16459 = vmatprep.subr.bf16.mxu0 %v23609_v40  ;;  %16846 = vmatprep.subr.bf16.mxu1 %v23612_v42  ;;  %v23673_v40 = vld [vmem:[%s25382_s11 + $0x3b18] ss:$68 sps:$4 sm:$0xff]   ;;  %v23676_v42 = vld [vmem:[%s25382_s11 + $0x3b20] ss:$68 sps:$4 sm:$0xff]  }
 0x68f   : > { %16460 = vmatpush1.bf16.msra.mxu0 %v23607_v43  ;;  %16847 = vmatpush1.bf16.msra.mxu1 %v23610_v44  ;;  %v23681_v43 = vld [vmem:[%s25382_s11 + $0x3ba4] ss:$68 sps:$4 sm:$0xff]   ;;  %v23684_v44 = vld [vmem:[%s25382_s11 + $0x3bac] ss:$68 sps:$4 sm:$0xff]  }
 0x690   : > { %16461 = vmatprep.subr.bf16.mxu0 %v23615_v45  ;;  %16848 = vmatprep.subr.bf16.mxu1 %v23618_v48  ;;  %v23679_v45 = vld [vmem:[%s25382_s11 + $0x3ba0] ss:$68 sps:$4 sm:$0xff]   ;;  %v23682_v48 = vld [vmem:[%s25382_s11 + $0x3ba8] ss:$68 sps:$4 sm:$0xff]  }
 0x693   : > { %16462 = vmatpush1.bf16.msra.mxu0 %v23613_v49  ;;  %16849 = vmatpush1.bf16.msra.mxu1 %v23616_v50  ;;  %v23687_v49 = vld [vmem:[%s25382_s11 + $0x3c2c] ss:$68 sps:$4 sm:$0xff]   ;;  %v23690_v50 = vld [vmem:[%s25382_s11 + $0x3c34] ss:$68 sps:$4 sm:$0xff]  }
 0x694   : > { %16463 = vmatprep.subr.bf16.mxu0 %v23621_v51  ;;  %16850 = vmatprep.subr.bf16.mxu1 %v23624_v52  ;;  %v23685_v51 = vld [vmem:[%s25382_s11 + $0x3c28] ss:$68 sps:$4 sm:$0xff]   ;;  %v23688_v52 = vld [vmem:[%s25382_s11 + $0x3c30] ss:$68 sps:$4 sm:$0xff]  }
 0x697   : > { %16464 = vmatpush1.bf16.msra.mxu0 %v23619_v54  ;;  %16851 = vmatpush1.bf16.msra.mxu1 %v23622_v55  ;;  %v23693_v54 = vld [vmem:[%s25382_s11 + $0x3cb4] ss:$68 sps:$4 sm:$0xff]   ;;  %v23696_v55 = vld [vmem:[%s25382_s11 + $0x3cbc] ss:$68 sps:$4 sm:$0xff]  }
 0x698   : > { %16465 = vmatprep.subr.bf16.mxu0 %v23627_v56  ;;  %16852 = vmatprep.subr.bf16.mxu1 %v23630_v58  ;;  %v23691_v56 = vld [vmem:[%s25382_s11 + $0x3cb0] ss:$68 sps:$4 sm:$0xff]   ;;  %v23694_v58 = vld [vmem:[%s25382_s11 + $0x3cb8] ss:$68 sps:$4 sm:$0xff]  }
 0x69b   : > { %16466 = vmatpush1.bf16.msra.mxu0 %v23625_v59  ;;  %16853 = vmatpush1.bf16.msra.mxu1 %v23628_v60  ;;  %v23699_v59 = vld [vmem:[%s25382_s11 + $0x3d3c] ss:$68 sps:$4 sm:$0xff]   ;;  %v23702_v60 = vld [vmem:[%s25382_s11 + $0x3d44] ss:$68 sps:$4 sm:$0xff]  }
 0x69c   : > { %16467 = vmatprep.subr.bf16.mxu0 %v23633_v61  ;;  %16854 = vmatprep.subr.bf16.mxu1 %v23636_v63  ;;  %v23697_v61 = vld [vmem:[%s25382_s11 + $0x3d38] ss:$68 sps:$4 sm:$0xff]   ;;  %v23700_v63 = vld [vmem:[%s25382_s11 + $0x3d40] ss:$68 sps:$4 sm:$0xff]  }
 0x69f   : > { %16468 = vmatpush1.bf16.msra.mxu0 %v23631_v2  ;;  %16855 = vmatpush1.bf16.msra.mxu1 %v23634_v3  ;;  %v23705_v2 = vld [vmem:[%s25382_s11 + $0x3dc4] ss:$68 sps:$4 sm:$0xff]   ;;  %v23708_v3 = vld [vmem:[%s25382_s11 + $0x3dcc] ss:$68 sps:$4 sm:$0xff]  }
 0x6a0   : > { %16469 = vmatprep.subr.bf16.mxu0 %v23639_v4  ;;  %16856 = vmatprep.subr.bf16.mxu1 %v23642_v5  ;;  %v23703_v4 = vld [vmem:[%s25382_s11 + $0x3dc0] ss:$68 sps:$4 sm:$0xff]   ;;  %v23706_v5 = vld [vmem:[%s25382_s11 + $0x3dc8] ss:$68 sps:$4 sm:$0xff]  }
 0x6a3   : > { %16470 = vmatpush1.bf16.msra.mxu0 %v23637_v9  ;;  %16857 = vmatpush1.bf16.msra.mxu1 %v23640_v10  ;;  %v23711_v9 = vld [vmem:[%s25382_s11 + $0x3e4c] ss:$68 sps:$4 sm:$0xff]   ;;  %v23714_v10 = vld [vmem:[%s25382_s11 + $0x3e54] ss:$68 sps:$4 sm:$0xff]  }
 0x6a4   : > { %16471 = vmatprep.subr.bf16.mxu0 %v23645_v11  ;;  %16858 = vmatprep.subr.bf16.mxu1 %v23648_v13  ;;  %v23709_v11 = vld [vmem:[%s25382_s11 + $0x3e48] ss:$68 sps:$4 sm:$0xff]   ;;  %v23712_v13 = vld [vmem:[%s25382_s11 + $0x3e50] ss:$68 sps:$4 sm:$0xff]  }
 0x6a7   : > { %16472 = vmatpush1.bf16.msra.mxu0 %v23643_v14  ;;  %16859 = vmatpush1.bf16.msra.mxu1 %v23646_v16  ;;  %v23717_v14 = vld [vmem:[%s25382_s11 + $0x3ed4] ss:$68 sps:$4 sm:$0xff]   ;;  %v23720_v16 = vld [vmem:[%s25382_s11 + $0x3edc] ss:$68 sps:$4 sm:$0xff]  }
 0x6a8   : > { %16473 = vmatprep.subr.bf16.mxu0 %v23651_v17  ;;  %16860 = vmatprep.subr.bf16.mxu1 %v23654_v18  ;;  %v23715_v17 = vld [vmem:[%s25382_s11 + $0x3ed0] ss:$68 sps:$4 sm:$0xff]   ;;  %v23718_v18 = vld [vmem:[%s25382_s11 + $0x3ed8] ss:$68 sps:$4 sm:$0xff]  }
 0x6ab   : > { %16474 = vmatpush1.bf16.msra.mxu0 %v23649_v19  ;;  %16861 = vmatpush1.bf16.msra.mxu1 %v23652_v20  ;;  %v23723_v19 = vld [vmem:[%s25382_s11 + $0x3f5c] ss:$68 sps:$4 sm:$0xff]   ;;  %v23726_v20 = vld [vmem:[%s25382_s11 + $0x3f64] ss:$68 sps:$4 sm:$0xff]  }
 0x6ac   : > { %16475 = vmatprep.subr.bf16.mxu0 %v23657_v21  ;;  %16862 = vmatprep.subr.bf16.mxu1 %v23660_v22  ;;  %v23721_v21 = vld [vmem:[%s25382_s11 + $0x3f58] ss:$68 sps:$4 sm:$0xff]   ;;  %v23724_v22 = vld [vmem:[%s25382_s11 + $0x3f60] ss:$68 sps:$4 sm:$0xff]  }
 0x6af   : > { %16476 = vmatpush1.bf16.msra.mxu0 %v23655_v25  ;;  %16863 = vmatpush1.bf16.msra.mxu1 %v23658_v26  ;;  %v23729_v25 = vld [vmem:[%s25382_s11 + $0x3fe4] ss:$68 sps:$4 sm:$0xff]   ;;  %v23732_v26 = vld [vmem:[%s25382_s11 + $0x3fec] ss:$68 sps:$4 sm:$0xff]  }
 0x6b0   : > { %16477 = vmatprep.subr.bf16.mxu0 %v23663_v27  ;;  %16864 = vmatprep.subr.bf16.mxu1 %v23666_v29  ;;  %v23727_v27 = vld [vmem:[%s25382_s11 + $0x3fe0] ss:$68 sps:$4 sm:$0xff]   ;;  %v23730_v29 = vld [vmem:[%s25382_s11 + $0x3fe8] ss:$68 sps:$4 sm:$0xff]  }
 0x6b3   : > { %16478 = vmatpush1.bf16.msra.mxu0 %v23661_v30  ;;  %16865 = vmatpush1.bf16.msra.mxu1 %v23664_v31  ;;  %v23735_v30 = vld [vmem:[%s25382_s11 + $0x406c] ss:$68 sps:$4 sm:$0xff]   ;;  %v23738_v31 = vld [vmem:[%s25382_s11 + $0x4074] ss:$68 sps:$4 sm:$0xff]  }
 0x6b4   : > { %16479 = vmatprep.subr.bf16.mxu0 %v23669_v32  ;;  %16866 = vmatprep.subr.bf16.mxu1 %v23672_v33  ;;  %v23733_v32 = vld [vmem:[%s25382_s11 + $0x4068] ss:$68 sps:$4 sm:$0xff]   ;;  %v23736_v33 = vld [vmem:[%s25382_s11 + $0x4070] ss:$68 sps:$4 sm:$0xff]  }
 0x6b7   : > { %16480 = vmatpush1.bf16.msra.mxu0 %v23667_v35  ;;  %16867 = vmatpush1.bf16.msra.mxu1 %v23670_v36  ;;  %v23741_v35 = vld [vmem:[%s25382_s11 + $0x40f4] ss:$68 sps:$4 sm:$0xff]   ;;  %v23744_v36 = vld [vmem:[%s25382_s11 + $0x40fc] ss:$68 sps:$4 sm:$0xff]  }
 0x6b8   : > { %16481 = vmatprep.subr.bf16.mxu0 %v23675_v37  ;;  %16868 = vmatprep.subr.bf16.mxu1 %v23678_v39  ;;  %v23739_v37 = vld [vmem:[%s25382_s11 + $0x40f0] ss:$68 sps:$4 sm:$0xff]   ;;  %v23742_v39 = vld [vmem:[%s25382_s11 + $0x40f8] ss:$68 sps:$4 sm:$0xff]  }
 0x6bb   : > { %16482 = vmatpush1.bf16.msra.mxu0 %v23673_v40  ;;  %16869 = vmatpush1.bf16.msra.mxu1 %v23676_v42  ;;  %v23747_v40 = vld [vmem:[%s25382_s11 + $0x417c] ss:$68 sps:$4 sm:$0xff]   ;;  %v23750_v42 = vld [vmem:[%s25382_s11 + $0x4184] ss:$68 sps:$4 sm:$0xff]  }
 0x6bc   : > { %16494 = vmatprep.subr.bf16.mxu0 %v23681_v43  ;;  %16881 = vmatprep.subr.bf16.mxu1 %v23684_v44  ;;  %v23745_v43 = vld [vmem:[%s25382_s11 + $0x4178] ss:$68 sps:$4 sm:$0xff]   ;;  %v23748_v44 = vld [vmem:[%s25382_s11 + $0x4180] ss:$68 sps:$4 sm:$0xff]  }
 0x6be   : > { %16484 = vmatmul.mubr.bf16.vlgmr.msra.gmra.mrb[8].mxu0 %v25966_v0  ;;  %16871 = vmatmul.mubr.bf16.vlgmr.msra.gmra.mrb[8].mxu1 %v25966_v0 }
 0x6bf   : > { %16495 = vmatpush1.bf16.msra.mxu0 %v23679_v45  ;;  %16882 = vmatpush1.bf16.msra.mxu1 %v23682_v48  ;;  %v23753_v45 = vld [vmem:[%s25382_s11 + $0x4204] ss:$68 sps:$4 sm:$0xff]   ;;  %v23756_v48 = vld [vmem:[%s25382_s11 + $0x420c] ss:$68 sps:$4 sm:$0xff]  }
 0x6c0   : > { %16496 = vmatprep.subr.bf16.mxu0 %v23687_v49  ;;  %16883 = vmatprep.subr.bf16.mxu1 %v23690_v50  ;;  %v23751_v49 = vld [vmem:[%s25382_s11 + $0x4200] ss:$68 sps:$4 sm:$0xff]   ;;  %v23754_v50 = vld [vmem:[%s25382_s11 + $0x4208] ss:$68 sps:$4 sm:$0xff]  }
 0x6c1   : > { %16526 = vmatprep.mubr.bf16.mxu0 %v25972_v6  ;;  %16913 = vmatprep.mubr.bf16.mxu1 %v25972_v6 }
 0x6c3   : > { %16497 = vmatpush1.bf16.msra.mxu0 %v23685_v51  ;;  %16884 = vmatpush1.bf16.msra.mxu1 %v23688_v52  ;;  %v23759_v51 = vld [vmem:[%s25382_s11 + $0x428c] ss:$68 sps:$4 sm:$0xff]   ;;  %v23762_v52 = vld [vmem:[%s25382_s11 + $0x4294] ss:$68 sps:$4 sm:$0xff]  }
 0x6c4   : > { %16498 = vmatprep.subr.bf16.mxu0 %v23693_v54  ;;  %16885 = vmatprep.subr.bf16.mxu1 %v23696_v55  ;;  %v23757_v54 = vld [vmem:[%s25382_s11 + $0x4288] ss:$68 sps:$4 sm:$0xff]   ;;  %v23760_v55 = vld [vmem:[%s25382_s11 + $0x4290] ss:$68 sps:$4 sm:$0xff]  }
 0x6c7   : > { %16499 = vmatpush1.bf16.msra.mxu0 %v23691_v56  ;;  %16886 = vmatpush1.bf16.msra.mxu1 %v23694_v58  ;;  %v23765_v56 = vld [vmem:[%s25382_s11 + $0x4314] ss:$68 sps:$4 sm:$0xff]   ;;  %v23768_v58 = vld [vmem:[%s25382_s11 + $0x431c] ss:$68 sps:$4 sm:$0xff]  }
 0x6c8   : > { %16500 = vmatprep.subr.bf16.mxu0 %v23699_v59  ;;  %16887 = vmatprep.subr.bf16.mxu1 %v23702_v60  ;;  %v23763_v59 = vld [vmem:[%s25382_s11 + $0x4310] ss:$68 sps:$4 sm:$0xff]   ;;  %v23766_v60 = vld [vmem:[%s25382_s11 + $0x4318] ss:$68 sps:$4 sm:$0xff]  }
 0x6cb   : > { %16501 = vmatpush1.bf16.msra.mxu0 %v23697_v61  ;;  %16888 = vmatpush1.bf16.msra.mxu1 %v23700_v63  ;;  %v23771_v61 = vld [vmem:[%s25382_s11 + $0x439c] ss:$68 sps:$4 sm:$0xff]   ;;  %v23774_v63 = vld [vmem:[%s25382_s11 + $0x43a4] ss:$68 sps:$4 sm:$0xff]  }
 0x6cc   : > { %16502 = vmatprep.subr.bf16.mxu0 %v23705_v2  ;;  %16889 = vmatprep.subr.bf16.mxu1 %v23708_v3  ;;  %v23769_v2 = vld [vmem:[%s25382_s11 + $0x4398] ss:$68 sps:$4 sm:$0xff]   ;;  %v23772_v3 = vld [vmem:[%s25382_s11 + $0x43a0] ss:$68 sps:$4 sm:$0xff]  }
 0x6cf   : > { %16503 = vmatpush1.bf16.msra.mxu0 %v23703_v4  ;;  %16890 = vmatpush1.bf16.msra.mxu1 %v23706_v5  ;;  %v23777_v4 = vld [vmem:[%s25382_s11 + $0x4424] ss:$68 sps:$4 sm:$0xff]   ;;  %v23780_v5 = vld [vmem:[%s25382_s11 + $0x442c] ss:$68 sps:$4 sm:$0xff]  }
 0x6d0   : > { %16504 = vmatprep.subr.bf16.mxu0 %v23711_v9  ;;  %16891 = vmatprep.subr.bf16.mxu1 %v23714_v10  ;;  %v23775_v9 = vld [vmem:[%s25382_s11 + $0x4420] ss:$68 sps:$4 sm:$0xff]   ;;  %v23778_v10 = vld [vmem:[%s25382_s11 + $0x4428] ss:$68 sps:$4 sm:$0xff]  }
 0x6d3   : > { %16505 = vmatpush1.bf16.msra.mxu0 %v23709_v11  ;;  %16892 = vmatpush1.bf16.msra.mxu1 %v23712_v13  ;;  %v23783_v11 = vld [vmem:[%s25382_s11 + $0x44ac] ss:$68 sps:$4 sm:$0xff]   ;;  %v23786_v13 = vld [vmem:[%s25382_s11 + $0x44b4] ss:$68 sps:$4 sm:$0xff]  }
 0x6d4   : > { %16506 = vmatprep.subr.bf16.mxu0 %v23717_v14  ;;  %16893 = vmatprep.subr.bf16.mxu1 %v23720_v16  ;;  %v23781_v14 = vld [vmem:[%s25382_s11 + $0x44a8] ss:$68 sps:$4 sm:$0xff]   ;;  %v23784_v16 = vld [vmem:[%s25382_s11 + $0x44b0] ss:$68 sps:$4 sm:$0xff]  }
 0x6d7   : > { %16507 = vmatpush1.bf16.msra.mxu0 %v23715_v17  ;;  %16894 = vmatpush1.bf16.msra.mxu1 %v23718_v18  ;;  %v23789_v17 = vld [vmem:[%s25382_s11 + $0x4534] ss:$68 sps:$4 sm:$0xff]   ;;  %v23792_v18 = vld [vmem:[%s25382_s11 + $0x453c] ss:$68 sps:$4 sm:$0xff]  }
 0x6d8   : > { %16508 = vmatprep.subr.bf16.mxu0 %v23723_v19  ;;  %16895 = vmatprep.subr.bf16.mxu1 %v23726_v20  ;;  %v23787_v19 = vld [vmem:[%s25382_s11 + $0x4530] ss:$68 sps:$4 sm:$0xff]   ;;  %v23790_v20 = vld [vmem:[%s25382_s11 + $0x4538] ss:$68 sps:$4 sm:$0xff]  }
 0x6db   : > { %16509 = vmatpush1.bf16.msra.mxu0 %v23721_v21  ;;  %16896 = vmatpush1.bf16.msra.mxu1 %v23724_v22  ;;  %v23795_v21 = vld [vmem:[%s25382_s11 + $0x45bc] ss:$68 sps:$4 sm:$0xff]   ;;  %v23798_v22 = vld [vmem:[%s25382_s11 + $0x45c4] ss:$68 sps:$4 sm:$0xff]  }
 0x6dc   : > { %16510 = vmatprep.subr.bf16.mxu0 %v23729_v25  ;;  %16897 = vmatprep.subr.bf16.mxu1 %v23732_v26  ;;  %v23793_v25 = vld [vmem:[%s25382_s11 + $0x45b8] ss:$68 sps:$4 sm:$0xff]   ;;  %v23796_v26 = vld [vmem:[%s25382_s11 + $0x45c0] ss:$68 sps:$4 sm:$0xff]  }
 0x6df   : > { %16511 = vmatpush1.bf16.msra.mxu0 %v23727_v27  ;;  %16898 = vmatpush1.bf16.msra.mxu1 %v23730_v29  ;;  %v23801_v27 = vld [vmem:[%s25382_s11 + $0x4644] ss:$68 sps:$4 sm:$0xff]   ;;  %v23804_v29 = vld [vmem:[%s25382_s11 + $0x464c] ss:$68 sps:$4 sm:$0xff]  }
 0x6e0   : > { %16512 = vmatprep.subr.bf16.mxu0 %v23735_v30  ;;  %16899 = vmatprep.subr.bf16.mxu1 %v23738_v31  ;;  %v23799_v30 = vld [vmem:[%s25382_s11 + $0x4640] ss:$68 sps:$4 sm:$0xff]   ;;  %v23802_v31 = vld [vmem:[%s25382_s11 + $0x4648] ss:$68 sps:$4 sm:$0xff]  }
 0x6e3   : > { %16513 = vmatpush1.bf16.msra.mxu0 %v23733_v32  ;;  %16900 = vmatpush1.bf16.msra.mxu1 %v23736_v33  ;;  %v23807_v32 = vld [vmem:[%s25382_s11 + $0x46cc] ss:$68 sps:$4 sm:$0xff]   ;;  %v23810_v33 = vld [vmem:[%s25382_s11 + $0x46d4] ss:$68 sps:$4 sm:$0xff]  }
 0x6e4   : > { %16514 = vmatprep.subr.bf16.mxu0 %v23741_v35  ;;  %16901 = vmatprep.subr.bf16.mxu1 %v23744_v36  ;;  %v23805_v35 = vld [vmem:[%s25382_s11 + $0x46c8] ss:$68 sps:$4 sm:$0xff]   ;;  %v23808_v36 = vld [vmem:[%s25382_s11 + $0x46d0] ss:$68 sps:$4 sm:$0xff]  }
 0x6e7   : > { %16515 = vmatpush1.bf16.msra.mxu0 %v23739_v37  ;;  %16902 = vmatpush1.bf16.msra.mxu1 %v23742_v39  ;;  %v23813_v37 = vld [vmem:[%s25382_s11 + $0x4754] ss:$68 sps:$4 sm:$0xff]   ;;  %v23816_v39 = vld [vmem:[%s25382_s11 + $0x475c] ss:$68 sps:$4 sm:$0xff]  }
 0x6e8   : > { %16516 = vmatprep.subr.bf16.mxu0 %v23747_v40  ;;  %16903 = vmatprep.subr.bf16.mxu1 %v23750_v42  ;;  %v23811_v40 = vld [vmem:[%s25382_s11 + $0x4750] ss:$68 sps:$4 sm:$0xff]   ;;  %v23814_v42 = vld [vmem:[%s25382_s11 + $0x4758] ss:$68 sps:$4 sm:$0xff]  }
 0x6eb   : > { %16517 = vmatpush1.bf16.msra.mxu0 %v23745_v43  ;;  %16904 = vmatpush1.bf16.msra.mxu1 %v23748_v44  ;;  %v23819_v43 = vld [vmem:[%s25382_s11 + $0x47dc] ss:$68 sps:$4 sm:$0xff]   ;;  %v23822_v44 = vld [vmem:[%s25382_s11 + $0x47e4] ss:$68 sps:$4 sm:$0xff]  }
 0x6ec   : > { %16518 = vmatprep.subr.bf16.mxu0 %v23753_v45  ;;  %16905 = vmatprep.subr.bf16.mxu1 %v23756_v48  ;;  %v23817_v45 = vld [vmem:[%s25382_s11 + $0x47d8] ss:$68 sps:$4 sm:$0xff]   ;;  %v23820_v48 = vld [vmem:[%s25382_s11 + $0x47e0] ss:$68 sps:$4 sm:$0xff]  }
 0x6ef   : > { %16519 = vmatpush1.bf16.msra.mxu0 %v23751_v49  ;;  %16906 = vmatpush1.bf16.msra.mxu1 %v23754_v50  ;;  %v23825_v49 = vld [vmem:[%s25382_s11 + $0x34] ss:$68 sps:$4 sm:$0xff]   ;;  %v23828_v50 = vld [vmem:[%s25382_s11 + $0x3c] ss:$68 sps:$4 sm:$0xff]  }
 0x6f0   : > { %16520 = vmatprep.subr.bf16.mxu0 %v23759_v51  ;;  %16907 = vmatprep.subr.bf16.mxu1 %v23762_v52  ;;  %v23823_v51 = vld [vmem:[%s25382_s11 + $0x30] ss:$68 sps:$4 sm:$0xff]   ;;  %v23826_v52 = vld [vmem:[%s25382_s11 + $0x38] ss:$68 sps:$4 sm:$0xff]  }
 0x6f3   : > { %16521 = vmatpush1.bf16.msra.mxu0 %v23757_v54  ;;  %16908 = vmatpush1.bf16.msra.mxu1 %v23760_v55  ;;  %v23831_v54 = vld [vmem:[%s25382_s11 + $0xbc] ss:$68 sps:$4 sm:$0xff]   ;;  %v23834_v55 = vld [vmem:[%s25382_s11 + $0xc4] ss:$68 sps:$4 sm:$0xff]  }
 0x6f4   : > { %16522 = vmatprep.subr.bf16.mxu0 %v23765_v56  ;;  %16909 = vmatprep.subr.bf16.mxu1 %v23768_v58  ;;  %v23829_v56 = vld [vmem:[%s25382_s11 + $0xb8] ss:$68 sps:$4 sm:$0xff]   ;;  %v23832_v58 = vld [vmem:[%s25382_s11 + $0xc0] ss:$68 sps:$4 sm:$0xff]  }
 0x6f7   : > { %16523 = vmatpush1.bf16.msra.mxu0 %v23763_v59  ;;  %16910 = vmatpush1.bf16.msra.mxu1 %v23766_v60  ;;  %v23837_v59 = vld [vmem:[%s25382_s11 + $0x144] ss:$68 sps:$4 sm:$0xff]   ;;  %v23840_v60 = vld [vmem:[%s25382_s11 + $0x14c] ss:$68 sps:$4 sm:$0xff]  }
 0x6f8   : > { %16524 = vmatprep.subr.bf16.mxu0 %v23771_v61  ;;  %16911 = vmatprep.subr.bf16.mxu1 %v23774_v63  ;;  %v23835_v61 = vld [vmem:[%s25382_s11 + $0x140] ss:$68 sps:$4 sm:$0xff]   ;;  %v23838_v63 = vld [vmem:[%s25382_s11 + $0x148] ss:$68 sps:$4 sm:$0xff]  }
 0x6fb   : > { %16525 = vmatpush1.bf16.msra.mxu0 %v23769_v2  ;;  %16912 = vmatpush1.bf16.msra.mxu1 %v23772_v3  ;;  %v23843_v2 = vld [vmem:[%s25382_s11 + $0x1cc] ss:$68 sps:$4 sm:$0xff]   ;;  %v23846_v3 = vld [vmem:[%s25382_s11 + $0x1d4] ss:$68 sps:$4 sm:$0xff]  }
 0x6fc   : > { %16537 = vmatprep.subr.bf16.mxu0 %v23777_v4  ;;  %16924 = vmatprep.subr.bf16.mxu1 %v23780_v5  ;;  %v23841_v4 = vld [vmem:[%s25382_s11 + $0x1c8] ss:$68 sps:$4 sm:$0xff]   ;;  %v23844_v5 = vld [vmem:[%s25382_s11 + $0x1d0] ss:$68 sps:$4 sm:$0xff]  }
 0x6fe   : > { %16527 = vmatmul.mubr.bf16.vlgmr.msra.gmra.mrb[8].mxu0 %v26040_v24  ;;  %16914 = vmatmul.mubr.bf16.vlgmr.msra.gmra.mrb[8].mxu1 %v26040_v24 }
 0x6ff   : > { %16538 = vmatpush1.bf16.msra.mxu0 %v23775_v9  ;;  %16925 = vmatpush1.bf16.msra.mxu1 %v23778_v10  ;;  %v23849_v9 = vld [vmem:[%s25382_s11 + $0x254] ss:$68 sps:$4 sm:$0xff]   ;;  %v23852_v10 = vld [vmem:[%s25382_s11 + $0x25c] ss:$68 sps:$4 sm:$0xff]  }
 0x700   : > { %16539 = vmatprep.subr.bf16.mxu0 %v23783_v11  ;;  %16926 = vmatprep.subr.bf16.mxu1 %v23786_v13  ;;  %v23847_v11 = vld [vmem:[%s25382_s11 + $0x250] ss:$68 sps:$4 sm:$0xff]   ;;  %v23850_v13 = vld [vmem:[%s25382_s11 + $0x258] ss:$68 sps:$4 sm:$0xff]  }
 0x701   : > { %16569 = vmatprep.mubr.bf16.mxu0 %v25030_v34  ;;  %16956 = vmatprep.mubr.bf16.mxu1 %v25030_v34 }
 0x703   : > { %16540 = vmatpush1.bf16.msra.mxu0 %v23781_v14  ;;  %16927 = vmatpush1.bf16.msra.mxu1 %v23784_v16  ;;  %v23855_v14 = vld [vmem:[%s25382_s11 + $0x2dc] ss:$68 sps:$4 sm:$0xff]   ;;  %v23858_v16 = vld [vmem:[%s25382_s11 + $0x2e4] ss:$68 sps:$4 sm:$0xff]  }
 0x704   : > { %16541 = vmatprep.subr.bf16.mxu0 %v23789_v17  ;;  %16928 = vmatprep.subr.bf16.mxu1 %v23792_v18  ;;  %v23853_v17 = vld [vmem:[%s25382_s11 + $0x2d8] ss:$68 sps:$4 sm:$0xff]   ;;  %v23856_v18 = vld [vmem:[%s25382_s11 + $0x2e0] ss:$68 sps:$4 sm:$0xff]  }
 0x707   : > { %16542 = vmatpush1.bf16.msra.mxu0 %v23787_v19  ;;  %16929 = vmatpush1.bf16.msra.mxu1 %v23790_v20  ;;  %v23861_v19 = vld [vmem:[%s25382_s11 + $0x364] ss:$68 sps:$4 sm:$0xff]   ;;  %v23864_v20 = vld [vmem:[%s25382_s11 + $0x36c] ss:$68 sps:$4 sm:$0xff]  }
 0x708   : > { %16543 = vmatprep.subr.bf16.mxu0 %v23795_v21  ;;  %16930 = vmatprep.subr.bf16.mxu1 %v23798_v22  ;;  %v23859_v21 = vld [vmem:[%s25382_s11 + $0x360] ss:$68 sps:$4 sm:$0xff]   ;;  %v23862_v22 = vld [vmem:[%s25382_s11 + $0x368] ss:$68 sps:$4 sm:$0xff]  }
 0x70b   : > { %16544 = vmatpush1.bf16.msra.mxu0 %v23793_v25  ;;  %16931 = vmatpush1.bf16.msra.mxu1 %v23796_v26  ;;  %v23867_v25 = vld [vmem:[%s25382_s11 + $0x3ec] ss:$68 sps:$4 sm:$0xff]   ;;  %v23870_v26 = vld [vmem:[%s25382_s11 + $0x3f4] ss:$68 sps:$4 sm:$0xff]  }
 0x70c   : > { %16545 = vmatprep.subr.bf16.mxu0 %v23801_v27  ;;  %16932 = vmatprep.subr.bf16.mxu1 %v23804_v29  ;;  %v23865_v27 = vld [vmem:[%s25382_s11 + $0x3e8] ss:$68 sps:$4 sm:$0xff]   ;;  %v23868_v29 = vld [vmem:[%s25382_s11 + $0x3f0] ss:$68 sps:$4 sm:$0xff]  }
 0x70f   : > { %16546 = vmatpush1.bf16.msra.mxu0 %v23799_v30  ;;  %16933 = vmatpush1.bf16.msra.mxu1 %v23802_v31  ;;  %v23873_v30 = vld [vmem:[%s25382_s11 + $0x474] ss:$68 sps:$4 sm:$0xff]   ;;  %v23876_v31 = vld [vmem:[%s25382_s11 + $0x47c] ss:$68 sps:$4 sm:$0xff]  }
 0x710   : > { %16547 = vmatprep.subr.bf16.mxu0 %v23807_v32  ;;  %16934 = vmatprep.subr.bf16.mxu1 %v23810_v33  ;;  %v23871_v32 = vld [vmem:[%s25382_s11 + $0x470] ss:$68 sps:$4 sm:$0xff]   ;;  %v23874_v33 = vld [vmem:[%s25382_s11 + $0x478] ss:$68 sps:$4 sm:$0xff]  }
 0x713   : > { %16548 = vmatpush1.bf16.msra.mxu0 %v23805_v35  ;;  %16935 = vmatpush1.bf16.msra.mxu1 %v23808_v36  ;;  %v23879_v35 = vld [vmem:[%s25382_s11 + $0x4fc] ss:$68 sps:$4 sm:$0xff]   ;;  %v23882_v36 = vld [vmem:[%s25382_s11 + $0x504] ss:$68 sps:$4 sm:$0xff]  }
 0x714   : > { %16549 = vmatprep.subr.bf16.mxu0 %v23813_v37  ;;  %16936 = vmatprep.subr.bf16.mxu1 %v23816_v39  ;;  %v23877_v37 = vld [vmem:[%s25382_s11 + $0x4f8] ss:$68 sps:$4 sm:$0xff]   ;;  %v23880_v39 = vld [vmem:[%s25382_s11 + $0x500] ss:$68 sps:$4 sm:$0xff]  }
 0x717   : > { %16550 = vmatpush1.bf16.msra.mxu0 %v23811_v40  ;;  %16937 = vmatpush1.bf16.msra.mxu1 %v23814_v42  ;;  %v23885_v40 = vld [vmem:[%s25382_s11 + $0x584] ss:$68 sps:$4 sm:$0xff]   ;;  %v23888_v42 = vld [vmem:[%s25382_s11 + $0x58c] ss:$68 sps:$4 sm:$0xff]  }
 0x718   : > { %16551 = vmatprep.subr.bf16.mxu0 %v23819_v43  ;;  %16938 = vmatprep.subr.bf16.mxu1 %v23822_v44  ;;  %v23883_v43 = vld [vmem:[%s25382_s11 + $0x580] ss:$68 sps:$4 sm:$0xff]   ;;  %v23886_v44 = vld [vmem:[%s25382_s11 + $0x588] ss:$68 sps:$4 sm:$0xff]  }
 0x71b   : > { %16552 = vmatpush1.bf16.msra.mxu0 %v23817_v45  ;;  %16939 = vmatpush1.bf16.msra.mxu1 %v23820_v48  ;;  %v23891_v45 = vld [vmem:[%s25382_s11 + $0x60c] ss:$68 sps:$4 sm:$0xff]   ;;  %v23894_v48 = vld [vmem:[%s25382_s11 + $0x614] ss:$68 sps:$4 sm:$0xff]  }
 0x71c   : > { %16967 = vmatprep.subr.bf16.mxu0 %v23825_v49  ;;  %17354 = vmatprep.subr.bf16.mxu1 %v23828_v50  ;;  %v23889_v49 = vld [vmem:[%s25382_s11 + $0x608] ss:$68 sps:$4 sm:$0xff]   ;;  %v23892_v50 = vld [vmem:[%s25382_s11 + $0x610] ss:$68 sps:$4 sm:$0xff]  }
 0x71e   : > { %16570 = vmatmul.mubr.bf16.vlgmr.msra.gmra.mrb[8].mxu0 %v26080_v8  ;;  %16957 = vmatmul.mubr.bf16.vlgmr.msra.gmra.mrb[8].mxu1 %v26080_v8 }
 0x71f   : > { %16968 = vmatpush1.bf16.msra.mxu0 %v23823_v51  ;;  %17355 = vmatpush1.bf16.msra.mxu1 %v23826_v52  ;;  %v23897_v51 = vld [vmem:[%s25382_s11 + $0x694] ss:$68 sps:$4 sm:$0xff]   ;;  %v23900_v52 = vld [vmem:[%s25382_s11 + $0x69c] ss:$68 sps:$4 sm:$0xff]  }
 0x720   : > { %16969 = vmatprep.subr.bf16.mxu0 %v23831_v54  ;;  %17356 = vmatprep.subr.bf16.mxu1 %v23834_v55  ;;  %v23895_v54 = vld [vmem:[%s25382_s11 + $0x690] ss:$68 sps:$4 sm:$0xff]   ;;  %v23898_v55 = vld [vmem:[%s25382_s11 + $0x698] ss:$68 sps:$4 sm:$0xff]  }
 0x721   : > { %16999 = vmatprep.mubr.bf16.mxu0 %v25484_v15  ;;  %17386 = vmatprep.mubr.bf16.mxu1 %v25484_v15 }
 0x723   : > { %16970 = vmatpush1.bf16.msra.mxu0 %v23829_v56  ;;  %17357 = vmatpush1.bf16.msra.mxu1 %v23832_v58  ;;  %v23903_v56 = vld [vmem:[%s25382_s11 + $0x71c] ss:$68 sps:$4 sm:$0xff]   ;;  %v23906_v58 = vld [vmem:[%s25382_s11 + $0x724] ss:$68 sps:$4 sm:$0xff]  }
 0x724   : > { %16971 = vmatprep.subr.bf16.mxu0 %v23837_v59  ;;  %17358 = vmatprep.subr.bf16.mxu1 %v23840_v60  ;;  %v23901_v59 = vld [vmem:[%s25382_s11 + $0x718] ss:$68 sps:$4 sm:$0xff]   ;;  %v23904_v60 = vld [vmem:[%s25382_s11 + $0x720] ss:$68 sps:$4 sm:$0xff]  }
 0x727   : > { %16972 = vmatpush1.bf16.msra.mxu0 %v23835_v61  ;;  %17359 = vmatpush1.bf16.msra.mxu1 %v23838_v63  ;;  %v23909_v61 = vld [vmem:[%s25382_s11 + $0x7a4] ss:$68 sps:$4 sm:$0xff]   ;;  %v23912_v63 = vld [vmem:[%s25382_s11 + $0x7ac] ss:$68 sps:$4 sm:$0xff]  }
 0x728   : > { %16973 = vmatprep.subr.bf16.mxu0 %v23843_v2  ;;  %17360 = vmatprep.subr.bf16.mxu1 %v23846_v3  ;;  %v23907_v2 = vld [vmem:[%s25382_s11 + $0x7a0] ss:$68 sps:$4 sm:$0xff]   ;;  %v23910_v3 = vld [vmem:[%s25382_s11 + $0x7a8] ss:$68 sps:$4 sm:$0xff]  }
 0x72b   : > { %16974 = vmatpush1.bf16.msra.mxu0 %v23841_v4  ;;  %17361 = vmatpush1.bf16.msra.mxu1 %v23844_v5  ;;  %v23915_v4 = vld [vmem:[%s25382_s11 + $0x82c] ss:$68 sps:$4 sm:$0xff]   ;;  %v23918_v5 = vld [vmem:[%s25382_s11 + $0x834] ss:$68 sps:$4 sm:$0xff]  }
 0x72c   : > { %16975 = vmatprep.subr.bf16.mxu0 %v23849_v9  ;;  %17362 = vmatprep.subr.bf16.mxu1 %v23852_v10  ;;  %v23913_v9 = vld [vmem:[%s25382_s11 + $0x828] ss:$68 sps:$4 sm:$0xff]   ;;  %v23916_v10 = vld [vmem:[%s25382_s11 + $0x830] ss:$68 sps:$4 sm:$0xff]  }
 0x72f   : > { %16976 = vmatpush1.bf16.msra.mxu0 %v23847_v11  ;;  %17363 = vmatpush1.bf16.msra.mxu1 %v23850_v13  ;;  %v23921_v11 = vld [vmem:[%s25382_s11 + $0x8b4] ss:$68 sps:$4 sm:$0xff]   ;;  %v23924_v13 = vld [vmem:[%s25382_s11 + $0x8bc] ss:$68 sps:$4 sm:$0xff]  }
 0x730   : > { %16977 = vmatprep.subr.bf16.mxu0 %v23855_v14  ;;  %17364 = vmatprep.subr.bf16.mxu1 %v23858_v16  ;;  %v23919_v14 = vld [vmem:[%s25382_s11 + $0x8b0] ss:$68 sps:$4 sm:$0xff]   ;;  %v23922_v16 = vld [vmem:[%s25382_s11 + $0x8b8] ss:$68 sps:$4 sm:$0xff]  }
 0x733   : > { %16978 = vmatpush1.bf16.msra.mxu0 %v23853_v17  ;;  %17365 = vmatpush1.bf16.msra.mxu1 %v23856_v18  ;;  %v23927_v17 = vld [vmem:[%s25382_s11 + $0x93c] ss:$68 sps:$4 sm:$0xff]   ;;  %v23930_v18 = vld [vmem:[%s25382_s11 + $0x944] ss:$68 sps:$4 sm:$0xff]  }
 0x734   : > { %16979 = vmatprep.subr.bf16.mxu0 %v23861_v19  ;;  %17366 = vmatprep.subr.bf16.mxu1 %v23864_v20  ;;  %v23925_v19 = vld [vmem:[%s25382_s11 + $0x938] ss:$68 sps:$4 sm:$0xff]   ;;  %v23928_v20 = vld [vmem:[%s25382_s11 + $0x940] ss:$68 sps:$4 sm:$0xff]  }
 0x737   : > { %16980 = vmatpush1.bf16.msra.mxu0 %v23859_v21  ;;  %17367 = vmatpush1.bf16.msra.mxu1 %v23862_v22  ;;  %v23933_v21 = vld [vmem:[%s25382_s11 + $0x9c4] ss:$68 sps:$4 sm:$0xff]   ;;  %v23936_v22 = vld [vmem:[%s25382_s11 + $0x9cc] ss:$68 sps:$4 sm:$0xff]  }
 0x738   : > { %16981 = vmatprep.subr.bf16.mxu0 %v23867_v25  ;;  %17368 = vmatprep.subr.bf16.mxu1 %v23870_v26  ;;  %v23931_v25 = vld [vmem:[%s25382_s11 + $0x9c0] ss:$68 sps:$4 sm:$0xff]   ;;  %v23934_v26 = vld [vmem:[%s25382_s11 + $0x9c8] ss:$68 sps:$4 sm:$0xff]  }
 0x73b   : > { %16982 = vmatpush1.bf16.msra.mxu0 %v23865_v27  ;;  %17369 = vmatpush1.bf16.msra.mxu1 %v23868_v29  ;;  %v23939_v27 = vld [vmem:[%s25382_s11 + $0xa4c] ss:$68 sps:$4 sm:$0xff]   ;;  %v23942_v29 = vld [vmem:[%s25382_s11 + $0xa54] ss:$68 sps:$4 sm:$0xff]  }
 0x73c   : > { %16983 = vmatprep.subr.bf16.mxu0 %v23873_v30  ;;  %17370 = vmatprep.subr.bf16.mxu1 %v23876_v31  ;;  %v23937_v30 = vld [vmem:[%s25382_s11 + $0xa48] ss:$68 sps:$4 sm:$0xff]   ;;  %v23940_v31 = vld [vmem:[%s25382_s11 + $0xa50] ss:$68 sps:$4 sm:$0xff]  }
 0x73f   : > { %16984 = vmatpush1.bf16.msra.mxu0 %v23871_v32  ;;  %17371 = vmatpush1.bf16.msra.mxu1 %v23874_v33  ;;  %v23945_v32 = vld [vmem:[%s25382_s11 + $0xad4] ss:$68 sps:$4 sm:$0xff]   ;;  %v23948_v33 = vld [vmem:[%s25382_s11 + $0xadc] ss:$68 sps:$4 sm:$0xff]  }
 0x740   : > { %16985 = vmatprep.subr.bf16.mxu0 %v23879_v35  ;;  %17372 = vmatprep.subr.bf16.mxu1 %v23882_v36  ;;  %v23943_v35 = vld [vmem:[%s25382_s11 + $0xad0] ss:$68 sps:$4 sm:$0xff]   ;;  %v23946_v36 = vld [vmem:[%s25382_s11 + $0xad8] ss:$68 sps:$4 sm:$0xff]  }
 0x743   : > { %16986 = vmatpush1.bf16.msra.mxu0 %v23877_v37  ;;  %17373 = vmatpush1.bf16.msra.mxu1 %v23880_v39  ;;  %v23951_v37 = vld [vmem:[%s25382_s11 + $0xb5c] ss:$68 sps:$4 sm:$0xff]   ;;  %v23954_v39 = vld [vmem:[%s25382_s11 + $0xb64] ss:$68 sps:$4 sm:$0xff]  }
 0x744   : > { %16987 = vmatprep.subr.bf16.mxu0 %v23885_v40  ;;  %17374 = vmatprep.subr.bf16.mxu1 %v23888_v42  ;;  %v23949_v40 = vld [vmem:[%s25382_s11 + $0xb58] ss:$68 sps:$4 sm:$0xff]   ;;  %v23952_v42 = vld [vmem:[%s25382_s11 + $0xb60] ss:$68 sps:$4 sm:$0xff]  }
 0x747   : > { %16988 = vmatpush1.bf16.msra.mxu0 %v23883_v43  ;;  %17375 = vmatpush1.bf16.msra.mxu1 %v23886_v44  ;;  %v23957_v43 = vld [vmem:[%s25382_s11 + $0xbe4] ss:$68 sps:$4 sm:$0xff]   ;;  %v23960_v44 = vld [vmem:[%s25382_s11 + $0xbec] ss:$68 sps:$4 sm:$0xff]  }
 0x748   : > { %16989 = vmatprep.subr.bf16.mxu0 %v23891_v45  ;;  %17376 = vmatprep.subr.bf16.mxu1 %v23894_v48  ;;  %v23955_v45 = vld [vmem:[%s25382_s11 + $0xbe0] ss:$68 sps:$4 sm:$0xff]   ;;  %v23958_v48 = vld [vmem:[%s25382_s11 + $0xbe8] ss:$68 sps:$4 sm:$0xff]  }
 0x74b   : > { %16990 = vmatpush1.bf16.msra.mxu0 %v23889_v49  ;;  %17377 = vmatpush1.bf16.msra.mxu1 %v23892_v50  ;;  %v23963_v49 = vld [vmem:[%s25382_s11 + $0xc6c] ss:$68 sps:$4 sm:$0xff]   ;;  %v23966_v50 = vld [vmem:[%s25382_s11 + $0xc74] ss:$68 sps:$4 sm:$0xff]  }
 0x74c   : > { %16991 = vmatprep.subr.bf16.mxu0 %v23897_v51  ;;  %17378 = vmatprep.subr.bf16.mxu1 %v23900_v52  ;;  %v23961_v51 = vld [vmem:[%s25382_s11 + $0xc68] ss:$68 sps:$4 sm:$0xff]   ;;  %v23964_v52 = vld [vmem:[%s25382_s11 + $0xc70] ss:$68 sps:$4 sm:$0xff]  }
 0x74f   : > { %16992 = vmatpush1.bf16.msra.mxu0 %v23895_v54  ;;  %17379 = vmatpush1.bf16.msra.mxu1 %v23898_v55  ;;  %v23969_v54 = vld [vmem:[%s25382_s11 + $0xcf4] ss:$68 sps:$4 sm:$0xff]   ;;  %v23972_v55 = vld [vmem:[%s25382_s11 + $0xcfc] ss:$68 sps:$4 sm:$0xff]  }
 0x750   : > { %16993 = vmatprep.subr.bf16.mxu0 %v23903_v56  ;;  %17380 = vmatprep.subr.bf16.mxu1 %v23906_v58  ;;  %v23967_v56 = vld [vmem:[%s25382_s11 + $0xcf0] ss:$68 sps:$4 sm:$0xff]   ;;  %v23970_v58 = vld [vmem:[%s25382_s11 + $0xcf8] ss:$68 sps:$4 sm:$0xff]  }
 0x753   : > { %16994 = vmatpush1.bf16.msra.mxu0 %v23901_v59  ;;  %17381 = vmatpush1.bf16.msra.mxu1 %v23904_v60  ;;  %v23975_v59 = vld [vmem:[%s25382_s11 + $0xd7c] ss:$68 sps:$4 sm:$0xff]   ;;  %v23978_v60 = vld [vmem:[%s25382_s11 + $0xd84] ss:$68 sps:$4 sm:$0xff]  }
 0x754   : > { %16995 = vmatprep.subr.bf16.mxu0 %v23909_v61  ;;  %17382 = vmatprep.subr.bf16.mxu1 %v23912_v63  ;;  %v23973_v61 = vld [vmem:[%s25382_s11 + $0xd78] ss:$68 sps:$4 sm:$0xff]   ;;  %v23976_v63 = vld [vmem:[%s25382_s11 + $0xd80] ss:$68 sps:$4 sm:$0xff]  }
 0x757   : > { %16996 = vmatpush1.bf16.msra.mxu0 %v23907_v2  ;;  %17383 = vmatpush1.bf16.msra.mxu1 %v23910_v3  ;;  %v23981_v2 = vld [vmem:[%s25382_s11 + $0xe04] ss:$68 sps:$4 sm:$0xff]   ;;  %v23984_v3 = vld [vmem:[%s25382_s11 + $0xe0c] ss:$68 sps:$4 sm:$0xff]  }
 0x758   : > { %16997 = vmatprep.subr.bf16.mxu0 %v23915_v4  ;;  %17384 = vmatprep.subr.bf16.mxu1 %v23918_v5  ;;  %v23979_v4 = vld [vmem:[%s25382_s11 + $0xe00] ss:$68 sps:$4 sm:$0xff]   ;;  %v23982_v5 = vld [vmem:[%s25382_s11 + $0xe08] ss:$68 sps:$4 sm:$0xff]  }
 0x75b   : > { %16998 = vmatpush1.bf16.msra.mxu0 %v23913_v9  ;;  %17385 = vmatpush1.bf16.msra.mxu1 %v23916_v10  ;;  %v23987_v9 = vld [vmem:[%s25382_s11 + $0xe8c] ss:$68 sps:$4 sm:$0xff]   ;;  %v23990_v10 = vld [vmem:[%s25382_s11 + $0xe94] ss:$68 sps:$4 sm:$0xff]  }
 0x75c   : > { %17010 = vmatprep.subr.bf16.mxu0 %v23921_v11  ;;  %17397 = vmatprep.subr.bf16.mxu1 %v23924_v13  ;;  %v23985_v11 = vld [vmem:[%s25382_s11 + $0xe88] ss:$68 sps:$4 sm:$0xff]   ;;  %v23988_v13 = vld [vmem:[%s25382_s11 + $0xe90] ss:$68 sps:$4 sm:$0xff]  }
 0x75e   : > { %17000 = vmatmul.mubr.bf16.vlgmr.msra.gmra.mrb[12].mxu0 %v25510_v38  ;;  %17387 = vmatmul.mubr.bf16.vlgmr.msra.gmra.mrb[12].mxu1 %v25510_v38 }
 0x75f   : > { %17011 = vmatpush1.bf16.msra.mxu0 %v23919_v14  ;;  %17398 = vmatpush1.bf16.msra.mxu1 %v23922_v16  ;;  %v23993_v14 = vld [vmem:[%s25382_s11 + $0xf14] ss:$68 sps:$4 sm:$0xff]   ;;  %v23996_v16 = vld [vmem:[%s25382_s11 + $0xf1c] ss:$68 sps:$4 sm:$0xff]  }
 0x760   : > { %17012 = vmatprep.subr.bf16.mxu0 %v23927_v17  ;;  %17399 = vmatprep.subr.bf16.mxu1 %v23930_v18  ;;  %v23991_v17 = vld [vmem:[%s25382_s11 + $0xf10] ss:$68 sps:$4 sm:$0xff]   ;;  %v23994_v18 = vld [vmem:[%s25382_s11 + $0xf18] ss:$68 sps:$4 sm:$0xff]  }
 0x761   : > { %17042 = vmatprep.mubr.bf16.mxu0 %v25540_v1  ;;  %17429 = vmatprep.mubr.bf16.mxu1 %v25540_v1 }
 0x763   : > { %17013 = vmatpush1.bf16.msra.mxu0 %v23925_v19  ;;  %17400 = vmatpush1.bf16.msra.mxu1 %v23928_v20  ;;  %v23999_v19 = vld [vmem:[%s25382_s11 + $0xf9c] ss:$68 sps:$4 sm:$0xff]   ;;  %v24002_v20 = vld [vmem:[%s25382_s11 + $0xfa4] ss:$68 sps:$4 sm:$0xff]  }
 0x764   : > { %17014 = vmatprep.subr.bf16.mxu0 %v23933_v21  ;;  %17401 = vmatprep.subr.bf16.mxu1 %v23936_v22  ;;  %v23997_v21 = vld [vmem:[%s25382_s11 + $0xf98] ss:$68 sps:$4 sm:$0xff]   ;;  %v24000_v22 = vld [vmem:[%s25382_s11 + $0xfa0] ss:$68 sps:$4 sm:$0xff]  }
 0x767   : > { %17015 = vmatpush1.bf16.msra.mxu0 %v23931_v25  ;;  %17402 = vmatpush1.bf16.msra.mxu1 %v23934_v26  ;;  %v24005_v25 = vld [vmem:[%s25382_s11 + $0x1024] ss:$68 sps:$4 sm:$0xff]   ;;  %v24008_v26 = vld [vmem:[%s25382_s11 + $0x102c] ss:$68 sps:$4 sm:$0xff]  }
 0x768   : > { %17016 = vmatprep.subr.bf16.mxu0 %v23939_v27  ;;  %17403 = vmatprep.subr.bf16.mxu1 %v23942_v29  ;;  %v24003_v27 = vld [vmem:[%s25382_s11 + $0x1020] ss:$68 sps:$4 sm:$0xff]   ;;  %v24006_v29 = vld [vmem:[%s25382_s11 + $0x1028] ss:$68 sps:$4 sm:$0xff]  }
 0x76b   : > { %17017 = vmatpush1.bf16.msra.mxu0 %v23937_v30  ;;  %17404 = vmatpush1.bf16.msra.mxu1 %v23940_v31  ;;  %v24011_v30 = vld [vmem:[%s25382_s11 + $0x10ac] ss:$68 sps:$4 sm:$0xff]   ;;  %v24014_v31 = vld [vmem:[%s25382_s11 + $0x10b4] ss:$68 sps:$4 sm:$0xff]  }
 0x76c   : > { %17018 = vmatprep.subr.bf16.mxu0 %v23945_v32  ;;  %17405 = vmatprep.subr.bf16.mxu1 %v23948_v33  ;;  %v24009_v32 = vld [vmem:[%s25382_s11 + $0x10a8] ss:$68 sps:$4 sm:$0xff]   ;;  %v24012_v33 = vld [vmem:[%s25382_s11 + $0x10b0] ss:$68 sps:$4 sm:$0xff]  }
 0x76f   : > { %17019 = vmatpush1.bf16.msra.mxu0 %v23943_v35  ;;  %17406 = vmatpush1.bf16.msra.mxu1 %v23946_v36  ;;  %v24017_v35 = vld [vmem:[%s25382_s11 + $0x1134] ss:$68 sps:$4 sm:$0xff]   ;;  %v24020_v36 = vld [vmem:[%s25382_s11 + $0x113c] ss:$68 sps:$4 sm:$0xff]  }
 0x770   : > { %17020 = vmatprep.subr.bf16.mxu0 %v23951_v37  ;;  %17407 = vmatprep.subr.bf16.mxu1 %v23954_v39  ;;  %v24015_v37 = vld [vmem:[%s25382_s11 + $0x1130] ss:$68 sps:$4 sm:$0xff]   ;;  %v24018_v39 = vld [vmem:[%s25382_s11 + $0x1138] ss:$68 sps:$4 sm:$0xff]  }
 0x773   : > { %17021 = vmatpush1.bf16.msra.mxu0 %v23949_v40  ;;  %17408 = vmatpush1.bf16.msra.mxu1 %v23952_v42  ;;  %v24023_v40 = vld [vmem:[%s25382_s11 + $0x11bc] ss:$68 sps:$4 sm:$0xff]   ;;  %v24026_v42 = vld [vmem:[%s25382_s11 + $0x11c4] ss:$68 sps:$4 sm:$0xff]  }
 0x774   : > { %17022 = vmatprep.subr.bf16.mxu0 %v23957_v43  ;;  %17409 = vmatprep.subr.bf16.mxu1 %v23960_v44  ;;  %v24021_v43 = vld [vmem:[%s25382_s11 + $0x11b8] ss:$68 sps:$4 sm:$0xff]   ;;  %v24024_v44 = vld [vmem:[%s25382_s11 + $0x11c0] ss:$68 sps:$4 sm:$0xff]  }
 0x777   : > { %17023 = vmatpush1.bf16.msra.mxu0 %v23955_v45  ;;  %17410 = vmatpush1.bf16.msra.mxu1 %v23958_v48  ;;  %v24029_v45 = vld [vmem:[%s25382_s11 + $0x1244] ss:$68 sps:$4 sm:$0xff]   ;;  %v24032_v48 = vld [vmem:[%s25382_s11 + $0x124c] ss:$68 sps:$4 sm:$0xff]  }
 0x778   : > { %17024 = vmatprep.subr.bf16.mxu0 %v23963_v49  ;;  %17411 = vmatprep.subr.bf16.mxu1 %v23966_v50  ;;  %v24027_v49 = vld [vmem:[%s25382_s11 + $0x1240] ss:$68 sps:$4 sm:$0xff]   ;;  %v24030_v50 = vld [vmem:[%s25382_s11 + $0x1248] ss:$68 sps:$4 sm:$0xff]  }
 0x77b   : > { %17025 = vmatpush1.bf16.msra.mxu0 %v23961_v51  ;;  %17412 = vmatpush1.bf16.msra.mxu1 %v23964_v52  ;;  %v24035_v51 = vld [vmem:[%s25382_s11 + $0x12cc] ss:$68 sps:$4 sm:$0xff]   ;;  %v24038_v52 = vld [vmem:[%s25382_s11 + $0x12d4] ss:$68 sps:$4 sm:$0xff]  }
 0x77c   : > { %17026 = vmatprep.subr.bf16.mxu0 %v23969_v54  ;;  %17413 = vmatprep.subr.bf16.mxu1 %v23972_v55  ;;  %v24033_v54 = vld [vmem:[%s25382_s11 + $0x12c8] ss:$68 sps:$4 sm:$0xff]   ;;  %v24036_v55 = vld [vmem:[%s25382_s11 + $0x12d0] ss:$68 sps:$4 sm:$0xff]  }
 0x77f   : > { %17027 = vmatpush1.bf16.msra.mxu0 %v23967_v56  ;;  %17414 = vmatpush1.bf16.msra.mxu1 %v23970_v58  ;;  %v24041_v56 = vld [vmem:[%s25382_s11 + $0x1354] ss:$68 sps:$4 sm:$0xff]   ;;  %v24044_v58 = vld [vmem:[%s25382_s11 + $0x135c] ss:$68 sps:$4 sm:$0xff]  }
 0x780   : > { %17028 = vmatprep.subr.bf16.mxu0 %v23975_v59  ;;  %17415 = vmatprep.subr.bf16.mxu1 %v23978_v60  ;;  %v24039_v59 = vld [vmem:[%s25382_s11 + $0x1350] ss:$68 sps:$4 sm:$0xff]   ;;  %v24042_v60 = vld [vmem:[%s25382_s11 + $0x1358] ss:$68 sps:$4 sm:$0xff]  }
 0x783   : > { %17029 = vmatpush1.bf16.msra.mxu0 %v23973_v61  ;;  %17416 = vmatpush1.bf16.msra.mxu1 %v23976_v63  ;;  %v24047_v61 = vld [vmem:[%s25382_s11 + $0x13dc] ss:$68 sps:$4 sm:$0xff]   ;;  %v24050_v63 = vld [vmem:[%s25382_s11 + $0x13e4] ss:$68 sps:$4 sm:$0xff]  }
 0x784   : > { %17030 = vmatprep.subr.bf16.mxu0 %v23981_v2  ;;  %17417 = vmatprep.subr.bf16.mxu1 %v23984_v3  ;;  %v24045_v2 = vld [vmem:[%s25382_s11 + $0x13d8] ss:$68 sps:$4 sm:$0xff]   ;;  %v24048_v3 = vld [vmem:[%s25382_s11 + $0x13e0] ss:$68 sps:$4 sm:$0xff]  }
 0x787   : > { %17031 = vmatpush1.bf16.msra.mxu0 %v23979_v4  ;;  %17418 = vmatpush1.bf16.msra.mxu1 %v23982_v5  ;;  %v24053_v4 = vld [vmem:[%s25382_s11 + $0x1464] ss:$68 sps:$4 sm:$0xff]   ;;  %v24056_v5 = vld [vmem:[%s25382_s11 + $0x146c] ss:$68 sps:$4 sm:$0xff]  }
 0x788   : > { %17032 = vmatprep.subr.bf16.mxu0 %v23987_v9  ;;  %17419 = vmatprep.subr.bf16.mxu1 %v23990_v10  ;;  %v24051_v9 = vld [vmem:[%s25382_s11 + $0x1460] ss:$68 sps:$4 sm:$0xff]   ;;  %v24054_v10 = vld [vmem:[%s25382_s11 + $0x1468] ss:$68 sps:$4 sm:$0xff]  }
 0x78b   : > { %17033 = vmatpush1.bf16.msra.mxu0 %v23985_v11  ;;  %17420 = vmatpush1.bf16.msra.mxu1 %v23988_v13  ;;  %v24059_v11 = vld [vmem:[%s25382_s11 + $0x14ec] ss:$68 sps:$4 sm:$0xff]   ;;  %v24062_v13 = vld [vmem:[%s25382_s11 + $0x14f4] ss:$68 sps:$4 sm:$0xff]  }
 0x78c   : > { %17034 = vmatprep.subr.bf16.mxu0 %v23993_v14  ;;  %17421 = vmatprep.subr.bf16.mxu1 %v23996_v16  ;;  %v24057_v14 = vld [vmem:[%s25382_s11 + $0x14e8] ss:$68 sps:$4 sm:$0xff]   ;;  %v24060_v16 = vld [vmem:[%s25382_s11 + $0x14f0] ss:$68 sps:$4 sm:$0xff]  }
 0x78f   : > { %17035 = vmatpush1.bf16.msra.mxu0 %v23991_v17  ;;  %17422 = vmatpush1.bf16.msra.mxu1 %v23994_v18  ;;  %v24065_v17 = vld [vmem:[%s25382_s11 + $0x1574] ss:$68 sps:$4 sm:$0xff]   ;;  %v24068_v18 = vld [vmem:[%s25382_s11 + $0x157c] ss:$68 sps:$4 sm:$0xff]  }
 0x790   : > { %17036 = vmatprep.subr.bf16.mxu0 %v23999_v19  ;;  %17423 = vmatprep.subr.bf16.mxu1 %v24002_v20  ;;  %v24063_v19 = vld [vmem:[%s25382_s11 + $0x1570] ss:$68 sps:$4 sm:$0xff]   ;;  %v24066_v20 = vld [vmem:[%s25382_s11 + $0x1578] ss:$68 sps:$4 sm:$0xff]  }
 0x793   : > { %17037 = vmatpush1.bf16.msra.mxu0 %v23997_v21  ;;  %17424 = vmatpush1.bf16.msra.mxu1 %v24000_v22  ;;  %v24071_v21 = vld [vmem:[%s25382_s11 + $0x15fc] ss:$68 sps:$4 sm:$0xff]   ;;  %v24074_v22 = vld [vmem:[%s25382_s11 + $0x1604] ss:$68 sps:$4 sm:$0xff]  }
 0x794   : > { %17038 = vmatprep.subr.bf16.mxu0 %v24005_v25  ;;  %17425 = vmatprep.subr.bf16.mxu1 %v24008_v26  ;;  %v24069_v25 = vld [vmem:[%s25382_s11 + $0x15f8] ss:$68 sps:$4 sm:$0xff]   ;;  %v24072_v26 = vld [vmem:[%s25382_s11 + $0x1600] ss:$68 sps:$4 sm:$0xff]  }
 0x797   : > { %17039 = vmatpush1.bf16.msra.mxu0 %v24003_v27  ;;  %17426 = vmatpush1.bf16.msra.mxu1 %v24006_v29  ;;  %v24077_v27 = vld [vmem:[%s25382_s11 + $0x1684] ss:$68 sps:$4 sm:$0xff]   ;;  %v24080_v29 = vld [vmem:[%s25382_s11 + $0x168c] ss:$68 sps:$4 sm:$0xff]  }
 0x798   : > { %17040 = vmatprep.subr.bf16.mxu0 %v24011_v30  ;;  %17427 = vmatprep.subr.bf16.mxu1 %v24014_v31  ;;  %v24075_v30 = vld [vmem:[%s25382_s11 + $0x1680] ss:$68 sps:$4 sm:$0xff]   ;;  %v24078_v31 = vld [vmem:[%s25382_s11 + $0x1688] ss:$68 sps:$4 sm:$0xff]  }
 0x79b   : > { %17041 = vmatpush1.bf16.msra.mxu0 %v24009_v32  ;;  %17428 = vmatpush1.bf16.msra.mxu1 %v24012_v33  ;;  %v24083_v32 = vld [vmem:[%s25382_s11 + $0x170c] ss:$68 sps:$4 sm:$0xff]   ;;  %v24086_v33 = vld [vmem:[%s25382_s11 + $0x1714] ss:$68 sps:$4 sm:$0xff]  }
 0x79c   : > { %17053 = vmatprep.subr.bf16.mxu0 %v24017_v35  ;;  %17440 = vmatprep.subr.bf16.mxu1 %v24020_v36  ;;  %v24081_v35 = vld [vmem:[%s25382_s11 + $0x1708] ss:$68 sps:$4 sm:$0xff]   ;;  %v24084_v36 = vld [vmem:[%s25382_s11 + $0x1710] ss:$68 sps:$4 sm:$0xff]  }
 0x79e   : > { %17043 = vmatmul.mubr.bf16.vlgmr.msra.gmra.mrb[12].mxu0 %v25586_v46  ;;  %17430 = vmatmul.mubr.bf16.vlgmr.msra.gmra.mrb[12].mxu1 %v25586_v46 }
 0x79f   : > { %17054 = vmatpush1.bf16.msra.mxu0 %v24015_v37  ;;  %17441 = vmatpush1.bf16.msra.mxu1 %v24018_v39  ;;  %v24089_v37 = vld [vmem:[%s25382_s11 + $0x1794] ss:$68 sps:$4 sm:$0xff]   ;;  %v24092_v39 = vld [vmem:[%s25382_s11 + $0x179c] ss:$68 sps:$4 sm:$0xff]  }
 0x7a0   : > { %17055 = vmatprep.subr.bf16.mxu0 %v24023_v40  ;;  %17442 = vmatprep.subr.bf16.mxu1 %v24026_v42  ;;  %v24087_v40 = vld [vmem:[%s25382_s11 + $0x1790] ss:$68 sps:$4 sm:$0xff]   ;;  %v24090_v42 = vld [vmem:[%s25382_s11 + $0x1798] ss:$68 sps:$4 sm:$0xff]  }
 0x7a1   : > { %17085 = vmatprep.mubr.bf16.mxu0 %v25596_v53  ;;  %17472 = vmatprep.mubr.bf16.mxu1 %v25596_v53 }
 0x7a3   : > { %17056 = vmatpush1.bf16.msra.mxu0 %v24021_v43  ;;  %17443 = vmatpush1.bf16.msra.mxu1 %v24024_v44  ;;  %v24095_v43 = vld [vmem:[%s25382_s11 + $0x181c] ss:$68 sps:$4 sm:$0xff]   ;;  %v24098_v44 = vld [vmem:[%s25382_s11 + $0x1824] ss:$68 sps:$4 sm:$0xff]  }
 0x7a4   : > { %17057 = vmatprep.subr.bf16.mxu0 %v24029_v45  ;;  %17444 = vmatprep.subr.bf16.mxu1 %v24032_v48  ;;  %v24093_v45 = vld [vmem:[%s25382_s11 + $0x1818] ss:$68 sps:$4 sm:$0xff]   ;;  %v24096_v48 = vld [vmem:[%s25382_s11 + $0x1820] ss:$68 sps:$4 sm:$0xff]  }
 0x7a7   : > { %17058 = vmatpush1.bf16.msra.mxu0 %v24027_v49  ;;  %17445 = vmatpush1.bf16.msra.mxu1 %v24030_v50  ;;  %v24101_v49 = vld [vmem:[%s25382_s11 + $0x18a4] ss:$68 sps:$4 sm:$0xff]   ;;  %v24104_v50 = vld [vmem:[%s25382_s11 + $0x18ac] ss:$68 sps:$4 sm:$0xff]  }
 0x7a8   : > { %17059 = vmatprep.subr.bf16.mxu0 %v24035_v51  ;;  %17446 = vmatprep.subr.bf16.mxu1 %v24038_v52  ;;  %v24099_v51 = vld [vmem:[%s25382_s11 + $0x18a0] ss:$68 sps:$4 sm:$0xff]   ;;  %v24102_v52 = vld [vmem:[%s25382_s11 + $0x18a8] ss:$68 sps:$4 sm:$0xff]  }
 0x7ab   : > { %17060 = vmatpush1.bf16.msra.mxu0 %v24033_v54  ;;  %17447 = vmatpush1.bf16.msra.mxu1 %v24036_v55  ;;  %v24107_v54 = vld [vmem:[%s25382_s11 + $0x192c] ss:$68 sps:$4 sm:$0xff]   ;;  %v24110_v55 = vld [vmem:[%s25382_s11 + $0x1934] ss:$68 sps:$4 sm:$0xff]  }
 0x7ac   : > { %17061 = vmatprep.subr.bf16.mxu0 %v24041_v56  ;;  %17448 = vmatprep.subr.bf16.mxu1 %v24044_v58  ;;  %v24105_v56 = vld [vmem:[%s25382_s11 + $0x1928] ss:$68 sps:$4 sm:$0xff]   ;;  %v24108_v58 = vld [vmem:[%s25382_s11 + $0x1930] ss:$68 sps:$4 sm:$0xff]  }
 0x7af   : > { %17062 = vmatpush1.bf16.msra.mxu0 %v24039_v59  ;;  %17449 = vmatpush1.bf16.msra.mxu1 %v24042_v60  ;;  %v24113_v59 = vld [vmem:[%s25382_s11 + $0x19b4] ss:$68 sps:$4 sm:$0xff]   ;;  %v24116_v60 = vld [vmem:[%s25382_s11 + $0x19bc] ss:$68 sps:$4 sm:$0xff]  }
 0x7b0   : > { %17063 = vmatprep.subr.bf16.mxu0 %v24047_v61  ;;  %17450 = vmatprep.subr.bf16.mxu1 %v24050_v63  ;;  %v24111_v61 = vld [vmem:[%s25382_s11 + $0x19b0] ss:$68 sps:$4 sm:$0xff]   ;;  %v24114_v63 = vld [vmem:[%s25382_s11 + $0x19b8] ss:$68 sps:$4 sm:$0xff]  }
 0x7b3   : > { %17064 = vmatpush1.bf16.msra.mxu0 %v24045_v2  ;;  %17451 = vmatpush1.bf16.msra.mxu1 %v24048_v3  ;;  %v24119_v2 = vld [vmem:[%s25382_s11 + $0x1a3c] ss:$68 sps:$4 sm:$0xff]   ;;  %v24122_v3 = vld [vmem:[%s25382_s11 + $0x1a44] ss:$68 sps:$4 sm:$0xff]  }
 0x7b4   : > { %17065 = vmatprep.subr.bf16.mxu0 %v24053_v4  ;;  %17452 = vmatprep.subr.bf16.mxu1 %v24056_v5  ;;  %v24117_v4 = vld [vmem:[%s25382_s11 + $0x1a38] ss:$68 sps:$4 sm:$0xff]   ;;  %v24120_v5 = vld [vmem:[%s25382_s11 + $0x1a40] ss:$68 sps:$4 sm:$0xff]  }
 0x7b7   : > { %17066 = vmatpush1.bf16.msra.mxu0 %v24051_v9  ;;  %17453 = vmatpush1.bf16.msra.mxu1 %v24054_v10  ;;  %v24125_v9 = vld [vmem:[%s25382_s11 + $0x1ac4] ss:$68 sps:$4 sm:$0xff]   ;;  %v24128_v10 = vld [vmem:[%s25382_s11 + $0x1acc] ss:$68 sps:$4 sm:$0xff]  }
 0x7b8   : > { %17067 = vmatprep.subr.bf16.mxu0 %v24059_v11  ;;  %17454 = vmatprep.subr.bf16.mxu1 %v24062_v13  ;;  %v24123_v11 = vld [vmem:[%s25382_s11 + $0x1ac0] ss:$68 sps:$4 sm:$0xff]   ;;  %v24126_v13 = vld [vmem:[%s25382_s11 + $0x1ac8] ss:$68 sps:$4 sm:$0xff]  }
 0x7bb   : > { %17068 = vmatpush1.bf16.msra.mxu0 %v24057_v14  ;;  %17455 = vmatpush1.bf16.msra.mxu1 %v24060_v16  ;;  %v24131_v14 = vld [vmem:[%s25382_s11 + $0x1b4c] ss:$68 sps:$4 sm:$0xff]   ;;  %v24134_v16 = vld [vmem:[%s25382_s11 + $0x1b54] ss:$68 sps:$4 sm:$0xff]  }
 0x7bc   : > { %17069 = vmatprep.subr.bf16.mxu0 %v24065_v17  ;;  %17456 = vmatprep.subr.bf16.mxu1 %v24068_v18  ;;  %v24129_v17 = vld [vmem:[%s25382_s11 + $0x1b48] ss:$68 sps:$4 sm:$0xff]   ;;  %v24132_v18 = vld [vmem:[%s25382_s11 + $0x1b50] ss:$68 sps:$4 sm:$0xff]  }
 0x7bf   : > { %17070 = vmatpush1.bf16.msra.mxu0 %v24063_v19  ;;  %17457 = vmatpush1.bf16.msra.mxu1 %v24066_v20  ;;  %v24137_v19 = vld [vmem:[%s25382_s11 + $0x1bd4] ss:$68 sps:$4 sm:$0xff]   ;;  %v24140_v20 = vld [vmem:[%s25382_s11 + $0x1bdc] ss:$68 sps:$4 sm:$0xff]  }
 0x7c0   : > { %17071 = vmatprep.subr.bf16.mxu0 %v24071_v21  ;;  %17458 = vmatprep.subr.bf16.mxu1 %v24074_v22  ;;  %v24135_v21 = vld [vmem:[%s25382_s11 + $0x1bd0] ss:$68 sps:$4 sm:$0xff]   ;;  %v24138_v22 = vld [vmem:[%s25382_s11 + $0x1bd8] ss:$68 sps:$4 sm:$0xff]  }
 0x7c3   : > { %17072 = vmatpush1.bf16.msra.mxu0 %v24069_v25  ;;  %17459 = vmatpush1.bf16.msra.mxu1 %v24072_v26  ;;  %v24143_v25 = vld [vmem:[%s25382_s11 + $0x1c5c] ss:$68 sps:$4 sm:$0xff]   ;;  %v24146_v26 = vld [vmem:[%s25382_s11 + $0x1c64] ss:$68 sps:$4 sm:$0xff]  }
 0x7c4   : > { %17073 = vmatprep.subr.bf16.mxu0 %v24077_v27  ;;  %17460 = vmatprep.subr.bf16.mxu1 %v24080_v29  ;;  %v424_v27 = vld [vmem:[%s25397_s28 + $0x40] sm:$0xff]  ;;  %v426_v29 = vld [vmem:[%s25397_s28 + $0x50] sm:$0xff] }
 0x7c7   : > { %17074 = vmatpush1.bf16.msra.mxu0 %v24075_v30  ;;  %17461 = vmatpush1.bf16.msra.mxu1 %v24078_v31  ;;  %v425_v30 = vld [vmem:[%s25397_s28 + $0x48] sm:$0xff] }
 0x7c8   : > { %17075 = vmatprep.subr.bf16.mxu0 %v24083_v32  ;;  %17462 = vmatprep.subr.bf16.mxu1 %v24086_v33  ;;  %v24141_v31 = vld [vmem:[%s25382_s11 + $0x1c58] ss:$68 sps:$4 sm:$0xff]   ;;  %v24144_v32 = vld [vmem:[%s25382_s11 + $0x1c60] ss:$68 sps:$4 sm:$0xff]  }
 0x7c9   : > { %v427_v33 = vld [vmem:[%s25397_s28 + $0x58] sm:$0xff] }
 0x7cb   : > { %17076 = vmatpush1.bf16.msra.mxu0 %v24081_v35  ;;  %17463 = vmatpush1.bf16.msra.mxu1 %v24084_v36  ;;  %v24149_v35 = vld [vmem:[%s25382_s11 + $0x1ce4] ss:$68 sps:$4 sm:$0xff]   ;;  %v24152_v36 = vld [vmem:[%s25382_s11 + $0x1cec] ss:$68 sps:$4 sm:$0xff]  }
 0x7cc   : > { %17077 = vmatprep.subr.bf16.mxu0 %v24089_v37  ;;  %17464 = vmatprep.subr.bf16.mxu1 %v24092_v39 }
 0x7cf   : > { %17078 = vmatpush1.bf16.msra.mxu0 %v24087_v40  ;;  %17465 = vmatpush1.bf16.msra.mxu1 %v24090_v42  ;;  %v441_v40 = vld [vmem:[%s25397_s28 + $0xc8] sm:$0xff]  ;;  %v443_v42 = vld [vmem:[%s25397_s28 + $0xd8] sm:$0xff] }
 0x7d0   : > { %17079 = vmatprep.subr.bf16.mxu0 %v24095_v43  ;;  %17466 = vmatprep.subr.bf16.mxu1 %v24098_v44 }
 0x7d3   : > { %17080 = vmatpush1.bf16.msra.mxu0 %v24093_v45  ;;  %17467 = vmatpush1.bf16.msra.mxu1 %v24096_v48 }
 0x7d4   : > { %17081 = vmatprep.subr.bf16.mxu0 %v24101_v49  ;;  %17468 = vmatprep.subr.bf16.mxu1 %v24104_v50  ;;  %v442_v49 = vld [vmem:[%s25397_s28 + $0xd0] sm:$0xff]  ;;  %v444_v50 = vld [vmem:[%s25397_s28 + $0xe0] sm:$0xff] }
 0x7d7   : > { %17082 = vmatpush1.bf16.msra.mxu0 %v24099_v51  ;;  %17469 = vmatpush1.bf16.msra.mxu1 %v24102_v52 }
 0x7d8   : > { %17083 = vmatprep.subr.bf16.mxu0 %v24107_v54  ;;  %17470 = vmatprep.subr.bf16.mxu1 %v24110_v55 }
 0x7db   : > { %17084 = vmatpush1.bf16.msra.mxu0 %v24105_v56  ;;  %17471 = vmatpush1.bf16.msra.mxu1 %v24108_v58  ;;  %v24147_v56 = vld [vmem:[%s25382_s11 + $0x1ce0] ss:$68 sps:$4 sm:$0xff]   ;;  %v24150_v58 = vld [vmem:[%s25382_s11 + $0x1ce8] ss:$68 sps:$4 sm:$0xff]  }
 0x7dc   : > { %17096 = vmatprep.subr.bf16.mxu0 %v24113_v59  ;;  %17483 = vmatprep.subr.bf16.mxu1 %v24116_v60 }
 0x7de   : > { %17086 = vmatmul.mubr.bf16.vlgmr.msra.gmra.mrb[12].mxu0 %v25662_v57  ;;  %17473 = vmatmul.mubr.bf16.vlgmr.msra.gmra.mrb[12].mxu1 %v25662_v57 }
 0x7df   : > { %17097 = vmatpush1.bf16.msra.mxu0 %v24111_v61  ;;  %17484 = vmatpush1.bf16.msra.mxu1 %v24114_v63 }
 0x7e0   : > { %17098 = vmatprep.subr.bf16.mxu0 %v24119_v2  ;;  %17485 = vmatprep.subr.bf16.mxu1 %v24122_v3  ;;  %v24155_v2 = vld [vmem:[%s25382_s11 + $0x1d6c] ss:$68 sps:$4 sm:$0xff]   ;;  %v24158_v3 = vld [vmem:[%s25382_s11 + $0x1d74] ss:$68 sps:$4 sm:$0xff]  }
 0x7e1   : > { %17128 = vmatprep.mubr.bf16.mxu0 %v25668_v62  ;;  %17515 = vmatprep.mubr.bf16.mxu1 %v25668_v62 }
 0x7e3   : > { %17099 = vmatpush1.bf16.msra.mxu0 %v24117_v4  ;;  %17486 = vmatpush1.bf16.msra.mxu1 %v24120_v5 }
 0x7e4   : > { %17100 = vmatprep.subr.bf16.mxu0 %v24125_v9  ;;  %17487 = vmatprep.subr.bf16.mxu1 %v24128_v10  ;;  %v24153_v9 = vld [vmem:[%s25382_s11 + $0x1d68] ss:$68 sps:$4 sm:$0xff]   ;;  %v24156_v10 = vld [vmem:[%s25382_s11 + $0x1d70] ss:$68 sps:$4 sm:$0xff]  }
 0x7e7   : > { %17101 = vmatpush1.bf16.msra.mxu0 %v24123_v11  ;;  %17488 = vmatpush1.bf16.msra.mxu1 %v24126_v13  ;;  %v24161_v11 = vld [vmem:[%s25382_s11 + $0x1df4] ss:$68 sps:$4 sm:$0xff]   ;;  %v24164_v13 = vld [vmem:[%s25382_s11 + $0x1dfc] ss:$68 sps:$4 sm:$0xff]  }
 0x7e8   : > { %17102 = vmatprep.subr.bf16.mxu0 %v24131_v14  ;;  %17489 = vmatprep.subr.bf16.mxu1 %v24134_v16  ;;  %v24159_v14 = vld [vmem:[%s25382_s11 + $0x1df0] ss:$68 sps:$4 sm:$0xff]   ;;  %v24162_v16 = vld [vmem:[%s25382_s11 + $0x1df8] ss:$68 sps:$4 sm:$0xff]  }
 0x7eb   : > { %17103 = vmatpush1.bf16.msra.mxu0 %v24129_v17  ;;  %17490 = vmatpush1.bf16.msra.mxu1 %v24132_v18  ;;  %v24167_v17 = vld [vmem:[%s25382_s11 + $0x1e7c] ss:$68 sps:$4 sm:$0xff]   ;;  %v24170_v18 = vld [vmem:[%s25382_s11 + $0x1e84] ss:$68 sps:$4 sm:$0xff]  }
 0x7ec   : > { %17104 = vmatprep.subr.bf16.mxu0 %v24137_v19  ;;  %17491 = vmatprep.subr.bf16.mxu1 %v24140_v20  ;;  %v24165_v19 = vld [vmem:[%s25382_s11 + $0x1e78] ss:$68 sps:$4 sm:$0xff]   ;;  %v24168_v20 = vld [vmem:[%s25382_s11 + $0x1e80] ss:$68 sps:$4 sm:$0xff]  }
 0x7ef   : > { %17105 = vmatpush1.bf16.msra.mxu0 %v24135_v21  ;;  %17492 = vmatpush1.bf16.msra.mxu1 %v24138_v22  ;;  %v24173_v21 = vld [vmem:[%s25382_s11 + $0x1f04] ss:$68 sps:$4 sm:$0xff]   ;;  %v24176_v22 = vld [vmem:[%s25382_s11 + $0x1f0c] ss:$68 sps:$4 sm:$0xff]  }
 0x7f0   : > { %17106 = vmatprep.subr.bf16.mxu0 %v24143_v25  ;;  %17493 = vmatprep.subr.bf16.mxu1 %v24146_v26  ;;  %v24171_v25 = vld [vmem:[%s25382_s11 + $0x1f00] ss:$68 sps:$4 sm:$0xff]   ;;  %v24174_v26 = vld [vmem:[%s25382_s11 + $0x1f08] ss:$68 sps:$4 sm:$0xff]  }
 0x7f1   : > { %v16571_v37 = vpop.f32.mrb[8].mxu0  ;;  %v16958_v39 = vpop.f32.mrb[8].mxu1 }
 0x7f2   : > { %v18118_v43 = vadd.f32 %v16571_v37, %v424_v27  ;;  %v18120_v44 = vadd.f32 %v16958_v39, %v426_v29  ;;  %v16573_v45 = vpop.f32.mrb[9].mxu0  ;;  %v16960_v48 = vpop.f32.mrb[9].mxu1  ;;  %v24179_v27 = vld [vmem:[%s25382_s11 + $0x1f8c] ss:$68 sps:$4 sm:$0xff]   ;;  %v24182_v29 = vld [vmem:[%s25382_s11 + $0x1f94] ss:$68 sps:$4 sm:$0xff]  }
 0x7f3   : > { %v18119_v51 = vadd.f32 %v16573_v45, %v425_v30  ;;  %v18121_v52 = vadd.f32 %v16960_v48, %v427_v33  ;;  %v16575_v54 = vpop.f32.mrb[10].mxu0  ;;  %v16962_v55 = vpop.f32.mrb[10].mxu1  ;;  %17107 = vmatpush1.bf16.msra.mxu0 %v24141_v31  ;;  %17494 = vmatpush1.bf16.msra.mxu1 %v24144_v32  ;;  %v24177_v30 = vld [vmem:[%s25382_s11 + $0x1f88] ss:$68 sps:$4 sm:$0xff]   ;;  %v24180_v31 = vld [vmem:[%s25382_s11 + $0x1f90] ss:$68 sps:$4 sm:$0xff]  }
 0x7f4   : > { %18152 = vst [vmem:[%s25397_s28 + $0x40] sm:$0xff] %v18118_v43  ;;  %18154 = vst [vmem:[%s25397_s28 + $0x50] sm:$0xff] %v18120_v44  ;;  %v18135_v59 = vadd.f32 %v16575_v54, %v441_v40  ;;  %v18137_v60 = vadd.f32 %v16962_v55, %v443_v42  ;;  %v16577_v61 = vpop.f32.mrb[11].mxu0  ;;  %v16964_v63 = vpop.f32.mrb[11].mxu1  ;;  %17108 = vmatprep.subr.bf16.mxu0 %v24149_v35  ;;  %17495 = vmatprep.subr.bf16.mxu1 %v24152_v36  ;;  %v24185_v32 = vld [vmem:[%s25382_s11 + $0x2014] ss:$68 sps:$4 sm:$0xff]  }
 0x7f5   : > { %18153 = vst [vmem:[%s25397_s28 + $0x48] sm:$0xff] %v18119_v51  ;;  %18155 = vst [vmem:[%s25397_s28 + $0x58] sm:$0xff] %v18121_v52  ;;  %v18136_v4 = vadd.f32 %v16577_v61, %v442_v49  ;;  %v18138_v5 = vadd.f32 %v16964_v63, %v444_v50  ;;  %v24188_v33 = vld [vmem:[%s25382_s11 + $0x201c] ss:$68 sps:$4 sm:$0xff]   ;;  %v24183_v35 = vld [vmem:[%s25382_s11 + $0x2010] ss:$68 sps:$4 sm:$0xff]  }
 0x7f6   : > { %18169 = vst [vmem:[%s25397_s28 + $0xc8] sm:$0xff] %v18135_v59  ;;  %18171 = vst [vmem:[%s25397_s28 + $0xd8] sm:$0xff] %v18137_v60  ;;  %v24186_v36 = vld [vmem:[%s25382_s11 + $0x2018] ss:$68 sps:$4 sm:$0xff]   ;;  %v24194_v39 = vld [vmem:[%s25382_s11 + $0x20a4] ss:$68 sps:$4 sm:$0xff]  }
 0x7f7   : > { %18170 = vst [vmem:[%s25397_s28 + $0xd0] sm:$0xff] %v18136_v4  ;;  %18172 = vst [vmem:[%s25397_s28 + $0xe0] sm:$0xff] %v18138_v5  ;;  %17109 = vmatpush1.bf16.msra.mxu0 %v24147_v56  ;;  %17496 = vmatpush1.bf16.msra.mxu1 %v24150_v58  ;;  %v24191_v37 = vld [vmem:[%s25382_s11 + $0x209c] ss:$68 sps:$4 sm:$0xff]   ;;  %v24197_v43 = vld [vmem:[%s25382_s11 + $0x2124] ss:$68 sps:$4 sm:$0xff]  }
 0x7f8   : > { %17110 = vmatprep.subr.bf16.mxu0 %v24155_v2  ;;  %17497 = vmatprep.subr.bf16.mxu1 %v24158_v3  ;;  %v24189_v40 = vld [vmem:[%s25382_s11 + $0x2098] ss:$68 sps:$4 sm:$0xff]   ;;  %v24192_v42 = vld [vmem:[%s25382_s11 + $0x20a0] ss:$68 sps:$4 sm:$0xff]   ;;  %v24200_v44 = vld [vmem:[%s25382_s11 + $0x212c] ss:$68 sps:$4 sm:$0xff]  }
 0x7f9   : > { %v24195_v45 = vld [vmem:[%s25382_s11 + $0x2120] ss:$68 sps:$4 sm:$0xff]   ;;  %v24198_v48 = vld [vmem:[%s25382_s11 + $0x2128] ss:$68 sps:$4 sm:$0xff]   ;;  %v24206_v50 = vld [vmem:[%s25382_s11 + $0x21b4] ss:$68 sps:$4 sm:$0xff]  }
 0x7fa   : > { %v24203_v49 = vld [vmem:[%s25382_s11 + $0x21ac] ss:$68 sps:$4 sm:$0xff]   ;;  %v24209_v54 = vld [vmem:[%s25382_s11 + $0x2234] ss:$68 sps:$4 sm:$0xff]   ;;  %v24212_v55 = vld [vmem:[%s25382_s11 + $0x223c] ss:$68 sps:$4 sm:$0xff]  }
 0x7fb   : > { %17111 = vmatpush1.bf16.msra.mxu0 %v24153_v9  ;;  %17498 = vmatpush1.bf16.msra.mxu1 %v24156_v10  ;;  %v24201_v51 = vld [vmem:[%s25382_s11 + $0x21a8] ss:$68 sps:$4 sm:$0xff]   ;;  %v24204_v52 = vld [vmem:[%s25382_s11 + $0x21b0] ss:$68 sps:$4 sm:$0xff]   ;;  %v24210_v58 = vld [vmem:[%s25382_s11 + $0x2238] ss:$68 sps:$4 sm:$0xff]  }
 0x7fc   : > { %17112 = vmatprep.subr.bf16.mxu0 %v24161_v11  ;;  %17499 = vmatprep.subr.bf16.mxu1 %v24164_v13  ;;  %v24207_v56 = vld [vmem:[%s25382_s11 + $0x2230] ss:$68 sps:$4 sm:$0xff]   ;;  %v24215_v59 = vld [vmem:[%s25382_s11 + $0x22bc] ss:$68 sps:$4 sm:$0xff]   ;;  %v24218_v60 = vld [vmem:[%s25382_s11 + $0x22c4] ss:$68 sps:$4 sm:$0xff]  }
 0x7fd   : > { %v24213_v61 = vld [vmem:[%s25382_s11 + $0x22b8] ss:$68 sps:$4 sm:$0xff]   ;;  %v24216_v63 = vld [vmem:[%s25382_s11 + $0x22c0] ss:$68 sps:$4 sm:$0xff]   ;;  %v24224_v3 = vld [vmem:[%s25382_s11 + $0x234c] ss:$68 sps:$4 sm:$0xff]  }
 0x7fe   : > { %v24221_v2 = vld [vmem:[%s25382_s11 + $0x2344] ss:$68 sps:$4 sm:$0xff]   ;;  %v24227_v9 = vld [vmem:[%s25382_s11 + $0x23cc] ss:$68 sps:$4 sm:$0xff]   ;;  %v24230_v10 = vld [vmem:[%s25382_s11 + $0x23d4] ss:$68 sps:$4 sm:$0xff]  }
 0x7ff   : > { %17113 = vmatpush1.bf16.msra.mxu0 %v24159_v14  ;;  %17500 = vmatpush1.bf16.msra.mxu1 %v24162_v16  ;;  %v24219_v4 = vld [vmem:[%s25382_s11 + $0x2340] ss:$68 sps:$4 sm:$0xff]   ;;  %v24222_v5 = vld [vmem:[%s25382_s11 + $0x2348] ss:$68 sps:$4 sm:$0xff]   ;;  %v24228_v13 = vld [vmem:[%s25382_s11 + $0x23d0] ss:$68 sps:$4 sm:$0xff]  }
 0x800   : > { %17114 = vmatprep.subr.bf16.mxu0 %v24167_v17  ;;  %17501 = vmatprep.subr.bf16.mxu1 %v24170_v18  ;;  %v24225_v11 = vld [vmem:[%s25382_s11 + $0x23c8] ss:$68 sps:$4 sm:$0xff]   ;;  %v24233_v14 = vld [vmem:[%s25382_s11 + $0x2454] ss:$68 sps:$4 sm:$0xff]   ;;  %v24236_v16 = vld [vmem:[%s25382_s11 + $0x245c] ss:$68 sps:$4 sm:$0xff]  }
 0x801   : > { %v24231_v17 = vld [vmem:[%s25382_s11 + $0x2450] ss:$68 sps:$4 sm:$0xff]   ;;  %v24234_v18 = vld [vmem:[%s25382_s11 + $0x2458] ss:$68 sps:$4 sm:$0xff]  }
 0x803   : > { %17115 = vmatpush1.bf16.msra.mxu0 %v24165_v19  ;;  %17502 = vmatpush1.bf16.msra.mxu1 %v24168_v20  ;;  %v24239_v19 = vld [vmem:[%s25382_s11 + $0x24dc] ss:$68 sps:$4 sm:$0xff]   ;;  %v24242_v20 = vld [vmem:[%s25382_s11 + $0x24e4] ss:$68 sps:$4 sm:$0xff]  }
 0x804   : > { %17116 = vmatprep.subr.bf16.mxu0 %v24173_v21  ;;  %17503 = vmatprep.subr.bf16.mxu1 %v24176_v22  ;;  %v24237_v21 = vld [vmem:[%s25382_s11 + $0x24d8] ss:$68 sps:$4 sm:$0xff]   ;;  %v24240_v22 = vld [vmem:[%s25382_s11 + $0x24e0] ss:$68 sps:$4 sm:$0xff]  }
 0x807   : > { %17117 = vmatpush1.bf16.msra.mxu0 %v24171_v25  ;;  %17504 = vmatpush1.bf16.msra.mxu1 %v24174_v26  ;;  %v24245_v25 = vld [vmem:[%s25382_s11 + $0x2564] ss:$68 sps:$4 sm:$0xff]   ;;  %v24248_v26 = vld [vmem:[%s25382_s11 + $0x256c] ss:$68 sps:$4 sm:$0xff]  }
 0x808   : > { %17118 = vmatprep.subr.bf16.mxu0 %v24179_v27  ;;  %17505 = vmatprep.subr.bf16.mxu1 %v24182_v29  ;;  %v24243_v27 = vld [vmem:[%s25382_s11 + $0x2560] ss:$68 sps:$4 sm:$0xff]   ;;  %v24246_v29 = vld [vmem:[%s25382_s11 + $0x2568] ss:$68 sps:$4 sm:$0xff]  }
 0x80b   : > { %17119 = vmatpush1.bf16.msra.mxu0 %v24177_v30  ;;  %17506 = vmatpush1.bf16.msra.mxu1 %v24180_v31  ;;  %v24251_v30 = vld [vmem:[%s25382_s11 + $0x25ec] ss:$68 sps:$4 sm:$0xff]   ;;  %v24254_v31 = vld [vmem:[%s25382_s11 + $0x25f4] ss:$68 sps:$4 sm:$0xff]  }
 0x80c   : > { %17120 = vmatprep.subr.bf16.mxu0 %v24185_v32  ;;  %17507 = vmatprep.subr.bf16.mxu1 %v24188_v33  ;;  %v24249_v32 = vld [vmem:[%s25382_s11 + $0x25e8] ss:$68 sps:$4 sm:$0xff]   ;;  %v24252_v33 = vld [vmem:[%s25382_s11 + $0x25f0] ss:$68 sps:$4 sm:$0xff]  }
 0x80f   : > { %17121 = vmatpush1.bf16.msra.mxu0 %v24183_v35  ;;  %17508 = vmatpush1.bf16.msra.mxu1 %v24186_v36  ;;  %v24257_v35 = vld [vmem:[%s25382_s11 + $0x2674] ss:$68 sps:$4 sm:$0xff]   ;;  %v24260_v36 = vld [vmem:[%s25382_s11 + $0x267c] ss:$68 sps:$4 sm:$0xff]  }
 0x810   : > { %17122 = vmatprep.subr.bf16.mxu0 %v24191_v37  ;;  %17509 = vmatprep.subr.bf16.mxu1 %v24194_v39  ;;  %v24255_v37 = vld [vmem:[%s25382_s11 + $0x2670] ss:$68 sps:$4 sm:$0xff]   ;;  %v24258_v39 = vld [vmem:[%s25382_s11 + $0x2678] ss:$68 sps:$4 sm:$0xff]  }
 0x813   : > { %17123 = vmatpush1.bf16.msra.mxu0 %v24189_v40  ;;  %17510 = vmatpush1.bf16.msra.mxu1 %v24192_v42  ;;  %v24263_v40 = vld [vmem:[%s25382_s11 + $0x26fc] ss:$68 sps:$4 sm:$0xff]   ;;  %v24266_v42 = vld [vmem:[%s25382_s11 + $0x2704] ss:$68 sps:$4 sm:$0xff]  }
 0x814   : > { %17124 = vmatprep.subr.bf16.mxu0 %v24197_v43  ;;  %17511 = vmatprep.subr.bf16.mxu1 %v24200_v44  ;;  %v24261_v43 = vld [vmem:[%s25382_s11 + $0x26f8] ss:$68 sps:$4 sm:$0xff]   ;;  %v24264_v44 = vld [vmem:[%s25382_s11 + $0x2700] ss:$68 sps:$4 sm:$0xff]  }
 0x817   : > { %17125 = vmatpush1.bf16.msra.mxu0 %v24195_v45  ;;  %17512 = vmatpush1.bf16.msra.mxu1 %v24198_v48  ;;  %v24269_v45 = vld [vmem:[%s25382_s11 + $0x2784] ss:$68 sps:$4 sm:$0xff]   ;;  %v24272_v48 = vld [vmem:[%s25382_s11 + $0x278c] ss:$68 sps:$4 sm:$0xff]  }
 0x818   : > { %17126 = vmatprep.subr.bf16.mxu0 %v24203_v49  ;;  %17513 = vmatprep.subr.bf16.mxu1 %v24206_v50  ;;  %v24267_v49 = vld [vmem:[%s25382_s11 + $0x2780] ss:$68 sps:$4 sm:$0xff]   ;;  %v24270_v50 = vld [vmem:[%s25382_s11 + $0x2788] ss:$68 sps:$4 sm:$0xff]  }
 0x81b   : > { %17127 = vmatpush1.bf16.msra.mxu0 %v24201_v51  ;;  %17514 = vmatpush1.bf16.msra.mxu1 %v24204_v52  ;;  %v24275_v51 = vld [vmem:[%s25382_s11 + $0x280c] ss:$68 sps:$4 sm:$0xff]   ;;  %v24278_v52 = vld [vmem:[%s25382_s11 + $0x2814] ss:$68 sps:$4 sm:$0xff]  }
 0x81c   : > { %17139 = vmatprep.subr.bf16.mxu0 %v24209_v54  ;;  %17526 = vmatprep.subr.bf16.mxu1 %v24212_v55  ;;  %v24273_v54 = vld [vmem:[%s25382_s11 + $0x2808] ss:$68 sps:$4 sm:$0xff]   ;;  %v24276_v55 = vld [vmem:[%s25382_s11 + $0x2810] ss:$68 sps:$4 sm:$0xff]  }
 0x81e   : > { %17129 = vmatmul.mubr.bf16.vlgmr.msra.gmra.mrb[12].mxu0 %v25738_v7  ;;  %17516 = vmatmul.mubr.bf16.vlgmr.msra.gmra.mrb[12].mxu1 %v25738_v7 }
 0x81f   : > { %17140 = vmatpush1.bf16.msra.mxu0 %v24207_v56  ;;  %17527 = vmatpush1.bf16.msra.mxu1 %v24210_v58  ;;  %v24281_v56 = vld [vmem:[%s25382_s11 + $0x2894] ss:$68 sps:$4 sm:$0xff]   ;;  %v24284_v58 = vld [vmem:[%s25382_s11 + $0x289c] ss:$68 sps:$4 sm:$0xff]  }
 0x820   : > { %17141 = vmatprep.subr.bf16.mxu0 %v24215_v59  ;;  %17528 = vmatprep.subr.bf16.mxu1 %v24218_v60  ;;  %v24279_v59 = vld [vmem:[%s25382_s11 + $0x2890] ss:$68 sps:$4 sm:$0xff]   ;;  %v24282_v60 = vld [vmem:[%s25382_s11 + $0x2898] ss:$68 sps:$4 sm:$0xff]  }
 0x821   : > { %17171 = vmatprep.mubr.bf16.mxu0 %v25744_v12  ;;  %17558 = vmatprep.mubr.bf16.mxu1 %v25744_v12 }
 0x823   : > { %17142 = vmatpush1.bf16.msra.mxu0 %v24213_v61  ;;  %17529 = vmatpush1.bf16.msra.mxu1 %v24216_v63  ;;  %v24287_v61 = vld [vmem:[%s25382_s11 + $0x291c] ss:$68 sps:$4 sm:$0xff]   ;;  %v24290_v63 = vld [vmem:[%s25382_s11 + $0x2924] ss:$68 sps:$4 sm:$0xff]  }
 0x824   : > { %17143 = vmatprep.subr.bf16.mxu0 %v24221_v2  ;;  %17530 = vmatprep.subr.bf16.mxu1 %v24224_v3  ;;  %v24285_v2 = vld [vmem:[%s25382_s11 + $0x2918] ss:$68 sps:$4 sm:$0xff]   ;;  %v24288_v3 = vld [vmem:[%s25382_s11 + $0x2920] ss:$68 sps:$4 sm:$0xff]  }
 0x827   : > { %17144 = vmatpush1.bf16.msra.mxu0 %v24219_v4  ;;  %17531 = vmatpush1.bf16.msra.mxu1 %v24222_v5  ;;  %v24293_v4 = vld [vmem:[%s25382_s11 + $0x29a4] ss:$68 sps:$4 sm:$0xff]   ;;  %v24296_v5 = vld [vmem:[%s25382_s11 + $0x29ac] ss:$68 sps:$4 sm:$0xff]  }
 0x828   : > { %17145 = vmatprep.subr.bf16.mxu0 %v24227_v9  ;;  %17532 = vmatprep.subr.bf16.mxu1 %v24230_v10  ;;  %v24291_v9 = vld [vmem:[%s25382_s11 + $0x29a0] ss:$68 sps:$4 sm:$0xff]   ;;  %v24294_v10 = vld [vmem:[%s25382_s11 + $0x29a8] ss:$68 sps:$4 sm:$0xff]  }
 0x82b   : > { %17146 = vmatpush1.bf16.msra.mxu0 %v24225_v11  ;;  %17533 = vmatpush1.bf16.msra.mxu1 %v24228_v13  ;;  %v24299_v11 = vld [vmem:[%s25382_s11 + $0x2a2c] ss:$68 sps:$4 sm:$0xff]   ;;  %v24302_v13 = vld [vmem:[%s25382_s11 + $0x2a34] ss:$68 sps:$4 sm:$0xff]  }
 0x82c   : > { %17147 = vmatprep.subr.bf16.mxu0 %v24233_v14  ;;  %17534 = vmatprep.subr.bf16.mxu1 %v24236_v16  ;;  %v24297_v14 = vld [vmem:[%s25382_s11 + $0x2a28] ss:$68 sps:$4 sm:$0xff]   ;;  %v24300_v16 = vld [vmem:[%s25382_s11 + $0x2a30] ss:$68 sps:$4 sm:$0xff]  }
 0x82f   : > { %17148 = vmatpush1.bf16.msra.mxu0 %v24231_v17  ;;  %17535 = vmatpush1.bf16.msra.mxu1 %v24234_v18  ;;  %v24305_v17 = vld [vmem:[%s25382_s11 + $0x2ab4] ss:$68 sps:$4 sm:$0xff]   ;;  %v24308_v18 = vld [vmem:[%s25382_s11 + $0x2abc] ss:$68 sps:$4 sm:$0xff]  }
 0x830   : > { %17149 = vmatprep.subr.bf16.mxu0 %v24239_v19  ;;  %17536 = vmatprep.subr.bf16.mxu1 %v24242_v20  ;;  %v24303_v19 = vld [vmem:[%s25382_s11 + $0x2ab0] ss:$68 sps:$4 sm:$0xff]   ;;  %v24306_v20 = vld [vmem:[%s25382_s11 + $0x2ab8] ss:$68 sps:$4 sm:$0xff]  }
 0x833   : > { %17150 = vmatpush1.bf16.msra.mxu0 %v24237_v21  ;;  %17537 = vmatpush1.bf16.msra.mxu1 %v24240_v22  ;;  %v24311_v21 = vld [vmem:[%s25382_s11 + $0x2b3c] ss:$68 sps:$4 sm:$0xff]   ;;  %v24314_v22 = vld [vmem:[%s25382_s11 + $0x2b44] ss:$68 sps:$4 sm:$0xff]  }
 0x834   : > { %17151 = vmatprep.subr.bf16.mxu0 %v24245_v25  ;;  %17538 = vmatprep.subr.bf16.mxu1 %v24248_v26  ;;  %v24309_v25 = vld [vmem:[%s25382_s11 + $0x2b38] ss:$68 sps:$4 sm:$0xff]   ;;  %v24312_v26 = vld [vmem:[%s25382_s11 + $0x2b40] ss:$68 sps:$4 sm:$0xff]  }
 0x837   : > { %17152 = vmatpush1.bf16.msra.mxu0 %v24243_v27  ;;  %17539 = vmatpush1.bf16.msra.mxu1 %v24246_v29  ;;  %v24317_v27 = vld [vmem:[%s25382_s11 + $0x2bc4] ss:$68 sps:$4 sm:$0xff]   ;;  %v24320_v29 = vld [vmem:[%s25382_s11 + $0x2bcc] ss:$68 sps:$4 sm:$0xff]  }
 0x838   : > { %17153 = vmatprep.subr.bf16.mxu0 %v24251_v30  ;;  %17540 = vmatprep.subr.bf16.mxu1 %v24254_v31  ;;  %v24315_v30 = vld [vmem:[%s25382_s11 + $0x2bc0] ss:$68 sps:$4 sm:$0xff]   ;;  %v24318_v31 = vld [vmem:[%s25382_s11 + $0x2bc8] ss:$68 sps:$4 sm:$0xff]  }
 0x83b   : > { %17154 = vmatpush1.bf16.msra.mxu0 %v24249_v32  ;;  %17541 = vmatpush1.bf16.msra.mxu1 %v24252_v33  ;;  %v24323_v32 = vld [vmem:[%s25382_s11 + $0x2c4c] ss:$68 sps:$4 sm:$0xff]   ;;  %v24326_v33 = vld [vmem:[%s25382_s11 + $0x2c54] ss:$68 sps:$4 sm:$0xff]  }
 0x83c   : > { %17155 = vmatprep.subr.bf16.mxu0 %v24257_v35  ;;  %17542 = vmatprep.subr.bf16.mxu1 %v24260_v36  ;;  %v24321_v35 = vld [vmem:[%s25382_s11 + $0x2c48] ss:$68 sps:$4 sm:$0xff]   ;;  %v24324_v36 = vld [vmem:[%s25382_s11 + $0x2c50] ss:$68 sps:$4 sm:$0xff]  }
 0x83f   : > { %17156 = vmatpush1.bf16.msra.mxu0 %v24255_v37  ;;  %17543 = vmatpush1.bf16.msra.mxu1 %v24258_v39  ;;  %v24329_v37 = vld [vmem:[%s25382_s11 + $0x2cd4] ss:$68 sps:$4 sm:$0xff]   ;;  %v24332_v39 = vld [vmem:[%s25382_s11 + $0x2cdc] ss:$68 sps:$4 sm:$0xff]  }
 0x840   : > { %17157 = vmatprep.subr.bf16.mxu0 %v24263_v40  ;;  %17544 = vmatprep.subr.bf16.mxu1 %v24266_v42  ;;  %v24327_v40 = vld [vmem:[%s25382_s11 + $0x2cd0] ss:$68 sps:$4 sm:$0xff]   ;;  %v24330_v42 = vld [vmem:[%s25382_s11 + $0x2cd8] ss:$68 sps:$4 sm:$0xff]  }
 0x843   : > { %17158 = vmatpush1.bf16.msra.mxu0 %v24261_v43  ;;  %17545 = vmatpush1.bf16.msra.mxu1 %v24264_v44  ;;  %v24335_v43 = vld [vmem:[%s25382_s11 + $0x2d5c] ss:$68 sps:$4 sm:$0xff]   ;;  %v24338_v44 = vld [vmem:[%s25382_s11 + $0x2d64] ss:$68 sps:$4 sm:$0xff]  }
 0x844   : > { %17159 = vmatprep.subr.bf16.mxu0 %v24269_v45  ;;  %17546 = vmatprep.subr.bf16.mxu1 %v24272_v48  ;;  %v24333_v45 = vld [vmem:[%s25382_s11 + $0x2d58] ss:$68 sps:$4 sm:$0xff]   ;;  %v24336_v48 = vld [vmem:[%s25382_s11 + $0x2d60] ss:$68 sps:$4 sm:$0xff]  }
 0x847   : > { %17160 = vmatpush1.bf16.msra.mxu0 %v24267_v49  ;;  %17547 = vmatpush1.bf16.msra.mxu1 %v24270_v50  ;;  %v24341_v49 = vld [vmem:[%s25382_s11 + $0x2de4] ss:$68 sps:$4 sm:$0xff]   ;;  %v24344_v50 = vld [vmem:[%s25382_s11 + $0x2dec] ss:$68 sps:$4 sm:$0xff]  }
 0x848   : > { %17161 = vmatprep.subr.bf16.mxu0 %v24275_v51  ;;  %17548 = vmatprep.subr.bf16.mxu1 %v24278_v52  ;;  %v24339_v51 = vld [vmem:[%s25382_s11 + $0x2de0] ss:$68 sps:$4 sm:$0xff]   ;;  %v24342_v52 = vld [vmem:[%s25382_s11 + $0x2de8] ss:$68 sps:$4 sm:$0xff]  }
 0x84b   : > { %17162 = vmatpush1.bf16.msra.mxu0 %v24273_v54  ;;  %17549 = vmatpush1.bf16.msra.mxu1 %v24276_v55  ;;  %v24347_v54 = vld [vmem:[%s25382_s11 + $0x2e6c] ss:$68 sps:$4 sm:$0xff]   ;;  %v24350_v55 = vld [vmem:[%s25382_s11 + $0x2e74] ss:$68 sps:$4 sm:$0xff]  }
 0x84c   : > { %17163 = vmatprep.subr.bf16.mxu0 %v24281_v56  ;;  %17550 = vmatprep.subr.bf16.mxu1 %v24284_v58  ;;  %v24345_v56 = vld [vmem:[%s25382_s11 + $0x2e68] ss:$68 sps:$4 sm:$0xff]   ;;  %v24348_v58 = vld [vmem:[%s25382_s11 + $0x2e70] ss:$68 sps:$4 sm:$0xff]  }
 0x84f   : > { %17164 = vmatpush1.bf16.msra.mxu0 %v24279_v59  ;;  %17551 = vmatpush1.bf16.msra.mxu1 %v24282_v60  ;;  %v24353_v59 = vld [vmem:[%s25382_s11 + $0x2ef4] ss:$68 sps:$4 sm:$0xff]   ;;  %v24356_v60 = vld [vmem:[%s25382_s11 + $0x2efc] ss:$68 sps:$4 sm:$0xff]  }
 0x850   : > { %17165 = vmatprep.subr.bf16.mxu0 %v24287_v61  ;;  %17552 = vmatprep.subr.bf16.mxu1 %v24290_v63  ;;  %v24351_v61 = vld [vmem:[%s25382_s11 + $0x2ef0] ss:$68 sps:$4 sm:$0xff]   ;;  %v24354_v63 = vld [vmem:[%s25382_s11 + $0x2ef8] ss:$68 sps:$4 sm:$0xff]  }
 0x853   : > { %17166 = vmatpush1.bf16.msra.mxu0 %v24285_v2  ;;  %17553 = vmatpush1.bf16.msra.mxu1 %v24288_v3  ;;  %v24359_v2 = vld [vmem:[%s25382_s11 + $0x2f7c] ss:$68 sps:$4 sm:$0xff]   ;;  %v24362_v3 = vld [vmem:[%s25382_s11 + $0x2f84] ss:$68 sps:$4 sm:$0xff]  }
 0x854   : > { %17167 = vmatprep.subr.bf16.mxu0 %v24293_v4  ;;  %17554 = vmatprep.subr.bf16.mxu1 %v24296_v5  ;;  %v24357_v4 = vld [vmem:[%s25382_s11 + $0x2f78] ss:$68 sps:$4 sm:$0xff]   ;;  %v24360_v5 = vld [vmem:[%s25382_s11 + $0x2f80] ss:$68 sps:$4 sm:$0xff]  }
 0x857   : > { %17168 = vmatpush1.bf16.msra.mxu0 %v24291_v9  ;;  %17555 = vmatpush1.bf16.msra.mxu1 %v24294_v10  ;;  %v24365_v9 = vld [vmem:[%s25382_s11 + $0x3004] ss:$68 sps:$4 sm:$0xff]   ;;  %v24368_v10 = vld [vmem:[%s25382_s11 + $0x300c] ss:$68 sps:$4 sm:$0xff]  }
 0x858   : > { %17169 = vmatprep.subr.bf16.mxu0 %v24299_v11  ;;  %17556 = vmatprep.subr.bf16.mxu1 %v24302_v13  ;;  %v24363_v11 = vld [vmem:[%s25382_s11 + $0x3000] ss:$68 sps:$4 sm:$0xff]   ;;  %v24366_v13 = vld [vmem:[%s25382_s11 + $0x3008] ss:$68 sps:$4 sm:$0xff]  }
 0x85b   : > { %17170 = vmatpush1.bf16.msra.mxu0 %v24297_v14  ;;  %17557 = vmatpush1.bf16.msra.mxu1 %v24300_v16  ;;  %v24371_v14 = vld [vmem:[%s25382_s11 + $0x308c] ss:$68 sps:$4 sm:$0xff]   ;;  %v24374_v16 = vld [vmem:[%s25382_s11 + $0x3094] ss:$68 sps:$4 sm:$0xff]  }
 0x85c   : > { %17182 = vmatprep.subr.bf16.mxu0 %v24305_v17  ;;  %17569 = vmatprep.subr.bf16.mxu1 %v24308_v18  ;;  %v24369_v17 = vld [vmem:[%s25382_s11 + $0x3088] ss:$68 sps:$4 sm:$0xff]   ;;  %v24372_v18 = vld [vmem:[%s25382_s11 + $0x3090] ss:$68 sps:$4 sm:$0xff]  }
 0x85e   : > { %17172 = vmatmul.mubr.bf16.vlgmr.msra.gmra.mrb[12].mxu0 %v25814_v23  ;;  %17559 = vmatmul.mubr.bf16.vlgmr.msra.gmra.mrb[12].mxu1 %v25814_v23 }
 0x85f   : > { %17183 = vmatpush1.bf16.msra.mxu0 %v24303_v19  ;;  %17570 = vmatpush1.bf16.msra.mxu1 %v24306_v20  ;;  %v24377_v19 = vld [vmem:[%s25382_s11 + $0x3114] ss:$68 sps:$4 sm:$0xff]   ;;  %v24380_v20 = vld [vmem:[%s25382_s11 + $0x311c] ss:$68 sps:$4 sm:$0xff]  }
 0x860   : > { %17184 = vmatprep.subr.bf16.mxu0 %v24311_v21  ;;  %17571 = vmatprep.subr.bf16.mxu1 %v24314_v22  ;;  %v24375_v21 = vld [vmem:[%s25382_s11 + $0x3110] ss:$68 sps:$4 sm:$0xff]   ;;  %v24378_v22 = vld [vmem:[%s25382_s11 + $0x3118] ss:$68 sps:$4 sm:$0xff]  }
 0x861   : > { %17214 = vmatprep.mubr.bf16.mxu0 %v25820_v28  ;;  %17601 = vmatprep.mubr.bf16.mxu1 %v25820_v28 }
 0x863   : > { %17185 = vmatpush1.bf16.msra.mxu0 %v24309_v25  ;;  %17572 = vmatpush1.bf16.msra.mxu1 %v24312_v26  ;;  %v24383_v25 = vld [vmem:[%s25382_s11 + $0x319c] ss:$68 sps:$4 sm:$0xff]   ;;  %v24386_v26 = vld [vmem:[%s25382_s11 + $0x31a4] ss:$68 sps:$4 sm:$0xff]  }
 0x864   : > { %17186 = vmatprep.subr.bf16.mxu0 %v24317_v27  ;;  %17573 = vmatprep.subr.bf16.mxu1 %v24320_v29  ;;  %v24381_v27 = vld [vmem:[%s25382_s11 + $0x3198] ss:$68 sps:$4 sm:$0xff]   ;;  %v24384_v29 = vld [vmem:[%s25382_s11 + $0x31a0] ss:$68 sps:$4 sm:$0xff]  }
 0x867   : > { %17187 = vmatpush1.bf16.msra.mxu0 %v24315_v30  ;;  %17574 = vmatpush1.bf16.msra.mxu1 %v24318_v31  ;;  %v24389_v30 = vld [vmem:[%s25382_s11 + $0x3224] ss:$68 sps:$4 sm:$0xff]   ;;  %v24392_v31 = vld [vmem:[%s25382_s11 + $0x322c] ss:$68 sps:$4 sm:$0xff]  }
 0x868   : > { %17188 = vmatprep.subr.bf16.mxu0 %v24323_v32  ;;  %17575 = vmatprep.subr.bf16.mxu1 %v24326_v33  ;;  %v24387_v32 = vld [vmem:[%s25382_s11 + $0x3220] ss:$68 sps:$4 sm:$0xff]   ;;  %v24390_v33 = vld [vmem:[%s25382_s11 + $0x3228] ss:$68 sps:$4 sm:$0xff]  }
 0x86b   : > { %17189 = vmatpush1.bf16.msra.mxu0 %v24321_v35  ;;  %17576 = vmatpush1.bf16.msra.mxu1 %v24324_v36  ;;  %v24395_v35 = vld [vmem:[%s25382_s11 + $0x32ac] ss:$68 sps:$4 sm:$0xff]   ;;  %v24398_v36 = vld [vmem:[%s25382_s11 + $0x32b4] ss:$68 sps:$4 sm:$0xff]  }
 0x86c   : > { %17190 = vmatprep.subr.bf16.mxu0 %v24329_v37  ;;  %17577 = vmatprep.subr.bf16.mxu1 %v24332_v39  ;;  %v24393_v37 = vld [vmem:[%s25382_s11 + $0x32a8] ss:$68 sps:$4 sm:$0xff]   ;;  %v24396_v39 = vld [vmem:[%s25382_s11 + $0x32b0] ss:$68 sps:$4 sm:$0xff]  }
 0x86f   : > { %17191 = vmatpush1.bf16.msra.mxu0 %v24327_v40  ;;  %17578 = vmatpush1.bf16.msra.mxu1 %v24330_v42  ;;  %v24401_v40 = vld [vmem:[%s25382_s11 + $0x3334] ss:$68 sps:$4 sm:$0xff]   ;;  %v24404_v42 = vld [vmem:[%s25382_s11 + $0x333c] ss:$68 sps:$4 sm:$0xff]  }
 0x870   : > { %17192 = vmatprep.subr.bf16.mxu0 %v24335_v43  ;;  %17579 = vmatprep.subr.bf16.mxu1 %v24338_v44  ;;  %v24399_v43 = vld [vmem:[%s25382_s11 + $0x3330] ss:$68 sps:$4 sm:$0xff]   ;;  %v24402_v44 = vld [vmem:[%s25382_s11 + $0x3338] ss:$68 sps:$4 sm:$0xff]  }
 0x873   : > { %17193 = vmatpush1.bf16.msra.mxu0 %v24333_v45  ;;  %17580 = vmatpush1.bf16.msra.mxu1 %v24336_v48  ;;  %v24407_v45 = vld [vmem:[%s25382_s11 + $0x33bc] ss:$68 sps:$4 sm:$0xff]   ;;  %v24410_v48 = vld [vmem:[%s25382_s11 + $0x33c4] ss:$68 sps:$4 sm:$0xff]  }
 0x874   : > { %17194 = vmatprep.subr.bf16.mxu0 %v24341_v49  ;;  %17581 = vmatprep.subr.bf16.mxu1 %v24344_v50  ;;  %v24405_v49 = vld [vmem:[%s25382_s11 + $0x33b8] ss:$68 sps:$4 sm:$0xff]   ;;  %v24408_v50 = vld [vmem:[%s25382_s11 + $0x33c0] ss:$68 sps:$4 sm:$0xff]  }
 0x877   : > { %17195 = vmatpush1.bf16.msra.mxu0 %v24339_v51  ;;  %17582 = vmatpush1.bf16.msra.mxu1 %v24342_v52  ;;  %v24413_v51 = vld [vmem:[%s25382_s11 + $0x3444] ss:$68 sps:$4 sm:$0xff]   ;;  %v24416_v52 = vld [vmem:[%s25382_s11 + $0x344c] ss:$68 sps:$4 sm:$0xff]  }
 0x878   : > { %17196 = vmatprep.subr.bf16.mxu0 %v24347_v54  ;;  %17583 = vmatprep.subr.bf16.mxu1 %v24350_v55  ;;  %v24411_v54 = vld [vmem:[%s25382_s11 + $0x3440] ss:$68 sps:$4 sm:$0xff]   ;;  %v24414_v55 = vld [vmem:[%s25382_s11 + $0x3448] ss:$68 sps:$4 sm:$0xff]  }
 0x87b   : > { %17197 = vmatpush1.bf16.msra.mxu0 %v24345_v56  ;;  %17584 = vmatpush1.bf16.msra.mxu1 %v24348_v58  ;;  %v24419_v56 = vld [vmem:[%s25382_s11 + $0x34cc] ss:$68 sps:$4 sm:$0xff]   ;;  %v24422_v58 = vld [vmem:[%s25382_s11 + $0x34d4] ss:$68 sps:$4 sm:$0xff]  }
 0x87c   : > { %17198 = vmatprep.subr.bf16.mxu0 %v24353_v59  ;;  %17585 = vmatprep.subr.bf16.mxu1 %v24356_v60  ;;  %v24417_v59 = vld [vmem:[%s25382_s11 + $0x34c8] ss:$68 sps:$4 sm:$0xff]   ;;  %v24420_v60 = vld [vmem:[%s25382_s11 + $0x34d0] ss:$68 sps:$4 sm:$0xff]  }
 0x87f   : > { %17199 = vmatpush1.bf16.msra.mxu0 %v24351_v61  ;;  %17586 = vmatpush1.bf16.msra.mxu1 %v24354_v63  ;;  %v24425_v61 = vld [vmem:[%s25382_s11 + $0x3554] ss:$68 sps:$4 sm:$0xff]   ;;  %v24428_v63 = vld [vmem:[%s25382_s11 + $0x355c] ss:$68 sps:$4 sm:$0xff]  }
 0x880   : > { %17200 = vmatprep.subr.bf16.mxu0 %v24359_v2  ;;  %17587 = vmatprep.subr.bf16.mxu1 %v24362_v3  ;;  %v24423_v2 = vld [vmem:[%s25382_s11 + $0x3550] ss:$68 sps:$4 sm:$0xff]   ;;  %v24426_v3 = vld [vmem:[%s25382_s11 + $0x3558] ss:$68 sps:$4 sm:$0xff]  }
 0x883   : > { %17201 = vmatpush1.bf16.msra.mxu0 %v24357_v4  ;;  %17588 = vmatpush1.bf16.msra.mxu1 %v24360_v5  ;;  %v24431_v4 = vld [vmem:[%s25382_s11 + $0x35dc] ss:$68 sps:$4 sm:$0xff]   ;;  %v24434_v5 = vld [vmem:[%s25382_s11 + $0x35e4] ss:$68 sps:$4 sm:$0xff]  }
 0x884   : > { %17202 = vmatprep.subr.bf16.mxu0 %v24365_v9  ;;  %17589 = vmatprep.subr.bf16.mxu1 %v24368_v10  ;;  %v24429_v9 = vld [vmem:[%s25382_s11 + $0x35d8] ss:$68 sps:$4 sm:$0xff]   ;;  %v24432_v10 = vld [vmem:[%s25382_s11 + $0x35e0] ss:$68 sps:$4 sm:$0xff]  }
 0x887   : > { %17203 = vmatpush1.bf16.msra.mxu0 %v24363_v11  ;;  %17590 = vmatpush1.bf16.msra.mxu1 %v24366_v13  ;;  %v24437_v11 = vld [vmem:[%s25382_s11 + $0x3664] ss:$68 sps:$4 sm:$0xff]   ;;  %v24440_v13 = vld [vmem:[%s25382_s11 + $0x366c] ss:$68 sps:$4 sm:$0xff]  }
 0x888   : > { %17204 = vmatprep.subr.bf16.mxu0 %v24371_v14  ;;  %17591 = vmatprep.subr.bf16.mxu1 %v24374_v16  ;;  %v24435_v14 = vld [vmem:[%s25382_s11 + $0x3660] ss:$68 sps:$4 sm:$0xff]   ;;  %v24438_v16 = vld [vmem:[%s25382_s11 + $0x3668] ss:$68 sps:$4 sm:$0xff]  }
 0x88b   : > { %17205 = vmatpush1.bf16.msra.mxu0 %v24369_v17  ;;  %17592 = vmatpush1.bf16.msra.mxu1 %v24372_v18  ;;  %v24443_v17 = vld [vmem:[%s25382_s11 + $0x36ec] ss:$68 sps:$4 sm:$0xff]   ;;  %v24446_v18 = vld [vmem:[%s25382_s11 + $0x36f4] ss:$68 sps:$4 sm:$0xff]  }
 0x88c   : > { %17206 = vmatprep.subr.bf16.mxu0 %v24377_v19  ;;  %17593 = vmatprep.subr.bf16.mxu1 %v24380_v20  ;;  %v24441_v19 = vld [vmem:[%s25382_s11 + $0x36e8] ss:$68 sps:$4 sm:$0xff]   ;;  %v24444_v20 = vld [vmem:[%s25382_s11 + $0x36f0] ss:$68 sps:$4 sm:$0xff]  }
 0x88f   : > { %17207 = vmatpush1.bf16.msra.mxu0 %v24375_v21  ;;  %17594 = vmatpush1.bf16.msra.mxu1 %v24378_v22  ;;  %v24449_v21 = vld [vmem:[%s25382_s11 + $0x3774] ss:$68 sps:$4 sm:$0xff]   ;;  %v24452_v22 = vld [vmem:[%s25382_s11 + $0x377c] ss:$68 sps:$4 sm:$0xff]  }
 0x890   : > { %17208 = vmatprep.subr.bf16.mxu0 %v24383_v25  ;;  %17595 = vmatprep.subr.bf16.mxu1 %v24386_v26  ;;  %v24447_v25 = vld [vmem:[%s25382_s11 + $0x3770] ss:$68 sps:$4 sm:$0xff]   ;;  %v24450_v26 = vld [vmem:[%s25382_s11 + $0x3778] ss:$68 sps:$4 sm:$0xff]  }
 0x893   : > { %17209 = vmatpush1.bf16.msra.mxu0 %v24381_v27  ;;  %17596 = vmatpush1.bf16.msra.mxu1 %v24384_v29  ;;  %v24455_v27 = vld [vmem:[%s25382_s11 + $0x37fc] ss:$68 sps:$4 sm:$0xff]   ;;  %v24458_v29 = vld [vmem:[%s25382_s11 + $0x3804] ss:$68 sps:$4 sm:$0xff]  }
 0x894   : > { %17210 = vmatprep.subr.bf16.mxu0 %v24389_v30  ;;  %17597 = vmatprep.subr.bf16.mxu1 %v24392_v31  ;;  %v24453_v30 = vld [vmem:[%s25382_s11 + $0x37f8] ss:$68 sps:$4 sm:$0xff]   ;;  %v24456_v31 = vld [vmem:[%s25382_s11 + $0x3800] ss:$68 sps:$4 sm:$0xff]  }
 0x897   : > { %17211 = vmatpush1.bf16.msra.mxu0 %v24387_v32  ;;  %17598 = vmatpush1.bf16.msra.mxu1 %v24390_v33  ;;  %v24461_v32 = vld [vmem:[%s25382_s11 + $0x3884] ss:$68 sps:$4 sm:$0xff]   ;;  %v24464_v33 = vld [vmem:[%s25382_s11 + $0x388c] ss:$68 sps:$4 sm:$0xff]  }
 0x898   : > { %17212 = vmatprep.subr.bf16.mxu0 %v24395_v35  ;;  %17599 = vmatprep.subr.bf16.mxu1 %v24398_v36  ;;  %v24459_v35 = vld [vmem:[%s25382_s11 + $0x3880] ss:$68 sps:$4 sm:$0xff]   ;;  %v24462_v36 = vld [vmem:[%s25382_s11 + $0x3888] ss:$68 sps:$4 sm:$0xff]  }
 0x89b   : > { %17213 = vmatpush1.bf16.msra.mxu0 %v24393_v37  ;;  %17600 = vmatpush1.bf16.msra.mxu1 %v24396_v39  ;;  %v24467_v37 = vld [vmem:[%s25382_s11 + $0x390c] ss:$68 sps:$4 sm:$0xff]   ;;  %v24470_v39 = vld [vmem:[%s25382_s11 + $0x3914] ss:$68 sps:$4 sm:$0xff]  }
 0x89c   : > { %17225 = vmatprep.subr.bf16.mxu0 %v24401_v40  ;;  %17612 = vmatprep.subr.bf16.mxu1 %v24404_v42  ;;  %v24465_v40 = vld [vmem:[%s25382_s11 + $0x3908] ss:$68 sps:$4 sm:$0xff]   ;;  %v24468_v42 = vld [vmem:[%s25382_s11 + $0x3910] ss:$68 sps:$4 sm:$0xff]  }
 0x89e   : > { %17215 = vmatmul.mubr.bf16.vlgmr.msra.gmra.mrb[12].mxu0 %v25890_v41  ;;  %17602 = vmatmul.mubr.bf16.vlgmr.msra.gmra.mrb[12].mxu1 %v25890_v41 }
 0x89f   : > { %17226 = vmatpush1.bf16.msra.mxu0 %v24399_v43  ;;  %17613 = vmatpush1.bf16.msra.mxu1 %v24402_v44  ;;  %v24473_v43 = vld [vmem:[%s25382_s11 + $0x3994] ss:$68 sps:$4 sm:$0xff]   ;;  %v24476_v44 = vld [vmem:[%s25382_s11 + $0x399c] ss:$68 sps:$4 sm:$0xff]  }
 0x8a0   : > { %17227 = vmatprep.subr.bf16.mxu0 %v24407_v45  ;;  %17614 = vmatprep.subr.bf16.mxu1 %v24410_v48  ;;  %v24471_v45 = vld [vmem:[%s25382_s11 + $0x3990] ss:$68 sps:$4 sm:$0xff]   ;;  %v24474_v48 = vld [vmem:[%s25382_s11 + $0x3998] ss:$68 sps:$4 sm:$0xff]  }
 0x8a1   : > { %17257 = vmatprep.mubr.bf16.mxu0 %v25896_v47  ;;  %17644 = vmatprep.mubr.bf16.mxu1 %v25896_v47 }
 0x8a3   : > { %17228 = vmatpush1.bf16.msra.mxu0 %v24405_v49  ;;  %17615 = vmatpush1.bf16.msra.mxu1 %v24408_v50  ;;  %v24479_v49 = vld [vmem:[%s25382_s11 + $0x3a1c] ss:$68 sps:$4 sm:$0xff]   ;;  %v24482_v50 = vld [vmem:[%s25382_s11 + $0x3a24] ss:$68 sps:$4 sm:$0xff]  }
 0x8a4   : > { %17229 = vmatprep.subr.bf16.mxu0 %v24413_v51  ;;  %17616 = vmatprep.subr.bf16.mxu1 %v24416_v52  ;;  %v24477_v51 = vld [vmem:[%s25382_s11 + $0x3a18] ss:$68 sps:$4 sm:$0xff]   ;;  %v24480_v52 = vld [vmem:[%s25382_s11 + $0x3a20] ss:$68 sps:$4 sm:$0xff]  }
 0x8a7   : > { %17230 = vmatpush1.bf16.msra.mxu0 %v24411_v54  ;;  %17617 = vmatpush1.bf16.msra.mxu1 %v24414_v55  ;;  %v24485_v54 = vld [vmem:[%s25382_s11 + $0x3aa4] ss:$68 sps:$4 sm:$0xff]   ;;  %v24488_v55 = vld [vmem:[%s25382_s11 + $0x3aac] ss:$68 sps:$4 sm:$0xff]  }
 0x8a8   : > { %17231 = vmatprep.subr.bf16.mxu0 %v24419_v56  ;;  %17618 = vmatprep.subr.bf16.mxu1 %v24422_v58  ;;  %v24483_v56 = vld [vmem:[%s25382_s11 + $0x3aa0] ss:$68 sps:$4 sm:$0xff]   ;;  %v24486_v58 = vld [vmem:[%s25382_s11 + $0x3aa8] ss:$68 sps:$4 sm:$0xff]  }
 0x8ab   : > { %17232 = vmatpush1.bf16.msra.mxu0 %v24417_v59  ;;  %17619 = vmatpush1.bf16.msra.mxu1 %v24420_v60  ;;  %v24491_v59 = vld [vmem:[%s25382_s11 + $0x3b2c] ss:$68 sps:$4 sm:$0xff]   ;;  %v24494_v60 = vld [vmem:[%s25382_s11 + $0x3b34] ss:$68 sps:$4 sm:$0xff]  }
 0x8ac   : > { %17233 = vmatprep.subr.bf16.mxu0 %v24425_v61  ;;  %17620 = vmatprep.subr.bf16.mxu1 %v24428_v63  ;;  %v24489_v61 = vld [vmem:[%s25382_s11 + $0x3b28] ss:$68 sps:$4 sm:$0xff]   ;;  %v24492_v63 = vld [vmem:[%s25382_s11 + $0x3b30] ss:$68 sps:$4 sm:$0xff]  }
 0x8af   : > { %17234 = vmatpush1.bf16.msra.mxu0 %v24423_v2  ;;  %17621 = vmatpush1.bf16.msra.mxu1 %v24426_v3  ;;  %v24497_v2 = vld [vmem:[%s25382_s11 + $0x3bb4] ss:$68 sps:$4 sm:$0xff]   ;;  %v24500_v3 = vld [vmem:[%s25382_s11 + $0x3bbc] ss:$68 sps:$4 sm:$0xff]  }
 0x8b0   : > { %17235 = vmatprep.subr.bf16.mxu0 %v24431_v4  ;;  %17622 = vmatprep.subr.bf16.mxu1 %v24434_v5  ;;  %v24495_v4 = vld [vmem:[%s25382_s11 + $0x3bb0] ss:$68 sps:$4 sm:$0xff]   ;;  %v24498_v5 = vld [vmem:[%s25382_s11 + $0x3bb8] ss:$68 sps:$4 sm:$0xff]  }
 0x8b3   : > { %17236 = vmatpush1.bf16.msra.mxu0 %v24429_v9  ;;  %17623 = vmatpush1.bf16.msra.mxu1 %v24432_v10  ;;  %v24503_v9 = vld [vmem:[%s25382_s11 + $0x3c3c] ss:$68 sps:$4 sm:$0xff]   ;;  %v24506_v10 = vld [vmem:[%s25382_s11 + $0x3c44] ss:$68 sps:$4 sm:$0xff]  }
 0x8b4   : > { %17237 = vmatprep.subr.bf16.mxu0 %v24437_v11  ;;  %17624 = vmatprep.subr.bf16.mxu1 %v24440_v13  ;;  %v24501_v11 = vld [vmem:[%s25382_s11 + $0x3c38] ss:$68 sps:$4 sm:$0xff]   ;;  %v24504_v13 = vld [vmem:[%s25382_s11 + $0x3c40] ss:$68 sps:$4 sm:$0xff]  }
 0x8b7   : > { %17238 = vmatpush1.bf16.msra.mxu0 %v24435_v14  ;;  %17625 = vmatpush1.bf16.msra.mxu1 %v24438_v16  ;;  %v24509_v14 = vld [vmem:[%s25382_s11 + $0x3cc4] ss:$68 sps:$4 sm:$0xff]   ;;  %v24512_v16 = vld [vmem:[%s25382_s11 + $0x3ccc] ss:$68 sps:$4 sm:$0xff]  }
 0x8b8   : > { %17239 = vmatprep.subr.bf16.mxu0 %v24443_v17  ;;  %17626 = vmatprep.subr.bf16.mxu1 %v24446_v18  ;;  %v24507_v17 = vld [vmem:[%s25382_s11 + $0x3cc0] ss:$68 sps:$4 sm:$0xff]   ;;  %v24510_v18 = vld [vmem:[%s25382_s11 + $0x3cc8] ss:$68 sps:$4 sm:$0xff]  }
 0x8bb   : > { %17240 = vmatpush1.bf16.msra.mxu0 %v24441_v19  ;;  %17627 = vmatpush1.bf16.msra.mxu1 %v24444_v20  ;;  %v24515_v19 = vld [vmem:[%s25382_s11 + $0x3d4c] ss:$68 sps:$4 sm:$0xff]   ;;  %v24518_v20 = vld [vmem:[%s25382_s11 + $0x3d54] ss:$68 sps:$4 sm:$0xff]  }
 0x8bc   : > { %17241 = vmatprep.subr.bf16.mxu0 %v24449_v21  ;;  %17628 = vmatprep.subr.bf16.mxu1 %v24452_v22  ;;  %v24513_v21 = vld [vmem:[%s25382_s11 + $0x3d48] ss:$68 sps:$4 sm:$0xff]   ;;  %v24516_v22 = vld [vmem:[%s25382_s11 + $0x3d50] ss:$68 sps:$4 sm:$0xff]  }
 0x8bf   : > { %17242 = vmatpush1.bf16.msra.mxu0 %v24447_v25  ;;  %17629 = vmatpush1.bf16.msra.mxu1 %v24450_v26  ;;  %v24521_v25 = vld [vmem:[%s25382_s11 + $0x3dd4] ss:$68 sps:$4 sm:$0xff]   ;;  %v24524_v26 = vld [vmem:[%s25382_s11 + $0x3ddc] ss:$68 sps:$4 sm:$0xff]  }
 0x8c0   : > { %17243 = vmatprep.subr.bf16.mxu0 %v24455_v27  ;;  %17630 = vmatprep.subr.bf16.mxu1 %v24458_v29  ;;  %v24519_v27 = vld [vmem:[%s25382_s11 + $0x3dd0] ss:$68 sps:$4 sm:$0xff]   ;;  %v24522_v29 = vld [vmem:[%s25382_s11 + $0x3dd8] ss:$68 sps:$4 sm:$0xff]  }
 0x8c3   : > { %17244 = vmatpush1.bf16.msra.mxu0 %v24453_v30  ;;  %17631 = vmatpush1.bf16.msra.mxu1 %v24456_v31  ;;  %v24527_v30 = vld [vmem:[%s25382_s11 + $0x3e5c] ss:$68 sps:$4 sm:$0xff]   ;;  %v24530_v31 = vld [vmem:[%s25382_s11 + $0x3e64] ss:$68 sps:$4 sm:$0xff]  }
 0x8c4   : > { %17245 = vmatprep.subr.bf16.mxu0 %v24461_v32  ;;  %17632 = vmatprep.subr.bf16.mxu1 %v24464_v33  ;;  %v24525_v32 = vld [vmem:[%s25382_s11 + $0x3e58] ss:$68 sps:$4 sm:$0xff]   ;;  %v24528_v33 = vld [vmem:[%s25382_s11 + $0x3e60] ss:$68 sps:$4 sm:$0xff]  }
 0x8c7   : > { %17246 = vmatpush1.bf16.msra.mxu0 %v24459_v35  ;;  %17633 = vmatpush1.bf16.msra.mxu1 %v24462_v36  ;;  %v24533_v35 = vld [vmem:[%s25382_s11 + $0x3ee4] ss:$68 sps:$4 sm:$0xff]   ;;  %v24536_v36 = vld [vmem:[%s25382_s11 + $0x3eec] ss:$68 sps:$4 sm:$0xff]  }
 0x8c8   : > { %17247 = vmatprep.subr.bf16.mxu0 %v24467_v37  ;;  %17634 = vmatprep.subr.bf16.mxu1 %v24470_v39  ;;  %v24531_v37 = vld [vmem:[%s25382_s11 + $0x3ee0] ss:$68 sps:$4 sm:$0xff]   ;;  %v24534_v39 = vld [vmem:[%s25382_s11 + $0x3ee8] ss:$68 sps:$4 sm:$0xff]  }
 0x8cb   : > { %17248 = vmatpush1.bf16.msra.mxu0 %v24465_v40  ;;  %17635 = vmatpush1.bf16.msra.mxu1 %v24468_v42  ;;  %v24539_v40 = vld [vmem:[%s25382_s11 + $0x3f6c] ss:$68 sps:$4 sm:$0xff]   ;;  %v24542_v42 = vld [vmem:[%s25382_s11 + $0x3f74] ss:$68 sps:$4 sm:$0xff]  }
 0x8cc   : > { %17249 = vmatprep.subr.bf16.mxu0 %v24473_v43  ;;  %17636 = vmatprep.subr.bf16.mxu1 %v24476_v44  ;;  %v24537_v43 = vld [vmem:[%s25382_s11 + $0x3f68] ss:$68 sps:$4 sm:$0xff]   ;;  %v24540_v44 = vld [vmem:[%s25382_s11 + $0x3f70] ss:$68 sps:$4 sm:$0xff]  }
 0x8cf   : > { %17250 = vmatpush1.bf16.msra.mxu0 %v24471_v45  ;;  %17637 = vmatpush1.bf16.msra.mxu1 %v24474_v48  ;;  %v24545_v45 = vld [vmem:[%s25382_s11 + $0x3ff4] ss:$68 sps:$4 sm:$0xff]   ;;  %v24548_v48 = vld [vmem:[%s25382_s11 + $0x3ffc] ss:$68 sps:$4 sm:$0xff]  }
 0x8d0   : > { %17251 = vmatprep.subr.bf16.mxu0 %v24479_v49  ;;  %17638 = vmatprep.subr.bf16.mxu1 %v24482_v50  ;;  %v24543_v49 = vld [vmem:[%s25382_s11 + $0x3ff0] ss:$68 sps:$4 sm:$0xff]   ;;  %v24546_v50 = vld [vmem:[%s25382_s11 + $0x3ff8] ss:$68 sps:$4 sm:$0xff]  }
 0x8d3   : > { %17252 = vmatpush1.bf16.msra.mxu0 %v24477_v51  ;;  %17639 = vmatpush1.bf16.msra.mxu1 %v24480_v52  ;;  %v24551_v51 = vld [vmem:[%s25382_s11 + $0x407c] ss:$68 sps:$4 sm:$0xff]   ;;  %v24554_v52 = vld [vmem:[%s25382_s11 + $0x4084] ss:$68 sps:$4 sm:$0xff]  }
 0x8d4   : > { %17253 = vmatprep.subr.bf16.mxu0 %v24485_v54  ;;  %17640 = vmatprep.subr.bf16.mxu1 %v24488_v55  ;;  %v24549_v54 = vld [vmem:[%s25382_s11 + $0x4078] ss:$68 sps:$4 sm:$0xff]   ;;  %v24552_v55 = vld [vmem:[%s25382_s11 + $0x4080] ss:$68 sps:$4 sm:$0xff]  }
 0x8d7   : > { %17254 = vmatpush1.bf16.msra.mxu0 %v24483_v56  ;;  %17641 = vmatpush1.bf16.msra.mxu1 %v24486_v58  ;;  %v24557_v56 = vld [vmem:[%s25382_s11 + $0x4104] ss:$68 sps:$4 sm:$0xff]   ;;  %v24560_v58 = vld [vmem:[%s25382_s11 + $0x410c] ss:$68 sps:$4 sm:$0xff]  }
 0x8d8   : > { %17255 = vmatprep.subr.bf16.mxu0 %v24491_v59  ;;  %17642 = vmatprep.subr.bf16.mxu1 %v24494_v60  ;;  %v24555_v59 = vld [vmem:[%s25382_s11 + $0x4100] ss:$68 sps:$4 sm:$0xff]   ;;  %v24558_v60 = vld [vmem:[%s25382_s11 + $0x4108] ss:$68 sps:$4 sm:$0xff]  }
 0x8db   : > { %17256 = vmatpush1.bf16.msra.mxu0 %v24489_v61  ;;  %17643 = vmatpush1.bf16.msra.mxu1 %v24492_v63  ;;  %v24563_v61 = vld [vmem:[%s25382_s11 + $0x418c] ss:$68 sps:$4 sm:$0xff]   ;;  %v24566_v63 = vld [vmem:[%s25382_s11 + $0x4194] ss:$68 sps:$4 sm:$0xff]  }
 0x8dc   : > { %17268 = vmatprep.subr.bf16.mxu0 %v24497_v2  ;;  %17655 = vmatprep.subr.bf16.mxu1 %v24500_v3  ;;  %v24561_v2 = vld [vmem:[%s25382_s11 + $0x4188] ss:$68 sps:$4 sm:$0xff]   ;;  %v24564_v3 = vld [vmem:[%s25382_s11 + $0x4190] ss:$68 sps:$4 sm:$0xff]  }
 0x8de   : > { %17258 = vmatmul.mubr.bf16.vlgmr.msra.gmra.mrb[12].mxu0 %v25966_v0  ;;  %17645 = vmatmul.mubr.bf16.vlgmr.msra.gmra.mrb[12].mxu1 %v25966_v0 }
 0x8df   : > { %17269 = vmatpush1.bf16.msra.mxu0 %v24495_v4  ;;  %17656 = vmatpush1.bf16.msra.mxu1 %v24498_v5  ;;  %v24569_v4 = vld [vmem:[%s25382_s11 + $0x4214] ss:$68 sps:$4 sm:$0xff]   ;;  %v24572_v5 = vld [vmem:[%s25382_s11 + $0x421c] ss:$68 sps:$4 sm:$0xff]  }
 0x8e0   : > { %17270 = vmatprep.subr.bf16.mxu0 %v24503_v9  ;;  %17657 = vmatprep.subr.bf16.mxu1 %v24506_v10  ;;  %v24567_v9 = vld [vmem:[%s25382_s11 + $0x4210] ss:$68 sps:$4 sm:$0xff]   ;;  %v24570_v10 = vld [vmem:[%s25382_s11 + $0x4218] ss:$68 sps:$4 sm:$0xff]  }
 0x8e1   : > { %17300 = vmatprep.mubr.bf16.mxu0 %v25972_v6  ;;  %17687 = vmatprep.mubr.bf16.mxu1 %v25972_v6 }
 0x8e3   : > { %17271 = vmatpush1.bf16.msra.mxu0 %v24501_v11  ;;  %17658 = vmatpush1.bf16.msra.mxu1 %v24504_v13  ;;  %v24575_v11 = vld [vmem:[%s25382_s11 + $0x429c] ss:$68 sps:$4 sm:$0xff]   ;;  %v24578_v13 = vld [vmem:[%s25382_s11 + $0x42a4] ss:$68 sps:$4 sm:$0xff]  }
 0x8e4   : > { %17272 = vmatprep.subr.bf16.mxu0 %v24509_v14  ;;  %17659 = vmatprep.subr.bf16.mxu1 %v24512_v16  ;;  %v24573_v14 = vld [vmem:[%s25382_s11 + $0x4298] ss:$68 sps:$4 sm:$0xff]   ;;  %v24576_v16 = vld [vmem:[%s25382_s11 + $0x42a0] ss:$68 sps:$4 sm:$0xff]  }
 0x8e7   : > { %17273 = vmatpush1.bf16.msra.mxu0 %v24507_v17  ;;  %17660 = vmatpush1.bf16.msra.mxu1 %v24510_v18  ;;  %v24581_v17 = vld [vmem:[%s25382_s11 + $0x4324] ss:$68 sps:$4 sm:$0xff]   ;;  %v24584_v18 = vld [vmem:[%s25382_s11 + $0x432c] ss:$68 sps:$4 sm:$0xff]  }
 0x8e8   : > { %17274 = vmatprep.subr.bf16.mxu0 %v24515_v19  ;;  %17661 = vmatprep.subr.bf16.mxu1 %v24518_v20  ;;  %v24579_v19 = vld [vmem:[%s25382_s11 + $0x4320] ss:$68 sps:$4 sm:$0xff]   ;;  %v24582_v20 = vld [vmem:[%s25382_s11 + $0x4328] ss:$68 sps:$4 sm:$0xff]  }
 0x8eb   : > { %17275 = vmatpush1.bf16.msra.mxu0 %v24513_v21  ;;  %17662 = vmatpush1.bf16.msra.mxu1 %v24516_v22  ;;  %v24587_v21 = vld [vmem:[%s25382_s11 + $0x43ac] ss:$68 sps:$4 sm:$0xff]   ;;  %v24590_v22 = vld [vmem:[%s25382_s11 + $0x43b4] ss:$68 sps:$4 sm:$0xff]  }
 0x8ec   : > { %17276 = vmatprep.subr.bf16.mxu0 %v24521_v25  ;;  %17663 = vmatprep.subr.bf16.mxu1 %v24524_v26  ;;  %v24585_v25 = vld [vmem:[%s25382_s11 + $0x43a8] ss:$68 sps:$4 sm:$0xff]   ;;  %v24588_v26 = vld [vmem:[%s25382_s11 + $0x43b0] ss:$68 sps:$4 sm:$0xff]  }
 0x8ef   : > { %17277 = vmatpush1.bf16.msra.mxu0 %v24519_v27  ;;  %17664 = vmatpush1.bf16.msra.mxu1 %v24522_v29  ;;  %v24593_v27 = vld [vmem:[%s25382_s11 + $0x4434] ss:$68 sps:$4 sm:$0xff]   ;;  %v24596_v29 = vld [vmem:[%s25382_s11 + $0x443c] ss:$68 sps:$4 sm:$0xff]  }
 0x8f0   : > { %17278 = vmatprep.subr.bf16.mxu0 %v24527_v30  ;;  %17665 = vmatprep.subr.bf16.mxu1 %v24530_v31  ;;  %v24591_v30 = vld [vmem:[%s25382_s11 + $0x4430] ss:$68 sps:$4 sm:$0xff]   ;;  %v24594_v31 = vld [vmem:[%s25382_s11 + $0x4438] ss:$68 sps:$4 sm:$0xff]  }
 0x8f3   : > { %17279 = vmatpush1.bf16.msra.mxu0 %v24525_v32  ;;  %17666 = vmatpush1.bf16.msra.mxu1 %v24528_v33  ;;  %v24599_v32 = vld [vmem:[%s25382_s11 + $0x44bc] ss:$68 sps:$4 sm:$0xff]   ;;  %v24602_v33 = vld [vmem:[%s25382_s11 + $0x44c4] ss:$68 sps:$4 sm:$0xff]  }
 0x8f4   : > { %17280 = vmatprep.subr.bf16.mxu0 %v24533_v35  ;;  %17667 = vmatprep.subr.bf16.mxu1 %v24536_v36  ;;  %v24597_v35 = vld [vmem:[%s25382_s11 + $0x44b8] ss:$68 sps:$4 sm:$0xff]   ;;  %v24600_v36 = vld [vmem:[%s25382_s11 + $0x44c0] ss:$68 sps:$4 sm:$0xff]  }
 0x8f7   : > { %17281 = vmatpush1.bf16.msra.mxu0 %v24531_v37  ;;  %17668 = vmatpush1.bf16.msra.mxu1 %v24534_v39  ;;  %v24605_v37 = vld [vmem:[%s25382_s11 + $0x4544] ss:$68 sps:$4 sm:$0xff]   ;;  %v24608_v39 = vld [vmem:[%s25382_s11 + $0x454c] ss:$68 sps:$4 sm:$0xff]  }
 0x8f8   : > { %17282 = vmatprep.subr.bf16.mxu0 %v24539_v40  ;;  %17669 = vmatprep.subr.bf16.mxu1 %v24542_v42  ;;  %v24603_v40 = vld [vmem:[%s25382_s11 + $0x4540] ss:$68 sps:$4 sm:$0xff]   ;;  %v24606_v42 = vld [vmem:[%s25382_s11 + $0x4548] ss:$68 sps:$4 sm:$0xff]  }
 0x8fb   : > { %17283 = vmatpush1.bf16.msra.mxu0 %v24537_v43  ;;  %17670 = vmatpush1.bf16.msra.mxu1 %v24540_v44  ;;  %v24611_v43 = vld [vmem:[%s25382_s11 + $0x45cc] ss:$68 sps:$4 sm:$0xff]   ;;  %v24614_v44 = vld [vmem:[%s25382_s11 + $0x45d4] ss:$68 sps:$4 sm:$0xff]  }
 0x8fc   : > { %17284 = vmatprep.subr.bf16.mxu0 %v24545_v45  ;;  %17671 = vmatprep.subr.bf16.mxu1 %v24548_v48  ;;  %v24609_v45 = vld [vmem:[%s25382_s11 + $0x45c8] ss:$68 sps:$4 sm:$0xff]   ;;  %v24612_v48 = vld [vmem:[%s25382_s11 + $0x45d0] ss:$68 sps:$4 sm:$0xff]  }
 0x8ff   : > { %17285 = vmatpush1.bf16.msra.mxu0 %v24543_v49  ;;  %17672 = vmatpush1.bf16.msra.mxu1 %v24546_v50  ;;  %v24620_v49 = vld [vmem:[%s25382_s11 + $0x465c] ss:$68 sps:$4 sm:$0xff]   ;;  %v24615_v50 = vld [vmem:[%s25382_s11 + $0x4650] ss:$68 sps:$4 sm:$0xff]  }
 0x900   : > { %17286 = vmatprep.subr.bf16.mxu0 %v24551_v51  ;;  %17673 = vmatprep.subr.bf16.mxu1 %v24554_v52  ;;  %v24618_v51 = vld [vmem:[%s25382_s11 + $0x4658] ss:$68 sps:$4 sm:$0xff]  }
 0x901   : > { %v24623_v52 = vld [vmem:[%s25382_s11 + $0x46dc] ss:$68 sps:$4 sm:$0xff]  }
 0x903   : > { %17287 = vmatpush1.bf16.msra.mxu0 %v24549_v54  ;;  %17674 = vmatpush1.bf16.msra.mxu1 %v24552_v55  ;;  %v24626_v54 = vld [vmem:[%s25382_s11 + $0x46e4] ss:$68 sps:$4 sm:$0xff]   ;;  %v24621_v55 = vld [vmem:[%s25382_s11 + $0x46d8] ss:$68 sps:$4 sm:$0xff]  }
 0x904   : > { %17288 = vmatprep.subr.bf16.mxu0 %v24557_v56  ;;  %17675 = vmatprep.subr.bf16.mxu1 %v24560_v58  ;;  %v24624_v56 = vld [vmem:[%s25382_s11 + $0x46e0] ss:$68 sps:$4 sm:$0xff]  }
 0x905   : > { %v24629_v58 = vld [vmem:[%s25382_s11 + $0x4764] ss:$68 sps:$4 sm:$0xff]  }
 0x907   : > { %17289 = vmatpush1.bf16.msra.mxu0 %v24555_v59  ;;  %17676 = vmatpush1.bf16.msra.mxu1 %v24558_v60  ;;  %v24632_v59 = vld [vmem:[%s25382_s11 + $0x476c] ss:$68 sps:$4 sm:$0xff]   ;;  %v24627_v60 = vld [vmem:[%s25382_s11 + $0x4760] ss:$68 sps:$4 sm:$0xff]  }
 0x908   : > { %17290 = vmatprep.subr.bf16.mxu0 %v24563_v61  ;;  %17677 = vmatprep.subr.bf16.mxu1 %v24566_v63  ;;  %v24630_v61 = vld [vmem:[%s25382_s11 + $0x4768] ss:$68 sps:$4 sm:$0xff]  }
 0x909   : > { %v24635_v63 = vld [vmem:[%s25382_s11 + $0x47ec] ss:$68 sps:$4 sm:$0xff]  }
 0x90b   : > { %17291 = vmatpush1.bf16.msra.mxu0 %v24561_v2  ;;  %17678 = vmatpush1.bf16.msra.mxu1 %v24564_v3  ;;  %v24638_v2 = vld [vmem:[%s25382_s11 + $0x47f4] ss:$68 sps:$4 sm:$0xff]   ;;  %v24633_v3 = vld [vmem:[%s25382_s11 + $0x47e8] ss:$68 sps:$4 sm:$0xff]  }
 0x90c   : > { %17292 = vmatprep.subr.bf16.mxu0 %v24569_v4  ;;  %17679 = vmatprep.subr.bf16.mxu1 %v24572_v5  ;;  %v24636_v4 = vld [vmem:[%s25382_s11 + $0x47f0] ss:$68 sps:$4 sm:$0xff]   ;;  %v24639_v5 = vld [vmem:[%s25382_s11 + $0x480] ss:$68 sps:$4 sm:$0xff]  }
 0x90f   : > { %17293 = vmatpush1.bf16.msra.mxu0 %v24567_v9  ;;  %17680 = vmatpush1.bf16.msra.mxu1 %v24570_v10  ;;  %v24640_v9 = vld [vmem:[%s25382_s11 + $0xd00] ss:$68 sps:$4 sm:$0xff]  }
 0x910   : > { %17294 = vmatprep.subr.bf16.mxu0 %v24575_v11  ;;  %17681 = vmatprep.subr.bf16.mxu1 %v24578_v13  ;;  %v24641_v10 = vld [vmem:[%s25382_s11 + $0x40] ss:$68 sps:$4 sm:$0xff]   ;;  %v24643_v13 = vld [vmem:[%s25382_s11 + $0x508] ss:$68 sps:$4 sm:$0xff]  }
 0x911   : > { %v24642_v11 = vld [vmem:[%s25382_s11 + $0x8c0] ss:$68 sps:$4 sm:$0xff]  }
 0x913   : > { %17295 = vmatpush1.bf16.msra.mxu0 %v24573_v14  ;;  %17682 = vmatpush1.bf16.msra.mxu1 %v24576_v16  ;;  %v24644_v14 = vld [vmem:[%s25382_s11 + $0xd88] ss:$68 sps:$4 sm:$0xff]  }
 0x914   : > { %17296 = vmatprep.subr.bf16.mxu0 %v24581_v17  ;;  %17683 = vmatprep.subr.bf16.mxu1 %v24584_v18  ;;  %v24645_v16 = vld [vmem:[%s25382_s11 + $0xc8] ss:$68 sps:$4 sm:$0xff]   ;;  %v24647_v18 = vld [vmem:[%s25382_s11 + $0x590] ss:$68 sps:$4 sm:$0xff]  }
 0x915   : > { %v24646_v17 = vld [vmem:[%s25382_s11 + $0x948] ss:$68 sps:$4 sm:$0xff]  }
 0x917   : > { %17297 = vmatpush1.bf16.msra.mxu0 %v24579_v19  ;;  %17684 = vmatpush1.bf16.msra.mxu1 %v24582_v20  ;;  %v24648_v19 = vld [vmem:[%s25382_s11 + $0xe10] ss:$68 sps:$4 sm:$0xff]  }
 0x918   : > { %17298 = vmatprep.subr.bf16.mxu0 %v24587_v21  ;;  %17685 = vmatprep.subr.bf16.mxu1 %v24590_v22  ;;  %v24649_v20 = vld [vmem:[%s25382_s11 + $0x150] ss:$68 sps:$4 sm:$0xff]   ;;  %v24651_v22 = vld [vmem:[%s25382_s11 + $0x618] ss:$68 sps:$4 sm:$0xff]  }
 0x919   : > { %v24650_v21 = vld [vmem:[%s25382_s11 + $0x9d0] ss:$68 sps:$4 sm:$0xff]  }
 0x91b   : > { %17299 = vmatpush1.bf16.msra.mxu0 %v24585_v25  ;;  %17686 = vmatpush1.bf16.msra.mxu1 %v24588_v26  ;;  %v24652_v25 = vld [vmem:[%s25382_s11 + $0xe98] ss:$68 sps:$4 sm:$0xff]  }
 0x91c   : > { %17311 = vmatprep.subr.bf16.mxu0 %v24593_v27  ;;  %17698 = vmatprep.subr.bf16.mxu1 %v24596_v29  ;;  %v24653_v26 = vld [vmem:[%s25382_s11 + $0x1d8] ss:$68 sps:$4 sm:$0xff]   ;;  %v24656_v27 = vld [vmem:[%s25382_s11 + $0xf20] ss:$68 sps:$4 sm:$0xff]  }
 0x91d   : > { %v24657_v29 = vld [vmem:[%s25382_s11 + $0x260] ss:$68 sps:$4 sm:$0xff]  }
 0x91e   : > { %17301 = vmatmul.mubr.bf16.vlgmr.msra.gmra.mrb[12].mxu0 %v26040_v24  ;;  %17688 = vmatmul.mubr.bf16.vlgmr.msra.gmra.mrb[12].mxu1 %v26040_v24 }
 0x91f   : > { %17312 = vmatpush1.bf16.msra.mxu0 %v24591_v30  ;;  %17699 = vmatpush1.bf16.msra.mxu1 %v24594_v31  ;;  %v24658_v30 = vld [vmem:[%s25382_s11 + $0xae0] ss:$68 sps:$4 sm:$0xff]   ;;  %v24659_v31 = vld [vmem:[%s25382_s11 + $0x728] ss:$68 sps:$4 sm:$0xff]  }
 0x920   : > { %17313 = vmatprep.subr.bf16.mxu0 %v24599_v32  ;;  %17700 = vmatprep.subr.bf16.mxu1 %v24602_v33  ;;  %v24660_v32 = vld [vmem:[%s25382_s11 + $0xfa8] ss:$68 sps:$4 sm:$0xff]  }
 0x921   : > { %17343 = vmatprep.mubr.bf16.mxu0 %v25030_v34  ;;  %17730 = vmatprep.mubr.bf16.mxu1 %v25030_v34  ;;  %v24617_v34 = vld [vmem:[%s25382_s11 + $0x4654] ss:$68 sps:$4 sm:$0xff]   ;;  %v24661_v33 = vld [vmem:[%s25382_s11 + $0x2e8] ss:$68 sps:$4 sm:$0xff]  }
 0x923   : > { %17314 = vmatpush1.bf16.msra.mxu0 %v24597_v35  ;;  %17701 = vmatpush1.bf16.msra.mxu1 %v24600_v36  ;;  %v24662_v35 = vld [vmem:[%s25382_s11 + $0xb68] ss:$68 sps:$4 sm:$0xff]   ;;  %v24663_v36 = vld [vmem:[%s25382_s11 + $0x7b0] ss:$68 sps:$4 sm:$0xff]  }
 0x924   : > { %17315 = vmatprep.subr.bf16.mxu0 %v24605_v37  ;;  %17702 = vmatprep.subr.bf16.mxu1 %v24608_v39  ;;  %v24664_v37 = vld [vmem:[%s25382_s11 + $0x1030] ss:$68 sps:$4 sm:$0xff]  }
 0x925   : > { %v24665_v39 = vld [vmem:[%s25382_s11 + $0x370] ss:$68 sps:$4 sm:$0xff]  }
 0x927   : > { %17316 = vmatpush1.bf16.msra.mxu0 %v24603_v40  ;;  %17703 = vmatpush1.bf16.msra.mxu1 %v24606_v42  ;;  %v24666_v40 = vld [vmem:[%s25382_s11 + $0xbf0] ss:$68 sps:$4 sm:$0xff]   ;;  %v24667_v42 = vld [vmem:[%s25382_s11 + $0x838] ss:$68 sps:$4 sm:$0xff]  }
 0x928   : > { %17317 = vmatprep.subr.bf16.mxu0 %v24611_v43  ;;  %17704 = vmatprep.subr.bf16.mxu1 %v24614_v44  ;;  %v24668_v43 = vld [vmem:[%s25382_s11 + $0x10b8] ss:$68 sps:$4 sm:$0xff]  }
 0x929   : > { %v24669_v44 = vld [vmem:[%s25382_s11 + $0x3f8] ss:$68 sps:$4 sm:$0xff]  }
 0x92b   : > { %17318 = vmatpush1.bf16.msra.mxu0 %v24609_v45  ;;  %17705 = vmatpush1.bf16.msra.mxu1 %v24612_v48  ;;  %v24670_v45 = vld [vmem:[%s25382_s11 + $0xc78] ss:$68 sps:$4 sm:$0xff]   ;;  %v24671_v48 = vld [vmem:[%s25382_s11 + $0x1580] ss:$68 sps:$4 sm:$0xff]  }
 0x92c   : > { %17319 = vmatprep.subr.bf16.mxu0 %v24617_v34  ;;  %17706 = vmatprep.subr.bf16.mxu1 %v24620_v49  ;;  %v24673_v34 = vld [vmem:[%s25382_s11 + $0x1e00] ss:$68 sps:$4 sm:$0xff]  }
 0x92d   : > { %v24672_v49 = vld [vmem:[%s25382_s11 + $0x1140] ss:$68 sps:$4 sm:$0xff]  }
 0x92f   : > { %17320 = vmatpush1.bf16.msra.mxu0 %v24615_v50  ;;  %17707 = vmatpush1.bf16.msra.mxu1 %v24618_v51  ;;  %v24674_v50 = vld [vmem:[%s25382_s11 + $0x19c0] ss:$68 sps:$4 sm:$0xff]   ;;  %v24675_v51 = vld [vmem:[%s25382_s11 + $0x1608] ss:$68 sps:$4 sm:$0xff]  }
 0x930   : > { %17321 = vmatprep.subr.bf16.mxu0 %v24623_v52  ;;  %17708 = vmatprep.subr.bf16.mxu1 %v24626_v54  ;;  %v24677_v52 = vld [vmem:[%s25382_s11 + $0x1e88] ss:$68 sps:$4 sm:$0xff]  }
 0x931   : > { %v24676_v54 = vld [vmem:[%s25382_s11 + $0x11c8] ss:$68 sps:$4 sm:$0xff]  }
 0x933   : > { %17322 = vmatpush1.bf16.msra.mxu0 %v24621_v55  ;;  %17709 = vmatpush1.bf16.msra.mxu1 %v24624_v56  ;;  %v24678_v55 = vld [vmem:[%s25382_s11 + $0x1a48] ss:$68 sps:$4 sm:$0xff]   ;;  %v24679_v56 = vld [vmem:[%s25382_s11 + $0x1690] ss:$68 sps:$4 sm:$0xff]  }
 0x934   : > { %17323 = vmatprep.subr.bf16.mxu0 %v24629_v58  ;;  %17710 = vmatprep.subr.bf16.mxu1 %v24632_v59  ;;  %v24681_v58 = vld [vmem:[%s25382_s11 + $0x1f10] ss:$68 sps:$4 sm:$0xff]   ;;  %v24683_v59 = vld [vmem:[%s25382_s11 + $0x1718] ss:$68 sps:$4 sm:$0xff]  }
 0x937   : > { %17324 = vmatpush1.bf16.msra.mxu0 %v24627_v60  ;;  %17711 = vmatpush1.bf16.msra.mxu1 %v24630_v61  ;;  %v24685_v60 = vld [vmem:[%s25382_s11 + $0x1f98] ss:$68 sps:$4 sm:$0xff]  }
 0x938   : > { %17325 = vmatprep.subr.bf16.mxu0 %v24635_v63  ;;  %17712 = vmatprep.subr.bf16.mxu1 %v24638_v2  ;;  %v24684_v61 = vld [vmem:[%s25382_s11 + $0x12d8] ss:$68 sps:$4 sm:$0xff]   ;;  %v24689_v63 = vld [vmem:[%s25382_s11 + $0x2020] ss:$68 sps:$4 sm:$0xff]  }
 0x939   : > { %v24688_v2 = vld [vmem:[%s25382_s11 + $0x1360] ss:$68 sps:$4 sm:$0xff]  }
 0x93b   : > { %17326 = vmatpush1.bf16.msra.mxu0 %v24633_v3  ;;  %17713 = vmatpush1.bf16.msra.mxu1 %v24636_v4  ;;  %v24690_v3 = vld [vmem:[%s25382_s11 + $0x1be0] ss:$68 sps:$4 sm:$0xff]   ;;  %v24691_v4 = vld [vmem:[%s25382_s11 + $0x1828] ss:$68 sps:$4 sm:$0xff]  }
 0x93c   : > { %20757 = vmatprep.subr.bf16.mxu0 %v24639_v5  ;;  %20779 = vmatprep.subr.bf16.mxu1 %v24640_v9  ;;  %v24693_v5 = vld [vmem:[%s25382_s11 + $0x20a8] ss:$68 sps:$4 sm:$0xff]  }
 0x93d   : > { %v24692_v9 = vld [vmem:[%s25382_s11 + $0x13e8] ss:$68 sps:$4 sm:$0xff]  }
 0x93e   : > { %17344 = vmatmul.mubr.bf16.vlgmr.msra.gmra.mrb[12].mxu0 %v26080_v8  ;;  %17731 = vmatmul.mubr.bf16.vlgmr.msra.gmra.mrb[12].mxu1 %v26080_v8 }
 0x93f   : > { %20758 = vmatpush3.bf16.msra.mxu0 %v24641_v10  ;;  %20780 = vmatpush3.bf16.msra.mxu1 %v24642_v11  ;;  %v24694_v10 = vld [vmem:[%s25382_s11 + $0x1c68] ss:$68 sps:$4 sm:$0xff]   ;;  %v24695_v11 = vld [vmem:[%s25382_s11 + $0x18b0] ss:$68 sps:$4 sm:$0xff]  }
 0x940   : > { %20759 = vmatprep.subr.bf16.mxu0 %v24643_v13  ;;  %20781 = vmatprep.subr.bf16.mxu1 %v24644_v14  ;;  %v24697_v13 = vld [vmem:[%s25382_s11 + $0x2130] ss:$68 sps:$4 sm:$0xff]  }
 0x941   : > { %17773 = vmatprep.mubr.bf16.mxu0 %v25484_v15  ;;  %17814 = vmatprep.mubr.bf16.mxu1 %v25540_v1  ;;  %v24654_v15 = vld [vmem:[%s25382_s11 + $0xa58] ss:$68 sps:$4 sm:$0xff]   ;;  %v24655_v1 = vld [vmem:[%s25382_s11 + $0x6a0] ss:$68 sps:$4 sm:$0xff]   ;;  %v24696_v14 = vld [vmem:[%s25382_s11 + $0x1470] ss:$68 sps:$4 sm:$0xff]  }
 0x943   : > { %20760 = vmatpush3.bf16.msra.mxu0 %v24645_v16  ;;  %20782 = vmatpush3.bf16.msra.mxu1 %v24646_v17  ;;  %v24698_v16 = vld [vmem:[%s25382_s11 + $0x1cf0] ss:$68 sps:$4 sm:$0xff]   ;;  %v24699_v17 = vld [vmem:[%s25382_s11 + $0x1938] ss:$68 sps:$4 sm:$0xff]  }
 0x944   : > { %20761 = vmatprep.subr.bf16.mxu0 %v24647_v18  ;;  %20783 = vmatprep.subr.bf16.mxu1 %v24648_v19  ;;  %v24701_v18 = vld [vmem:[%s25382_s11 + $0x21b8] ss:$68 sps:$4 sm:$0xff]  }
 0x945   : > { %v24700_v19 = vld [vmem:[%s25382_s11 + $0x14f8] ss:$68 sps:$4 sm:$0xff]  }
 0x947   : > { %20762 = vmatpush3.bf16.msra.mxu0 %v24649_v20  ;;  %20784 = vmatpush3.bf16.msra.mxu1 %v24650_v21  ;;  %v24702_v20 = vld [vmem:[%s25382_s11 + $0x1d78] ss:$68 sps:$4 sm:$0xff]   ;;  %v24703_v21 = vld [vmem:[%s25382_s11 + $0x2680] ss:$68 sps:$4 sm:$0xff]  }
 0x948   : > { %20763 = vmatprep.subr.bf16.mxu0 %v24651_v22  ;;  %20785 = vmatprep.subr.bf16.mxu1 %v24652_v25  ;;  %v24705_v22 = vld [vmem:[%s25382_s11 + $0x2f00] ss:$68 sps:$4 sm:$0xff]  }
 0x949   : > { %v24704_v25 = vld [vmem:[%s25382_s11 + $0x2240] ss:$68 sps:$4 sm:$0xff]  }
 0x94b   : > { %20764 = vmatpush3.bf16.msra.mxu0 %v24653_v26  ;;  %20786 = vmatpush3.bf16.msra.mxu1 %v24654_v15  ;;  %v24706_v26 = vld [vmem:[%s25382_s11 + $0x2ac0] ss:$68 sps:$4 sm:$0xff]   ;;  %v24707_v15 = vld [vmem:[%s25382_s11 + $0x2708] ss:$68 sps:$4 sm:$0xff]  }
 0x94c   : > { %20765 = vmatprep.subr.bf16.mxu0 %v24655_v1  ;;  %20787 = vmatprep.subr.bf16.mxu1 %v24656_v27  ;;  %v24709_v1 = vld [vmem:[%s25382_s11 + $0x2f88] ss:$68 sps:$4 sm:$0xff]  }
 0x94d   : > { %v24708_v27 = vld [vmem:[%s25382_s11 + $0x22c8] ss:$68 sps:$4 sm:$0xff]  }
 0x94f   : > { %20766 = vmatpush3.bf16.msra.mxu0 %v24657_v29  ;;  %20788 = vmatpush3.bf16.msra.mxu1 %v24658_v30  ;;  %v24710_v29 = vld [vmem:[%s25382_s11 + $0x2b48] ss:$68 sps:$4 sm:$0xff]   ;;  %v24711_v30 = vld [vmem:[%s25382_s11 + $0x2790] ss:$68 sps:$4 sm:$0xff]  }
 0x950   : > { %20767 = vmatprep.subr.bf16.mxu0 %v24659_v31  ;;  %20789 = vmatprep.subr.bf16.mxu1 %v24660_v32  ;;  %v24713_v31 = vld [vmem:[%s25382_s11 + $0x3010] ss:$68 sps:$4 sm:$0xff]   ;;  %v24715_v32 = vld [vmem:[%s25382_s11 + $0x2818] ss:$68 sps:$4 sm:$0xff]  }
 0x953   : > { %20768 = vmatpush3.bf16.msra.mxu0 %v24661_v33  ;;  %20790 = vmatpush3.bf16.msra.mxu1 %v24662_v35  ;;  %v24717_v33 = vld [vmem:[%s25382_s11 + $0x3098] ss:$68 sps:$4 sm:$0xff]  }
 0x954   : > { %20769 = vmatprep.subr.bf16.mxu0 %v24663_v36  ;;  %20791 = vmatprep.subr.bf16.mxu1 %v24664_v37  ;;  %v24716_v35 = vld [vmem:[%s25382_s11 + $0x23d8] ss:$68 sps:$4 sm:$0xff]   ;;  %v24721_v36 = vld [vmem:[%s25382_s11 + $0x3120] ss:$68 sps:$4 sm:$0xff]  }
 0x955   : > { %v24720_v37 = vld [vmem:[%s25382_s11 + $0x2460] ss:$68 sps:$4 sm:$0xff]  }
 0x957   : > { %20770 = vmatpush3.bf16.msra.mxu0 %v24665_v39  ;;  %20792 = vmatpush3.bf16.msra.mxu1 %v24666_v40  ;;  %v24722_v39 = vld [vmem:[%s25382_s11 + $0x2ce0] ss:$68 sps:$4 sm:$0xff]   ;;  %v24723_v40 = vld [vmem:[%s25382_s11 + $0x2928] ss:$68 sps:$4 sm:$0xff]  }
 0x958   : > { %20771 = vmatprep.subr.bf16.mxu0 %v24667_v42  ;;  %20793 = vmatprep.subr.bf16.mxu1 %v24668_v43  ;;  %v24725_v42 = vld [vmem:[%s25382_s11 + $0x31a8] ss:$68 sps:$4 sm:$0xff]  }
 0x959   : > { %v24724_v43 = vld [vmem:[%s25382_s11 + $0x24e8] ss:$68 sps:$4 sm:$0xff]  }
 0x95b   : > { %20772 = vmatpush3.bf16.msra.mxu0 %v24669_v44  ;;  %20794 = vmatpush3.bf16.msra.mxu1 %v24670_v45  ;;  %v24726_v44 = vld [vmem:[%s25382_s11 + $0x2d68] ss:$68 sps:$4 sm:$0xff]   ;;  %v24727_v45 = vld [vmem:[%s25382_s11 + $0x29b0] ss:$68 sps:$4 sm:$0xff]  }
 0x95c   : > { %20801 = vmatprep.subr.bf16.mxu0 %v24671_v48  ;;  %20823 = vmatprep.subr.bf16.mxu1 %v24673_v34  ;;  %v24729_v48 = vld [vmem:[%s25382_s11 + $0x3230] ss:$68 sps:$4 sm:$0xff]  }
 0x95d   : > { %v24728_v34 = vld [vmem:[%s25382_s11 + $0x2570] ss:$68 sps:$4 sm:$0xff]  }
 0x95e   : > { %17774 = vmatmul.mubr.bf16.vlgmr.msra.gmra.mrb[16].mxu0 %v25510_v38  ;;  %17815 = vmatmul.mubr.bf16.vlgmr.msra.gmra.mrb[16].mxu1 %v25586_v46  ;;  %v24680_v38 = vld [vmem:[%s25382_s11 + $0x1250] ss:$68 sps:$4 sm:$0xff]  }
 0x95f   : > { %20802 = vmatpush3.bf16.msra.mxu0 %v24672_v49  ;;  %20824 = vmatpush3.bf16.msra.mxu1 %v24674_v50  ;;  %v24682_v46 = vld [vmem:[%s25382_s11 + $0x1ad0] ss:$68 sps:$4 sm:$0xff]   ;;  %v24731_v50 = vld [vmem:[%s25382_s11 + $0x2a38] ss:$68 sps:$4 sm:$0xff]  }
 0x960   : > { %20803 = vmatprep.subr.bf16.mxu0 %v24675_v51  ;;  %20825 = vmatprep.subr.bf16.mxu1 %v24677_v52  ;;  %v24730_v49 = vld [vmem:[%s25382_s11 + $0x2df0] ss:$68 sps:$4 sm:$0xff]   ;;  %v24733_v51 = vld [vmem:[%s25382_s11 + $0x32b8] ss:$68 sps:$4 sm:$0xff]  }
 0x961   : > { %17855 = vmatprep.mubr.bf16.mxu0 %v25596_v53  ;;  %17896 = vmatprep.mubr.bf16.mxu1 %v25668_v62  ;;  %v24686_v53 = vld [vmem:[%s25382_s11 + $0x1b58] ss:$68 sps:$4 sm:$0xff]   ;;  %v24687_v62 = vld [vmem:[%s25382_s11 + $0x17a0] ss:$68 sps:$4 sm:$0xff]  }
 0x962   : > { %v24732_v52 = vld [vmem:[%s25382_s11 + $0x25f8] ss:$68 sps:$4 sm:$0xff]  }
 0x963   : > { %20804 = vmatpush3.bf16.msra.mxu0 %v24676_v54  ;;  %20826 = vmatpush3.bf16.msra.mxu1 %v24678_v55  ;;  %v24734_v54 = vld [vmem:[%s25382_s11 + $0x2e78] ss:$68 sps:$4 sm:$0xff]   ;;  %v24735_v55 = vld [vmem:[%s25382_s11 + $0x3780] ss:$68 sps:$4 sm:$0xff]  }
 0x964   : > { %20805 = vmatprep.subr.bf16.mxu0 %v24679_v56  ;;  %20827 = vmatprep.subr.bf16.mxu1 %v24681_v58  ;;  %v24737_v56 = vld [vmem:[%s25382_s11 + $0x4000] ss:$68 sps:$4 sm:$0xff]  }
 0x965   : > { %v24736_v58 = vld [vmem:[%s25382_s11 + $0x3340] ss:$68 sps:$4 sm:$0xff]  }
 0x967   : > { %20806 = vmatpush3.bf16.msra.mxu0 %v24680_v38  ;;  %20828 = vmatpush3.bf16.msra.mxu1 %v24682_v46  ;;  %v24738_v38 = vld [vmem:[%s25382_s11 + $0x3bc0] ss:$68 sps:$4 sm:$0xff]   ;;  %v24739_v46 = vld [vmem:[%s25382_s11 + $0x3808] ss:$68 sps:$4 sm:$0xff]  }
 0x968   : > { %20807 = vmatprep.subr.bf16.mxu0 %v24683_v59  ;;  %20829 = vmatprep.subr.bf16.mxu1 %v24685_v60  ;;  %v24741_v59 = vld [vmem:[%s25382_s11 + $0x4088] ss:$68 sps:$4 sm:$0xff]  }
 0x969   : > { %v24740_v60 = vld [vmem:[%s25382_s11 + $0x33c8] ss:$68 sps:$4 sm:$0xff]  }
 0x96b   : > { %20808 = vmatpush3.bf16.msra.mxu0 %v24684_v61  ;;  %20830 = vmatpush3.bf16.msra.mxu1 %v24686_v53  ;;  %v24742_v61 = vld [vmem:[%s25382_s11 + $0x3c48] ss:$68 sps:$4 sm:$0xff]   ;;  %v24743_v53 = vld [vmem:[%s25382_s11 + $0x3890] ss:$68 sps:$4 sm:$0xff]  }
 0x96c   : > { %20809 = vmatprep.subr.bf16.mxu0 %v24687_v62  ;;  %20831 = vmatprep.subr.bf16.mxu1 %v24689_v63  ;;  %v24745_v62 = vld [vmem:[%s25382_s11 + $0x4110] ss:$68 sps:$4 sm:$0xff]   ;;  %v24747_v63 = vld [vmem:[%s25382_s11 + $0x3918] ss:$68 sps:$4 sm:$0xff]  }
 0x96f   : > { %20810 = vmatpush3.bf16.msra.mxu0 %v24688_v2  ;;  %20832 = vmatpush3.bf16.msra.mxu1 %v24690_v3  ;;  %v24749_v2 = vld [vmem:[%s25382_s11 + $0x4198] ss:$68 sps:$4 sm:$0xff]  }
 0x970   : > { %20811 = vmatprep.subr.bf16.mxu0 %v24691_v4  ;;  %20833 = vmatprep.subr.bf16.mxu1 %v24693_v5  ;;  %v24748_v3 = vld [vmem:[%s25382_s11 + $0x34d8] ss:$68 sps:$4 sm:$0xff]   ;;  %v24753_v4 = vld [vmem:[%s25382_s11 + $0x4220] ss:$68 sps:$4 sm:$0xff]  }
 0x971   : > { %v24752_v5 = vld [vmem:[%s25382_s11 + $0x3560] ss:$68 sps:$4 sm:$0xff]  }
 0x973   : > { %20812 = vmatpush3.bf16.msra.mxu0 %v24692_v9  ;;  %20834 = vmatpush3.bf16.msra.mxu1 %v24694_v10  ;;  %v24754_v9 = vld [vmem:[%s25382_s11 + $0x3de0] ss:$68 sps:$4 sm:$0xff]   ;;  %v24755_v10 = vld [vmem:[%s25382_s11 + $0x3a28] ss:$68 sps:$4 sm:$0xff]  }
 0x974   : > { %20813 = vmatprep.subr.bf16.mxu0 %v24695_v11  ;;  %20835 = vmatprep.subr.bf16.mxu1 %v24697_v13  ;;  %v24757_v11 = vld [vmem:[%s25382_s11 + $0x42a8] ss:$68 sps:$4 sm:$0xff]  }
 0x975   : > { %v24756_v13 = vld [vmem:[%s25382_s11 + $0x35e8] ss:$68 sps:$4 sm:$0xff]  }
 0x977   : > { %20814 = vmatpush3.bf16.msra.mxu0 %v24696_v14  ;;  %20836 = vmatpush3.bf16.msra.mxu1 %v24698_v16  ;;  %v24758_v14 = vld [vmem:[%s25382_s11 + $0x3e68] ss:$68 sps:$4 sm:$0xff]   ;;  %v24759_v16 = vld [vmem:[%s25382_s11 + $0x3ab0] ss:$68 sps:$4 sm:$0xff]  }
 0x978   : > { %20815 = vmatprep.subr.bf16.mxu0 %v24699_v17  ;;  %20837 = vmatprep.subr.bf16.mxu1 %v24701_v18  ;;  %v24761_v17 = vld [vmem:[%s25382_s11 + $0x4330] ss:$68 sps:$4 sm:$0xff]  }
 0x979   : > { %v24760_v18 = vld [vmem:[%s25382_s11 + $0x3670] ss:$68 sps:$4 sm:$0xff]  }
 0x97b   : > { %20816 = vmatpush3.bf16.msra.mxu0 %v24700_v19  ;;  %20838 = vmatpush3.bf16.msra.mxu1 %v24702_v20  ;;  %v24762_v19 = vld [vmem:[%s25382_s11 + $0x3ef0] ss:$68 sps:$4 sm:$0xff]   ;;  %v24763_v20 = vld [vmem:[%s25382_s11 + $0x3b38] ss:$68 sps:$4 sm:$0xff]  }
 0x97c   : > { %20845 = vmatprep.subr.bf16.mxu0 %v24703_v21  ;;  %20867 = vmatprep.subr.bf16.mxu1 %v24705_v22  ;;  %v24765_v21 = vld [vmem:[%s25382_s11 + $0x43b8] ss:$68 sps:$4 sm:$0xff]  }
 0x97d   : > { %v24764_v22 = vld [vmem:[%s25382_s11 + $0x36f8] ss:$68 sps:$4 sm:$0xff]  }
 0x97e   : > { %17856 = vmatmul.mubr.bf16.vlgmr.msra.gmra.mrb[20].mxu0 %v25662_v57  ;;  %17897 = vmatmul.mubr.bf16.vlgmr.msra.gmra.mrb[20].mxu1 %v25738_v7  ;;  %v24712_v57 = vld [vmem:[%s25382_s11 + $0x2350] ss:$68 sps:$4 sm:$0xff]  }
 0x97f   : > { %20846 = vmatpush3.bf16.msra.mxu0 %v24704_v25  ;;  %20868 = vmatpush3.bf16.msra.mxu1 %v24706_v26  ;;  %v24714_v7 = vld [vmem:[%s25382_s11 + $0x2bd0] ss:$68 sps:$4 sm:$0xff]   ;;  %v24766_v25 = vld [vmem:[%s25382_s11 + $0x3f78] ss:$68 sps:$4 sm:$0xff]   ;;  %v24767_v26 = vld [vmem:[%s25382_s11 + $0x4440] ss:$68 sps:$4 sm:$0xff]  }
 0x980   : > { %20847 = vmatprep.subr.bf16.mxu0 %v24707_v15  ;;  %20869 = vmatprep.subr.bf16.mxu1 %v24709_v1  ;;  %v25031_v15 = vmov 0.0   ;;  %v24768_v1 = vld [vmem:[%s25382_s11 + $0x44c8] ss:$68 sps:$4 sm:$0xff]  }
 0x981   : > { %17937 = vmatprep.mubr.bf16.mxu0 %v25744_v12  ;;  %17978 = vmatprep.mubr.bf16.mxu1 %v25820_v28  ;;  %v24718_v12 = vld [vmem:[%s25382_s11 + $0x2c58] ss:$68 sps:$4 sm:$0xff]   ;;  %v24719_v28 = vld [vmem:[%s25382_s11 + $0x28a0] ss:$68 sps:$4 sm:$0xff]  }
 0x983   : > { %20848 = vmatpush3.bf16.msra.mxu0 %v24708_v27  ;;  %20870 = vmatpush3.bf16.msra.mxu1 %v24710_v29  ;;  %v24769_v27 = vld [vmem:[%s25382_s11 + $0x4550] ss:$68 sps:$4 sm:$0xff]   ;;  %v24770_v29 = vld [vmem:[%s25382_s11 + $0x45d8] ss:$68 sps:$4 sm:$0xff]  }
 0x984   : > { %20849 = vmatprep.subr.bf16.mxu0 %v24711_v30  ;;  %20871 = vmatprep.subr.bf16.mxu1 %v24713_v31  ;;  %v24773_v30 = vld [vmem:[%s25382_s11 + $0x4770] ss:$68 sps:$4 sm:$0xff]   ;;  %v24774_v31 = vld [vmem:[%s25382_s11 + $0x47f8] ss:$68 sps:$4 sm:$0xff]  }
 0x987   : > { %20850 = vmatpush3.bf16.msra.mxu0 %v24712_v57  ;;  %20872 = vmatpush3.bf16.msra.mxu1 %v24714_v7  ;;  %v428_v57 = vld [vmem:[%s25397_s28 + $0x60] sm:$0xff]  ;;  %v430_v7 = vld [vmem:[%s25397_s28 + $0x70] sm:$0xff] }
 0x988   : > { %20851 = vmatprep.subr.bf16.mxu0 %v24715_v32  ;;  %20873 = vmatprep.subr.bf16.mxu1 %v24717_v33  ;;  %v429_v32 = vld [vmem:[%s25397_s28 + $0x68] sm:$0xff]  ;;  %v431_v33 = vld [vmem:[%s25397_s28 + $0x78] sm:$0xff] }
 0x98b   : > { %20852 = vmatpush3.bf16.msra.mxu0 %v24716_v35  ;;  %20874 = vmatpush3.bf16.msra.mxu1 %v24718_v12 }
 0x98c   : > { %20853 = vmatprep.subr.bf16.mxu0 %v24719_v28  ;;  %20875 = vmatprep.subr.bf16.mxu1 %v24721_v36  ;;  %v445_v28 = vld [vmem:[%s25397_s28 + $0xe8] sm:$0xff]  ;;  %v447_v36 = vld [vmem:[%s25397_s28 + $0xf8] sm:$0xff] }
 0x98f   : > { %20854 = vmatpush3.bf16.msra.mxu0 %v24720_v37  ;;  %20876 = vmatpush3.bf16.msra.mxu1 %v24722_v39 }
 0x990   : > { %20855 = vmatprep.subr.bf16.mxu0 %v24723_v40  ;;  %20877 = vmatprep.subr.bf16.mxu1 %v24725_v42 }
 0x993   : > { %20856 = vmatpush3.bf16.msra.mxu0 %v24724_v43  ;;  %20878 = vmatpush3.bf16.msra.mxu1 %v24726_v44  ;;  %v446_v43 = vld [vmem:[%s25397_s28 + $0xf0] sm:$0xff]  ;;  %v448_v44 = vld [vmem:[%s25397_s28 + $0x100] sm:$0xff] }
 0x994   : > { %20857 = vmatprep.subr.bf16.mxu0 %v24727_v45  ;;  %20879 = vmatprep.subr.bf16.mxu1 %v24729_v48 }
 0x997   : > { %20858 = vmatpush3.bf16.msra.mxu0 %v24728_v34  ;;  %20880 = vmatpush3.bf16.msra.mxu1 %v24730_v49 }
 0x998   : > { %20859 = vmatprep.subr.bf16.mxu0 %v24731_v50  ;;  %20881 = vmatprep.subr.bf16.mxu1 %v24733_v51 }
 0x99b   : > { %20860 = vmatpush3.bf16.msra.mxu0 %v24732_v52  ;;  %20882 = vmatpush3.bf16.msra.mxu1 %v24734_v54 }
 0x99c   : > { %20889 = vmatprep.subr.bf16.mxu0 %v24735_v55  ;;  %20911 = vmatprep.subr.bf16.mxu1 %v24737_v56 }
 0x99e   : > { %17938 = vmatmul.mubr.bf16.vlgmr.msra.gmra.mrb[24].mxu0 %v25814_v23  ;;  %17979 = vmatmul.mubr.bf16.vlgmr.msra.gmra.mrb[24].mxu1 %v25890_v41  ;;  %v24744_v23 = vld [vmem:[%s25382_s11 + $0x3450] ss:$68 sps:$4 sm:$0xff]  }
 0x99f   : > { %20890 = vmatpush3.bf16.msra.mxu0 %v24736_v58  ;;  %20912 = vmatpush3.bf16.msra.mxu1 %v24738_v38  ;;  %v24746_v41 = vld [vmem:[%s25382_s11 + $0x3cd0] ss:$68 sps:$4 sm:$0xff]  }
 0x9a0   : > { %20891 = vmatprep.subr.bf16.mxu0 %v24739_v46  ;;  %20913 = vmatprep.subr.bf16.mxu1 %v24741_v59 }
 0x9a1   : > { %18019 = vmatprep.mubr.bf16.mxu0 %v25896_v47  ;;  %18060 = vmatprep.mubr.bf16.mxu1 %v25972_v6  ;;  %v24750_v47 = vld [vmem:[%s25382_s11 + $0x3d58] ss:$68 sps:$4 sm:$0xff]   ;;  %v24751_v6 = vld [vmem:[%s25382_s11 + $0x39a0] ss:$68 sps:$4 sm:$0xff]  }
 0x9a3   : > { %20892 = vmatpush3.bf16.msra.mxu0 %v24740_v60  ;;  %20914 = vmatpush3.bf16.msra.mxu1 %v24742_v61 }
 0x9a4   : > { %20893 = vmatprep.subr.bf16.mxu0 %v24743_v53  ;;  %20915 = vmatprep.subr.bf16.mxu1 %v24745_v62 }
 0x9a7   : > { %20894 = vmatpush3.bf16.msra.mxu0 %v24744_v23  ;;  %20916 = vmatpush3.bf16.msra.mxu1 %v24746_v41 }
 0x9a8   : > { %20895 = vmatprep.subr.bf16.mxu0 %v24747_v63  ;;  %20917 = vmatprep.subr.bf16.mxu1 %v24749_v2 }
 0x9ab   : > { %20896 = vmatpush3.bf16.msra.mxu0 %v24748_v3  ;;  %20918 = vmatpush3.bf16.msra.mxu1 %v24750_v47 }
 0x9ac   : > { %20897 = vmatprep.subr.bf16.mxu0 %v24751_v6  ;;  %20919 = vmatprep.subr.bf16.mxu1 %v24753_v4 }
 0x9af   : > { %20898 = vmatpush3.bf16.msra.mxu0 %v24752_v5  ;;  %20920 = vmatpush3.bf16.msra.mxu1 %v24754_v9 }
 0x9b0   : > { %20899 = vmatprep.subr.bf16.mxu0 %v24755_v10  ;;  %20921 = vmatprep.subr.bf16.mxu1 %v24757_v11 }
 0x9b3   : > { %20900 = vmatpush3.bf16.msra.mxu0 %v24756_v13  ;;  %20922 = vmatpush3.bf16.msra.mxu1 %v24758_v14 }
 0x9b4   : > { %20901 = vmatprep.subr.bf16.mxu0 %v24759_v16  ;;  %20923 = vmatprep.subr.bf16.mxu1 %v24761_v17 }
 0x9b7   : > { %20902 = vmatpush3.bf16.msra.mxu0 %v24760_v18  ;;  %20924 = vmatpush3.bf16.msra.mxu1 %v24762_v19 }
 0x9b8   : > { %20903 = vmatprep.subr.bf16.mxu0 %v24763_v20  ;;  %20925 = vmatprep.subr.bf16.mxu1 %v24765_v21 }
 0x9bb   : > { %20904 = vmatpush3.bf16.msra.mxu0 %v24764_v22  ;;  %20926 = vmatpush3.bf16.msra.mxu1 %v24766_v25 }
 0x9bc   : > { %20942 = vmatprep.subr.bf16.mxu0 %v25031_v15 }
 0x9be   : > { %18020 = vmatmul.mubr.bf16.vlgmr.msra.gmra.mrb[28].mxu0 %v25966_v0  ;;  %18061 = vmatmul.mubr.bf16.vlgmr.msra.gmra.mrb[28].mxu1 %v26040_v24  ;;  %v24771_v0 = vld [vmem:[%s25382_s11 + $0x4660] ss:$68 sps:$4 sm:$0xff]   ;;  %v24772_v24 = vld [vmem:[%s25382_s11 + $0x46e8] ss:$68 sps:$4 sm:$0xff]  }
 0x9bf   : > { %20943 = vmatpush3.bf16.msra.mxu0 %v24767_v26  ;;  %20958 = vmatprep.mubr.msk.bf16.mxu0 %vm25032_vm0, %v25031_v15 }
 0x9c0   : > { %20944 = vmatprep.subr.bf16.mxu0 %v25031_v15 }
 0x9c3   : > { %20945 = vmatpush3.bf16.msra.mxu0 %v24768_v1 }
 0x9c4   : > { %20946 = vmatprep.subr.bf16.mxu0 %v25031_v15 }
 0x9c7   : > { %20947 = vmatpush3.bf16.msra.mxu0 %v24769_v27 }
 0x9c8   : > { %20948 = vmatprep.subr.bf16.mxu0 %v25031_v15 }
 0x9cb   : > { %20949 = vmatpush3.bf16.msra.mxu0 %v24770_v29 }
 0x9cc   : > { %20950 = vmatprep.subr.bf16.mxu0 %v25031_v15 }
 0x9cf   : > { %20951 = vmatpush3.bf16.msra.mxu0 %v24771_v0 }
 0x9d0   : > { %20952 = vmatprep.subr.bf16.mxu0 %v25031_v15 }
 0x9d3   : > { %20953 = vmatpush3.bf16.msra.mxu0 %v24772_v24 }
 0x9d4   : > { %20954 = vmatprep.subr.bf16.mxu0 %v25031_v15 }
 0x9d7   : > { %20955 = vmatpush3.bf16.msra.mxu0 %v24773_v30 }
 0x9d8   : > { %20956 = vmatprep.subr.bf16.mxu0 %v25031_v15 }
 0x9db   : > { %20957 = vmatpush3.bf16.msra.mxu0 %v24774_v31 }
 0x9de   : > { %20959 = vmatmul.mubr.bf16.vlgmr.msra.gmra.mrb[32].mxu0 %v26080_v8 }
 0xa11   : > { %v17345_v35 = vpop.f32.mrb[12].mxu0  ;;  %v17732_v12 = vpop.f32.mrb[12].mxu1 }
 0xa12   : > { %v18122_v37 = vadd.f32 %v17345_v35, %v428_v57  ;;  %v18124_v39 = vadd.f32 %v17732_v12, %v430_v7  ;;  %v17347_v40 = vpop.f32.mrb[13].mxu0  ;;  %v17734_v42 = vpop.f32.mrb[13].mxu1 }
 0xa13   : > { %v18123_v8 = vadd.f32 %v17347_v40, %v429_v32  ;;  %v18125_v45 = vadd.f32 %v17734_v42, %v431_v33  ;;  %v17349_v48 = vpop.f32.mrb[14].mxu0  ;;  %v17736_v34 = vpop.f32.mrb[14].mxu1 }
 0xa14   : > { %18156 = vst [vmem:[%s25397_s28 + $0x60] sm:$0xff] %v18122_v37  ;;  %18158 = vst [vmem:[%s25397_s28 + $0x70] sm:$0xff] %v18124_v39  ;;  %v18139_v49 = vadd.f32 %v17349_v48, %v445_v28  ;;  %v18141_v50 = vadd.f32 %v17736_v34, %v447_v36  ;;  %v17351_v51 = vpop.f32.mrb[15].mxu0  ;;  %v17738_v52 = vpop.f32.mrb[15].mxu1 }
 0xa15   : > { %18157 = vst [vmem:[%s25397_s28 + $0x68] sm:$0xff] %v18123_v8  ;;  %18159 = vst [vmem:[%s25397_s28 + $0x78] sm:$0xff] %v18125_v45  ;;  %v18140_v54 = vadd.f32 %v17351_v51, %v446_v43  ;;  %v18142_v55 = vadd.f32 %v17738_v52, %v448_v44 }
 0xa16   : > { %18173 = vst [vmem:[%s25397_s28 + $0xe8] sm:$0xff] %v18139_v49  ;;  %18175 = vst [vmem:[%s25397_s28 + $0xf8] sm:$0xff] %v18141_v50 }
 0xa17   : > { %18174 = vst [vmem:[%s25397_s28 + $0xf0] sm:$0xff] %v18140_v54  ;;  %18176 = vst [vmem:[%s25397_s28 + $0x100] sm:$0xff] %v18142_v55  ;;  %v432_v54 = vld [vmem:[%s25397_s28 + $0x80] sm:$0xff] }
 0xa31   : > { %v20773_v56 = vpop.f32.mrb[16].mxu0  ;;  %v20795_v58 = vpop.f32.mrb[16].mxu1 }
 0xa32   : > { %v20774_v38 = vpop.f32.mrb[17].mxu0  ;;  %v20796_v46 = vpop.f32.mrb[17].mxu1 }
 0xa33   : > { %v20775_v59 = vadd.f32 %v20774_v38, %v20773_v56  ;;  %v20797_v60 = vadd.f32 %v20796_v46, %v20795_v58  ;;  %v20776_v61 = vpop.f32.mrb[18].mxu0  ;;  %v20798_v53 = vpop.f32.mrb[18].mxu1  ;;  %v449_v38 = vld [vmem:[%s25397_s28 + $0x108] sm:$0xff] }
 0xa34   : > { %v20777_v62 = vpop.f32.mrb[19].mxu0  ;;  %v20799_v23 = vpop.f32.mrb[19].mxu1 }
 0xa35   : > { %v17817_v41 = vadd.f32 %v20797_v60, %v20775_v59  ;;  %v20778_v63 = vadd.f32 %v20777_v62, %v20776_v61  ;;  %v20800_v2 = vadd.f32 %v20799_v23, %v20798_v53  ;;  %v18182_v62 = vld [vmem:[%s25397_s28] sm:$0xff] (!%p20750_p8)  ;;  %v18183_v23 = vld [vmem:[%s25397_s28 + $0x8] sm:$0xff] (!%p20750_p8) }
 0xa37   : > { %v17820_v3 = vadd.f32 %v20800_v2, %v20778_v63  ;;  %v18216_v63 = vmax.f32 (!%p20750_p8), %v18182_v62, 0.0  ;;  %v18217_v2 = vmax.f32 (!%p20750_p8), %v18183_v23, 0.0 }
 0xa39   : > { %18250 = vst [vmem:[%s25397_s28] sm:$0xff] (!%p20750_p8), %v18216_v63  ;;  %18251 = vst [vmem:[%s25397_s28 + $0x8] sm:$0xff] (!%p20750_p8), %v18217_v2 }
 0xa51   : > { %v20817_v47 = vpop.f32.mrb[20].mxu0  ;;  %v20839_v6 = vpop.f32.mrb[20].mxu1 }
 0xa52   : > { %v20818_v4 = vpop.f32.mrb[21].mxu0  ;;  %v20840_v5 = vpop.f32.mrb[21].mxu1 }
 0xa53   : > { %v20819_v9 = vadd.f32 %v20818_v4, %v20817_v47  ;;  %v20820_v10 = vpop.f32.mrb[22].mxu0  ;;  %v20841_v11 = vadd.f32 %v20840_v5, %v20839_v6  ;;  %v20842_v13 = vpop.f32.mrb[22].mxu1  ;;  %v18185_v47 = vld [vmem:[%s25397_s28 + $0x18] sm:$0xff] (!%p20750_p8)  ;;  %v18186_v6 = vld [vmem:[%s25397_s28 + $0x20] sm:$0xff] (!%p20750_p8)  ;;  %v18187_v4 = vld [vmem:[%s25397_s28 + $0x28] sm:$0xff] (!%p20750_p8) }
 0xa54   : > { %v20821_v14 = vpop.f32.mrb[23].mxu0  ;;  %v20843_v16 = vpop.f32.mrb[23].mxu1  ;;  %v18219_v5 = vmax.f32 (!%p20750_p8), %v18185_v47, 0.0 }
 0xa55   : > { %v17858_v17 = vadd.f32 %v20819_v9, %v17817_v41  ;;  %v20822_v18 = vadd.f32 %v20821_v14, %v20820_v10  ;;  %v20844_v19 = vadd.f32 %v20843_v16, %v20842_v13  ;;  %v18184_v41 = vld [vmem:[%s25397_s28 + $0x10] sm:$0xff] (!%p20750_p8)  ;;  %v18220_v9 = vmax.f32 (!%p20750_p8), %v18186_v6, 0.0  ;;  %v18189_v13 = vld [vmem:[%s25397_s28 + $0x38] sm:$0xff] (!%p20750_p8)  ;;  %v18190_v14 = vld [vmem:[%s25397_s28 + $0x40] sm:$0xff] (!%p20750_p8) }
 0xa56   : > { %v18221_v10 = vmax.f32 (!%p20750_p8), %v18187_v4, 0.0  ;;  %18253 = vst [vmem:[%s25397_s28 + $0x18] sm:$0xff] (!%p20750_p8), %v18219_v5 }
 0xa57   : > { %v17861_v20 = vadd.f32 %v20822_v18, %v17820_v3  ;;  %v17899_v21 = vadd.f32 %v20841_v11, %v17858_v17  ;;  %v18218_v3 = vmax.f32 (!%p20750_p8), %v18184_v41, 0.0  ;;  %v18188_v11 = vld [vmem:[%s25397_s28 + $0x30] sm:$0xff] (!%p20750_p8)  ;;  %v18223_v17 = vmax.f32 (!%p20750_p8), %v18189_v13, 0.0  ;;  %18254 = vst [vmem:[%s25397_s28 + $0x20] sm:$0xff] (!%p20750_p8), %v18220_v9 }
 0xa58   : > { %v18222_v16 = vmax.f32 (!%p20750_p8), %v18188_v11, 0.0  ;;  %v18224_v18 = vmax.f32 (!%p20750_p8), %v18190_v14, 0.0  ;;  %18255 = vst [vmem:[%s25397_s28 + $0x28] sm:$0xff] (!%p20750_p8), %v18221_v10 }
 0xa59   : > { %v17902_v22 = vadd.f32 %v20844_v19, %v17861_v20  ;;  %18252 = vst [vmem:[%s25397_s28 + $0x10] sm:$0xff] (!%p20750_p8), %v18218_v3  ;;  %v18191_v19 = vld [vmem:[%s25397_s28 + $0x48] sm:$0xff] (!%p20750_p8)  ;;  %v18192_v20 = vld [vmem:[%s25397_s28 + $0x50] sm:$0xff] (!%p20750_p8)  ;;  %18257 = vst [vmem:[%s25397_s28 + $0x38] sm:$0xff] (!%p20750_p8), %v18223_v17 }
 0xa5a   : > { %18256 = vst [vmem:[%s25397_s28 + $0x30] sm:$0xff] (!%p20750_p8), %v18222_v16  ;;  %18258 = vst [vmem:[%s25397_s28 + $0x40] sm:$0xff] (!%p20750_p8), %v18224_v18 }
 0xa71   : > { %v20861_v25 = vpop.f32.mrb[24].mxu0  ;;  %v20883_v26 = vpop.f32.mrb[24].mxu1 }
 0xa72   : > { %v20862_v15 = vpop.f32.mrb[25].mxu0  ;;  %v20884_v1 = vpop.f32.mrb[25].mxu1 }
 0xa73   : > { %v20863_v27 = vadd.f32 %v20862_v15, %v20861_v25  ;;  %v20864_v29 = vpop.f32.mrb[26].mxu0  ;;  %v20885_v0 = vadd.f32 %v20884_v1, %v20883_v26  ;;  %v20886_v24 = vpop.f32.mrb[26].mxu1  ;;  %v18226_v25 = vmax.f32 (!%p20750_p8), %v18192_v20, 0.0  ;;  %v18194_v15 = vld [vmem:[%s25397_s28 + $0x60] sm:$0xff] (!%p20750_p8)  ;;  %v18195_v1 = vld [vmem:[%s25397_s28 + $0x68] sm:$0xff] (!%p20750_p8) }
 0xa74   : > { %v20865_v30 = vpop.f32.mrb[27].mxu0  ;;  %v20887_v31 = vpop.f32.mrb[27].mxu1 }
 0xa75   : > { %v17940_v57 = vadd.f32 %v20863_v27, %v17899_v21  ;;  %v20866_v7 = vadd.f32 %v20865_v30, %v20864_v29  ;;  %v20888_v32 = vadd.f32 %v20887_v31, %v20886_v24  ;;  %v18193_v21 = vld [vmem:[%s25397_s28 + $0x58] sm:$0xff] (!%p20750_p8)  ;;  %v18196_v27 = vld [vmem:[%s25397_s28 + $0x70] sm:$0xff] (!%p20750_p8)  ;;  %v18228_v29 = vmax.f32 (!%p20750_p8), %v18194_v15, 0.0  ;;  %18260 = vst [vmem:[%s25397_s28 + $0x50] sm:$0xff] (!%p20750_p8), %v18226_v25 }
 0xa76   : > { %v18227_v26 = vmax.f32 (!%p20750_p8), %v18193_v21, 0.0  ;;  %v18230_v24 = vmax.f32 (!%p20750_p8), %v18196_v27, 0.0  ;;  %v18197_v30 = vld [vmem:[%s25397_s28 + $0x78] sm:$0xff] (!%p20750_p8) }
 0xa77   : > { %v17943_v33 = vadd.f32 %v20866_v7, %v17902_v22  ;;  %v17981_v35 = vadd.f32 %v20885_v0, %v17940_v57  ;;  %v18225_v22 = vmax.f32 (!%p20750_p8), %v18191_v19, 0.0  ;;  %v18229_v0 = vmax.f32 (!%p20750_p8), %v18195_v1, 0.0  ;;  %v18199_v57 = vld [vmem:[%s25397_s28 + $0x88] sm:$0xff] (!%p20750_p8)  ;;  %18262 = vst [vmem:[%s25397_s28 + $0x60] sm:$0xff] (!%p20750_p8), %v18228_v29 }
 0xa78   : > { %18261 = vst [vmem:[%s25397_s28 + $0x58] sm:$0xff] (!%p20750_p8), %v18227_v26  ;;  %v18231_v7 = vmax.f32 (!%p20750_p8), %v18197_v30, 0.0  ;;  %18264 = vst [vmem:[%s25397_s28 + $0x70] sm:$0xff] (!%p20750_p8), %v18230_v24 }
 0xa79   : > { %v17984_v12 = vadd.f32 %v20888_v32, %v17943_v33  ;;  %18259 = vst [vmem:[%s25397_s28 + $0x48] sm:$0xff] (!%p20750_p8), %v18225_v22  ;;  %v18233_v33 = vmax.f32 (!%p20750_p8), %v18199_v57, 0.0  ;;  %18263 = vst [vmem:[%s25397_s28 + $0x68] sm:$0xff] (!%p20750_p8), %v18229_v0 }
 0xa7a   : > { %18265 = vst [vmem:[%s25397_s28 + $0x78] sm:$0xff] (!%p20750_p8), %v18231_v7 }
 0xa7b   : > { %18267 = vst [vmem:[%s25397_s28 + $0x88] sm:$0xff] (!%p20750_p8), %v18233_v33 }
 0xa91   : > { %v20905_v28 = vpop.f32.mrb[28].mxu0  ;;  %v20927_v36 = vpop.f32.mrb[28].mxu1 }
 0xa92   : > { %v20906_v37 = vpop.f32.mrb[29].mxu0  ;;  %v20928_v39 = vpop.f32.mrb[29].mxu1 }
 0xa93   : > { %v20907_v40 = vadd.f32 %v20906_v37, %v20905_v28  ;;  %v20908_v42 = vpop.f32.mrb[30].mxu0  ;;  %v20929_v43 = vadd.f32 %v20928_v39, %v20927_v36  ;;  %v20930_v44 = vpop.f32.mrb[30].mxu1  ;;  %v18202_v28 = vld [vmem:[%s25397_s28 + $0xa0] sm:$0xff] (!%p20750_p8) }
 0xa94   : > { %v20909_v8 = vpop.f32.mrb[31].mxu0  ;;  %v20931_v45 = vpop.f32.mrb[31].mxu1  ;;  %v18236_v39 = vmax.f32 (!%p20750_p8), %v18202_v28, 0.0 }
 0xa95   : > { %v18022_v48 = vadd.f32 %v20907_v40, %v17981_v35  ;;  %v20910_v34 = vadd.f32 %v20909_v8, %v20908_v42  ;;  %v20932_v49 = vadd.f32 %v20931_v45, %v20930_v44  ;;  %v18200_v35 = vld [vmem:[%s25397_s28 + $0x90] sm:$0xff] (!%p20750_p8)  ;;  %v18203_v40 = vld [vmem:[%s25397_s28 + $0xa8] sm:$0xff] (!%p20750_p8) }
 0xa96   : > { %v18234_v36 = vmax.f32 (!%p20750_p8), %v18200_v35, 0.0  ;;  %v18204_v42 = vld [vmem:[%s25397_s28 + $0xb0] sm:$0xff] (!%p20750_p8)  ;;  %v18237_v44 = vmax.f32 (!%p20750_p8), %v18203_v40, 0.0  ;;  %18270 = vst [vmem:[%s25397_s28 + $0xa0] sm:$0xff] (!%p20750_p8), %v18236_v39 }
 0xa97   : > { %v18025_v50 = vadd.f32 %v20910_v34, %v17984_v12  ;;  %v18063_v51 = vadd.f32 %v20929_v43, %v18022_v48  ;;  %v18201_v12 = vld [vmem:[%s25397_s28 + $0x98] sm:$0xff] (!%p20750_p8)  ;;  %v18238_v8 = vmax.f32 (!%p20750_p8), %v18204_v42, 0.0  ;;  %v18206_v48 = vld [vmem:[%s25397_s28 + $0xc0] sm:$0xff] (!%p20750_p8)  ;;  %v18207_v34 = vld [vmem:[%s25397_s28 + $0xc8] sm:$0xff] (!%p20750_p8) }
 0xa98   : > { %v18235_v37 = vmax.f32 (!%p20750_p8), %v18201_v12, 0.0  ;;  %v18205_v43 = vld [vmem:[%s25397_s28 + $0xb8] sm:$0xff] (!%p20750_p8)  ;;  %18268 = vst [vmem:[%s25397_s28 + $0x90] sm:$0xff] (!%p20750_p8), %v18234_v36  ;;  %18271 = vst [vmem:[%s25397_s28 + $0xa8] sm:$0xff] (!%p20750_p8), %v18237_v44 }
 0xa99   : > { %v18066_v52 = vadd.f32 %v20932_v49, %v18025_v50  ;;  %v18239_v45 = vmax.f32 (!%p20750_p8), %v18205_v43, 0.0  ;;  %v18208_v49 = vld [vmem:[%s25397_s28 + $0xd0] sm:$0xff] (!%p20750_p8)  ;;  %v18240_v50 = vmax.f32 (!%p20750_p8), %v18206_v48, 0.0  ;;  %18272 = vst [vmem:[%s25397_s28 + $0xb0] sm:$0xff] (!%p20750_p8), %v18238_v8 }
 0xa9a   : > { %18269 = vst [vmem:[%s25397_s28 + $0x98] sm:$0xff] (!%p20750_p8), %v18235_v37 }
 0xa9b   : > { %18273 = vst [vmem:[%s25397_s28 + $0xb8] sm:$0xff] (!%p20750_p8), %v18239_v45  ;;  %18274 = vst [vmem:[%s25397_s28 + $0xc0] sm:$0xff] (!%p20750_p8), %v18240_v50 }
 0xab1   : > { %v18103_v55 = vpop.f32.mrb[32].mxu0 }
 0xab2   : > { %v18104_v56 = vadd.f32 %v18103_v55, %v18063_v51  ;;  %v20960_v58 = vpop.f32.mrb[33].mxu0  ;;  %18181 = sbr.rel (%p20750_p8) target bundleno = 2755 (0xac3), region = 52  ;;  %v18241_v51 = vmax.f32 (!%p20750_p8), %v18207_v34, 0.0  ;;  %v18210_v55 = vld [vmem:[%s25397_s28 + $0xe0] sm:$0xff] (!%p20750_p8) }
 0xab3   : > { %v18106_v46 = vpop.f32.mrb[34].mxu0 }
 0xab4   : > { %v18126_v59 = vadd.f32 %v18104_v56, %v432_v54  ;;  %v18107_v60 = vadd.f32 %v18106_v46, %v18066_v52  ;;  %v20961_v61 = vpop.f32.mrb[35].mxu0  ;;  %v18242_v52 = vmax.f32 (!%p20750_p8), %v18208_v49, 0.0  ;;  %v18209_v54 = vld [vmem:[%s25397_s28 + $0xd8] sm:$0xff] (!%p20750_p8)  ;;  %v18211_v56 = vld [vmem:[%s25397_s28 + $0xe8] sm:$0xff] (!%p20750_p8)  ;;  %18275 = vst [vmem:[%s25397_s28 + $0xc8] sm:$0xff] (!%p20750_p8), %v18241_v51 }
 0xab5   : > { %v18243_v58 = vmax.f32 (!%p20750_p8), %v18209_v54, 0.0  ;;  %v18245_v46 = vmax.f32 (!%p20750_p8), %v18211_v56, 0.0  ;;  %v18214_v61 = vld [vmem:[%s25397_s28 + $0x100] sm:$0xff] (!%p20750_p8) }
 0xab6   : > { %18160 = vst [vmem:[%s25397_s28 + $0x80] sm:$0xff] %v18126_v59  ;;  %v18143_v53 = vadd.f32 %v18107_v60, %v449_v38  ;;  %v18244_v38 = vmax.f32 (!%p20750_p8), %v18210_v55, 0.0  ;;  %v18212_v59 = vld [vmem:[%s25397_s28 + $0xf0] sm:$0xff] (!%p20750_p8)  ;;  %v18213_v60 = vld [vmem:[%s25397_s28 + $0xf8] sm:$0xff] (!%p20750_p8)  ;;  %18276 = vst [vmem:[%s25397_s28 + $0xd0] sm:$0xff] (!%p20750_p8), %v18242_v52  ;;  %v18248_v23 = vmax.f32 (!%p20750_p8), %v18214_v61, 0.0 }
 0xab7   : > { %v18247_v62 = vmax.f32 (!%p20750_p8), %v18213_v60, 0.0  ;;  %18277 = vst [vmem:[%s25397_s28 + $0xd8] sm:$0xff] (!%p20750_p8), %v18243_v58  ;;  %18279 = vst [vmem:[%s25397_s28 + $0xe8] sm:$0xff] (!%p20750_p8), %v18245_v46 }
 0xab8   : > { %18177 = vst [vmem:[%s25397_s28 + $0x108] sm:$0xff] %v18143_v53  ;;  %v18246_v53 = vmax.f32 (!%p20750_p8), %v18212_v59, 0.0  ;;  %18278 = vst [vmem:[%s25397_s28 + $0xe0] sm:$0xff] (!%p20750_p8), %v18244_v38 }
 0xab9   : > { %18281 = vst [vmem:[%s25397_s28 + $0xf8] sm:$0xff] %v18247_v62  ;;  %18282 = vst [vmem:[%s25397_s28 + $0x100] sm:$0xff] %v18248_v23 }
 0xaba   : > { %18280 = vst [vmem:[%s25397_s28 + $0xf0] sm:$0xff] %v18246_v53 }
 0xabd   : > { %v18198_v31 = vld [vmem:[%s25397_s28 + $0x80] sm:$0xff] }
 0xabe   : > { %v18232_v32 = vmax.f32 %v18198_v31, 0.0 }
 0xabf   : > { %v18215_v41 = vld [vmem:[%s25397_s28 + $0x108] sm:$0xff] }
 0xac0   : > { %18266 = vst [vmem:[%s25397_s28 + $0x80] sm:$0xff] %v18232_v32  ;;  %v18249_v63 = vmax.f32 %v18215_v41, 0.0 }
 0xac2   : > { %18283 = vst [vmem:[%s25397_s28 + $0x108] sm:$0xff] %v18249_v63 }
 0xac3 PF: > { %s28248_s7 = sld [smem:[#allocation14_spill]]  ;;  %s18298_s18 = sshll.u32 %s25397_s28, 4  ;;  %s28119_s18 = int_to_ptr.vmem [resolvable:$true] %s18298_s18 }
 0xac4   : > { %s28249_s9 = sld [smem:[#allocation21_spill]]  ;;  %s18285_s29 = scalar_lea.sflag [#allocation4], %s25389_s0 }
 0xac5   : > { %s24865_s3 = scalar_lea.vmem %s28119_s18, 4352  ;;  %p28250_p2 = scmp.ne.s32.totalorder %s28238_s1, 0 }
 0xac6   : > { %p24866_p6 = scmp.ne.s32.totalorder %s28119_s18, %s24865_s3  ;;  %s25033_s11 = smov [#allocation8]  }
 0xac7   : > { %s24869_s21 = sshll.u32 %s25033_s11, 4  ;;  %s24870_s21 = int_to_ptr.vmem [resolvable:$false] %s24869_s21 }
 0xac8   : > { %p24867_p13 = pnand %p24866_p6, %p28250_p2  ;;  %s24871_s15 = scalar_lea.vmem %s24870_s21, 8704 }
 0xac9   : > { %s20756_s24 = smul.u32 2176, %s28248_s7  ;;  %p24872_p10 = scmp.lt.s32.totalorder %s28119_s18, %s24870_s21 }
 0xaca   : > { %p24868_p5 = pneg %p24867_p13  ;;  %p24873_p12 = scmp.lt.s32.totalorder %s24871_s15, %s24865_s3 }
 0xacb   : > { %s28117_s30 = scalar_lea.hbm %s28249_s9, %s20756_s24 }
 0xacc   : > { %p24874_p3 = por %p24873_p12, %p24872_p10 }
 0xace   : > { %p24875_p7 = pnand %p24874_p3, %p24868_p5 }
 0xad0   : > { %24878 = shalt.err (!%p24875_p7)
}
 0xad1   : > { %s24879_s10 = scalar_lea.hbm %s28117_s30, 4352  ;;  %s24883_s27 = scalar_lea.hbm %s28249_s9, 17408 }
 0xad2   : > { %p24880_p11 = scmp.ne.s32.totalorder %s28117_s30, %s24879_s10  ;;  %p24884_p1 = scmp.lt.u32.totalorder %s28117_s30, %s28249_s9 }
 0xad3   : > { %p24885_p4 = scmp.lt.u32.totalorder %s24883_s27, %s24879_s10  ;;  %p24887_p6 = scmp.lt.u32.totalorder %s24879_s10, %s28117_s30 }
 0xad4   : > { %p24881_p9 = pnand %p24880_p11, %p28250_p2 }
 0xad5   : > { %p24886_p8 = por %p24885_p4, %p24884_p1 }
 0xad6   : > { %p24882_p0 = pneg %p24881_p9 }
 0xad7   : > { %p24888_p13 = por %p24887_p6, %p24886_p8 }
 0xad9   : > { %p24889_p5 = pnand %p24888_p13, %p24882_p0 }
 0xadb   : > { %24892 = shalt.err (!%p24889_p5)
}
 0xadc   : > { %s25034_s26 = smov 2176   ;;  %s25035_s4 = smov 8704  }
 0xadd   : > { %s25036_s3 = smov 136  }
 0xade   : > { %21232 = dma.vmem_to_hbm [thread:$0]  (%p28250_p2), %s28119_s18, 4352, %s28117_s30, %s18285_s29, %s25034_s26, %s25035_s4, %s25036_s3  }
 0xadf PF: > { %p21250_p10 = scmp.ge.s32.totalorder %s25019_s25, 2  ;;  %s18313_s11 = sand.u32 1, %s24967_s12  }
 0xae0   : > { %p28251_p12 = scmp.ne.s32.totalorder %s28239_s22, 0  ;;  %s18314_s21 = scalar_lea.sflag [#allocation4], %s18313_s11 }
 0xae2   : > { %p21245_p3 = pnand %p21250_p10, %p28251_p12 }
 0xae4   : > { %24962 = dma.done.wait (!%p21245_p3), %s18314_s21, 4352  }
 0xae5   : > { %24964 = vsyncadd (!%p21245_p3), %s18314_s21, 4294962944  ;;  %s22_s25 = sadd.s32 1, %s25019_s25   ;;  %s28253_s21 = sld [smem:[#allocation15_spill]] }
 0xae6   : > { %p28150_p7 = scmp.ge.s32.totalorder %s22_s25, 34   ;;  %s28254_s22 = sld [smem:[#allocation16_spill]] }
 0xae7   : > { %s28255_s1 = sld [smem:[#allocation17_spill]]  ;;  %s28256_s24 = sld [smem:[#allocation18_spill]] }
 0xae8   : > { %s28258_s12 = smov %s24971_s13  ;;  %s28259_s13 = smov %s24975_s14 }
 0xae9   : > { %s28260_s14 = smov %s25313_s5  ;;  %s28261_s15 = smov %s24983_s16 }
 0xaea   : > { %s28262_s16 = smov %s24987_s17  ;;  %s28263_s17 = smov %s25318_s23 }
 0xaeb   : > { %s28264_s18 = smov %s24995_s19  ;;  %s28265_s19 = smov %s24999_s20 }
 0xaec   : > { %s28266_s20 = smov %s25210_s8  ;;  %21 = sbr.rel (!%p28150_p7) target bundleno = 16 (0x10), region = 109 }
 0xaed   : > { %s28267_s23 = smov %s28255_s1 }
 0xaf3   :  { %18319 = vsyncpa [#allocation3], 1 }
 0xaf4   :  { %18321 = vsyncpa [#allocation3 + $0x1], 1 }
 0xaf5   :  { %18322 = vsyncpa [#allocation6], 1 }
 0xaf6   :  { %18324 = vsyncpa [#allocation6 + $0x1], 1 }
 0xaf7   :  { %18325 = vsyncpa [#allocation4], 1 }
 0xaf8   :  { %18327 = vsyncpa [#allocation4 + $0x1], 1 }

</bundles_post_ra>
